<compile_context>
chip_gen: v7x
topology: tpu7x:2x2x1
jax: 0.10.0
libtpu: 0.0.40
codegen_flags: <defaults>
</compile_context>

<pallas_src>
import functools

import jax
import jax.numpy as jnp
from jax import lax
from jax.experimental import pallas as pl
from jax.experimental.pallas import tpu as pltpu

EPS = 1e-5      # PyTorch BatchNorm2d default eps
PAD_OFF = 8     # sublane-aligned column offset of the activation inside the pad scratch
LANE = 128      # lane width / channel padding granularity


# ---------------------------------------------------------------- kernel ----

def _fill_pad_and_im2col(pad_ref, col_ref, a_hwc, H, W, C):
    """Zero the halo of pad_ref, store the activation interior once (bf16), then
    scatter the 9 shifted copies into the im2col buffer col_ref (lane offset t*C)."""
    Wp = pad_ref.shape[1]
    # Halo-only zeroing (interior is fully overwritten below; halo feeds the conv pad).
    zrow = jnp.zeros((1, Wp, C), dtype=pad_ref.dtype)
    pad_ref[0:1, :, :] = zrow
    pad_ref[H + 1:H + 2, :, :] = zrow
    zcol = jnp.zeros((H + 2, PAD_OFF, C), dtype=pad_ref.dtype)
    pad_ref[:, 0:PAD_OFF, :] = zcol
    pad_ref[:, PAD_OFF + W:, :] = zcol
    # Interior store at a sublane-aligned column offset.
    pad_ref[1:H + 1, PAD_OFF:PAD_OFF + W, :] = a_hwc
    # im2col: tap t = 3*dy + dx -> lanes [t*C, (t+1)*C).
    c0 = PAD_OFF - 1
    for dy in range(3):
        for dx in range(3):
            t = 3 * dy + dx
            patch = pad_ref[dy:dy + H, c0 + dx:c0 + dx + W, :]      # (H, W, C)
            col_ref[:, t * C:(t + 1) * C] = patch.reshape(H * W, C)


def _wide_basic_kernel(x_ref, s1_ref, t1_ref, w1_ref, b1_ref,
                       s2_ref, t2_ref, w2_ref, b2_ref,
                       o_ref, pad1_ref, col1_ref, pad2_ref, col2_ref):
    """Fused wide_basic: out = conv2(relu(bn2(conv1(relu(bn1(x)))+b1)))+b2 + shortcut(x).

    x_ref  : (1, H, W, Ci)      f32
    w1_ref : (9*Ci, Cmp)        bf16   (Cmp = planes padded to 128)
    w2_ref : (9*Cmp + Ci, Cop)  bf16   (conv2 taps + shortcut rows; Cop padded to 128)
    o_ref  : (1, H*W, Cop)      f32    (lane-dense; channel padding sliced off outside)
    """
    H, W, Ci = x_ref.shape[1], x_ref.shape[2], x_ref.shape[3]
    Cmp = w1_ref.shape[1]
    Cop = o_ref.shape[2]

    x2d = x_ref[...].reshape(H * W, Ci)

    # ---- BN1 + ReLU in f32 (VPU), single bf16 cast ------------------------------
    a1 = jnp.maximum(x2d * s1_ref[...] + t1_ref[...], 0.0).astype(jnp.bfloat16)

    # ---- conv1: pad + im2col (K = 9*Ci) + ONE matmul + bias ----------------------
    _fill_pad_and_im2col(pad1_ref, col1_ref, a1.reshape(H, W, Ci), H, W, Ci)
    y = jnp.dot(col1_ref[...], w1_ref[...],
                preferred_element_type=jnp.float32) + b1_ref[...]      # (H*W, Cmp) f32

    # ---- BN2 + ReLU in f32, single bf16 cast (padded channels stay exactly 0) ----
    a2 = jnp.maximum(y * s2_ref[...] + t2_ref[...], 0.0).astype(jnp.bfloat16)

    # ---- conv2: pad + im2col (K = 9*Cmp, 128-aligned tap stores) -----------------
    _fill_pad_and_im2col(pad2_ref, col2_ref, a2.reshape(H, W, Cmp), H, W, Cmp)

    # ---- shortcut (1x1 conv or identity) folded in as extra K rows ---------------
    col2_ref[:, 9 * Cmp:9 * Cmp + Ci] = x2d.astype(jnp.bfloat16)

    # ---- conv2 + shortcut in ONE matmul; single lane-dense f32 store -------------
    out = jnp.dot(col2_ref[...], w2_ref[...],
                  preferred_element_type=jnp.float32) + b2_ref[...]
    o_ref[...] = out.reshape(1, H * W, Cop)


# --------------------------------------------------------------- wrapper ----

def _call_block(x, pk):
    """x: (N, H, W, Ci) f32 NHWC.  Returns (N, H*W, Cop) f32 (channel-padded)."""
    N, H, W, Ci = x.shape
    K1, Cmp = pk['w1'].shape
    K2, Cop = pk['w2'].shape
    Wp = 2 * PAD_OFF + W

    flops = 2 * N * H * W * (K1 * Cmp + K2 * Cop)
    bytes_acc = int((x.size + N * H * W * Cop) * 4
                    + (pk['w1'].size + pk['w2'].size) * 2
                    + (pk['b1'].size + pk['b2'].size + pk['scale1'].size
                       + pk['shift1'].size + pk['scale2'].size + pk['shift2'].size) * 4)

    return pl.pallas_call(
        _wide_basic_kernel,
        out_shape=jax.ShapeDtypeStruct((N, H * W, Cop), jnp.float32),
        grid=(N,),
        in_specs=[
            pl.BlockSpec((1, H, W, Ci), lambda n: (n, 0, 0, 0)),   # x
            pl.BlockSpec((1, Ci), lambda n: (0, 0)),               # bn1 scale
            pl.BlockSpec((1, Ci), lambda n: (0, 0)),               # bn1 shift
            pl.BlockSpec((K1, Cmp), lambda n: (0, 0)),             # w1 (9*Ci, Cmp)
            pl.BlockSpec((1, Cmp), lambda n: (0, 0)),              # b1
            pl.BlockSpec((1, Cmp), lambda n: (0, 0)),              # bn2 scale
            pl.BlockSpec((1, Cmp), lambda n: (0, 0)),              # bn2 shift
            pl.BlockSpec((K2, Cop), lambda n: (0, 0)),             # w2 + shortcut rows
            pl.BlockSpec((1, Cop), lambda n: (0, 0)),              # b2 (+ sc bias)
        ],
        out_specs=pl.BlockSpec((1, H * W, Cop), lambda n: (n, 0, 0)),
        scratch_shapes=[
            pltpu.VMEM((H + 2, Wp, Ci), jnp.bfloat16),    # pad buffer, conv1
            pltpu.VMEM((H * W, K1), jnp.bfloat16),        # im2col, conv1 (K1 = 9*Ci)
            pltpu.VMEM((H + 2, Wp, Cmp), jnp.bfloat16),   # pad buffer, conv2
            pltpu.VMEM((H * W, K2), jnp.bfloat16),        # im2col, conv2 (+shortcut)
        ],
        compiler_params=pltpu.CompilerParams(dimension_semantics=("parallel",)),
        cost_estimate=pl.CostEstimate(flops=flops, transcendentals=0,
                                      bytes_accessed=bytes_acc),
    )(x, pk['scale1'], pk['shift1'], pk['w1'], pk['b1'],
      pk['scale2'], pk['shift2'], pk['w2'], pk['b2'])


@functools.partial(jax.jit, static_argnames=('out_channels',))
def wide_basic_forward(x_nchw, packed, *, out_channels):
    """Inference forward of wide_basic (activation='relu', stride=1). NCHW in/out."""
    x = jnp.transpose(x_nchw, (0, 2, 3, 1)).astype(jnp.float32)      # NHWC
    N, H, W, _ = x.shape
    out_p = _call_block(x, packed)                                    # (N, H*W, Cop)
    out = out_p[:, :, :out_channels].reshape(N, H, W, out_channels)
    return jnp.transpose(out, (0, 3, 1, 2))                           # back to NCHW


# ----------------------------------------------------- one-time weight pack ---

def _round_up(v, m):
    return (v + m - 1) // m * m


def pack_params(p):
    """Fold BN running stats, pre-pack im2col weights, pad channels to 128 — ONCE.

    w1 : (9*Ci, Cmp) bf16            row = (3*kh+kw)*Ci + ci
    w2 : (9*Cmp + Ci, Cop) bf16      conv2 rows (padded-channel rows are zero) followed
                                     by the shortcut rows (1x1 conv weights or identity)
    """
    Ci = p['conv1_w'].shape[1]
    Cm = p['conv1_w'].shape[0]
    Co = p['conv2_w'].shape[0]
    Cmp = _round_up(Cm, LANE)
    Cop = _round_up(Co, LANE)

    def fold_bn(g, b, m, v):
        inv = g / jnp.sqrt(v + EPS)
        return inv, b - m * inv

    s1, t1 = fold_bn(p['bn1_gamma'], p['bn1_beta'], p['bn1_mean'], p['bn1_var'])
    s2, t2 = fold_bn(p['bn2_gamma'], p['bn2_beta'], p['bn2_mean'], p['bn2_var'])

    # conv1: OIHW -> (kh, kw, ci, co) -> (9*Ci, Cm) -> pad cols to Cmp
    w1 = jnp.transpose(p['conv1_w'], (2, 3, 1, 0)).reshape(9 * Ci, Cm)
    w1 = jnp.pad(w1, ((0, 0), (0, Cmp - Cm))).astype(jnp.bfloat16)
    b1 = jnp.pad(p['conv1_b'], (0, Cmp - Cm)).reshape(1, Cmp).astype(jnp.float32)

    # conv2: pad input channels to Cmp (zero rows) and output channels to Cop.
    w2 = jnp.transpose(p['conv2_w'], (2, 3, 1, 0))                       # (3,3,Cm,Co)
    w2 = jnp.pad(w2, ((0, 0), (0, 0), (0, Cmp - Cm), (0, Cop - Co)))
    w2 = w2.reshape(9 * Cmp, Cop)

    # Shortcut folded in as K rows [9*Cmp, 9*Cmp+Ci): 1x1 conv weights or identity.
    if 'sc_w' in p:
        wsc = jnp.transpose(p['sc_w'][:, :, 0, 0], (1, 0))               # (Ci, Co)
        wsc = jnp.pad(wsc, ((0, 0), (0, Cop - Co)))
        b2 = p['conv2_b'] + p['sc_b']                                    # fold sc bias
    else:
        wsc = jnp.eye(Ci, Cop, dtype=jnp.float32)                        # identity (Ci==Co)
        b2 = p['conv2_b']
    w2s = jnp.concatenate([w2, wsc], axis=0).astype(jnp.bfloat16)        # (9*Cmp+Ci, Cop)
    b2p = jnp.pad(b2, (0, Cop - Co)).reshape(1, Cop).astype(jnp.float32)

    return {
        'scale1': s1.reshape(1, Ci).astype(jnp.float32),
        'shift1': t1.reshape(1, Ci).astype(jnp.float32),
        'w1': w1, 'b1': b1,
        'scale2': jnp.pad(s2, (0, Cmp - Cm)).reshape(1, Cmp).astype(jnp.float32),
        'shift2': jnp.pad(t2, (0, Cmp - Cm)).reshape(1, Cmp).astype(jnp.float32),
        'w2': w2s, 'b2': b2p,
    }


# -------------------------------------------------------------- reference ---

def _ref_forward(x, p):
    def bn(y, g, b, m, v):
        inv = (g / jnp.sqrt(v + EPS))[None, :, None, None]
        return (y - m[None, :, None, None]) * inv + b[None, :, None, None]

    dn = ('NCHW', 'OIHW', 'NCHW')
    out = jax.nn.relu(bn(x, p['bn1_gamma'], p['bn1_beta'], p['bn1_mean'], p['bn1_var']))
    out = lax.conv_general_dilated(out, p['conv1_w'], (1, 1), ((1, 1), (1, 1)),
                                   dimension_numbers=dn) + p['conv1_b'][None, :, None, None]
    out = jax.nn.relu(bn(out, p['bn2_gamma'], p['bn2_beta'], p['bn2_mean'], p['bn2_var']))
    out = lax.conv_general_dilated(out, p['conv2_w'], (1, 1), ((1, 1), (1, 1)),
                                   dimension_numbers=dn) + p['conv2_b'][None, :, None, None]
    if 'sc_w' in p:
        sc = lax.conv_general_dilated(x, p['sc_w'], (1, 1), ((0, 0), (0, 0)),
                                      dimension_numbers=dn) + p['sc_b'][None, :, None, None]
    else:
        sc = x
    return out + sc


def _make_params(key, in_planes, planes, with_shortcut):
    ks = jax.random.split(key, 16)
    p = {
        'bn1_gamma': 1.0 + 0.1 * jax.random.normal(ks[0], (in_planes,), jnp.float32),
        'bn1_beta':  0.1 * jax.random.normal(ks[1], (in_planes,), jnp.float32),
        'bn1_mean':  0.1 * jax.random.normal(ks[2], (in_planes,), jnp.float32),
        'bn1_var':   jnp.abs(jax.random.normal(ks[3], (in_planes,), jnp.float32)) + 0.5,
        'conv1_w':   0.1 * jax.random.normal(ks[4], (planes, in_planes, 3, 3), jnp.float32),
        'conv1_b':   0.1 * jax.random.normal(ks[5], (planes,), jnp.float32),
        'bn2_gamma': 1.0 + 0.1 * jax.random.normal(ks[6], (planes,), jnp.float32),
        'bn2_beta':  0.1 * jax.random.normal(ks[7], (planes,), jnp.float32),
        'bn2_mean':  0.1 * jax.random.normal(ks[8], (planes,), jnp.float32),
        'bn2_var':   jnp.abs(jax.random.normal(ks[9], (planes,), jnp.float32)) + 0.5,
        'conv2_w':   0.1 * jax.random.normal(ks[10], (planes, planes, 3, 3), jnp.float32),
        'conv2_b':   0.1 * jax.random.normal(ks[11], (planes,), jnp.float32),
    }
    if with_shortcut:
        p['sc_w'] = 0.1 * jax.random.normal(ks[12], (planes, in_planes, 1, 1), jnp.float32)
        p['sc_b'] = 0.1 * jax.random.normal(ks[13], (planes,), jnp.float32)
    return p


# ------------------------------------------------------------------ main ----

if __name__ == "__main__":
    key = jax.random.PRNGKey(0)
    k1, k2, kx1, kx2 = jax.random.split(key, 4)
    N, H, W = 2, 16, 16

    # bf16 MXU inputs with f32 accumulation -> compare against the f32 XLA reference
    # with bf16-appropriate tolerance (intentional inference precision contract).
    ATOL = RTOL = 2e-2

    # Case 1: in_planes != planes -> 1x1-conv shortcut (folded into the conv2 matmul).
    in_planes, planes = 4, 8
    p1 = _make_params(k1, in_planes, planes, with_shortcut=True)
    x1 = jax.random.normal(kx1, (N, in_planes, H, W), jnp.float32)
    out1 = wide_basic_forward(x1, pack_params(p1), out_channels=planes)
    jax.block_until_ready(out1)
    ref1 = _ref_forward(x1, p1)
    assert out1.shape == (N, planes, H, W), out1.shape
    assert jnp.allclose(out1, ref1, atol=ATOL, rtol=RTOL), \
        float(jnp.max(jnp.abs(out1 - ref1)))

    # Case 2: in_planes == planes -> identity shortcut (identity rows in the matmul).
    p2 = _make_params(k2, planes, planes, with_shortcut=False)
    x2 = jax.random.normal(kx2, (N, planes, H, W), jnp.float32)
    out2 = wide_basic_forward(x2, pack_params(p2), out_channels=planes)
    jax.block_until_ready(out2)
    ref2 = _ref_forward(x2, p2)
    assert out2.shape == (N, planes, H, W), out2.shape
    assert jnp.allclose(out2, ref2, atol=ATOL, rtol=RTOL), \
        float(jnp.max(jnp.abs(out2 - ref2)))

    print("KERNEL_OK")
</pallas_src>

<mosaic_0001>
module attributes {stable_mosaic.version = 11 : i64} {
  func.func @_wide_basic_kernel(%arg0: i32, %arg1: memref<1x16x16x4xf32, #tpu.memory_space<vmem>>, %arg2: memref<1x4xf32, #tpu.memory_space<vmem>>, %arg3: memref<1x4xf32, #tpu.memory_space<vmem>>, %arg4: memref<36x128xbf16, #tpu.memory_space<vmem>>, %arg5: memref<1x128xf32, #tpu.memory_space<vmem>>, %arg6: memref<1x128xf32, #tpu.memory_space<vmem>>, %arg7: memref<1x128xf32, #tpu.memory_space<vmem>>, %arg8: memref<1156x128xbf16, #tpu.memory_space<vmem>>, %arg9: memref<1x128xf32, #tpu.memory_space<vmem>>, %arg10: memref<1x256x128xf32, #tpu.memory_space<vmem>>, %arg11: memref<18x32x4xbf16, #tpu.memory_space<vmem>>, %arg12: memref<256x36xbf16, #tpu.memory_space<vmem>>, %arg13: memref<18x32x128xbf16, #tpu.memory_space<vmem>>, %arg14: memref<256x1156xbf16, #tpu.memory_space<vmem>>) attributes {dimension_semantics = [#tpu.dimension_semantics<parallel>], iteration_bounds = array<i64: 2>, scalar_prefetch = 0 : i64, scratch_operands = 4 : i64, tpu.core_type = #tpu.core_type<tc>, window_params = [{transform_indices = @transform_0, window_bounds = array<i64: 1, 16, 16, 4>}, {pipeline_mode = #tpu.pipeline_mode<synchronous>, transform_indices = @transform_1, window_bounds = array<i64: 1, 4>}, {pipeline_mode = #tpu.pipeline_mode<synchronous>, transform_indices = @transform_2, window_bounds = array<i64: 1, 4>}, {pipeline_mode = #tpu.pipeline_mode<synchronous>, transform_indices = @transform_3, window_bounds = array<i64: 36, 128>}, {pipeline_mode = #tpu.pipeline_mode<synchronous>, transform_indices = @transform_4, window_bounds = array<i64: 1, 128>}, {pipeline_mode = #tpu.pipeline_mode<synchronous>, transform_indices = @transform_5, window_bounds = array<i64: 1, 128>}, {pipeline_mode = #tpu.pipeline_mode<synchronous>, transform_indices = @transform_6, window_bounds = array<i64: 1, 128>}, {pipeline_mode = #tpu.pipeline_mode<synchronous>, transform_indices = @transform_7, window_bounds = array<i64: 1156, 128>}, {pipeline_mode = #tpu.pipeline_mode<synchronous>, transform_indices = @transform_8, window_bounds = array<i64: 1, 128>}, {transform_indices = @transform_9, window_bounds = array<i64: 1, 256, 128>}]} {
    %c0 = arith.constant 0 : index
    %c0_0 = arith.constant 0 : index
    %c0_1 = arith.constant 0 : index
    %c0_2 = arith.constant 0 : index
    %0 = vector.load %arg1[%c0, %c0_0, %c0_1, %c0_2] : memref<1x16x16x4xf32, #tpu.memory_space<vmem>>, vector<1x16x16x4xf32>
    %1 = vector.shape_cast %0 : vector<1x16x16x4xf32> to vector<256x4xf32>
    %c0_3 = arith.constant 0 : index
    %c0_4 = arith.constant 0 : index
    %2 = vector.load %arg2[%c0_3, %c0_4] : memref<1x4xf32, #tpu.memory_space<vmem>>, vector<1x4xf32>
    %3 = vector.broadcast %2 : vector<1x4xf32> to vector<256x4xf32>
    %4 = arith.mulf %1, %3 : vector<256x4xf32>
    %c0_5 = arith.constant 0 : index
    %c0_6 = arith.constant 0 : index
    %5 = vector.load %arg3[%c0_5, %c0_6] : memref<1x4xf32, #tpu.memory_space<vmem>>, vector<1x4xf32>
    %6 = vector.broadcast %5 : vector<1x4xf32> to vector<256x4xf32>
    %7 = arith.addf %4, %6 : vector<256x4xf32>
    %cst = arith.constant 0.000000e+00 : f32
    %8 = vector.broadcast %cst : f32 to vector<256x4xf32>
    %9 = arith.maximumf %7, %8 : vector<256x4xf32>
    %10 = arith.truncf %9 : vector<256x4xf32> to vector<256x4xbf16>
    %11 = vector.shape_cast %10 : vector<256x4xbf16> to vector<16x16x4xbf16>
    %cst_7 = arith.constant 0.000000e+00 : bf16
    %12 = vector.broadcast %cst_7 : bf16 to vector<1x32x4xbf16>
    %c0_8 = arith.constant 0 : index
    %c0_9 = arith.constant 0 : index
    %c0_10 = arith.constant 0 : index
    %13 = vector.load %arg11[%c0_8, %c0_9, %c0_10] : memref<18x32x4xbf16, #tpu.memory_space<vmem>>, vector<1x32x4xbf16>
    tpu.vector_store %arg11[%c0_8, %c0_9, %c0_10], %12 {strides = array<i32>} : memref<18x32x4xbf16, #tpu.memory_space<vmem>>, vector<1x32x4xbf16>,
    %c17 = arith.constant 17 : index
    %c0_11 = arith.constant 0 : index
    %c0_12 = arith.constant 0 : index
    %14 = vector.load %arg11[%c17, %c0_11, %c0_12] : memref<18x32x4xbf16, #tpu.memory_space<vmem>>, vector<1x32x4xbf16>
    tpu.vector_store %arg11[%c17, %c0_11, %c0_12], %12 {strides = array<i32>} : memref<18x32x4xbf16, #tpu.memory_space<vmem>>, vector<1x32x4xbf16>,
    %cst_13 = arith.constant 0.000000e+00 : bf16
    %15 = vector.broadcast %cst_13 : bf16 to vector<18x8x4xbf16>
    %c0_14 = arith.constant 0 : index
    %c0_15 = arith.constant 0 : index
    %c0_16 = arith.constant 0 : index
    %16 = vector.load %arg11[%c0_14, %c0_15, %c0_16] : memref<18x32x4xbf16, #tpu.memory_space<vmem>>, vector<18x8x4xbf16>
    tpu.vector_store %arg11[%c0_14, %c0_15, %c0_16], %15 {strides = array<i32>} : memref<18x32x4xbf16, #tpu.memory_space<vmem>>, vector<18x8x4xbf16>,
    %c0_17 = arith.constant 0 : index
    %c24 = arith.constant 24 : index
    %c0_18 = arith.constant 0 : index
    %17 = vector.load %arg11[%c0_17, %c24, %c0_18] : memref<18x32x4xbf16, #tpu.memory_space<vmem>>, vector<18x8x4xbf16>
    tpu.vector_store %arg11[%c0_17, %c24, %c0_18], %15 {strides = array<i32>} : memref<18x32x4xbf16, #tpu.memory_space<vmem>>, vector<18x8x4xbf16>,
    %c1 = arith.constant 1 : index
    %c8 = arith.constant 8 : index
    %c0_19 = arith.constant 0 : index
    %18 = vector.load %arg11[%c1, %c8, %c0_19] : memref<18x32x4xbf16, #tpu.memory_space<vmem>>, vector<16x16x4xbf16>
    tpu.vector_store %arg11[%c1, %c8, %c0_19], %11 {strides = array<i32>} : memref<18x32x4xbf16, #tpu.memory_space<vmem>>, vector<16x16x4xbf16>,
    %c0_20 = arith.constant 0 : index
    %c7 = arith.constant 7 : index
    %c0_21 = arith.constant 0 : index
    %19 = vector.load %arg11[%c0_20, %c7, %c0_21] : memref<18x32x4xbf16, #tpu.memory_space<vmem>>, vector<16x16x4xbf16>
    %20 = vector.shape_cast %19 : vector<16x16x4xbf16> to vector<256x4xbf16>
    %c0_22 = arith.constant 0 : index
    %c0_23 = arith.constant 0 : index
    %21 = vector.load %arg12[%c0_22, %c0_23] : memref<256x36xbf16, #tpu.memory_space<vmem>>, vector<256x4xbf16>
    tpu.vector_store %arg12[%c0_22, %c0_23], %20 {strides = array<i32>} : memref<256x36xbf16, #tpu.memory_space<vmem>>, vector<256x4xbf16>,
    %c0_24 = arith.constant 0 : index
    %c8_25 = arith.constant 8 : index
    %c0_26 = arith.constant 0 : index
    %22 = vector.load %arg11[%c0_24, %c8_25, %c0_26] : memref<18x32x4xbf16, #tpu.memory_space<vmem>>, vector<16x16x4xbf16>
    %23 = vector.shape_cast %22 : vector<16x16x4xbf16> to vector<256x4xbf16>
    %c0_27 = arith.constant 0 : index
    %c4 = arith.constant 4 : index
    %24 = vector.load %arg12[%c0_27, %c4] : memref<256x36xbf16, #tpu.memory_space<vmem>>, vector<256x4xbf16>
    tpu.vector_store %arg12[%c0_27, %c4], %23 {strides = array<i32>} : memref<256x36xbf16, #tpu.memory_space<vmem>>, vector<256x4xbf16>,
    %c0_28 = arith.constant 0 : index
    %c9 = arith.constant 9 : index
    %c0_29 = arith.constant 0 : index
    %25 = vector.load %arg11[%c0_28, %c9, %c0_29] : memref<18x32x4xbf16, #tpu.memory_space<vmem>>, vector<16x16x4xbf16>
    %26 = vector.shape_cast %25 : vector<16x16x4xbf16> to vector<256x4xbf16>
    %c0_30 = arith.constant 0 : index
    %c8_31 = arith.constant 8 : index
    %27 = vector.load %arg12[%c0_30, %c8_31] : memref<256x36xbf16, #tpu.memory_space<vmem>>, vector<256x4xbf16>
    tpu.vector_store %arg12[%c0_30, %c8_31], %26 {strides = array<i32>} : memref<256x36xbf16, #tpu.memory_space<vmem>>, vector<256x4xbf16>,
    %c1_32 = arith.constant 1 : index
    %c7_33 = arith.constant 7 : index
    %c0_34 = arith.constant 0 : index
    %28 = vector.load %arg11[%c1_32, %c7_33, %c0_34] : memref<18x32x4xbf16, #tpu.memory_space<vmem>>, vector<16x16x4xbf16>
    %29 = vector.shape_cast %28 : vector<16x16x4xbf16> to vector<256x4xbf16>
    %c0_35 = arith.constant 0 : index
    %c12 = arith.constant 12 : index
    %30 = vector.load %arg12[%c0_35, %c12] : memref<256x36xbf16, #tpu.memory_space<vmem>>, vector<256x4xbf16>
    tpu.vector_store %arg12[%c0_35, %c12], %29 {strides = array<i32>} : memref<256x36xbf16, #tpu.memory_space<vmem>>, vector<256x4xbf16>,
    %c1_36 = arith.constant 1 : index
    %c8_37 = arith.constant 8 : index
    %c0_38 = arith.constant 0 : index
    %31 = vector.load %arg11[%c1_36, %c8_37, %c0_38] : memref<18x32x4xbf16, #tpu.memory_space<vmem>>, vector<16x16x4xbf16>
    %32 = vector.shape_cast %31 : vector<16x16x4xbf16> to vector<256x4xbf16>
    %c0_39 = arith.constant 0 : index
    %c16 = arith.constant 16 : index
    %33 = vector.load %arg12[%c0_39, %c16] : memref<256x36xbf16, #tpu.memory_space<vmem>>, vector<256x4xbf16>
    tpu.vector_store %arg12[%c0_39, %c16], %32 {strides = array<i32>} : memref<256x36xbf16, #tpu.memory_space<vmem>>, vector<256x4xbf16>,
    %c1_40 = arith.constant 1 : index
    %c9_41 = arith.constant 9 : index
    %c0_42 = arith.constant 0 : index
    %34 = vector.load %arg11[%c1_40, %c9_41, %c0_42] : memref<18x32x4xbf16, #tpu.memory_space<vmem>>, vector<16x16x4xbf16>
    %35 = vector.shape_cast %34 : vector<16x16x4xbf16> to vector<256x4xbf16>
    %c0_43 = arith.constant 0 : index
    %c20 = arith.constant 20 : index
    %36 = vector.load %arg12[%c0_43, %c20] : memref<256x36xbf16, #tpu.memory_space<vmem>>, vector<256x4xbf16>
    tpu.vector_store %arg12[%c0_43, %c20], %35 {strides = array<i32>} : memref<256x36xbf16, #tpu.memory_space<vmem>>, vector<256x4xbf16>,
    %c2 = arith.constant 2 : index
    %c7_44 = arith.constant 7 : index
    %c0_45 = arith.constant 0 : index
    %37 = vector.load %arg11[%c2, %c7_44, %c0_45] : memref<18x32x4xbf16, #tpu.memory_space<vmem>>, vector<16x16x4xbf16>
    %38 = vector.shape_cast %37 : vector<16x16x4xbf16> to vector<256x4xbf16>
    %c0_46 = arith.constant 0 : index
    %c24_47 = arith.constant 24 : index
    %39 = vector.load %arg12[%c0_46, %c24_47] : memref<256x36xbf16, #tpu.memory_space<vmem>>, vector<256x4xbf16>
    tpu.vector_store %arg12[%c0_46, %c24_47], %38 {strides = array<i32>} : memref<256x36xbf16, #tpu.memory_space<vmem>>, vector<256x4xbf16>,
    %c2_48 = arith.constant 2 : index
    %c8_49 = arith.constant 8 : index
    %c0_50 = arith.constant 0 : index
    %40 = vector.load %arg11[%c2_48, %c8_49, %c0_50] : memref<18x32x4xbf16, #tpu.memory_space<vmem>>, vector<16x16x4xbf16>
    %41 = vector.shape_cast %40 : vector<16x16x4xbf16> to vector<256x4xbf16>
    %c0_51 = arith.constant 0 : index
    %c28 = arith.constant 28 : index
    %42 = vector.load %arg12[%c0_51, %c28] : memref<256x36xbf16, #tpu.memory_space<vmem>>, vector<256x4xbf16>
    tpu.vector_store %arg12[%c0_51, %c28], %41 {strides = array<i32>} : memref<256x36xbf16, #tpu.memory_space<vmem>>, vector<256x4xbf16>,
    %c2_52 = arith.constant 2 : index
    %c9_53 = arith.constant 9 : index
    %c0_54 = arith.constant 0 : index
    %43 = vector.load %arg11[%c2_52, %c9_53, %c0_54] : memref<18x32x4xbf16, #tpu.memory_space<vmem>>, vector<16x16x4xbf16>
    %44 = vector.shape_cast %43 : vector<16x16x4xbf16> to vector<256x4xbf16>
    %c0_55 = arith.constant 0 : index
    %c32 = arith.constant 32 : index
    %45 = vector.load %arg12[%c0_55, %c32] : memref<256x36xbf16, #tpu.memory_space<vmem>>, vector<256x4xbf16>
    tpu.vector_store %arg12[%c0_55, %c32], %44 {strides = array<i32>} : memref<256x36xbf16, #tpu.memory_space<vmem>>, vector<256x4xbf16>,
    %c0_56 = arith.constant 0 : index
    %c0_57 = arith.constant 0 : index
    %46 = vector.load %arg12[%c0_56, %c0_57] : memref<256x36xbf16, #tpu.memory_space<vmem>>, vector<256x36xbf16>
    %c0_58 = arith.constant 0 : index
    %c0_59 = arith.constant 0 : index
    %47 = vector.load %arg4[%c0_58, %c0_59] : memref<36x128xbf16, #tpu.memory_space<vmem>>, vector<36x128xbf16>
    %cst_60 = arith.constant dense<0.000000e+00> : vector<256x128xf32>
    %48 = tpu.matmul %46, %47, %cst_60 {dimension_numbers = #tpu.dot_dimension_numbers<[1], [0], [0], [1], [0, 0, 1, 1], [], []>} : vector<256x36xbf16>, vector<36x128xbf16>, vector<256x128xf32> -> vector<256x128xf32>
    %c0_61 = arith.constant 0 : index
    %c0_62 = arith.constant 0 : index
    %49 = vector.load %arg5[%c0_61, %c0_62] : memref<1x128xf32, #tpu.memory_space<vmem>>, vector<1x128xf32>
    %50 = vector.broadcast %49 : vector<1x128xf32> to vector<256x128xf32>
    %51 = arith.addf %48, %50 : vector<256x128xf32>
    %c0_63 = arith.constant 0 : index
    %c0_64 = arith.constant 0 : index
    %52 = vector.load %arg6[%c0_63, %c0_64] : memref<1x128xf32, #tpu.memory_space<vmem>>, vector<1x128xf32>
    %53 = vector.broadcast %52 : vector<1x128xf32> to vector<256x128xf32>
    %54 = arith.mulf %51, %53 : vector<256x128xf32>
    %c0_65 = arith.constant 0 : index
    %c0_66 = arith.constant 0 : index
    %55 = vector.load %arg7[%c0_65, %c0_66] : memref<1x128xf32, #tpu.memory_space<vmem>>, vector<1x128xf32>
    %56 = vector.broadcast %55 : vector<1x128xf32> to vector<256x128xf32>
    %57 = arith.addf %54, %56 : vector<256x128xf32>
    %cst_67 = arith.constant 0.000000e+00 : f32
    %58 = vector.broadcast %cst_67 : f32 to vector<256x128xf32>
    %59 = arith.maximumf %57, %58 : vector<256x128xf32>
    %60 = arith.truncf %59 : vector<256x128xf32> to vector<256x128xbf16>
    %61 = vector.shape_cast %60 : vector<256x128xbf16> to vector<16x16x128xbf16>
    %cst_68 = arith.constant 0.000000e+00 : bf16
    %62 = vector.broadcast %cst_68 : bf16 to vector<1x32x128xbf16>
    %c0_69 = arith.constant 0 : index
    %c0_70 = arith.constant 0 : index
    %c0_71 = arith.constant 0 : index
    %63 = vector.load %arg13[%c0_69, %c0_70, %c0_71] : memref<18x32x128xbf16, #tpu.memory_space<vmem>>, vector<1x32x128xbf16>
    tpu.vector_store %arg13[%c0_69, %c0_70, %c0_71], %62 {strides = array<i32>} : memref<18x32x128xbf16, #tpu.memory_space<vmem>>, vector<1x32x128xbf16>,
    %c17_72 = arith.constant 17 : index
    %c0_73 = arith.constant 0 : index
    %c0_74 = arith.constant 0 : index
    %64 = vector.load %arg13[%c17_72, %c0_73, %c0_74] : memref<18x32x128xbf16, #tpu.memory_space<vmem>>, vector<1x32x128xbf16>
    tpu.vector_store %arg13[%c17_72, %c0_73, %c0_74], %62 {strides = array<i32>} : memref<18x32x128xbf16, #tpu.memory_space<vmem>>, vector<1x32x128xbf16>,
    %cst_75 = arith.constant 0.000000e+00 : bf16
    %65 = vector.broadcast %cst_75 : bf16 to vector<18x8x128xbf16>
    %c0_76 = arith.constant 0 : index
    %c0_77 = arith.constant 0 : index
    %c0_78 = arith.constant 0 : index
    %66 = vector.load %arg13[%c0_76, %c0_77, %c0_78] : memref<18x32x128xbf16, #tpu.memory_space<vmem>>, vector<18x8x128xbf16>
    tpu.vector_store %arg13[%c0_76, %c0_77, %c0_78], %65 {strides = array<i32>} : memref<18x32x128xbf16, #tpu.memory_space<vmem>>, vector<18x8x128xbf16>,
    %c0_79 = arith.constant 0 : index
    %c24_80 = arith.constant 24 : index
    %c0_81 = arith.constant 0 : index
    %67 = vector.load %arg13[%c0_79, %c24_80, %c0_81] : memref<18x32x128xbf16, #tpu.memory_space<vmem>>, vector<18x8x128xbf16>
    tpu.vector_store %arg13[%c0_79, %c24_80, %c0_81], %65 {strides = array<i32>} : memref<18x32x128xbf16, #tpu.memory_space<vmem>>, vector<18x8x128xbf16>,
    %c1_82 = arith.constant 1 : index
    %c8_83 = arith.constant 8 : index
    %c0_84 = arith.constant 0 : index
    %68 = vector.load %arg13[%c1_82, %c8_83, %c0_84] : memref<18x32x128xbf16, #tpu.memory_space<vmem>>, vector<16x16x128xbf16>
    tpu.vector_store %arg13[%c1_82, %c8_83, %c0_84], %61 {strides = array<i32>} : memref<18x32x128xbf16, #tpu.memory_space<vmem>>, vector<16x16x128xbf16>,
    %c0_85 = arith.constant 0 : index
    %c7_86 = arith.constant 7 : index
    %c0_87 = arith.constant 0 : index
    %69 = vector.load %arg13[%c0_85, %c7_86, %c0_87] : memref<18x32x128xbf16, #tpu.memory_space<vmem>>, vector<16x16x128xbf16>
    %70 = vector.shape_cast %69 : vector<16x16x128xbf16> to vector<256x128xbf16>
    %c0_88 = arith.constant 0 : index
    %c0_89 = arith.constant 0 : index
    %71 = vector.load %arg14[%c0_88, %c0_89] : memref<256x1156xbf16, #tpu.memory_space<vmem>>, vector<256x128xbf16>
    tpu.vector_store %arg14[%c0_88, %c0_89], %70 {strides = array<i32>} : memref<256x1156xbf16, #tpu.memory_space<vmem>>, vector<256x128xbf16>,
    %c0_90 = arith.constant 0 : index
    %c8_91 = arith.constant 8 : index
    %c0_92 = arith.constant 0 : index
    %72 = vector.load %arg13[%c0_90, %c8_91, %c0_92] : memref<18x32x128xbf16, #tpu.memory_space<vmem>>, vector<16x16x128xbf16>
    %73 = vector.shape_cast %72 : vector<16x16x128xbf16> to vector<256x128xbf16>
    %c0_93 = arith.constant 0 : index
    %c128 = arith.constant 128 : index
    %74 = vector.load %arg14[%c0_93, %c128] : memref<256x1156xbf16, #tpu.memory_space<vmem>>, vector<256x128xbf16>
    tpu.vector_store %arg14[%c0_93, %c128], %73 {strides = array<i32>} : memref<256x1156xbf16, #tpu.memory_space<vmem>>, vector<256x128xbf16>,
    %c0_94 = arith.constant 0 : index
    %c9_95 = arith.constant 9 : index
    %c0_96 = arith.constant 0 : index
    %75 = vector.load %arg13[%c0_94, %c9_95, %c0_96] : memref<18x32x128xbf16, #tpu.memory_space<vmem>>, vector<16x16x128xbf16>
    %76 = vector.shape_cast %75 : vector<16x16x128xbf16> to vector<256x128xbf16>
    %c0_97 = arith.constant 0 : index
    %c256 = arith.constant 256 : index
    %77 = vector.load %arg14[%c0_97, %c256] : memref<256x1156xbf16, #tpu.memory_space<vmem>>, vector<256x128xbf16>
    tpu.vector_store %arg14[%c0_97, %c256], %76 {strides = array<i32>} : memref<256x1156xbf16, #tpu.memory_space<vmem>>, vector<256x128xbf16>,
    %c1_98 = arith.constant 1 : index
    %c7_99 = arith.constant 7 : index
    %c0_100 = arith.constant 0 : index
    %78 = vector.load %arg13[%c1_98, %c7_99, %c0_100] : memref<18x32x128xbf16, #tpu.memory_space<vmem>>, vector<16x16x128xbf16>
    %79 = vector.shape_cast %78 : vector<16x16x128xbf16> to vector<256x128xbf16>
    %c0_101 = arith.constant 0 : index
    %c384 = arith.constant 384 : index
    %80 = vector.load %arg14[%c0_101, %c384] : memref<256x1156xbf16, #tpu.memory_space<vmem>>, vector<256x128xbf16>
    tpu.vector_store %arg14[%c0_101, %c384], %79 {strides = array<i32>} : memref<256x1156xbf16, #tpu.memory_space<vmem>>, vector<256x128xbf16>,
    %c1_102 = arith.constant 1 : index
    %c8_103 = arith.constant 8 : index
    %c0_104 = arith.constant 0 : index
    %81 = vector.load %arg13[%c1_102, %c8_103, %c0_104] : memref<18x32x128xbf16, #tpu.memory_space<vmem>>, vector<16x16x128xbf16>
    %82 = vector.shape_cast %81 : vector<16x16x128xbf16> to vector<256x128xbf16>
    %c0_105 = arith.constant 0 : index
    %c512 = arith.constant 512 : index
    %83 = vector.load %arg14[%c0_105, %c512] : memref<256x1156xbf16, #tpu.memory_space<vmem>>, vector<256x128xbf16>
    tpu.vector_store %arg14[%c0_105, %c512], %82 {strides = array<i32>} : memref<256x1156xbf16, #tpu.memory_space<vmem>>, vector<256x128xbf16>,
    %c1_106 = arith.constant 1 : index
    %c9_107 = arith.constant 9 : index
    %c0_108 = arith.constant 0 : index
    %84 = vector.load %arg13[%c1_106, %c9_107, %c0_108] : memref<18x32x128xbf16, #tpu.memory_space<vmem>>, vector<16x16x128xbf16>
    %85 = vector.shape_cast %84 : vector<16x16x128xbf16> to vector<256x128xbf16>
    %c0_109 = arith.constant 0 : index
    %c640 = arith.constant 640 : index
    %86 = vector.load %arg14[%c0_109, %c640] : memref<256x1156xbf16, #tpu.memory_space<vmem>>, vector<256x128xbf16>
    tpu.vector_store %arg14[%c0_109, %c640], %85 {strides = array<i32>} : memref<256x1156xbf16, #tpu.memory_space<vmem>>, vector<256x128xbf16>,
    %c2_110 = arith.constant 2 : index
    %c7_111 = arith.constant 7 : index
    %c0_112 = arith.constant 0 : index
    %87 = vector.load %arg13[%c2_110, %c7_111, %c0_112] : memref<18x32x128xbf16, #tpu.memory_space<vmem>>, vector<16x16x128xbf16>
    %88 = vector.shape_cast %87 : vector<16x16x128xbf16> to vector<256x128xbf16>
    %c0_113 = arith.constant 0 : index
    %c768 = arith.constant 768 : index
    %89 = vector.load %arg14[%c0_113, %c768] : memref<256x1156xbf16, #tpu.memory_space<vmem>>, vector<256x128xbf16>
    tpu.vector_store %arg14[%c0_113, %c768], %88 {strides = array<i32>} : memref<256x1156xbf16, #tpu.memory_space<vmem>>, vector<256x128xbf16>,
    %c2_114 = arith.constant 2 : index
    %c8_115 = arith.constant 8 : index
    %c0_116 = arith.constant 0 : index
    %90 = vector.load %arg13[%c2_114, %c8_115, %c0_116] : memref<18x32x128xbf16, #tpu.memory_space<vmem>>, vector<16x16x128xbf16>
    %91 = vector.shape_cast %90 : vector<16x16x128xbf16> to vector<256x128xbf16>
    %c0_117 = arith.constant 0 : index
    %c896 = arith.constant 896 : index
    %92 = vector.load %arg14[%c0_117, %c896] : memref<256x1156xbf16, #tpu.memory_space<vmem>>, vector<256x128xbf16>
    tpu.vector_store %arg14[%c0_117, %c896], %91 {strides = array<i32>} : memref<256x1156xbf16, #tpu.memory_space<vmem>>, vector<256x128xbf16>,
    %c2_118 = arith.constant 2 : index
    %c9_119 = arith.constant 9 : index
    %c0_120 = arith.constant 0 : index
    %93 = vector.load %arg13[%c2_118, %c9_119, %c0_120] : memref<18x32x128xbf16, #tpu.memory_space<vmem>>, vector<16x16x128xbf16>
    %94 = vector.shape_cast %93 : vector<16x16x128xbf16> to vector<256x128xbf16>
    %c0_121 = arith.constant 0 : index
    %c1024 = arith.constant 1024 : index
    %95 = vector.load %arg14[%c0_121, %c1024] : memref<256x1156xbf16, #tpu.memory_space<vmem>>, vector<256x128xbf16>
    tpu.vector_store %arg14[%c0_121, %c1024], %94 {strides = array<i32>} : memref<256x1156xbf16, #tpu.memory_space<vmem>>, vector<256x128xbf16>,
    %96 = arith.truncf %1 : vector<256x4xf32> to vector<256x4xbf16>
    %c0_122 = arith.constant 0 : index
    %c1152 = arith.constant 1152 : index
    %97 = vector.load %arg14[%c0_122, %c1152] : memref<256x1156xbf16, #tpu.memory_space<vmem>>, vector<256x4xbf16>
    tpu.vector_store %arg14[%c0_122, %c1152], %96 {strides = array<i32>} : memref<256x1156xbf16, #tpu.memory_space<vmem>>, vector<256x4xbf16>,
    %c0_123 = arith.constant 0 : index
    %c0_124 = arith.constant 0 : index
    %98 = vector.load %arg14[%c0_123, %c0_124] : memref<256x1156xbf16, #tpu.memory_space<vmem>>, vector<256x1156xbf16>
    %c0_125 = arith.constant 0 : index
    %c0_126 = arith.constant 0 : index
    %99 = vector.load %arg8[%c0_125, %c0_126] : memref<1156x128xbf16, #tpu.memory_space<vmem>>, vector<1156x128xbf16>
    %cst_127 = arith.constant dense<0.000000e+00> : vector<256x128xf32>
    %100 = tpu.matmul %98, %99, %cst_127 {dimension_numbers = #tpu.dot_dimension_numbers<[1], [0], [0], [1], [0, 0, 1, 1], [], []>} : vector<256x1156xbf16>, vector<1156x128xbf16>, vector<256x128xf32> -> vector<256x128xf32>
    %c0_128 = arith.constant 0 : index
    %c0_129 = arith.constant 0 : index
    %101 = vector.load %arg9[%c0_128, %c0_129] : memref<1x128xf32, #tpu.memory_space<vmem>>, vector<1x128xf32>
    %102 = vector.broadcast %101 : vector<1x128xf32> to vector<256x128xf32>
    %103 = arith.addf %100, %102 : vector<256x128xf32>
    %104 = vector.shape_cast %103 : vector<256x128xf32> to vector<1x256x128xf32>
    %c0_130 = arith.constant 0 : index
    %c0_131 = arith.constant 0 : index
    %c0_132 = arith.constant 0 : index
    %105 = vector.load %arg10[%c0_130, %c0_131, %c0_132] : memref<1x256x128xf32, #tpu.memory_space<vmem>>, vector<1x256x128xf32>
    tpu.vector_store %arg10[%c0_130, %c0_131, %c0_132], %104 {strides = array<i32>} : memref<1x256x128xf32, #tpu.memory_space<vmem>>, vector<1x256x128xf32>,
    return
  }
  func.func @transform_0(%arg0: i32) -> (i32, i32, i32, i32) {
    %c0_i32 = arith.constant 0 : i32
    %c0_i32_0 = arith.constant 0 : i32
    %c0_i32_1 = arith.constant 0 : i32
    %c0_i32_2 = arith.constant 0 : i32
    return %arg0, %c0_i32, %c0_i32_0, %c0_i32_1 : i32, i32, i32, i32
  }
  func.func @transform_1(%arg0: i32) -> (i32, i32) {
    %c0_i32 = arith.constant 0 : i32
    %c0_i32_0 = arith.constant 0 : i32
    %c0_i32_1 = arith.constant 0 : i32
    return %c0_i32, %c0_i32_0 : i32, i32
  }
  func.func @transform_2(%arg0: i32) -> (i32, i32) {
    %c0_i32 = arith.constant 0 : i32
    %c0_i32_0 = arith.constant 0 : i32
    %c0_i32_1 = arith.constant 0 : i32
    return %c0_i32, %c0_i32_0 : i32, i32
  }
  func.func @transform_3(%arg0: i32) -> (i32, i32) {
    %c0_i32 = arith.constant 0 : i32
    %c0_i32_0 = arith.constant 0 : i32
    %c0_i32_1 = arith.constant 0 : i32
    return %c0_i32, %c0_i32_0 : i32, i32
  }
  func.func @transform_4(%arg0: i32) -> (i32, i32) {
    %c0_i32 = arith.constant 0 : i32
    %c0_i32_0 = arith.constant 0 : i32
    %c0_i32_1 = arith.constant 0 : i32
    return %c0_i32, %c0_i32_0 : i32, i32
  }
  func.func @transform_5(%arg0: i32) -> (i32, i32) {
    %c0_i32 = arith.constant 0 : i32
    %c0_i32_0 = arith.constant 0 : i32
    %c0_i32_1 = arith.constant 0 : i32
    return %c0_i32, %c0_i32_0 : i32, i32
  }
  func.func @transform_6(%arg0: i32) -> (i32, i32) {
    %c0_i32 = arith.constant 0 : i32
    %c0_i32_0 = arith.constant 0 : i32
    %c0_i32_1 = arith.constant 0 : i32
    return %c0_i32, %c0_i32_0 : i32, i32
  }
  func.func @transform_7(%arg0: i32) -> (i32, i32) {
    %c0_i32 = arith.constant 0 : i32
    %c0_i32_0 = arith.constant 0 : i32
    %c0_i32_1 = arith.constant 0 : i32
    return %c0_i32, %c0_i32_0 : i32, i32
  }
  func.func @transform_8(%arg0: i32) -> (i32, i32) {
    %c0_i32 = arith.constant 0 : i32
    %c0_i32_0 = arith.constant 0 : i32
    %c0_i32_1 = arith.constant 0 : i32
    return %c0_i32, %c0_i32_0 : i32, i32
  }
  func.func @transform_9(%arg0: i32) -> (i32, i32, i32) {
    %c0_i32 = arith.constant 0 : i32
    %c0_i32_0 = arith.constant 0 : i32
    %c0_i32_1 = arith.constant 0 : i32
    return %arg0, %c0_i32, %c0_i32_0 : i32, i32, i32
  }
}

</mosaic_0001>

<bundles_post_ra>
// kernel: wide_basic_forward.1
= control target key start
LH: loop header
LB: loop body
LE: loop exit
PB: predicated region body
PF: predicated region fallthrough
CT: control target
= control target key end

     0   :  { %s8892_s30 = smov 0   ;;  %s11315_s0 = inlined_call_operand.vmem [shape: f32[2,16,16,4], index: 0, kind: input, shape index: {}]   ;;  %s11316_s1 = inlined_call_operand.vmem [shape: f32[1,4], index: 1, kind: input, shape index: {}]   ;;  %s11317_s2 = inlined_call_operand.vmem [shape: f32[1,4], index: 2, kind: input, shape index: {}]   ;;  %s11318_s3 = inlined_call_operand.vmem [shape: bf16[36,128], index: 3, kind: input, shape index: {}]   ;;  %s11319_s4 = inlined_call_operand.vmem [shape: f32[1,128], index: 4, kind: input, shape index: {}]   ;;  %s11320_s5 = inlined_call_operand.vmem [shape: f32[1,128], index: 5, kind: input, shape index: {}]   ;;  %s11321_s6 = inlined_call_operand.vmem [shape: f32[1,128], index: 6, kind: input, shape index: {}]   ;;  %s11322_s7 = inlined_call_operand.vmem [shape: bf16[1156,128], index: 7, kind: input, shape index: {}]   ;;  %s11323_s8 = inlined_call_operand.vmem [shape: f32[1,128], index: 8, kind: input, shape index: {}]   ;;  %s11324_s9 = inlined_call_operand.vmem [shape: f32[2,256,128], index: 9, kind: output, shape index: {}]  }
   0x1 LB: > { %s8009_s10 = sadd.s32 4294967295, %s8831_s30   ;;  %p8013_p0 = scmp.ge.s32.totalorder %s8831_s30, 1  ;;  %s8831_s30 = sphi %s8892_s30, %s19_s30  }
   0x2   : > { %p287_p1 = scmp.lt.s32.totalorder %s8831_s30, 3 }
   0x4   : > { %p288_p2 = pnand %p8013_p0, %p287_p1 }
   0x6   : > { %291 = sbr.rel (%p288_p2) target bundleno = 1221 (0x4c5), region = 56 }
   0xd   : > { %vm492_vm0 = vcmask 31744   ;;  %vm498_vm1 = vcmask 27648   ;;  %vm517_vm2 = vcmask 31748   ;;  %v8833_v0 = vmov 0   ;;  %p323_p3 = scmp.lt.s32.totalorder %s8009_s10, 1  ;;  %s8834_s19 = smov 4  }
   0xe   : > { %493 = vst.msk [vmem:[#allocation2] sm:$0xff] %vm492_vm0, %v8833_v0  ;;  %494 = vst.msk [vmem:[#allocation2 + $0x8] sm:$0xff] %vm492_vm0, %v8833_v0  ;;  %v9029_v1 = vld [vmem:[%s11316_s1] ss:$0 sm:$0xff]  ;;  %vm1164_vm3 = vsmask.f32 3328 }
   0xf   : > { %496 = vst.msk [vmem:[#allocation2 + $0x110] sm:$0xff] %vm492_vm0, %v8833_v0  ;;  %497 = vst.msk [vmem:[#allocation2 + $0x118] sm:$0xff] %vm492_vm0, %v8833_v0  ;;  %s11348_s10 = smov (!%p323_p3, %s8009_s10), 1  ;;  %v9042_v2 = vld [vmem:[%s11317_s2] ss:$0 sm:$0xff]  ;;  %vm1018_vm4 = vcmask 1043456  }
  0x10   : > { %500 = vst.msk [vmem:[#allocation2 + $0x10] sm:$0xf] %vm498_vm1, %v8833_v0  ;;  %501 = vst.msk [vmem:[#allocation2 + $0x20] sm:$0xf] %vm498_vm1, %v8833_v0  ;;  %s8134_s13 = sshll.u32 %s11348_s10, 8  ;;  %s8835_s20 = smov 8  }
  0x11   : > { %502 = vst.msk [vmem:[#allocation2 + $0x30] sm:$0xf] %vm498_vm1, %v8833_v0  ;;  %503 = vst.msk [vmem:[#allocation2 + $0x40] sm:$0xf] %vm498_vm1, %v8833_v0  ;;  %s9037_s16 = scalar_lea.vmem %s11315_s0, %s8134_s13  ;;  %s8836_s21 = smov 16   ;;  %vm1115_vm6 = vcmask 64544  }
  0x12   : > { %504 = vst.msk [vmem:[#allocation2 + $0x50] sm:$0xf] %vm498_vm1, %v8833_v0  ;;  %505 = vst.msk [vmem:[#allocation2 + $0x60] sm:$0xf] %vm498_vm1, %v8833_v0  ;;  %v336_v3 = vld [vmem:[%s9037_s16 + $0x10] sm:$0xff]  ;;  %v337_v4 = vld [vmem:[%s9037_s16 + $0x18] sm:$0xff]  ;;  %s11238_s14 = scalar_lea.vmem %s11324_s9, %s8134_s13 }
  0x13   : > { %506 = vst.msk [vmem:[#allocation2 + $0x70] sm:$0xf] %vm498_vm1, %v8833_v0  ;;  %507 = vst.msk [vmem:[#allocation2 + $0x80] sm:$0xf] %vm498_vm1, %v8833_v0  ;;  %v334_v5 = vld [vmem:[%s9037_s16] sm:$0xff]  ;;  %v375_v9 = vmul.f32 %v9029_v1, %v336_v3  ;;  %v376_v10 = vmul.f32 %v9029_v1, %v337_v4  ;;  %v335_v21 = vld [vmem:[%s9037_s16 + $0x8] sm:$0xff] }
  0x14   : > { %508 = vst.msk [vmem:[#allocation2 + $0x90] sm:$0xf] %vm498_vm1, %v8833_v0  ;;  %509 = vst.msk [vmem:[#allocation2 + $0xa0] sm:$0xf] %vm498_vm1, %v8833_v0  ;;  %v373_v11 = vmul.f32 %v9029_v1, %v334_v5  ;;  %v338_v22 = vld [vmem:[%s9037_s16 + $0x20] sm:$0xff]  ;;  %v374_v26 = vmul.f32 %v9029_v1, %v335_v21  ;;  %v339_v27 = vld [vmem:[%s9037_s16 + $0x28] sm:$0xff] }
  0x15   : > { %510 = vst.msk [vmem:[#allocation2 + $0xb0] sm:$0xf] %vm498_vm1, %v8833_v0  ;;  %511 = vst.msk [vmem:[#allocation2 + $0xc0] sm:$0xf] %vm498_vm1, %v8833_v0  ;;  %v1132_v6 = vld [vmem:[#allocation2] sm:$0xf0]  ;;  %v414_v19 = vadd.f32 %v9042_v2, %v375_v9  ;;  %v415_v20 = vadd.f32 %v9042_v2, %v376_v10  ;;  %v377_v37 = vmul.f32 %v9029_v1, %v338_v22 }
  0x16   : > { %512 = vst.msk [vmem:[#allocation2 + $0xd0] sm:$0xf] %vm498_vm1, %v8833_v0  ;;  %513 = vst.msk [vmem:[#allocation2 + $0xe0] sm:$0xf] %vm498_vm1, %v8833_v0  ;;  %v954_v7 = vld [vmem:[#allocation2] sm:$0xf0]  ;;  %v412_v35 = vadd.f32 %v9042_v2, %v373_v11  ;;  %v413_v36 = vadd.f32 %v9042_v2, %v374_v26  ;;  %v378_v40 = vmul.f32 %v9029_v1, %v339_v27 }
  0x17   : > { %514 = vst.msk [vmem:[#allocation2 + $0xf0] sm:$0xf] %vm498_vm1, %v8833_v0  ;;  %515 = vst.msk [vmem:[#allocation2 + $0x100] sm:$0xf] %vm498_vm1, %v8833_v0  ;;  %v955_v8 = vld [vmem:[#allocation2 + $0x8] sm:$0xf]  ;;  %v416_v46 = vadd.f32 %v9042_v2, %v377_v37 }
  0x18   : > { %519 = vst.msk [vmem:[#allocation2 + $0x18] sm:$0xf0] %vm517_vm2, %v8833_v0  ;;  %520 = vst.msk [vmem:[#allocation2 + $0x28] sm:$0xf0] %vm517_vm2, %v8833_v0  ;;  %v1166_v13 = vshrl.u32 %v1132_v6, 16  ;;  %v1169_v14 = vshll.u32 %v1132_v6, 16  ;;  %v417_v52 = vadd.f32 %v9042_v2, %v378_v40 }
  0x19   : > { %521 = vst.msk [vmem:[#allocation2 + $0x38] sm:$0xf0] %vm517_vm2, %v8833_v0  ;;  %522 = vst.msk [vmem:[#allocation2 + $0x48] sm:$0xf0] %vm517_vm2, %v8833_v0  ;;  %v1019_v15 = vrot.slane %v954_v7, 4  ;;  %v1020_v16 = vrot.slane %v955_v8, 4 }
  0x1a   : > { %523 = vst.msk [vmem:[#allocation2 + $0x58] sm:$0xf0] %vm517_vm2, %v8833_v0  ;;  %524 = vst.msk [vmem:[#allocation2 + $0x68] sm:$0xf0] %vm517_vm2, %v8833_v0  ;;  %v1168_v23 = vrot.slane %v1166_v13, 4  ;;  %v1171_v24 = vrot.slane %v1169_v14, 5 }
  0x1b   : > { %525 = vst.msk [vmem:[#allocation2 + $0x78] sm:$0xf0] %vm517_vm2, %v8833_v0  ;;  %526 = vst.msk [vmem:[#allocation2 + $0x88] sm:$0xf0] %vm517_vm2, %v8833_v0  ;;  %v1021_v25 = vsel %vm1018_vm4, %v1019_v15, %v1020_v16  ;;  %v340_v28 = vld [vmem:[%s9037_s16 + $0x30] sm:$0xff]  ;;  %v446_v31 = vmax.f32 %v414_v19, 0.0 }
  0x1c   : > { %527 = vst.msk [vmem:[#allocation2 + $0x98] sm:$0xf0] %vm517_vm2, %v8833_v0  ;;  %528 = vst.msk [vmem:[#allocation2 + $0xa8] sm:$0xf0] %vm517_vm2, %v8833_v0  ;;  %1067 = vrot.lane.b32.xlu0 %v1021_v25, %s8834_s19  ;;  %v447_v32 = vmax.f32 %v415_v20, 0.0  ;;  %v341_v33 = vld [vmem:[%s9037_s16 + $0x38] sm:$0xff]  ;;  %v1172_v34 = vor.u32 %v1171_v24, %v1168_v23  ;;  %v379_v41 = vmul.f32 %v9029_v1, %v340_v28 }
  0x1d   : > { %529 = vst.msk [vmem:[#allocation2 + $0xb8] sm:$0xf0] %vm517_vm2, %v8833_v0  ;;  %530 = vst.msk [vmem:[#allocation2 + $0xc8] sm:$0xf0] %vm517_vm2, %v8833_v0  ;;  %v342_v42 = vld [vmem:[%s9037_s16 + $0x40] sm:$0xff]  ;;  %v343_v43 = vld [vmem:[%s9037_s16 + $0x48] sm:$0xff]  ;;  %v380_v47 = vmul.f32 %v9029_v1, %v341_v33 }
  0x1e   : > { %531 = vst.msk [vmem:[#allocation2 + $0xd8] sm:$0xf0] %vm517_vm2, %v8833_v0  ;;  %532 = vst.msk [vmem:[#allocation2 + $0xe8] sm:$0xf0] %vm517_vm2, %v8833_v0  ;;  %v477_v39 = vpack.c.bf16 %v447_v32, %v446_v31  ;;  %v444_v44 = vmax.f32 %v412_v35, 0.0  ;;  %v445_v45 = vmax.f32 %v413_v36, 0.0  ;;  %v418_v53 = vadd.f32 %v9042_v2, %v379_v41 }
  0x1f   : > { %533 = vst.msk [vmem:[#allocation2 + $0xf8] sm:$0xf0] %vm517_vm2, %v8833_v0  ;;  %534 = vst.msk [vmem:[#allocation2 + $0x108] sm:$0xf0] %vm517_vm2, %v8833_v0  ;;  %v344_v48 = vld [vmem:[%s9037_s16 + $0x50] sm:$0xff]  ;;  %v345_v49 = vld [vmem:[%s9037_s16 + $0x58] sm:$0xff]  ;;  %v419_v57 = vadd.f32 %v9042_v2, %v380_v47  ;;  %v381_v58 = vmul.f32 %v9029_v1, %v342_v42  ;;  %v382_v62 = vmul.f32 %v9029_v1, %v343_v43 }
  0x20   : > { %3716 = vst [vmem:[#allocation4] sm:$0xff] %v8833_v0  ;;  %3717 = vst [vmem:[#allocation4 + $0x8] sm:$0xff] %v8833_v0  ;;  %v553_v51 = vrot.slane %v477_v39, 4  ;;  %v346_v54 = vld [vmem:[%s9037_s16 + $0x60] sm:$0xff]  ;;  %v476_v55 = vpack.c.bf16 %v445_v45, %v444_v44  ;;  %v448_v56 = vmax.f32 %v416_v46, 0.0  ;;  %v347_v59 = vld [vmem:[%s9037_s16 + $0x68] sm:$0xff]  ;;  %v383_v63 = vmul.f32 %v9029_v1, %v344_v48 }
  0x21   : > { %3719 = vst [vmem:[#allocation4 + $0x110] sm:$0xff] %v8833_v0  ;;  %3720 = vst [vmem:[#allocation4 + $0x118] sm:$0xff] %v8833_v0  ;;  %v449_v60 = vmax.f32 %v417_v52, 0.0  ;;  %v450_v61 = vmax.f32 %v418_v53, 0.0  ;;  %v451_v4 = vmax.f32 %v419_v57, 0.0  ;;  %v420_v5 = vadd.f32 %v9042_v2, %v381_v58  ;;  %v348_v15 = vld [vmem:[%s9037_s16 + $0x70] sm:$0xff] }
  0x22   : > { %3722 = vst [vmem:[#allocation4 + $0x10] sm:$0xf] %v8833_v0  ;;  %3723 = vst [vmem:[#allocation4 + $0x20] sm:$0xf] %v8833_v0  ;;  %v552_v3 = vrot.slane %v476_v55, 4  ;;  %v384_v6 = vmul.f32 %v9029_v1, %v345_v49  ;;  %v421_v8 = vadd.f32 %v9042_v2, %v382_v62  ;;  %v422_v9 = vadd.f32 %v9042_v2, %v383_v63  ;;  %v349_v23 = vld [vmem:[%s9037_s16 + $0x78] sm:$0xff] }
  0x23   : > { %3724 = vst [vmem:[#allocation4 + $0x30] sm:$0xf] %v8833_v0  ;;  %3725 = vst [vmem:[#allocation4 + $0x40] sm:$0xf] %v8833_v0  ;;  %v478_v7 = vpack.c.bf16 %v449_v60, %v448_v56  ;;  %v385_v10 = vmul.f32 %v9029_v1, %v346_v54  ;;  %v479_v11 = vpack.c.bf16 %v451_v4, %v450_v61  ;;  %v9096_v20 = vld [vmem:[#allocation2 + $0x8] sm:$0xf] }
  0x24   : > { %3726 = vst [vmem:[#allocation4 + $0x50] sm:$0xf] %v8833_v0  ;;  %3727 = vst [vmem:[#allocation4 + $0x60] sm:$0xf] %v8833_v0  ;;  %v423_v13 = vadd.f32 %v9042_v2, %v384_v6  ;;  %v386_v14 = vmul.f32 %v9029_v1, %v347_v59  ;;  %v350_v24 = vld [vmem:[%s9037_s16 + $0x80] sm:$0xff]  ;;  %v387_v27 = vmul.f32 %v9029_v1, %v348_v15  ;;  %v659_v28 = vshrl.u32 %v9096_v20, 16 }
  0x25   : > { %3728 = vst [vmem:[#allocation4 + $0x70] sm:$0xf] %v8833_v0  ;;  %3729 = vst [vmem:[#allocation4 + $0x80] sm:$0xf] %v8833_v0  ;;  %v554_v16 = vrot.slane %v478_v7, 4  ;;  %v9094_v19 = vadd.f32 %v9042_v2, %v385_v10  ;;  %v555_v21 = vrot.slane %v479_v11, 4  ;;  %v388_v44 = vmul.f32 %v9029_v1, %v349_v23 }
  0x26   : > { %3730 = vst [vmem:[#allocation4 + $0x90] sm:$0xf] %v8833_v0  ;;  %3731 = vst [vmem:[#allocation4 + $0xa0] sm:$0xf] %v8833_v0  ;;  %v455_v22 = vmax.f32 %v423_v13, 0.0  ;;  %v389_v45 = vmul.f32 %v9029_v1, %v350_v24  ;;  %s8837_s22 = smov 28  }
  0x27   : > { %3732 = vst [vmem:[#allocation4 + $0xb0] sm:$0xf] %v8833_v0  ;;  %3733 = vst [vmem:[#allocation4 + $0xc0] sm:$0xf] %v8833_v0  ;;  %v456_v26 = vmax.f32 %v9094_v19, 0.0  ;;  %s8838_s23 = smov 12  }
  0x28   : > { %3734 = vst [vmem:[#allocation4 + $0xd0] sm:$0xf] %v8833_v0  ;;  %3735 = vst [vmem:[#allocation4 + $0xe0] sm:$0xf] %v8833_v0  ;;  %vm649_vm5 = vsmask.f32 4352  ;;  %v9132_v6 = vadd.f32 %v9042_v2, %v389_v45 }
  0x29   : > { %3736 = vst [vmem:[#allocation4 + $0xf0] sm:$0xf] %v8833_v0  ;;  %3737 = vst [vmem:[#allocation4 + $0x100] sm:$0xf] %v8833_v0  ;;  %s8839_s24 = smov 20   ;;  %s8840_s25 = smov 24  }
  0x2a   : > { %3740 = vst [vmem:[#allocation4 + $0x18] sm:$0xf0] %v8833_v0  ;;  %3741 = vst [vmem:[#allocation4 + $0x28] sm:$0xf0] %v8833_v0  ;;  %s8841_s26 = smov 32   ;;  %vm1485_vm7 = vcmask 97344  }
  0x2b   : > { %3742 = vst [vmem:[#allocation4 + $0x38] sm:$0xf0] %v8833_v0  ;;  %3743 = vst [vmem:[#allocation4 + $0x48] sm:$0xf0] %v8833_v0  ;;  %v9254_v20 = vld [vmem:[%s11316_s1] ss:$0 sm:$0xff] }
  0x2c   : > { %3744 = vst [vmem:[#allocation4 + $0x58] sm:$0xf0] %v8833_v0  ;;  %3745 = vst [vmem:[#allocation4 + $0x68] sm:$0xf0] %v8833_v0  ;;  %vm1854_vm8 = vcmask 130144   ;;  %vm2031_vm9 = vcmask 162944  }
  0x2d   : > { %3746 = vst [vmem:[#allocation4 + $0x78] sm:$0xf0] %v8833_v0  ;;  %3747 = vst [vmem:[#allocation4 + $0x88] sm:$0xf0] %v8833_v0  ;;  %vm2400_vm10 = vcmask 195744   ;;  %vm2770_vm11 = vcmask 228544  }
  0x2e   : > { %3748 = vst [vmem:[#allocation4 + $0x98] sm:$0xf0] %v8833_v0  ;;  %3749 = vst [vmem:[#allocation4 + $0xa8] sm:$0xf0] %v8833_v0  ;;  %vm2947_vm12 = vcmask 261344   ;;  %vm3316_vm13 = vcmask 294144  }
  0x2f   : > { %3750 = vst [vmem:[#allocation4 + $0xb8] sm:$0xf0] %v8833_v0  ;;  %3751 = vst [vmem:[#allocation4 + $0xc8] sm:$0xf0] %v8833_v0  ;;  %vm3376_vm14 = vcmask 293888   ;;  %vm3425_vm15 = vcmask 1041408  }
  0x30   : > { %3752 = vst [vmem:[#allocation4 + $0xd8] sm:$0xf0] %v8833_v0  ;;  %3753 = vst [vmem:[#allocation4 + $0xe8] sm:$0xf0] %v8833_v0 }
  0x31   : > { %3754 = vst [vmem:[#allocation4 + $0xf8] sm:$0xf0] %v8833_v0  ;;  %3755 = vst [vmem:[#allocation4 + $0x108] sm:$0xf0] %v8833_v0 }
  0x32   : > { %518 = vst.msk [vmem:[#allocation2 + $0x8] sm:$0xf0] %vm517_vm2, %v8833_v0  ;;  %535 = vst.msk [vmem:[#allocation2 + $0x118] sm:$0xf0] %vm517_vm2, %v8833_v0 }
  0x33   : > { %499 = vst.msk [vmem:[#allocation2] sm:$0xf] %vm498_vm1, %v8833_v0  ;;  %516 = vst.msk [vmem:[#allocation2 + $0x110] sm:$0xf] %vm498_vm1, %v8833_v0 }
  0x34   : > { %3721 = vst [vmem:[#allocation4] sm:$0xf] %v8833_v0  ;;  %3738 = vst [vmem:[#allocation4 + $0x110] sm:$0xf] %v8833_v0 }
  0x35   : > { %3739 = vst [vmem:[#allocation4 + $0x8] sm:$0xf0] %v8833_v0  ;;  %3756 = vst [vmem:[#allocation4 + $0x118] sm:$0xf0] %v8833_v0 }
  0x36   : > { %587 = vst.msk [vmem:[#allocation2 + $0x20] sm:$0xf0] %vm517_vm2, %v553_v51  ;;  %585 = vst.msk [vmem:[#allocation2 + $0x10] sm:$0xf0] %vm517_vm2, %v552_v3 }
  0x37   : > { %588 = vst.msk [vmem:[#allocation2 + $0x28] sm:$0xf] %vm498_vm1, %v553_v51  ;;  %586 = vst.msk [vmem:[#allocation2 + $0x18] sm:$0xf] %vm498_vm1, %v552_v3 }
  0x38   : > { %589 = vst.msk [vmem:[#allocation2 + $0x30] sm:$0xf0] %vm517_vm2, %v554_v16  ;;  %591 = vst.msk [vmem:[#allocation2 + $0x40] sm:$0xf0] %vm517_vm2, %v555_v21 }
  0x39   : > { %v1133_v12 = vld [vmem:[#allocation2 + $0x8] sm:$0x1f]  ;;  %590 = vst.msk [vmem:[#allocation2 + $0x38] sm:$0xf] %vm498_vm1, %v554_v16  ;;  %592 = vst.msk [vmem:[#allocation2 + $0x48] sm:$0xf] %vm498_vm1, %v555_v21 }
  0x3a   : > { %v1174_v17 = vshrl.u32 %v1133_v12, 16  ;;  %v1177_v18 = vshll.u32 %v1133_v12, 16  ;;  %v452_v12 = vmax.f32 %v420_v5, 0.0  ;;  %v9129_v5 = vadd.f32 %v9042_v2, %v388_v44 }
  0x3c   : > { %v1176_v29 = vrot.slane %v1174_v17, 4  ;;  %v1179_v30 = vrot.slane %v1177_v18, 5  ;;  %v453_v17 = vmax.f32 %v421_v8, 0.0  ;;  %v454_v18 = vmax.f32 %v422_v9, 0.0 }
  0x3d   : > { %v958_v32 = vld [vmem:[#allocation2 + $0x20] sm:$0xf0]  ;;  %v956_v47 = vld [vmem:[#allocation2 + $0x10] sm:$0xf0] }
  0x3e   : > { %v1180_v38 = vor.u32 %v1179_v30, %v1176_v29  ;;  %v480_v25 = vpack.c.bf16 %v453_v17, %v452_v12  ;;  %v351_v29 = vld [vmem:[%s9037_s16 + $0x88] sm:$0xff]  ;;  %v1874_v31 = vld [vmem:[#allocation2 + $0x28] sm:$0xf]  ;;  %v481_v33 = vpack.c.bf16 %v455_v22, %v454_v18  ;;  %v957_v48 = vld [vmem:[#allocation2 + $0x18] sm:$0xf]  ;;  %v1022_v51 = vrot.slane %v956_v47, 4 }
  0x3f   : > { %v1873_v30 = vld [vmem:[#allocation2 + $0x20] sm:$0xf0]  ;;  %v1939_v36 = vrot.slane %v1874_v31, 4  ;;  %v959_v37 = vld [vmem:[#allocation2 + $0x28] sm:$0xf]  ;;  %v1023_v52 = vrot.slane %v957_v48, 4  ;;  %v9123_v55 = vmul.f32 %v9029_v1, %v351_v29 }
  0x40   : > { %v1181_v50 = vsel %vm1164_vm3, %v1172_v34, %v1180_v38  ;;  %v9109_v34 = vadd.f32 %v9042_v2, %v386_v14  ;;  %v1938_v35 = vrot.slane %v1873_v30, 4  ;;  %v1025_v38 = vrot.slane %v958_v32, 4  ;;  %v2787_v41 = vld [vmem:[#allocation2 + $0x20] sm:$0xf0]  ;;  %v2788_v42 = vld [vmem:[#allocation2 + $0x28] sm:$0xf] }
  0x41   : > { %1437 = vrot.lane.b32.xlu1 %v1181_v50, %s8835_s20  ;;  %v556_v39 = vrot.slane %v480_v25, 4  ;;  %v1026_v40 = vrot.slane %v959_v37, 4  ;;  %v557_v43 = vrot.slane %v481_v33, 4  ;;  %v1871_v49 = vld [vmem:[#allocation2 + $0x10] sm:$0xf0]  ;;  %v9117_v50 = vadd.f32 %v9042_v2, %v387_v27 }
  0x42   : > { %v1940_v46 = vsel %vm1018_vm4, %v1938_v35, %v1939_v36  ;;  %v1872_v53 = vld [vmem:[#allocation2 + $0x18] sm:$0xf]  ;;  %v1935_v54 = vrot.slane %v1871_v49, 4  ;;  %v2851_v57 = vrot.slane %v2787_v41, 4  ;;  %v2852_v58 = vrot.slane %v2788_v42, 4 }
  0x43   : > { %593 = vst.msk [vmem:[#allocation2 + $0x50] sm:$0xf0] %vm517_vm2, %v556_v39  ;;  %595 = vst.msk [vmem:[#allocation2 + $0x60] sm:$0xf0] %vm517_vm2, %v557_v43  ;;  %v1936_v56 = vrot.slane %v1872_v53, 4  ;;  %v457_v60 = vmax.f32 %v9109_v34, 0.0  ;;  %v1024_v61 = vsel %vm1018_vm4, %v1022_v51, %v1023_v52  ;;  %v1027_v3 = vsel %vm1018_vm4, %v1025_v38, %v1026_v40 }
  0x44   : > { %594 = vst.msk [vmem:[#allocation2 + $0x58] sm:$0xf] %vm498_vm1, %v556_v39  ;;  %596 = vst.msk [vmem:[#allocation2 + $0x68] sm:$0xf] %vm498_vm1, %v557_v43  ;;  %v1502_v59 = vld [vmem:[#allocation2 + $0x10] sm:$0xf8]  ;;  %1069 = vrot.lane.b32.xlu0 %v1024_v61, %s8834_s19  ;;  %v2853_v9 = vsel %vm1018_vm4, %v2851_v57, %v2852_v58 }
  0x45   : > { %1985 = vrot.lane.b32.xlu1 %v1940_v46, %s8836_s21  ;;  %v2789_v62 = vld [vmem:[#allocation2 + $0x30] sm:$0xf0]  ;;  %v2790_v63 = vld [vmem:[#allocation2 + $0x38] sm:$0xf]  ;;  %v1937_v8 = vsel %vm1018_vm4, %v1935_v54, %v1936_v56  ;;  %v1535_v14 = vshrl.u32 %v1502_v59, 16  ;;  %v1538_v15 = vshll.u32 %v1502_v59, 16 }
  0x46   : > { %v960_v4 = vld [vmem:[#allocation2 + $0x30] sm:$0xf0]  ;;  %v2854_v1 = vrot.slane %v2789_v62, 4  ;;  %v2855_v7 = vrot.slane %v2790_v63, 4  ;;  %v961_v10 = vld [vmem:[#allocation2 + $0x38] sm:$0xf] }
  0x47   : > { %v1503_v11 = vld [vmem:[#allocation2 + $0x18] sm:$0xf]  ;;  %v1028_v12 = vrot.slane %v960_v4, 4  ;;  %v1029_v13 = vrot.slane %v961_v10, 4  ;;  %v1134_v16 = vld [vmem:[#allocation2 + $0x10] sm:$0xf0] }
  0x48   : > { %v2856_v17 = vsel %vm1018_vm4, %v2854_v1, %v2855_v7  ;;  %v1543_v18 = vshrl.u32 %v1503_v11, 16  ;;  %v1546_v2 = vshll.u32 %v1503_v11, 16  ;;  %v1135_v21 = vld [vmem:[#allocation2 + $0x18] sm:$0x1f]  ;;  %v1183_v22 = vshrl.u32 %v1134_v16, 16  ;;  %1983 = vrot.lane.b32.xlu0 %v1937_v8, %s8836_s21 }
  0x49   : > { %2901 = vrot.lane.b32.xlu1 %v2856_v17, %s8837_s22  ;;  %v1030_v23 = vsel %vm1018_vm4, %v1028_v12, %v1029_v13  ;;  %v1537_v24 = vrot.slane %v1535_v14, 3  ;;  %v1540_v25 = vrot.slane %v1538_v15, 4  ;;  %v1186_v27 = vshll.u32 %v1134_v16, 16  ;;  %v2048_v29 = vld [vmem:[#allocation2 + $0x10] sm:$0xf0] }
  0x4a   : > { %v1545_v30 = vrot.slane %v1543_v18, 3  ;;  %v1548_v31 = vrot.slane %v1546_v2, 4  ;;  %v1185_v32 = vrot.slane %v1183_v22, 4  ;;  %v1191_v33 = vshrl.u32 %v1135_v21, 16  ;;  %v2049_v35 = vld [vmem:[#allocation2 + $0x18] sm:$0x1f] }
  0x4b   : > { %v1541_v36 = vor.u32 %v1540_v25, %v1537_v24  ;;  %v1188_v37 = vrot.slane %v1186_v27, 5  ;;  %v1194_v38 = vshll.u32 %v1135_v21, 16  ;;  %v2081_v39 = vshrl.u32 %v2048_v29, 16  ;;  %v1504_v40 = vld [vmem:[#allocation2 + $0x20] sm:$0xf8] }
  0x4c   : > { %v1549_v41 = vor.u32 %v1548_v31, %v1545_v30  ;;  %v1193_v42 = vrot.slane %v1191_v33, 4  ;;  %v2084_v43 = vshll.u32 %v2048_v29, 16  ;;  %v2089_v44 = vshrl.u32 %v2049_v35, 16  ;;  %v1505_v45 = vld [vmem:[#allocation2 + $0x28] sm:$0xf]  ;;  %2899 = vrot.lane.b32.xlu0 %v2853_v9, %s8837_s22 }
  0x4d   : > { %1071 = vrot.lane.b32.xlu1 %v1027_v3, %s8834_s19  ;;  %v1189_v46 = vor.u32 %v1188_v37, %v1185_v32  ;;  %v1196_v47 = vrot.slane %v1194_v38, 5  ;;  %v2083_v48 = vrot.slane %v2081_v39, 4  ;;  %v2092_v49 = vshll.u32 %v2049_v35, 16  ;;  %v2418_v51 = vld [vmem:[#allocation2 + $0x20] sm:$0xf8] }
  0x4e   : > { %v1550_v52 = vsel %vm649_vm5, %v1541_v36, %v1549_v41  ;;  %v2086_v53 = vrot.slane %v2084_v43, 5  ;;  %v2091_v54 = vrot.slane %v2089_v44, 4  ;;  %v1552_v56 = vshrl.u32 %v1504_v40, 16  ;;  %v2419_v62 = vld [vmem:[#allocation2 + $0x28] sm:$0xf] }
  0x4f   : > { %v1197_v57 = vor.u32 %v1196_v47, %v1193_v42  ;;  %v2094_v58 = vrot.slane %v2092_v49, 5  ;;  %v1555_v59 = vshll.u32 %v1504_v40, 16  ;;  %v1560_v61 = vshrl.u32 %v1505_v45, 16  ;;  %v2050_v7 = vld [vmem:[#allocation2 + $0x20] sm:$0xf0] }
  0x50   : > { %v2087_v63 = vor.u32 %v2086_v53, %v2083_v48  ;;  %v1554_v4 = vrot.slane %v1552_v56, 3  ;;  %v1563_v3 = vshll.u32 %v1505_v45, 16  ;;  %v2451_v1 = vshrl.u32 %v2418_v51, 16  ;;  %1806 = vrot.lane.b32.xlu0 %v1550_v52, %s8838_s23  ;;  %v2051_v16 = vld [vmem:[#allocation2 + $0x28] sm:$0x1f] }
  0x51   : > { %1073 = vrot.lane.b32.xlu1 %v1030_v23, %s8834_s19  ;;  %v1198_v8 = vsel %vm1164_vm3, %v1189_v46, %v1197_v57  ;;  %v2095_v9 = vor.u32 %v2094_v58, %v2091_v54  ;;  %v1557_v10 = vrot.slane %v1555_v59, 4  ;;  %v1562_v11 = vrot.slane %v1560_v61, 3  ;;  %v2964_v22 = vld [vmem:[#allocation2 + $0x20] sm:$0xf0]  ;;  %v2965_v33 = vld [vmem:[#allocation2 + $0x28] sm:$0x1f] }
  0x52   : > { %v1565_v12 = vrot.slane %v1563_v3, 4  ;;  %v2453_v13 = vrot.slane %v2451_v1, 3  ;;  %v2454_v14 = vshll.u32 %v2418_v51, 16  ;;  %v2459_v15 = vshrl.u32 %v2419_v62, 16  ;;  %v2420_v39 = vld [vmem:[#allocation2 + $0x30] sm:$0xf8] }
  0x53   : > { %v2096_v17 = vsel %vm1164_vm3, %v2087_v63, %v2095_v9  ;;  %v1558_v18 = vor.u32 %v1557_v10, %v1554_v4  ;;  %v2462_v2 = vshll.u32 %v2419_v62, 16  ;;  %v2098_v21 = vshrl.u32 %v2050_v7, 16  ;;  %v2421_v44 = vld [vmem:[#allocation2 + $0x38] sm:$0xf]  ;;  %v2966_v54 = vld [vmem:[#allocation2 + $0x30] sm:$0xf0] }
  0x54   : > { %v1566_v23 = vor.u32 %v1565_v12, %v1562_v11  ;;  %v2456_v24 = vrot.slane %v2454_v14, 4  ;;  %v2461_v25 = vrot.slane %v2459_v15, 3  ;;  %v2101_v27 = vshll.u32 %v2050_v7, 16  ;;  %2352 = vrot.lane.b32.xlu0 %v2096_v17, %s8839_s24  ;;  %v2967_v61 = vld [vmem:[#allocation2 + $0x38] sm:$0x1f] }
  0x55   : > { %1439 = vrot.lane.b32.xlu1 %v1198_v8, %s8835_s20  ;;  %v2464_v29 = vrot.slane %v2462_v2, 4  ;;  %v2100_v30 = vrot.slane %v2098_v21, 4  ;;  %v2106_v31 = vshrl.u32 %v2051_v16, 16  ;;  %v2109_v32 = vshll.u32 %v2051_v16, 16  ;;  %v1136_v1 = vld [vmem:[#allocation2 + $0x20] sm:$0xf0] }
  0x56   : > { %v1567_v35 = vsel %vm649_vm5, %v1558_v18, %v1566_v23  ;;  %v2457_v36 = vor.u32 %v2456_v24, %v2453_v13  ;;  %v2103_v37 = vrot.slane %v2101_v27, 5  ;;  %v2997_v38 = vshrl.u32 %v2964_v22, 16  ;;  %v1137_v15 = vld [vmem:[#allocation2 + $0x28] sm:$0x1f]  ;;  %v1138_v21 = vld [vmem:[#allocation2 + $0x30] sm:$0xf0] }
  0x57   : > { %v2465_v40 = vor.u32 %v2464_v29, %v2461_v25  ;;  %v2108_v41 = vrot.slane %v2106_v31, 4  ;;  %v2111_v42 = vrot.slane %v2109_v32, 5  ;;  %v3000_v43 = vshll.u32 %v2964_v22, 16  ;;  %v1139_v32 = vld [vmem:[#allocation2 + $0x38] sm:$0x1f] }
  0x58   : > { %v2104_v45 = vor.u32 %v2103_v37, %v2100_v30  ;;  %v2999_v46 = vrot.slane %v2997_v38, 4  ;;  %v3005_v47 = vshrl.u32 %v2965_v33, 16  ;;  %v3008_v48 = vshll.u32 %v2965_v33, 16  ;;  %v1506_v38 = vld [vmem:[#allocation2 + $0x30] sm:$0xf8] }
  0x59   : > { %1808 = vrot.lane.b32.xlu1 %v1567_v35, %s8838_s23  ;;  %v2466_v49 = vsel %vm649_vm5, %v2457_v36, %v2465_v40  ;;  %v2112_v51 = vor.u32 %v2111_v42, %v2108_v41  ;;  %v3002_v52 = vrot.slane %v3000_v43, 5  ;;  %v2468_v53 = vshrl.u32 %v2420_v39, 16  ;;  %v1507_v43 = vld [vmem:[#allocation2 + $0x38] sm:$0xf] }
  0x5a   : > { %2722 = vrot.lane.b32.xlu0 %v2466_v49, %s8840_s25  ;;  %v3007_v56 = vrot.slane %v3005_v47, 4  ;;  %v3010_v57 = vrot.slane %v3008_v48, 5  ;;  %v2471_v58 = vshll.u32 %v2420_v39, 16  ;;  %v2476_v59 = vshrl.u32 %v2421_v44, 16 }
  0x5b   : > { %v2113_v62 = vsel %vm1164_vm3, %v2104_v45, %v2112_v51  ;;  %v3003_v63 = vor.u32 %v3002_v52, %v2999_v46  ;;  %v2470_v4 = vrot.slane %v2468_v53, 3  ;;  %v2479_v3 = vshll.u32 %v2421_v44, 16  ;;  %v1508_v53 = vld [vmem:[#allocation2 + $0x40] sm:$0xf8] }
  0x5c   : > { %v3011_v7 = vor.u32 %v3010_v57, %v3007_v56  ;;  %v2473_v8 = vrot.slane %v2471_v58, 4  ;;  %v2478_v9 = vrot.slane %v2476_v59, 3  ;;  %v3014_v10 = vshrl.u32 %v2966_v54, 16 }
  0x5d   : > { %2354 = vrot.lane.b32.xlu1 %v2113_v62, %s8839_s24  ;;  %v2481_v11 = vrot.slane %v2479_v3, 4  ;;  %v3017_v12 = vshll.u32 %v2966_v54, 16  ;;  %v3022_v13 = vshrl.u32 %v2967_v61, 16  ;;  %v3025_v14 = vshll.u32 %v2967_v61, 16  ;;  %v1509_v54 = vld [vmem:[#allocation2 + $0x48] sm:$0xf] }
  0x5e   : > { %v3012_v16 = vsel %vm1164_vm3, %v3003_v63, %v3011_v7  ;;  %v2474_v17 = vor.u32 %v2473_v8, %v2470_v4  ;;  %v3016_v18 = vrot.slane %v3014_v10, 4  ;;  %v1200_v2 = vshrl.u32 %v1136_v1, 16  ;;  %v1875_v61 = vld [vmem:[#allocation2 + $0x30] sm:$0xf0]  ;;  %v1877_v7 = vld [vmem:[#allocation2 + $0x40] sm:$0xf0] }
  0x5f   : > { %3268 = vrot.lane.b32.xlu0 %v3012_v16, %s8841_s26  ;;  %v2482_v22 = vor.u32 %v2481_v11, %v2478_v9  ;;  %v3019_v23 = vrot.slane %v3017_v12, 5  ;;  %v3024_v24 = vrot.slane %v3022_v13, 4  ;;  %v3027_v25 = vrot.slane %v3025_v14, 5  ;;  %v1878_v12 = vld [vmem:[#allocation2 + $0x48] sm:$0xf] }
  0x60   : > { %v1202_v27 = vrot.slane %v1200_v2, 4  ;;  %v1203_v29 = vshll.u32 %v1136_v1, 16  ;;  %v1208_v30 = vshrl.u32 %v1137_v15, 16  ;;  %v1211_v31 = vshll.u32 %v1137_v15, 16  ;;  %v1876_v1 = vld [vmem:[#allocation2 + $0x38] sm:$0xf] }
  0x61   : > { %v2483_v33 = vsel %vm649_vm5, %v2474_v17, %v2482_v22  ;;  %v3020_v35 = vor.u32 %v3019_v23, %v3016_v18  ;;  %v3028_v36 = vor.u32 %v3027_v25, %v3024_v24  ;;  %v1217_v37 = vshrl.u32 %v1138_v21, 16  ;;  %v2052_v17 = vld [vmem:[#allocation2 + $0x30] sm:$0xf0] }
  0x62   : > { %2724 = vrot.lane.b32.xlu1 %v2483_v33, %s8840_s25  ;;  %v1205_v39 = vrot.slane %v1203_v29, 5  ;;  %v1210_v40 = vrot.slane %v1208_v30, 4  ;;  %v1213_v41 = vrot.slane %v1211_v31, 5  ;;  %v1220_v42 = vshll.u32 %v1138_v21, 16  ;;  %v2053_v29 = vld [vmem:[#allocation2 + $0x38] sm:$0x1f] }
  0x63   : > { %v3029_v44 = vsel %vm1164_vm3, %v3020_v35, %v3028_v36  ;;  %v1219_v45 = vrot.slane %v1217_v37, 4  ;;  %v1225_v46 = vshrl.u32 %v1139_v32, 16  ;;  %v1228_v47 = vshll.u32 %v1139_v32, 16  ;;  %v2054_v35 = vld [vmem:[#allocation2 + $0x40] sm:$0xf0] }
  0x64   : > { %3270 = vrot.lane.b32.xlu0 %v3029_v44, %s8841_s26  ;;  %v1206_v48 = vor.u32 %v1205_v39, %v1202_v27  ;;  %v1214_v49 = vor.u32 %v1213_v41, %v1210_v40  ;;  %v1222_v51 = vrot.slane %v1220_v42, 5  ;;  %v1569_v52 = vshrl.u32 %v1506_v38, 16  ;;  %v2055_v40 = vld [vmem:[#allocation2 + $0x48] sm:$0x1f] }
  0x65   : > { %v1227_v56 = vrot.slane %v1225_v46, 4  ;;  %v1230_v57 = vrot.slane %v1228_v47, 5  ;;  %v1572_v58 = vshll.u32 %v1506_v38, 16  ;;  %v1577_v59 = vshrl.u32 %v1507_v43, 16 }
  0x66   : > { %v1215_v62 = vsel %vm1164_vm3, %v1206_v48, %v1214_v49  ;;  %v1223_v63 = vor.u32 %v1222_v51, %v1219_v45  ;;  %v1571_v4 = vrot.slane %v1569_v52, 3  ;;  %v1580_v3 = vshll.u32 %v1507_v43, 16  ;;  %v2422_v45 = vld [vmem:[#allocation2 + $0x40] sm:$0xf8] }
  0x67   : > { %v1231_v8 = vor.u32 %v1230_v57, %v1227_v56  ;;  %v1574_v9 = vrot.slane %v1572_v58, 4  ;;  %v1579_v10 = vrot.slane %v1577_v59, 3  ;;  %v1586_v11 = vshrl.u32 %v1508_v53, 16  ;;  %v2423_v56 = vld [vmem:[#allocation2 + $0x48] sm:$0xf] }
  0x68   : > { %1441 = vrot.lane.b32.xlu0 %v1215_v62, %s8835_s20  ;;  %v1582_v13 = vrot.slane %v1580_v3, 4  ;;  %v1589_v14 = vshll.u32 %v1508_v53, 16  ;;  %v1594_v15 = vshrl.u32 %v1509_v54, 16  ;;  %v1597_v16 = vshll.u32 %v1509_v54, 16  ;;  %v2424_v62 = vld [vmem:[#allocation2 + $0x50] sm:$0xf8] }
  0x69   : > { %v1232_v18 = vsel %vm1164_vm3, %v1223_v63, %v1231_v8  ;;  %v1575_v2 = vor.u32 %v1574_v9, %v1571_v4  ;;  %v1588_v21 = vrot.slane %v1586_v11, 3  ;;  %v1941_v22 = vrot.slane %v1875_v61, 4 }
  0x6a   : > { %1443 = vrot.lane.b32.xlu1 %v1232_v18, %s8835_s20  ;;  %v1583_v23 = vor.u32 %v1582_v13, %v1579_v10  ;;  %v1591_v24 = vrot.slane %v1589_v14, 4  ;;  %v1596_v25 = vrot.slane %v1594_v15, 3  ;;  %v1599_v27 = vrot.slane %v1597_v16, 4  ;;  %v8675_v13 = vld [vmem:[%s11318_s3] sm:$0xff]   ;;  %v2792_v18 = vld [vmem:[#allocation2 + $0x48] sm:$0xf] }
  0x6b   : > { %v1942_v30 = vrot.slane %v1876_v1, 4  ;;  %v1944_v31 = vrot.slane %v1877_v7, 4  ;;  %v1945_v32 = vrot.slane %v1878_v12, 4  ;;  %v2115_v33 = vshrl.u32 %v2052_v17, 16  ;;  %v2425_v7 = vld [vmem:[#allocation2 + $0x58] sm:$0xf]  ;;  %8603 = vmatprep.subr.bf16.mxu0 %v8675_v13 }
  0x6c   : > { %v1584_v36 = vsel %vm649_vm5, %v1575_v2, %v1583_v23  ;;  %v1592_v37 = vor.u32 %v1591_v24, %v1588_v21  ;;  %v1600_v38 = vor.u32 %v1599_v27, %v1596_v25  ;;  %v2118_v39 = vshll.u32 %v2052_v17, 16  ;;  %v2791_v12 = vld [vmem:[#allocation2 + $0x40] sm:$0xf0]  ;;  %v2793_v2 = vld [vmem:[#allocation2 + $0x50] sm:$0xf0]  ;;  %8604 = vmatpush3.bf16.msra.mxu0 %v8675_v13 }
  0x6d   : > { %1810 = vrot.lane.b32.xlu0 %v1584_v36, %s8838_s23  ;;  %v1943_v41 = vsel %vm1018_vm4, %v1941_v22, %v1942_v30  ;;  %v1946_v42 = vsel %vm1018_vm4, %v1944_v31, %v1945_v32  ;;  %v2117_v43 = vrot.slane %v2115_v33, 4  ;;  %v2123_v44 = vshrl.u32 %v2053_v29, 16  ;;  %v2794_v25 = vld [vmem:[#allocation2 + $0x58] sm:$0xf]  ;;  %v2968_v32 = vld [vmem:[#allocation2 + $0x40] sm:$0xf0] }
  0x6e   : > { %v1601_v46 = vsel %vm649_vm5, %v1592_v37, %v1600_v38  ;;  %v2120_v47 = vrot.slane %v2118_v39, 5  ;;  %v2126_v48 = vshll.u32 %v2053_v29, 16  ;;  %v2132_v49 = vshrl.u32 %v2054_v35, 16  ;;  %v2969_v38 = vld [vmem:[#allocation2 + $0x48] sm:$0x1f]  ;;  %v8676_v39 = vld [vmem:[%s11318_s3 + $0x8] sm:$0xff]  }
  0x6f   : > { %1812 = vrot.lane.b32.xlu1 %v1601_v46, %s8838_s23  ;;  %v2125_v51 = vrot.slane %v2123_v44, 4  ;;  %v2135_v52 = vshll.u32 %v2054_v35, 16  ;;  %v2140_v53 = vshrl.u32 %v2055_v40, 16  ;;  %v2143_v54 = vshll.u32 %v2055_v40, 16  ;;  %v962_v44 = vld [vmem:[#allocation2 + $0x40] sm:$0xf0]  ;;  %8605 = vmatprep.subr.bf16.mxu0 %v8676_v39 }
  0x70   : > { %v2121_v57 = vor.u32 %v2120_v47, %v2117_v43  ;;  %v2128_v58 = vrot.slane %v2126_v48, 5  ;;  %v2134_v59 = vrot.slane %v2132_v49, 4  ;;  %v2485_v61 = vshrl.u32 %v2422_v45, 16  ;;  %v963_v49 = vld [vmem:[#allocation2 + $0x48] sm:$0xf]  ;;  %8606 = vmatpush3.bf16.msra.mxu0 %v8676_v39 }
  0x71   : > { %1987 = vrot.lane.b32.xlu0 %v1943_v41, %s8836_s21  ;;  %v2137_v63 = vrot.slane %v2135_v52, 5  ;;  %v2142_v4 = vrot.slane %v2140_v53, 4  ;;  %v2145_v3 = vrot.slane %v2143_v54, 5  ;;  %v2488_v1 = vshll.u32 %v2422_v45, 16  ;;  %v1140_v13 = vld [vmem:[#allocation2 + $0x40] sm:$0xf0] }
  0x72   : > { %v2129_v8 = vor.u32 %v2128_v58, %v2125_v51  ;;  %v2487_v9 = vrot.slane %v2485_v61, 3  ;;  %v2493_v10 = vshrl.u32 %v2423_v56, 16  ;;  %v2496_v11 = vshll.u32 %v2423_v56, 16  ;;  %v2970_v51 = vld [vmem:[#allocation2 + $0x50] sm:$0xf0] }
  0x73   : > { %1989 = vrot.lane.b32.xlu1 %v1946_v42, %s8836_s21  ;;  %v2138_v14 = vor.u32 %v2137_v63, %v2134_v59  ;;  %v2146_v15 = vor.u32 %v2145_v3, %v2142_v4  ;;  %v2490_v16 = vrot.slane %v2488_v1, 4  ;;  %v2502_v17 = vshrl.u32 %v2424_v62, 16  ;;  %v964_v63 = vld [vmem:[#allocation2 + $0x50] sm:$0xf0] }
  0x74   : > { %v2130_v21 = vsel %vm1164_vm3, %v2121_v57, %v2129_v8  ;;  %v2495_v22 = vrot.slane %v2493_v10, 3  ;;  %v2498_v23 = vrot.slane %v2496_v11, 4  ;;  %v2505_v24 = vshll.u32 %v2424_v62, 16  ;;  %v2971_v57 = vld [vmem:[#allocation2 + $0x58] sm:$0x1f] }
  0x75   : > { %2356 = vrot.lane.b32.xlu0 %v2130_v21, %s8839_s24  ;;  %v2147_v27 = vsel %vm1164_vm3, %v2138_v14, %v2146_v15  ;;  %v2491_v29 = vor.u32 %v2490_v16, %v2487_v9  ;;  %v2504_v30 = vrot.slane %v2502_v17, 3  ;;  %v2510_v31 = vshrl.u32 %v2425_v7, 16  ;;  %v965_v8 = vld [vmem:[#allocation2 + $0x58] sm:$0xf] }
  0x76   : > { %v2499_v33 = vor.u32 %v2498_v23, %v2495_v22  ;;  %v2507_v35 = vrot.slane %v2505_v24, 4  ;;  %v2513_v36 = vshll.u32 %v2425_v7, 16  ;;  %v2857_v37 = vrot.slane %v2791_v12, 4 }
  0x77   : > { %2358 = vrot.lane.b32.xlu1 %v2147_v27, %s8839_s24  ;;  %v2512_v40 = vrot.slane %v2510_v31, 3  ;;  %v2858_v41 = vrot.slane %v2792_v18, 4  ;;  %v2860_v42 = vrot.slane %v2793_v2, 4  ;;  %v2861_v43 = vrot.slane %v2794_v25, 4  ;;  %v1141_v18 = vld [vmem:[#allocation2 + $0x48] sm:$0x1f] }
  0x78   : > { %v2500_v45 = vsel %vm649_vm5, %v2491_v29, %v2499_v33  ;;  %v2508_v46 = vor.u32 %v2507_v35, %v2504_v30  ;;  %v2515_v47 = vrot.slane %v2513_v36, 4  ;;  %v3031_v48 = vshrl.u32 %v2968_v32, 16  ;;  %v1142_v30 = vld [vmem:[#allocation2 + $0x50] sm:$0xf0]  ;;  %v1143_v36 = vld [vmem:[#allocation2 + $0x58] sm:$0x1f] }
  0x79   : > { %2726 = vrot.lane.b32.xlu0 %v2500_v45, %s8840_s25  ;;  %v2859_v52 = vsel %vm1018_vm4, %v2857_v37, %v2858_v41  ;;  %v2862_v53 = vsel %vm1018_vm4, %v2860_v42, %v2861_v43  ;;  %v3034_v54 = vshll.u32 %v2968_v32, 16  ;;  %v3039_v56 = vshrl.u32 %v2969_v38, 16  ;;  %v1510_v41 = vld [vmem:[#allocation2 + $0x50] sm:$0xf8] }
  0x7a   : > { %v2516_v58 = vor.u32 %v2515_v47, %v2512_v40  ;;  %v3033_v59 = vrot.slane %v3031_v48, 4  ;;  %v3042_v61 = vshll.u32 %v2969_v38, 16  ;;  %v1031_v62 = vrot.slane %v962_v44, 4 }
  0x7b   : > { %v3036_v4 = vrot.slane %v3034_v54, 5  ;;  %v3041_v3 = vrot.slane %v3039_v56, 4  ;;  %v1032_v1 = vrot.slane %v963_v49, 4  ;;  %v3048_v7 = vshrl.u32 %v2970_v51, 16 }
  0x7c   : > { %v2517_v9 = vsel %vm649_vm5, %v2508_v46, %v2516_v58  ;;  %v3044_v10 = vrot.slane %v3042_v61, 5  ;;  %v3051_v11 = vshll.u32 %v2970_v51, 16  ;;  %v3056_v12 = vshrl.u32 %v2971_v57, 16  ;;  %v1511_v46 = vld [vmem:[#allocation2 + $0x58] sm:$0xf] }
  0x7d   : > { %2728 = vrot.lane.b32.xlu1 %v2517_v9, %s8840_s25  ;;  %2903 = vrot.lane.b32.xlu0 %v2859_v52, %s8837_s22  ;;  %v3037_v14 = vor.u32 %v3036_v4, %v3033_v59  ;;  %v1033_v15 = vsel %vm1018_vm4, %v1031_v62, %v1032_v1  ;;  %v3050_v16 = vrot.slane %v3048_v7, 4  ;;  %v3059_v17 = vshll.u32 %v2971_v57, 16  ;;  %v1512_v52 = vld [vmem:[#allocation2 + $0x60] sm:$0xf8]  ;;  %v1513_v58 = vld [vmem:[#allocation2 + $0x68] sm:$0xf] }
  0x7e   : > { %v3045_v2 = vor.u32 %v3044_v10, %v3041_v3  ;;  %v3053_v21 = vrot.slane %v3051_v11, 5  ;;  %v3058_v22 = vrot.slane %v3056_v12, 4  ;;  %v1034_v23 = vrot.slane %v964_v63, 4  ;;  %v1879_v4 = vld [vmem:[#allocation2 + $0x50] sm:$0xf0] }
  0x7f   : > { %v3061_v24 = vrot.slane %v3059_v17, 5  ;;  %v1035_v25 = vrot.slane %v965_v8, 4  ;;  %v1234_v27 = vshrl.u32 %v1140_v13, 16  ;;  %v1237_v29 = vshll.u32 %v1140_v13, 16  ;;  %v1880_v9 = vld [vmem:[#allocation2 + $0x58] sm:$0xf] }
  0x80   : > { %v3046_v31 = vsel %vm1164_vm3, %v3037_v14, %v3045_v2  ;;  %v3054_v32 = vor.u32 %v3053_v21, %v3050_v16  ;;  %v1242_v33 = vshrl.u32 %v1141_v18, 16  ;;  %v1245_v35 = vshll.u32 %v1141_v18, 16  ;;  %v1881_v10 = vld [vmem:[#allocation2 + $0x60] sm:$0xf0]  ;;  %v1882_v11 = vld [vmem:[#allocation2 + $0x68] sm:$0xf] }
  0x81   : > { %2905 = vrot.lane.b32.xlu1 %v2862_v53, %s8837_s22  ;;  %3272 = vrot.lane.b32.xlu0 %v3046_v31, %s8841_s26  ;;  %v3062_v37 = vor.u32 %v3061_v24, %v3058_v22  ;;  %v1036_v38 = vsel %vm1018_vm4, %v1034_v23, %v1035_v25  ;;  %v1236_v39 = vrot.slane %v1234_v27, 4  ;;  %v1239_v40 = vrot.slane %v1237_v29, 5  ;;  %v2056_v12 = vld [vmem:[#allocation2 + $0x50] sm:$0xf0]  ;;  %v2057_v22 = vld [vmem:[#allocation2 + $0x58] sm:$0x1f] }
  0x82   : > { %v1244_v42 = vrot.slane %v1242_v33, 4  ;;  %v1247_v43 = vrot.slane %v1245_v35, 5  ;;  %v1251_v44 = vshrl.u32 %v1142_v30, 16  ;;  %v1254_v45 = vshll.u32 %v1142_v30, 16  ;;  %v2058_v29 = vld [vmem:[#allocation2 + $0x60] sm:$0xf0] }
  0x83   : > { %v3063_v47 = vsel %vm1164_vm3, %v3054_v32, %v3062_v37  ;;  %v1240_v48 = vor.u32 %v1239_v40, %v1236_v39  ;;  %v1259_v49 = vshrl.u32 %v1143_v36, 16  ;;  %v1262_v51 = vshll.u32 %v1143_v36, 16  ;;  %v2059_v35 = vld [vmem:[#allocation2 + $0x68] sm:$0x1f] }
  0x84   : > { %v1248_v53 = vor.u32 %v1247_v43, %v1244_v42  ;;  %v1253_v54 = vrot.slane %v1251_v44, 4  ;;  %v1256_v56 = vrot.slane %v1254_v45, 5  ;;  %v1603_v57 = vshrl.u32 %v1510_v41, 16 }
  0x85   : > { %1075 = vrot.lane.b32.xlu1 %v1033_v15, %s8834_s19  ;;  %3274 = vrot.lane.b32.xlu0 %v3063_v47, %s8841_s26  ;;  %v1261_v59 = vrot.slane %v1259_v49, 4  ;;  %v1264_v61 = vrot.slane %v1262_v51, 5  ;;  %v1606_v62 = vshll.u32 %v1510_v41, 16  ;;  %v1611_v63 = vshrl.u32 %v1511_v46, 16  ;;  %v2426_v41 = vld [vmem:[#allocation2 + $0x60] sm:$0xf8] }
  0x86   : > { %v1249_v3 = vsel %vm1164_vm3, %v1240_v48, %v1248_v53  ;;  %v1257_v1 = vor.u32 %v1256_v56, %v1253_v54  ;;  %v1605_v7 = vrot.slane %v1603_v57, 3  ;;  %v1614_v8 = vshll.u32 %v1511_v46, 16  ;;  %v2427_v49 = vld [vmem:[#allocation2 + $0x68] sm:$0xf] }
  0x87   : > { %v1265_v13 = vor.u32 %v1264_v61, %v1261_v59  ;;  %v1608_v14 = vrot.slane %v1606_v62, 4  ;;  %v1613_v16 = vrot.slane %v1611_v63, 3  ;;  %v1620_v15 = vshrl.u32 %v1512_v52, 16  ;;  %v2795_v61 = vld [vmem:[#allocation2 + $0x60] sm:$0xf0] }
  0x88   : > { %v1616_v17 = vrot.slane %v1614_v8, 4  ;;  %v1623_v18 = vshll.u32 %v1512_v52, 16  ;;  %v1628_v2 = vshrl.u32 %v1513_v58, 16  ;;  %v1631_v21 = vshll.u32 %v1513_v58, 16 }
  0x89   : > { %1077 = vrot.lane.b32.xlu1 %v1036_v38, %s8834_s19  ;;  %1445 = vrot.lane.b32.xlu0 %v1249_v3, %s8835_s20  ;;  %v1266_v23 = vsel %vm1164_vm3, %v1257_v1, %v1265_v13  ;;  %v1609_v24 = vor.u32 %v1608_v14, %v1605_v7  ;;  %v1622_v25 = vrot.slane %v1620_v15, 3  ;;  %v1947_v27 = vrot.slane %v1879_v4, 4  ;;  %v2796_v1 = vld [vmem:[#allocation2 + $0x68] sm:$0xf] }
  0x8a   : > { %v1617_v30 = vor.u32 %v1616_v17, %v1613_v16  ;;  %v1625_v31 = vrot.slane %v1623_v18, 4  ;;  %v1630_v32 = vrot.slane %v1628_v2, 3  ;;  %v1633_v33 = vrot.slane %v1631_v21, 4  ;;  %v966_v17 = vld [vmem:[#allocation2 + $0x60] sm:$0xf0] }
  0x8b   : > { %v1948_v36 = vrot.slane %v1880_v9, 4  ;;  %v1950_v37 = vrot.slane %v1881_v10, 4  ;;  %v1951_v39 = vrot.slane %v1882_v11, 4  ;;  %v2149_v40 = vshrl.u32 %v2056_v12, 16  ;;  %v2972_v11 = vld [vmem:[#allocation2 + $0x60] sm:$0xf0] }
  0x8c   : > { %v1618_v38 = vsel %vm649_vm5, %v1609_v24, %v1617_v30  ;;  %v1626_v42 = vor.u32 %v1625_v31, %v1622_v25  ;;  %v1634_v43 = vor.u32 %v1633_v33, %v1630_v32  ;;  %v2152_v44 = vshll.u32 %v2056_v12, 16  ;;  %v2973_v12 = vld [vmem:[#allocation2 + $0x68] sm:$0x1f]  ;;  %v1144_v30 = vld [vmem:[#allocation2 + $0x60] sm:$0xf0] }
  0x8d   : > { %1447 = vrot.lane.b32.xlu1 %v1266_v23, %s8835_s20  ;;  %1814 = vrot.lane.b32.xlu0 %v1618_v38, %s8838_s23  ;;  %v1949_v45 = vsel %vm1018_vm4, %v1947_v27, %v1948_v36  ;;  %v1952_v46 = vsel %vm1018_vm4, %v1950_v37, %v1951_v39  ;;  %v2151_v47 = vrot.slane %v2149_v40, 4  ;;  %v2157_v48 = vshrl.u32 %v2057_v22, 16  ;;  %v967_v18 = vld [vmem:[#allocation2 + $0x68] sm:$0xf] }
  0x8e   : > { %v1635_v51 = vsel %vm649_vm5, %v1626_v42, %v1634_v43  ;;  %v2154_v52 = vrot.slane %v2152_v44, 5  ;;  %v2160_v53 = vshll.u32 %v2057_v22, 16  ;;  %v2166_v54 = vshrl.u32 %v2058_v29, 16  ;;  %v1145_v36 = vld [vmem:[#allocation2 + $0x68] sm:$0x1f] }
  0x8f   : > { %v2159_v56 = vrot.slane %v2157_v48, 4  ;;  %v2169_v57 = vshll.u32 %v2058_v29, 16  ;;  %v2174_v58 = vshrl.u32 %v2059_v35, 16  ;;  %v2177_v59 = vshll.u32 %v2059_v35, 16 }
  0x90   : > { %v2155_v62 = vor.u32 %v2154_v52, %v2151_v47  ;;  %v2162_v63 = vrot.slane %v2160_v53, 5  ;;  %v2168_v4 = vrot.slane %v2166_v54, 4  ;;  %v2519_v3 = vshrl.u32 %v2426_v41, 16 }
  0x91   : > { %1816 = vrot.lane.b32.xlu1 %v1635_v51, %s8838_s23  ;;  %1991 = vrot.lane.b32.xlu0 %v1949_v45, %s8836_s21  ;;  %v2171_v7 = vrot.slane %v2169_v57, 5  ;;  %v2176_v8 = vrot.slane %v2174_v58, 4  ;;  %v2179_v9 = vrot.slane %v2177_v59, 5  ;;  %v2522_v10 = vshll.u32 %v2426_v41, 16  ;;  %v9224_v41 = vld [vmem:[%s11317_s2] ss:$0 sm:$0xff] }
  0x92   : > { %v2163_v13 = vor.u32 %v2162_v63, %v2159_v56  ;;  %v2521_v14 = vrot.slane %v2519_v3, 3  ;;  %v2527_v16 = vshrl.u32 %v2427_v49, 16  ;;  %v2530_v15 = vshll.u32 %v2427_v49, 16  ;;  %v352_v51 = vld [vmem:[%s9037_s16 + $0x90] sm:$0xff]  ;;  %v353_v56 = vld [vmem:[%s9037_s16 + $0x98] sm:$0xff] }
  0x93   : > { %v2172_v2 = vor.u32 %v2171_v7, %v2168_v4  ;;  %v2180_v21 = vor.u32 %v2179_v9, %v2176_v8  ;;  %v2524_v22 = vrot.slane %v2522_v10, 4  ;;  %v482_v23 = vpack.c.bf16 %v457_v60, %v456_v26  ;;  %v9248_v9 = vld [vmem:[#allocation2 + $0x8] sm:$0xf] }
  0x94   : > { %v2164_v24 = vsel %vm1164_vm3, %v2155_v62, %v2163_v13  ;;  %v2529_v25 = vrot.slane %v2527_v16, 3  ;;  %v2532_v27 = vrot.slane %v2530_v15, 4  ;;  %v2863_v29 = vrot.slane %v2795_v61, 4  ;;  %v354_v62 = vld [vmem:[%s9037_s16 + $0xa0] sm:$0xff] }
  0x95   : > { %1993 = vrot.lane.b32.xlu1 %v1952_v46, %s8836_s21  ;;  %2360 = vrot.lane.b32.xlu0 %v2164_v24, %s8839_s24  ;;  %v2181_v31 = vsel %vm1164_vm3, %v2172_v2, %v2180_v21  ;;  %v2525_v32 = vor.u32 %v2524_v22, %v2521_v14  ;;  %v558_v33 = vrot.slane %v482_v23, 4  ;;  %v2864_v35 = vrot.slane %v2796_v1, 4 }
  0x96   : > { %v2533_v19 = vor.u32 %v2532_v27, %v2529_v25  ;;  %v3065_v37 = vshrl.u32 %v2972_v11, 16  ;;  %v3068_v34 = vshll.u32 %v2972_v11, 16  ;;  %v3073_v26 = vshrl.u32 %v2973_v12, 16 }
  0x97   : > { %597 = vst.msk [vmem:[#allocation2 + $0x70] sm:$0xf0] %vm517_vm2, %v558_v33  ;;  %v3076_v60 = vshll.u32 %v2973_v12, 16  ;;  %v1037_v39 = vrot.slane %v966_v17, 4  ;;  %v1038_v40 = vrot.slane %v967_v18, 4  ;;  %v9228_v38 = vadd.f32 %v9224_v41, %v9123_v55 }
  0x98   : > { %598 = vst.msk [vmem:[#allocation2 + $0x78] sm:$0xf] %vm498_vm1, %v558_v33  ;;  %v2534_v42 = vsel %vm649_vm5, %v2525_v32, %v2533_v19  ;;  %v3067_v43 = vrot.slane %v3065_v37, 4  ;;  %v3070_v44 = vrot.slane %v3068_v34, 5  ;;  %v3075_v45 = vrot.slane %v3073_v26, 4 }
  0x99   : > { %2362 = vrot.lane.b32.xlu1 %v2181_v31, %s8839_s24  ;;  %2730 = vrot.lane.b32.xlu0 %v2534_v42, %s8840_s25  ;;  %v2865_v46 = vsel %vm1018_vm4, %v2863_v29, %v2864_v35  ;;  %v3078_v47 = vrot.slane %v3076_v60, 5  ;;  %v1268_v48 = vshrl.u32 %v1144_v30, 16  ;;  %v1271_v49 = vshll.u32 %v1144_v30, 16 }
  0x9a   : > { %v3071_v52 = vor.u32 %v3070_v44, %v3067_v43  ;;  %v1276_v55 = vshrl.u32 %v1145_v36, 16  ;;  %v1279_v53 = vshll.u32 %v1145_v36, 16  ;;  %v458_v54 = vmax.f32 %v9117_v50, 0.0 }
  0x9b   : > { %v3079_v57 = vor.u32 %v3078_v47, %v3075_v45  ;;  %v1270_v58 = vrot.slane %v1268_v48, 4  ;;  %v1273_v59 = vrot.slane %v1271_v49, 5  ;;  %v459_v61 = vmax.f32 %v9129_v5, 0.0 }
  0x9c   : > { %v1039_v63 = vsel %vm1018_vm4, %v1037_v39, %v1038_v40  ;;  %v1278_v4 = vrot.slane %v1276_v55, 4  ;;  %v1281_v3 = vrot.slane %v1279_v53, 5  ;;  %v9242_v1 = vrot.slane %v659_v28, 3 }
  0x9d   : > { %2907 = vrot.lane.b32.xlu0 %v2865_v46, %s8837_s22  ;;  %v3080_v7 = vsel %vm1164_vm3, %v3071_v52, %v3079_v57  ;;  %v1274_v50 = vor.u32 %v1273_v59, %v1270_v58  ;;  %v9246_v8 = vpack.c.bf16 %v459_v61, %v458_v54  ;;  %v662_v5 = vshll.u32 %v9248_v9, 16 }
  0x9e   : > { %v2428_v10 = vld [vmem:[#allocation2 + $0x70] sm:$0xf8]  ;;  %v1282_v13 = vor.u32 %v1281_v3, %v1278_v4  ;;  %v391_v28 = vmul.f32 %v9254_v20, %v352_v51  ;;  %v9258_v14 = vmul.f32 %v9254_v20, %v353_v56  ;;  %v9261_v16 = vmul.f32 %v9254_v20, %v354_v62 }
  0x9f   : > { %v2429_v11 = vld [vmem:[#allocation2 + $0x78] sm:$0xf]  ;;  %v2797_v12 = vld [vmem:[#allocation2 + $0x70] sm:$0xf0]  ;;  %v2536_v15 = vshrl.u32 %v2428_v10, 16  ;;  %v2539_v17 = vshll.u32 %v2428_v10, 16 }
  0xa0   : > { %v2544_v18 = vshrl.u32 %v2429_v11, 16  ;;  %v2547_v2 = vshll.u32 %v2429_v11, 16  ;;  %v2798_v21 = vld [vmem:[#allocation2 + $0x78] sm:$0xf]  ;;  %v2866_v22 = vrot.slane %v2797_v12, 4  ;;  %v1283_v27 = vsel %vm1164_vm3, %v1274_v50, %v1282_v13 }
  0xa1   : > { %v2867_v23 = vrot.slane %v2798_v21, 4  ;;  %v2974_v24 = vld [vmem:[#allocation2 + $0x70] sm:$0xf0]  ;;  %v2975_v25 = vld [vmem:[#allocation2 + $0x78] sm:$0x1f]  ;;  %v9265_v29 = vadd.f32 %v9224_v41, %v391_v28  ;;  %v2538_v30 = vrot.slane %v2536_v15, 3  ;;  %3276 = vrot.lane.b32.xlu0 %v3080_v7, %s8841_s26 }
  0xa2   : > { %v2541_v31 = vrot.slane %v2539_v17, 4  ;;  %v2546_v32 = vrot.slane %v2544_v18, 3  ;;  %v2549_v33 = vrot.slane %v2547_v2, 4  ;;  %v968_v35 = vld [vmem:[#allocation2 + $0x70] sm:$0xf0]  ;;  %v3082_v19 = vshrl.u32 %v2974_v24, 16 }
  0xa3   : > { %v2868_v36 = vsel %vm1018_vm4, %v2866_v22, %v2867_v23  ;;  %v3085_v37 = vshll.u32 %v2974_v24, 16  ;;  %v3090_v34 = vshrl.u32 %v2975_v25, 16  ;;  %v969_v26 = vld [vmem:[#allocation2 + $0x78] sm:$0xf]  ;;  %v3093_v40 = vshll.u32 %v2975_v25, 16 }
  0xa4   : > { %v2542_v60 = vor.u32 %v2541_v31, %v2538_v30  ;;  %v2550_v39 = vor.u32 %v2549_v33, %v2546_v32  ;;  %v1040_v42 = vrot.slane %v968_v35, 4  ;;  %v1146_v43 = vld [vmem:[#allocation2 + $0x70] sm:$0xf0]  ;;  %v1147_v44 = vld [vmem:[#allocation2 + $0x78] sm:$0x1f]  ;;  %v3084_v45 = vrot.slane %v3082_v19, 4 }
  0xa5   : > { %v3087_v46 = vrot.slane %v3085_v37, 5  ;;  %v3092_v47 = vrot.slane %v3090_v34, 4  ;;  %v1041_v48 = vrot.slane %v969_v26, 4  ;;  %v1514_v49 = vld [vmem:[#allocation2 + $0x70] sm:$0xf8]  ;;  %v3095_v52 = vrot.slane %v3093_v40, 5  ;;  %1079 = vrot.lane.b32.xlu0 %v1039_v63, %s8834_s19 }
  0xa6   : > { %v2551_v51 = vsel %vm649_vm5, %v2542_v60, %v2550_v39  ;;  %v1285_v55 = vshrl.u32 %v1146_v43, 16  ;;  %v1288_v53 = vshll.u32 %v1146_v43, 16  ;;  %v1515_v54 = vld [vmem:[#allocation2 + $0x78] sm:$0xf]  ;;  %v1293_v58 = vshrl.u32 %v1147_v44, 16 }
  0xa7   : > { %2732 = vrot.lane.b32.xlu1 %v2551_v51, %s8840_s25  ;;  %v3088_v56 = vor.u32 %v3087_v46, %v3084_v45  ;;  %v9273_v57 = vsel %vm1018_vm4, %v1040_v42, %v1041_v48  ;;  %v1296_v59 = vshll.u32 %v1147_v44, 16  ;;  %v1883_v61 = vld [vmem:[#allocation2 + $0x70] sm:$0xf0]  ;;  %v1884_v62 = vld [vmem:[#allocation2 + $0x78] sm:$0xf]  ;;  %v3096_v4 = vor.u32 %v3095_v52, %v3092_v47  ;;  %v355_v52 = vld [vmem:[%s9037_s16 + $0xa8] sm:$0xff] }
  0xa8   : > { %v1287_v3 = vrot.slane %v1285_v55, 4  ;;  %v1290_v7 = vrot.slane %v1288_v53, 5  ;;  %v1637_v50 = vshrl.u32 %v1514_v49, 16  ;;  %v2060_v10 = vld [vmem:[#allocation2 + $0x70] sm:$0xf0]  ;;  %v1295_v11 = vrot.slane %v1293_v58, 4 }
  0xa9   : > { %v1298_v63 = vrot.slane %v1296_v59, 5  ;;  %v1640_v12 = vshll.u32 %v1514_v49, 16  ;;  %v1645_v13 = vshrl.u32 %v1515_v54, 16  ;;  %v2061_v28 = vld [vmem:[#allocation2 + $0x78] sm:$0x1f]  ;;  %v3097_v15 = vsel %vm1164_vm3, %v3088_v56, %v3096_v4  ;;  %1449 = vrot.lane.b32.xlu0 %v1283_v27, %s8835_s20 }
  0xaa   : > { %v1291_v17 = vor.u32 %v1290_v7, %v1287_v3  ;;  %v1639_v18 = vrot.slane %v1637_v50, 3  ;;  %v1648_v2 = vshll.u32 %v1515_v54, 16  ;;  %v559_v24 = vrot.slane %v9246_v8, 4  ;;  %v617_v33 = vld [vmem:[#allocation2] sm:$0xf8] }
  0xab   : > { %2909 = vrot.lane.b32.xlu1 %v2868_v36, %s8837_s22  ;;  %v1299_v21 = vor.u32 %v1298_v63, %v1295_v11  ;;  %v1642_v22 = vrot.slane %v1640_v12, 4  ;;  %v1647_v23 = vrot.slane %v1645_v13, 3  ;;  %v1953_v30 = vrot.slane %v1883_v61, 4  ;;  %v9282_v36 = vld [vmem:[#allocation2 + $0x18] sm:$0xf]  ;;  %v1068_v61 = vpop.permute.xlu0 %1067 }
  0xac   : > { %v1650_v25 = vrot.slane %v1648_v2, 4  ;;  %v1954_v31 = vrot.slane %v1884_v62, 4  ;;  %v2183_v32 = vshrl.u32 %v2060_v10, 16  ;;  %599 = vst.msk [vmem:[#allocation2 + $0x80] sm:$0xf0] %vm517_vm2, %v559_v24  ;;  %v2186_v27 = vshll.u32 %v2060_v10, 16 }
  0xad   : > { %v1300_v35 = vsel %vm1164_vm3, %v1291_v17, %v1299_v21  ;;  %v1643_v19 = vor.u32 %v1642_v22, %v1639_v18  ;;  %600 = vst.msk [vmem:[#allocation2 + $0x88] sm:$0xf] %vm498_vm1, %v559_v24  ;;  %v2191_v37 = vshrl.u32 %v2061_v28, 16  ;;  %v2194_v60 = vshll.u32 %v2061_v28, 16  ;;  %v9285_v39 = vld [vmem:[#allocation2 + $0x10] sm:$0xf8] }
  0xae   : > { %v1651_v34 = vor.u32 %v1650_v25, %v1647_v23  ;;  %v1955_v8 = vsel %vm1018_vm4, %v1953_v30, %v1954_v31  ;;  %v2185_v26 = vrot.slane %v2183_v32, 4  ;;  %v9287_v40 = vld [vmem:[#allocation2 + $0x28] sm:$0xf]  ;;  %v2188_v42 = vrot.slane %v2186_v27, 5 }
  0xaf   : > { %3278 = vrot.lane.b32.xlu1 %v3097_v15, %s8841_s26  ;;  %v2193_v43 = vrot.slane %v2191_v37, 4  ;;  %v664_v44 = vrot.slane %v662_v5, 4  ;;  %v651_v45 = vshrl.u32 %v617_v33, 16  ;;  %v2196_v47 = vrot.slane %v2194_v60, 5 }
  0xb0   : > { %v1652_v46 = vsel %vm649_vm5, %v1643_v19, %v1651_v34  ;;  %v654_v49 = vshll.u32 %v617_v33, 16  ;;  %v460_v51 = vmax.f32 %v9132_v6, 0.0  ;;  %v2189_v55 = vor.u32 %v2188_v42, %v2185_v26 }
  0xb1   : > { %1818 = vrot.lane.b32.xlu0 %v1652_v46, %s8838_s23  ;;  %v665_v53 = vor.u32 %v664_v44, %v9242_v1  ;;  %v653_v54 = vrot.slane %v651_v45, 3  ;;  %v461_v56 = vmax.f32 %v9228_v38, 0.0  ;;  %v2197_v9 = vor.u32 %v2196_v47, %v2193_v43 }
  0xb2   : > { %v656_v5 = vrot.slane %v654_v49, 4  ;;  %v676_v58 = vshrl.u32 %v9282_v36, 16  ;;  %v679_v59 = vshll.u32 %v9282_v36, 16  ;;  %v668_v62 = vshrl.u32 %v9285_v39, 16 }
  0xb3   : > { %v9293_v48 = vpop.permute.xlu1 %1437  ;;  %1081 = vrot.lane.b32.xlu1 %v9273_v57, %s8834_s19  ;;  %v9304_v6 = vpack.c.bf16 %v461_v56, %v460_v51  ;;  %v671_v4 = vshll.u32 %v9285_v39, 16  ;;  %v693_v1 = vshrl.u32 %v9287_v40, 16  ;;  %v1516_v3 = vld [vmem:[#allocation2 + $0x80] sm:$0xf8]  ;;  %v2198_v50 = vsel %vm1164_vm3, %v2189_v55, %v2197_v9  ;;  %v356_v39 = vld [vmem:[%s9037_s16 + $0xb0] sm:$0xff] }
  0xb4   : > { %v1517_v38 = vld [vmem:[#allocation2 + $0x88] sm:$0xf]  ;;  %v1885_v7 = vld [vmem:[#allocation2 + $0x80] sm:$0xf0]  ;;  %v657_v10 = vor.u32 %v656_v5, %v653_v54  ;;  %v9312_v11 = vadd.f32 %v9224_v41, %v9258_v14  ;;  %v9315_v57 = vmul.f32 %v9254_v20, %v355_v52  ;;  %v1654_v63 = vshrl.u32 %v1516_v3, 16 }
  0xb5   : > { %v1657_v12 = vshll.u32 %v1516_v3, 16  ;;  %v1662_v13 = vshrl.u32 %v1517_v38, 16  ;;  %v1665_v28 = vshll.u32 %v1517_v38, 16  ;;  %1995 = vrot.lane.b32.xlu0 %v1955_v8, %s8836_s21  ;;  %v1886_v15 = vld [vmem:[#allocation2 + $0x88] sm:$0xf]  ;;  %v1956_v17 = vrot.slane %v1885_v7, 4 }
  0xb6   : > { %v1957_v18 = vrot.slane %v1886_v15, 4  ;;  %v2062_v2 = vld [vmem:[#allocation2 + $0x80] sm:$0xf0]  ;;  %v2063_v21 = vld [vmem:[#allocation2 + $0x88] sm:$0x1f]  ;;  %v666_v22 = vsel %vm649_vm5, %v657_v10, %v665_v53  ;;  %v9323_v14 = vadd.f32 %v9224_v41, %v9261_v16  ;;  %v1656_v24 = vrot.slane %v1654_v63, 3  ;;  %v1070_v60 = vpop.permute.xlu0 %1069 }
  0xb7   : > { %v9319_v23 = vpop.permute.xlu1 %1985  ;;  %1451 = vrot.lane.b32.xlu1 %v1300_v35, %s8835_s20  ;;  %v1659_v25 = vrot.slane %v1657_v12, 4  ;;  %v1664_v30 = vrot.slane %v1662_v13, 3  ;;  %v1667_v31 = vrot.slane %v1665_v28, 4  ;;  %938 = vst.msk [vmem:[#allocation3] sm:$0xff] %vm492_vm0, %v666_v22  ;;  %v2430_v32 = vld [vmem:[#allocation2 + $0x80] sm:$0xf8] }
  0xb8   : > { %v1958_v33 = vsel %vm1018_vm4, %v1956_v17, %v1957_v18  ;;  %v2200_v19 = vshrl.u32 %v2062_v2, 16  ;;  %v2203_v27 = vshll.u32 %v2062_v2, 16  ;;  %v2208_v37 = vshrl.u32 %v2063_v21, 16  ;;  %1116 = vst.msk [vmem:[#allocation3] sm:$0xff] %vm1115_vm6, %v1068_v61  ;;  %v2431_v34 = vld [vmem:[#allocation2 + $0x88] sm:$0xf] }
  0xb9   : > { %v1660_v8 = vor.u32 %v1659_v25, %v1656_v24  ;;  %v1668_v16 = vor.u32 %v1667_v31, %v1664_v30  ;;  %2364 = vrot.lane.b32.xlu0 %v2198_v50, %s8839_s24  ;;  %v2211_v35 = vshll.u32 %v2063_v21, 16  ;;  %v2553_v26 = vshrl.u32 %v2430_v32, 16  ;;  %v2799_v52 = vld [vmem:[#allocation2 + $0x80] sm:$0xf0]  ;;  %v2800_v9 = vld [vmem:[#allocation2 + $0x88] sm:$0xf] }
  0xba   : > { %v2202_v42 = vrot.slane %v2200_v19, 4  ;;  %v2205_v43 = vrot.slane %v2203_v27, 5  ;;  %v2210_v44 = vrot.slane %v2208_v37, 4  ;;  %v2556_v45 = vshll.u32 %v2430_v32, 16  ;;  %v9339_v50 = vpop.permute.xlu0 %1983  ;;  %v2976_v10 = vld [vmem:[#allocation2 + $0x80] sm:$0xf0] }
  0xbb   : > { %v1669_v46 = vsel %vm649_vm5, %v1660_v8, %v1668_v16  ;;  %v2213_v47 = vrot.slane %v2211_v35, 5  ;;  %v2555_v49 = vrot.slane %v2553_v26, 3  ;;  %v2561_v51 = vshrl.u32 %v2431_v34, 16  ;;  %v9333_v5 = vpop.permute.xlu1 %2901  ;;  %v9351_v24 = vld [vmem:[#allocation2 + $0x20] sm:$0xf8]  ;;  %v357_v19 = vld [vmem:[%s9037_s16 + $0xb8] sm:$0xff] }
  0xbc   : > { %1820 = vrot.lane.b32.xlu1 %v1669_v46, %s8838_s23  ;;  %v2206_v55 = vor.u32 %v2205_v43, %v2202_v42  ;;  %v2558_v53 = vrot.slane %v2556_v45, 4  ;;  %v2564_v54 = vshll.u32 %v2431_v34, 16  ;;  %v560_v56 = vrot.slane %v9304_v6, 4  ;;  %1486 = vst.msk [vmem:[#allocation3] sm:$0xff] %vm1485_vm7, %v9293_v48 }
  0xbd   : > { %v2214_v61 = vor.u32 %v2213_v47, %v2210_v44  ;;  %v2563_v3 = vrot.slane %v2561_v51, 3  ;;  %v678_v38 = vrot.slane %v676_v58, 3  ;;  %v681_v7 = vrot.slane %v679_v59, 4  ;;  %v2977_v58 = vld [vmem:[#allocation2 + $0x88] sm:$0x1f] }
  0xbe   : > { %v2559_v63 = vor.u32 %v2558_v53, %v2555_v49  ;;  %v2566_v12 = vrot.slane %v2564_v54, 4  ;;  %601 = vst.msk [vmem:[#allocation2 + $0x90] sm:$0xf0] %vm517_vm2, %v560_v56  ;;  %v670_v6 = vrot.slane %v668_v62, 3  ;;  %v673_v13 = vrot.slane %v671_v4, 4  ;;  %v9359_v32 = vpop.permute.xlu0 %2899 }
  0xbf   : > { %602 = vst.msk [vmem:[#allocation2 + $0x98] sm:$0xf] %vm498_vm1, %v560_v56  ;;  %v2215_v36 = vsel %vm1164_vm3, %v2206_v55, %v2214_v61  ;;  %v682_v59 = vor.u32 %v681_v7, %v678_v38  ;;  %v2869_v28 = vrot.slane %v2799_v52, 4  ;;  %v2870_v15 = vrot.slane %v2800_v9, 4  ;;  %v9349_v22 = vpop.permute.xlu1 %1071  ;;  %v970_v62 = vld [vmem:[#allocation2 + $0x80] sm:$0xf0] }
  0xc0   : > { %1997 = vrot.lane.b32.xlu1 %v1958_v33, %s8836_s21  ;;  %v2567_v17 = vor.u32 %v2566_v12, %v2563_v3  ;;  %v674_v18 = vor.u32 %v673_v13, %v670_v6  ;;  %v3099_v2 = vshrl.u32 %v2976_v10, 16  ;;  %v3102_v21 = vshll.u32 %v2976_v10, 16  ;;  %v971_v33 = vld [vmem:[#allocation2 + $0x88] sm:$0xf] }
  0xc1   : > { %v2871_v4 = vsel %vm1018_vm4, %v2869_v28, %v2870_v15  ;;  %v3107_v25 = vshrl.u32 %v2977_v58, 16  ;;  %v3110_v30 = vshll.u32 %v2977_v58, 16  ;;  %v9357_v31 = vrot.slane %v693_v1, 3 }
  0xc2   : > { %v2568_v27 = vsel %vm649_vm5, %v2559_v63, %v2567_v17  ;;  %v683_v37 = vsel %vm649_vm5, %v674_v18, %v682_v59  ;;  %v3101_v34 = vrot.slane %v3099_v2, 4  ;;  %v3104_v8 = vrot.slane %v3102_v21, 5  ;;  %v9373_v55 = vpop.permute.xlu0 %1806  ;;  %v623_v2 = vld [vmem:[#allocation2 + $0x30] sm:$0xf8] }
  0xc3   : > { %2734 = vrot.lane.b32.xlu0 %v2568_v27, %s8840_s25  ;;  %939 = vst.msk [vmem:[#allocation3 + $0x8] sm:$0xff] %vm492_vm0, %v683_v37  ;;  %v3109_v16 = vrot.slane %v3107_v25, 4  ;;  %v3112_v35 = vrot.slane %v3110_v30, 5  ;;  %v696_v26 = vshll.u32 %v9287_v40, 16  ;;  %v685_v1 = vshrl.u32 %v9351_v24, 16  ;;  %v9371_v46 = vpop.permute.xlu1 %1073 }
  0xc4   : > { %2366 = vrot.lane.b32.xlu1 %v2215_v36, %s8839_s24  ;;  %1117 = vst.msk [vmem:[#allocation3 + $0x8] sm:$0xff] %vm1115_vm6, %v1070_v60  ;;  %v3105_v42 = vor.u32 %v3104_v8, %v3101_v34  ;;  %v688_v43 = vshll.u32 %v9351_v24, 16  ;;  %v1043_v44 = vrot.slane %v970_v62, 4  ;;  %v1044_v45 = vrot.slane %v971_v33, 4  ;;  %v624_v34 = vld [vmem:[#allocation2 + $0x38] sm:$0xf] }
  0xc5   : > { %v2432_v47 = vld [vmem:[#allocation2 + $0x90] sm:$0xf8]  ;;  %v3113_v52 = vor.u32 %v3112_v35, %v3109_v16  ;;  %v9377_v40 = vadd.f32 %v9224_v41, %v9315_v57  ;;  %v9380_v53 = vmul.f32 %v9254_v20, %v356_v39  ;;  %v9383_v60 = vmul.f32 %v9254_v20, %v357_v19  ;;  %1855 = vst.msk [vmem:[#allocation3] sm:$0xff] %vm1854_vm8, %v9373_v55 }
  0xc6   : > { %v2433_v49 = vld [vmem:[#allocation2 + $0x98] sm:$0xf]  ;;  %v2801_v51 = vld [vmem:[#allocation2 + $0x90] sm:$0xf0]  ;;  %v2570_v54 = vshrl.u32 %v2432_v47, 16  ;;  %v2573_v56 = vshll.u32 %v2432_v47, 16  ;;  %v1045_v12 = vsel %vm1018_vm4, %v1043_v44, %v1044_v45  ;;  %v9389_v21 = vpop.permute.xlu0 %2352 }
  0xc7   : > { %v2578_v9 = vshrl.u32 %v2433_v49, 16  ;;  %v2581_v61 = vshll.u32 %v2433_v49, 16  ;;  %v2802_v3 = vld [vmem:[#allocation2 + $0x98] sm:$0xf]  ;;  %2911 = vrot.lane.b32.xlu0 %v2871_v4, %s8837_s22  ;;  %v2872_v38 = vrot.slane %v2801_v51, 4  ;;  %v3114_v10 = vsel %vm1164_vm3, %v3105_v42, %v3113_v52  ;;  %v1440_v59 = vpop.permute.xlu1 %1439  ;;  %2032 = vst.msk [vmem:[#allocation3] sm:$0xff] %vm2031_vm9, %v9339_v50 }
  0xc8   : > { %v2873_v7 = vrot.slane %v2802_v3, 4  ;;  %v2978_v63 = vld [vmem:[#allocation2 + $0x90] sm:$0xf0]  ;;  %v2979_v57 = vld [vmem:[#allocation2 + $0x98] sm:$0x1f]  ;;  %v2572_v6 = vrot.slane %v2570_v54, 3 }
  0xc9   : > { %v2575_v13 = vrot.slane %v2573_v56, 4  ;;  %v2580_v58 = vrot.slane %v2578_v9, 3  ;;  %v2583_v36 = vrot.slane %v2581_v61, 4  ;;  %v3116_v15 = vshrl.u32 %v2978_v63, 16  ;;  %v972_v25 = vld [vmem:[#allocation2 + $0x90] sm:$0xf0] }
  0xca   : > { %v2874_v28 = vsel %vm1018_vm4, %v2872_v38, %v2873_v7  ;;  %v3119_v17 = vshll.u32 %v2978_v63, 16  ;;  %v3124_v18 = vshrl.u32 %v2979_v57, 16  ;;  %v3127_v39 = vshll.u32 %v2979_v57, 16  ;;  %v973_v30 = vld [vmem:[#allocation2 + $0x98] sm:$0xf]  ;;  %1487 = vst.msk [vmem:[#allocation3 + $0x8] sm:$0xff] %vm1485_vm7, %v1440_v59 }
  0xcb   : > { %v2576_v24 = vor.u32 %v2575_v13, %v2572_v6  ;;  %v2584_v62 = vor.u32 %v2583_v36, %v2580_v58  ;;  %v698_v4 = vrot.slane %v696_v26, 4  ;;  %3280 = vrot.lane.b32.xlu0 %v3114_v10, %s8841_s26  ;;  %v3118_v33 = vrot.slane %v3116_v15, 4  ;;  %v1809_v44 = vpop.permute.xlu1 %1808  ;;  %v1148_v51 = vld [vmem:[#allocation2 + $0x80] sm:$0xf0]  ;;  %v1149_v61 = vld [vmem:[#allocation2 + $0x88] sm:$0x1f] }
  0xcc   : > { %v3121_v19 = vrot.slane %v3119_v17, 5  ;;  %v3126_v27 = vrot.slane %v3124_v18, 4  ;;  %v687_v37 = vrot.slane %v685_v1, 3  ;;  %v3129_v16 = vrot.slane %v3127_v39, 5  ;;  %v9395_v52 = vpop.permute.xlu0 %2722  ;;  %v1150_v3 = vld [vmem:[#allocation2 + $0x90] sm:$0xf0] }
  0xcd   : > { %v2585_v8 = vsel %vm649_vm5, %v2576_v24, %v2584_v62  ;;  %v699_v35 = vor.u32 %v698_v4, %v9357_v31  ;;  %v690_v42 = vrot.slane %v688_v43, 4  ;;  %v1046_v26 = vrot.slane %v972_v25, 4  ;;  %v1151_v7 = vld [vmem:[#allocation2 + $0x98] sm:$0x1f]  ;;  %v1518_v59 = vld [vmem:[#allocation2 + $0x90] sm:$0xf8] }
  0xce   : > { %2736 = vrot.lane.b32.xlu1 %v2585_v8, %s8840_s25  ;;  %v3122_v45 = vor.u32 %v3121_v19, %v3118_v33  ;;  %v1047_v47 = vrot.slane %v973_v30, 4  ;;  %v702_v49 = vshrl.u32 %v623_v2, 16  ;;  %v3130_v54 = vor.u32 %v3129_v16, %v3126_v27  ;;  %1856 = vst.msk [vmem:[#allocation3 + $0x8] sm:$0xff] %vm1854_vm8, %v1809_v44  ;;  %v1519_v4 = vld [vmem:[#allocation2 + $0x98] sm:$0xf] }
  0xcf   : > { %v691_v56 = vor.u32 %v690_v42, %v687_v37  ;;  %v705_v1 = vshll.u32 %v623_v2, 16  ;;  %v710_v9 = vshrl.u32 %v624_v34, 16  ;;  %1083 = vrot.lane.b32.xlu0 %v1045_v12, %s8834_s19  ;;  %v713_v38 = vshll.u32 %v624_v34, 16  ;;  %v2355_v36 = vpop.permute.xlu1 %2354  ;;  %v1887_v34 = vld [vmem:[#allocation2 + $0x90] sm:$0xf0]  ;;  %2033 = vst.msk [vmem:[#allocation3 + $0x8] sm:$0xff] %vm2031_vm9, %v9319_v23 }
  0xd0   : > { %v9399_v31 = vsel %vm1018_vm4, %v1046_v26, %v1047_v47  ;;  %v704_v43 = vrot.slane %v702_v49, 3  ;;  %v3131_v10 = vsel %vm1164_vm3, %v3122_v45, %v3130_v54  ;;  %v1302_v13 = vshrl.u32 %v1148_v51, 16  ;;  %v2064_v47 = vld [vmem:[#allocation2 + $0x90] sm:$0xf0]  ;;  %2401 = vst.msk [vmem:[#allocation3] sm:$0xff] %vm2400_vm10, %v9389_v21  ;;  %2402 = vst.msk [vmem:[#allocation3 + $0x8] sm:$0xff] %vm2400_vm10, %v2355_v36 }
  0xd1   : > { %v700_v63 = vsel %vm649_vm5, %v691_v56, %v699_v35  ;;  %v707_v57 = vrot.slane %v705_v1, 4  ;;  %v712_v6 = vrot.slane %v710_v9, 3  ;;  %v715_v12 = vrot.slane %v713_v38, 4  ;;  %v1888_v35 = vld [vmem:[#allocation2 + $0x98] sm:$0xf]  ;;  %2771 = vst.msk [vmem:[#allocation3] sm:$0xff] %vm2770_vm11, %v9395_v52 }
  0xd2   : > { %2913 = vrot.lane.b32.xlu1 %v2874_v28, %s8837_s22  ;;  %940 = vst.msk [vmem:[#allocation3 + $0x10] sm:$0xff] %vm492_vm0, %v700_v63  ;;  %v1305_v58 = vshll.u32 %v1148_v51, 16  ;;  %v1310_v17 = vshrl.u32 %v1149_v61, 16  ;;  %v1313_v48 = vshll.u32 %v1149_v61, 16  ;;  %v1319_v18 = vshrl.u32 %v1150_v3, 16  ;;  %v9413_v28 = vpop.permute.xlu0 %3268 }
  0xd3   : > { %1118 = vst.msk [vmem:[#allocation3 + $0x10] sm:$0xff] %vm1115_vm6, %v9349_v22  ;;  %v708_v15 = vor.u32 %v707_v57, %v704_v43  ;;  %v716_v2 = vor.u32 %v715_v12, %v712_v6  ;;  %v1304_v24 = vrot.slane %v1302_v13, 4  ;;  %v1322_v39 = vshll.u32 %v1150_v3, 16  ;;  %v2065_v50 = vld [vmem:[#allocation2 + $0x98] sm:$0x1f] }
  0xd4   : > { %v1307_v62 = vrot.slane %v1305_v58, 5  ;;  %v1312_v25 = vrot.slane %v1310_v17, 4  ;;  %v1315_v30 = vrot.slane %v1313_v48, 5  ;;  %v1321_v22 = vrot.slane %v1319_v18, 4  ;;  %v2725_v49 = vpop.permute.xlu1 %2724  ;;  %v625_v12 = vld [vmem:[#allocation2 + $0x40] sm:$0xf8] }
  0xd5   : > { %v1327_v33 = vshrl.u32 %v1151_v7, 16  ;;  %v717_v55 = vsel %vm649_vm5, %v708_v15, %v716_v2  ;;  %v1324_v27 = vrot.slane %v1322_v39, 5  ;;  %v1330_v37 = vshll.u32 %v1151_v7, 16  ;;  %2772 = vst.msk [vmem:[#allocation3 + $0x8] sm:$0xff] %vm2770_vm11, %v2725_v49 }
  0xd6   : > { %3282 = vrot.lane.b32.xlu1 %v3131_v10, %s8841_s26  ;;  %v1308_v19 = vor.u32 %v1307_v62, %v1304_v24  ;;  %941 = vst.msk [vmem:[#allocation3 + $0x18] sm:$0xff] %vm492_vm0, %v717_v55  ;;  %v1316_v8 = vor.u32 %v1315_v30, %v1312_v25  ;;  %v1671_v45 = vshrl.u32 %v1518_v59, 16  ;;  %v1674_v26 = vshll.u32 %v1518_v59, 16  ;;  %v3271_v51 = vpop.permute.xlu0 %3270  ;;  %v8677_v57 = vld [vmem:[%s11318_s3 + $0x10] ss:$0 sps:$4 sm:$0x33]  }
  0xd7   : > { %v1329_v16 = vrot.slane %v1327_v33, 4  ;;  %1119 = vst.msk [vmem:[#allocation3 + $0x18] sm:$0xff] %vm1115_vm6, %v9371_v46  ;;  %v1325_v42 = vor.u32 %v1324_v27, %v1321_v22  ;;  %v1332_v44 = vrot.slane %v1330_v37, 5  ;;  %v1679_v56 = vshrl.u32 %v1519_v4, 16  ;;  %v9457_v24 = vld [vmem:[#allocation2 + $0x50] sm:$0xf8]  ;;  %8657 = vmatprep.subr.msk.bf16.mxu0 %vm3425_vm15, %v8677_v57 }
  0xd8   : > { %v1317_v54 = vsel %vm1164_vm3, %v1308_v19, %v1316_v8  ;;  %v1682_v46 = vshll.u32 %v1519_v4, 16  ;;  %v462_v1 = vmax.f32 %v9265_v29, 0.0  ;;  %v1673_v9 = vrot.slane %v1671_v45, 3  ;;  %2948 = vst.msk [vmem:[#allocation3] sm:$0xff] %vm2947_vm12, %v9359_v32  ;;  %2949 = vst.msk [vmem:[#allocation3 + $0x8] sm:$0xff] %vm2947_vm12, %v9333_v5  ;;  %v358_v55 = vld [vmem:[%s9037_s16 + $0xc0] sm:$0xff] }
  0xd9   : > { %1453 = vrot.lane.b32.xlu0 %v1317_v54, %s8835_s20  ;;  %v1333_v23 = vor.u32 %v1332_v44, %v1329_v16  ;;  %v1676_v61 = vrot.slane %v1674_v26, 4  ;;  %v463_v3 = vmax.f32 %v9312_v11, 0.0  ;;  %v1681_v43 = vrot.slane %v1679_v56, 3  ;;  %3317 = vst.msk [vmem:[#allocation3] sm:$0xff] %vm3316_vm13, %v9413_v28  ;;  %3318 = vst.msk [vmem:[#allocation3 + $0x8] sm:$0xff] %vm3316_vm13, %v3271_v51 }
  0xda   : > { %1085 = vrot.lane.b32.xlu1 %v9399_v31, %s8834_s19  ;;  %v1684_v38 = vrot.slane %v1682_v46, 4  ;;  %v1959_v21 = vrot.slane %v1887_v34, 4  ;;  %v1960_v63 = vrot.slane %v1888_v35, 4  ;;  %v1442_v31 = vpop.permute.xlu0 %1441  ;;  %v2217_v6 = vshrl.u32 %v2064_v47, 16  ;;  %v626_v32 = vld [vmem:[#allocation2 + $0x48] sm:$0xf] }
  0xdb   : > { %v1334_v7 = vsel %vm1164_vm3, %v1325_v42, %v1333_v23  ;;  %v1677_v29 = vor.u32 %v1676_v61, %v1673_v9  ;;  %v485_v10 = vpack.c.bf16 %v463_v3, %v462_v1  ;;  %1488 = vst.msk [vmem:[#allocation3 + $0x10] sm:$0xff] %vm1485_vm7, %v1442_v31  ;;  %v2220_v58 = vshll.u32 %v2064_v47, 16  ;;  %v9463_v25 = vld [vmem:[#allocation2 + $0x58] sm:$0xf]  ;;  %v360_v42 = vld [vmem:[%s9037_s16 + $0xd0] sm:$0xff] }
  0xdc   : > { %v1685_v11 = vor.u32 %v1684_v38, %v1681_v43  ;;  %v1961_v52 = vsel %vm1018_vm4, %v1959_v21, %v1960_v63  ;;  %v2225_v36 = vshrl.u32 %v2065_v50, 16  ;;  %v1444_v15 = vpop.permute.xlu1 %1443  ;;  %v2219_v48 = vrot.slane %v2217_v6, 4 }
  0xdd   : > { %v561_v13 = vrot.slane %v485_v10, 4  ;;  %v2228_v18 = vshll.u32 %v2065_v50, 16  ;;  %v464_v59 = vmax.f32 %v9323_v14, 0.0  ;;  %1489 = vst.msk [vmem:[#allocation3 + $0x18] sm:$0xff] %vm1485_vm7, %v1444_v15  ;;  %v2222_v5 = vrot.slane %v2220_v58, 5 }
  0xde   : > { %1455 = vrot.lane.b32.xlu1 %v1334_v7, %s8835_s20  ;;  %v1686_v17 = vsel %vm649_vm5, %v1677_v29, %v1685_v11  ;;  %v2227_v2 = vrot.slane %v2225_v36, 4  ;;  %v465_v28 = vmax.f32 %v9377_v40, 0.0  ;;  %v434_v39 = vadd.f32 %v9224_v41, %v9380_v53 }
  0xdf   : > { %1822 = vrot.lane.b32.xlu0 %v1686_v17, %s8838_s23  ;;  %603 = vst.msk [vmem:[#allocation2 + $0xa0] sm:$0xf0] %vm517_vm2, %v561_v13  ;;  %v2230_v62 = vrot.slane %v2228_v18, 5  ;;  %v1811_v14 = vpop.permute.xlu0 %1810  ;;  %v435_v4 = vadd.f32 %v9224_v41, %v9383_v60  ;;  %v2223_v30 = vor.u32 %v2222_v5, %v2219_v48  ;;  %v3427_v40 = vsel %vm3425_vm15, %v8677_v57, 0  ;;  %v359_v41 = vld [vmem:[%s9037_s16 + $0xc8] sm:$0xff] }
  0xe0   : > { %604 = vst.msk [vmem:[#allocation2 + $0xa8] sm:$0xf] %vm498_vm1, %v561_v13  ;;  %v486_v22 = vpack.c.bf16 %v465_v28, %v464_v59  ;;  %v719_v33 = vshrl.u32 %v625_v12, 16  ;;  %8608 = vmatpush3.bf16.msra.mxu0 %v3427_v40  ;;  %v466_v27 = vmax.f32 %v434_v39, 0.0  ;;  %v722_v34 = vshll.u32 %v625_v12, 16  ;;  %v3333_v49 = vld [vmem:[#allocation3] sm:$0xff] }
  0xe1   : > { %1857 = vst.msk [vmem:[#allocation3 + $0x10] sm:$0xff] %vm1854_vm8, %v1811_v14  ;;  %v2231_v19 = vor.u32 %v2230_v62, %v2227_v2  ;;  %v1813_v53 = vpop.permute.xlu1 %1812  ;;  %v467_v37 = vmax.f32 %v435_v4, 0.0  ;;  %v727_v16 = vshrl.u32 %v626_v32, 16  ;;  %v730_v35 = vshll.u32 %v626_v32, 16  ;;  %v3334_v51 = vld [vmem:[#allocation3 + $0x8] sm:$0xff]  ;;  %8609 = vmatprep.mubr.msk.bf16.mxu0 %vm3376_vm14, %v3333_v49 }
  0xe2   : > { %v562_v60 = vrot.slane %v486_v22, 4  ;;  %1858 = vst.msk [vmem:[#allocation3 + $0x18] sm:$0xff] %vm1854_vm8, %v1813_v53  ;;  %v9472_v8 = vrot.slane %v719_v33, 3  ;;  %v9476_v26 = vrot.slane %v722_v34, 4  ;;  %v736_v47 = vshrl.u32 %v9457_v24, 16 }
  0xe3   : > { %1999 = vrot.lane.b32.xlu0 %v1961_v52, %s8836_s21  ;;  %v2232_v44 = vsel %vm1164_vm3, %v2223_v30, %v2231_v19  ;;  %v1988_v45 = vpop.permute.xlu0 %1987  ;;  %v9482_v54 = vrot.slane %v727_v16, 3  ;;  %v9484_v56 = vrot.slane %v730_v35, 4  ;;  %v739_v46 = vshll.u32 %v9457_v24, 16  ;;  %8610 = vmatmul.mubr.msk.bf16.vlgmr.msra.gmra.mrb[0].mxu0 %vm3376_vm14, %v3334_v51 }
  0xe4   : > { %605 = vst.msk [vmem:[#allocation2 + $0xb0] sm:$0xf0] %vm517_vm2, %v562_v60  ;;  %v744_v1 = vshrl.u32 %v9463_v25, 16  ;;  %v9489_v3 = vpack.c.bf16 %v467_v37, %v466_v27  ;;  %v725_v43 = vor.u32 %v9476_v26, %v9472_v8  ;;  %v9494_v38 = vmul.f32 %v9254_v20, %v358_v55 }
  0xe5   : > { %606 = vst.msk [vmem:[#allocation2 + $0xb8] sm:$0xf] %vm498_vm1, %v562_v60  ;;  %v1990_v61 = vpop.permute.xlu1 %1989  ;;  %v9497_v21 = vmul.f32 %v9254_v20, %v359_v41  ;;  %v733_v52 = vor.u32 %v9484_v56, %v9482_v54  ;;  %v9505_v58 = vmul.f32 %v9254_v20, %v360_v42 }
  0xe6   : > { %2034 = vst.msk [vmem:[#allocation3 + $0x10] sm:$0xff] %vm2031_vm9, %v1988_v45  ;;  %v1520_v50 = vld [vmem:[#allocation2 + $0xa0] sm:$0xf8]  ;;  %2035 = vst.msk [vmem:[#allocation3 + $0x18] sm:$0xff] %vm2031_vm9, %v1990_v61  ;;  %v746_v24 = vrot.slane %v744_v1, 3 }
  0xe7   : > { %v1521_v23 = vld [vmem:[#allocation2 + $0xa8] sm:$0xf]  ;;  %v1889_v9 = vld [vmem:[#allocation2 + $0xa0] sm:$0xf0]  ;;  %v1688_v7 = vshrl.u32 %v1520_v50, 16  ;;  %v1691_v29 = vshll.u32 %v1520_v50, 16  ;;  %2368 = vrot.lane.b32.xlu0 %v2232_v44, %s8839_s24  ;;  %v2357_v13 = vpop.permute.xlu0 %2356 }
  0xe8   : > { %v1696_v10 = vshrl.u32 %v1521_v23, 16  ;;  %v1699_v63 = vshll.u32 %v1521_v23, 16  ;;  %v1890_v31 = vld [vmem:[#allocation2 + $0xa8] sm:$0xf]  ;;  %v1962_v57 = vrot.slane %v1889_v9, 4  ;;  %2403 = vst.msk [vmem:[#allocation3 + $0x10] sm:$0xff] %vm2400_vm10, %v2357_v13 }
  0xe9   : > { %v1963_v11 = vrot.slane %v1890_v31, 4  ;;  %v2066_v6 = vld [vmem:[#allocation2 + $0xa0] sm:$0xf0]  ;;  %v2067_v12 = vld [vmem:[#allocation2 + $0xa8] sm:$0x1f]  ;;  %v1690_v36 = vrot.slane %v1688_v7, 3  ;;  %v2359_v62 = vpop.permute.xlu1 %2358 }
  0xea   : > { %v1693_v15 = vrot.slane %v1691_v29, 4  ;;  %v1698_v17 = vrot.slane %v1696_v10, 3  ;;  %v1701_v48 = vrot.slane %v1699_v63, 4  ;;  %v2434_v18 = vld [vmem:[#allocation2 + $0xa0] sm:$0xf8]  ;;  %v2234_v32 = vshrl.u32 %v2066_v6, 16 }
  0xeb   : > { %v1964_v59 = vsel %vm1018_vm4, %v1962_v57, %v1963_v11  ;;  %v2237_v5 = vshll.u32 %v2066_v6, 16  ;;  %v2242_v2 = vshrl.u32 %v2067_v12, 16  ;;  %v2435_v28 = vld [vmem:[#allocation2 + $0xa8] sm:$0xf]  ;;  %v2245_v4 = vshll.u32 %v2067_v12, 16  ;;  %2404 = vst.msk [vmem:[#allocation3 + $0x18] sm:$0xff] %vm2400_vm10, %v2359_v62  ;;  %v2727_v53 = vpop.permute.xlu0 %2726 }
  0xec   : > { %v1694_v14 = vor.u32 %v1693_v15, %v1690_v36  ;;  %v1702_v39 = vor.u32 %v1701_v48, %v1698_v17  ;;  %v2587_v30 = vshrl.u32 %v2434_v18, 16  ;;  %v2236_v20 = vrot.slane %v2234_v32, 4  ;;  %v2436_v55 = vld [vmem:[#allocation2 + $0xb0] sm:$0xf8]  ;;  %v2803_v19 = vld [vmem:[#allocation2 + $0xa0] sm:$0xf0] }
  0xed   : > { %v2239_v22 = vrot.slane %v2237_v5, 5  ;;  %v2244_v40 = vrot.slane %v2242_v2, 4  ;;  %v2590_v33 = vshll.u32 %v2434_v18, 16  ;;  %v2247_v37 = vrot.slane %v2245_v4, 5  ;;  %v2437_v60 = vld [vmem:[#allocation2 + $0xb8] sm:$0xf] }
  0xee   : > { %v1703_v27 = vsel %vm649_vm5, %v1694_v14, %v1702_v39  ;;  %v2589_v34 = vrot.slane %v2587_v30, 3  ;;  %v2595_v41 = vshrl.u32 %v2435_v28, 16  ;;  %v2804_v16 = vld [vmem:[#allocation2 + $0xa8] sm:$0xf]  ;;  %2773 = vst.msk [vmem:[#allocation3 + $0x10] sm:$0xff] %vm2770_vm11, %v2727_v53  ;;  %v2598_v44 = vshll.u32 %v2435_v28, 16 }
  0xef   : > { %1824 = vrot.lane.b32.xlu1 %v1703_v27, %s8838_s23  ;;  %v2240_v35 = vor.u32 %v2239_v22, %v2236_v20  ;;  %v2592_v42 = vrot.slane %v2590_v33, 4  ;;  %v2604_v45 = vshrl.u32 %v2436_v55, 16  ;;  %v2805_v49 = vld [vmem:[#allocation2 + $0xb0] sm:$0xf0]  ;;  %v2248_v51 = vor.u32 %v2247_v37, %v2244_v40  ;;  %v2806_v61 = vld [vmem:[#allocation2 + $0xb8] sm:$0xf]  ;;  %v2729_v57 = vpop.permute.xlu1 %2728  ;;  %v2904_v11 = vpop.permute.xlu0 %2903 }
  0xf0   : > { %v2597_v50 = vrot.slane %v2595_v41, 3  ;;  %v2607_v23 = vshll.u32 %v2436_v55, 16  ;;  %v2612_v9 = vshrl.u32 %v2437_v60, 16  ;;  %v2600_v29 = vrot.slane %v2598_v44, 4  ;;  %v2980_v31 = vld [vmem:[#allocation2 + $0xa0] sm:$0xf0] }
  0xf1   : > { %v2593_v7 = vor.u32 %v2592_v42, %v2589_v34  ;;  %v2606_v10 = vrot.slane %v2604_v45, 3  ;;  %v2615_v63 = vshll.u32 %v2437_v60, 16  ;;  %v2249_v6 = vsel %vm1164_vm3, %v2240_v35, %v2248_v51  ;;  %v2981_v15 = vld [vmem:[#allocation2 + $0xa8] sm:$0x1f]  ;;  %2774 = vst.msk [vmem:[#allocation3 + $0x18] sm:$0xff] %vm2770_vm11, %v2729_v57 }
  0xf2   : > { %v2609_v12 = vrot.slane %v2607_v23, 4  ;;  %v2614_v13 = vrot.slane %v2612_v9, 3  ;;  %v2875_v36 = vrot.slane %v2803_v19, 4  ;;  %2950 = vst.msk [vmem:[#allocation3 + $0x10] sm:$0xff] %vm2947_vm12, %v2904_v11  ;;  %v2601_v17 = vor.u32 %v2600_v29, %v2597_v50  ;;  %v2982_v5 = vld [vmem:[#allocation2 + $0xb0] sm:$0xf0] }
  0xf3   : > { %2001 = vrot.lane.b32.xlu1 %v1964_v59, %s8836_s21  ;;  %v2617_v48 = vrot.slane %v2615_v63, 4  ;;  %v2876_v18 = vrot.slane %v2804_v16, 4  ;;  %v2878_v32 = vrot.slane %v2805_v49, 4  ;;  %v2879_v28 = vrot.slane %v2806_v61, 4  ;;  %v2983_v39 = vld [vmem:[#allocation2 + $0xb8] sm:$0x1f]  ;;  %v2906_v55 = vpop.permute.xlu1 %2905  ;;  %v3273_v59 = vpop.permute.xlu0 %3272 }
  0xf4   : > { %v2610_v2 = vor.u32 %v2609_v12, %v2606_v10  ;;  %v3133_v62 = vshrl.u32 %v2980_v31, 16  ;;  %v3136_v14 = vshll.u32 %v2980_v31, 16  ;;  %v2602_v4 = vsel %vm649_vm5, %v2593_v7, %v2601_v17  ;;  %v974_v40 = vld [vmem:[#allocation2 + $0xa0] sm:$0xf0]  ;;  %v975_v33 = vld [vmem:[#allocation2 + $0xa8] sm:$0xf] }
  0xf5   : > { %v2618_v30 = vor.u32 %v2617_v48, %v2614_v13  ;;  %v2877_v20 = vsel %vm1018_vm4, %v2875_v36, %v2876_v18  ;;  %v3141_v22 = vshrl.u32 %v2981_v15, 16  ;;  %2738 = vrot.lane.b32.xlu0 %v2602_v4, %s8840_s25  ;;  %v2880_v19 = vsel %vm1018_vm4, %v2878_v32, %v2879_v28  ;;  %v976_v34 = vld [vmem:[#allocation2 + $0xb0] sm:$0xf0]  ;;  %2951 = vst.msk [vmem:[#allocation3 + $0x18] sm:$0xff] %vm2947_vm12, %v2906_v55  ;;  %v977_v42 = vld [vmem:[#allocation2 + $0xb8] sm:$0xf] }
  0xf6   : > { %v3135_v53 = vrot.slane %v3133_v62, 4  ;;  %v3138_v27 = vrot.slane %v3136_v14, 5  ;;  %v3144_v37 = vshll.u32 %v2981_v15, 16  ;;  %3319 = vst.msk [vmem:[#allocation3 + $0x10] sm:$0xff] %vm3316_vm13, %v3273_v59  ;;  %v3150_v16 = vshrl.u32 %v2982_v5, 16 }
  0xf7   : > { %2370 = vrot.lane.b32.xlu1 %v2249_v6, %s8839_s24  ;;  %v2619_v41 = vsel %vm649_vm5, %v2610_v2, %v2618_v30  ;;  %v3143_v60 = vrot.slane %v3141_v22, 4  ;;  %v3153_v35 = vshll.u32 %v2982_v5, 16  ;;  %v3158_v49 = vshrl.u32 %v2983_v39, 16  ;;  %v1152_v50 = vld [vmem:[#allocation2 + $0xa0] sm:$0xf0]  ;;  %v9525_v10 = vpop.permute.xlu1 %1075  ;;  %v3275_v63 = vpop.permute.xlu0 %3274 }
  0xf8   : > { %v3139_v44 = vor.u32 %v3138_v27, %v3135_v53  ;;  %v3146_v45 = vrot.slane %v3144_v37, 5  ;;  %v3161_v51 = vshll.u32 %v2983_v39, 16  ;;  %v3152_v23 = vrot.slane %v3150_v16, 4  ;;  %v1153_v29 = vld [vmem:[#allocation2 + $0xa8] sm:$0x1f]  ;;  %3320 = vst.msk [vmem:[#allocation3 + $0x18] sm:$0xff] %vm3316_vm13, %v3275_v63 }
  0xf9   : > { %v3155_v9 = vrot.slane %v3153_v35, 5  ;;  %v1049_v61 = vrot.slane %v974_v40, 4  ;;  %v1050_v7 = vrot.slane %v975_v33, 4  ;;  %2915 = vrot.lane.b32.xlu0 %v2877_v20, %s8837_s22  ;;  %v3160_v57 = vrot.slane %v3158_v49, 4  ;;  %v1154_v12 = vld [vmem:[#allocation2 + $0xb0] sm:$0xf0] }
  0xfa   : > { %v3147_v31 = vor.u32 %v3146_v45, %v3143_v60  ;;  %v3163_v11 = vrot.slane %v3161_v51, 5  ;;  %v1052_v6 = vrot.slane %v976_v34, 4  ;;  %v1053_v15 = vrot.slane %v977_v42, 4  ;;  %v1155_v2 = vld [vmem:[#allocation2 + $0xb8] sm:$0x1f] }
  0xfb   : > { %2740 = vrot.lane.b32.xlu1 %v2619_v41, %s8840_s25  ;;  %v3156_v13 = vor.u32 %v3155_v9, %v3152_v23  ;;  %v1051_v36 = vsel %vm1018_vm4, %v1049_v61, %v1050_v7  ;;  %v1336_v17 = vshrl.u32 %v1152_v50, 16  ;;  %v1339_v32 = vshll.u32 %v1152_v50, 16  ;;  %v1522_v4 = vld [vmem:[#allocation2 + $0xb0] sm:$0xf8]  ;;  %v9535_v30 = vpop.permute.xlu1 %1077  ;;  %v9537_v20 = vpop.permute.xlu0 %1445  ;;  %v1523_v53 = vld [vmem:[#allocation2 + $0xb8] sm:$0xf] }
  0xfc   : > { %v3148_v48 = vsel %vm1164_vm3, %v3139_v44, %v3147_v31  ;;  %v3164_v18 = vor.u32 %v3163_v11, %v3160_v57  ;;  %v1344_v5 = vshrl.u32 %v1153_v29, 16  ;;  %v9533_v28 = vsel %vm1018_vm4, %v1052_v6, %v1053_v15  ;;  %v1891_v44 = vld [vmem:[#allocation2 + $0xb0] sm:$0xf0]  ;;  %v1892_v23 = vld [vmem:[#allocation2 + $0xb8] sm:$0xf] }
  0xfd   : > { %v1338_v62 = vrot.slane %v1336_v17, 4  ;;  %v1347_v14 = vshll.u32 %v1153_v29, 16  ;;  %v1353_v39 = vshrl.u32 %v1154_v12, 16  ;;  %v3335_v22 = vld [vmem:[#allocation3 + $0x10] sm:$0xff]  ;;  %3284 = vrot.lane.b32.xlu0 %v3148_v48, %s8841_s26  ;;  %v1341_v33 = vrot.slane %v1339_v32, 5 }
  0xfe   : > { %v3165_v40 = vsel %vm1164_vm3, %v3156_v13, %v3164_v18  ;;  %v1346_v55 = vrot.slane %v1344_v5, 4  ;;  %v1356_v59 = vshll.u32 %v1154_v12, 16  ;;  %8613 = vmatprep.mubr.msk.bf16.mxu0 %vm3376_vm14, %v3335_v22  ;;  %v1361_v34 = vshrl.u32 %v1155_v2, 16  ;;  %v2068_v31 = vld [vmem:[#allocation2 + $0xb0] sm:$0xf0] }
  0xff   : > { %2917 = vrot.lane.b32.xlu1 %v2880_v19, %s8837_s22  ;;  %v1349_v27 = vrot.slane %v1347_v14, 5  ;;  %v1355_v37 = vrot.slane %v1353_v39, 4  ;;  %v1364_v41 = vshll.u32 %v1155_v2, 16  ;;  %v1342_v60 = vor.u32 %v1341_v33, %v1338_v62  ;;  %v1815_v9 = vpop.permute.xlu0 %1814  ;;  %v3336_v61 = vld [vmem:[#allocation3 + $0x18] sm:$0xff]  ;;  %v9544_v57 = vpop.permute.xlu1 %1447 }
 0x100   : > { %v1358_v16 = vrot.slane %v1356_v59, 5  ;;  %v1705_v35 = vshrl.u32 %v1522_v4, 16  ;;  %v1708_v42 = vshll.u32 %v1522_v4, 16  ;;  %v1363_v49 = vrot.slane %v1361_v34, 4  ;;  %8614 = vmatmul.mubr.msk.bf16.gmra.mrb[4].mxu0 %vm3376_vm14, %v3336_v61  ;;  %v2069_v15 = vld [vmem:[#allocation2 + $0xb8] sm:$0x1f] }
 0x101   : > { %v1350_v45 = vor.u32 %v1349_v27, %v1346_v55  ;;  %v1366_v51 = vrot.slane %v1364_v41, 5  ;;  %v1713_v50 = vshrl.u32 %v1523_v53, 16  ;;  %1087 = vrot.lane.b32.xlu0 %v1051_v36, %s8834_s19  ;;  %v1716_v63 = vshll.u32 %v1523_v53, 16  ;;  %v361_v4 = vld [vmem:[%s9037_s16 + $0xd8] sm:$0xff]  ;;  %v9588_v55 = vld [vmem:[#allocation2 + $0x60] sm:$0xf8] }
 0x102   : > { %v1359_v7 = vor.u32 %v1358_v16, %v1355_v37  ;;  %v1707_v19 = vrot.slane %v1705_v35, 3  ;;  %v1710_v29 = vrot.slane %v1708_v42, 4  ;;  %v563_v13 = vrot.slane %v9489_v3, 4  ;;  %v9562_v3 = vld [vmem:[%s11317_s2] ss:$0 sm:$0xff] }
 0x103   : > { %3286 = vrot.lane.b32.xlu1 %v3165_v40, %s8841_s26  ;;  %v1351_v11 = vsel %vm1164_vm3, %v1342_v60, %v1350_v45  ;;  %v1367_v6 = vor.u32 %v1366_v51, %v1363_v49  ;;  %v1715_v12 = vrot.slane %v1713_v50, 3  ;;  %v1718_v36 = vrot.slane %v1716_v63, 4  ;;  %v1992_v14 = vpop.permute.xlu0 %1991  ;;  %v362_v27 = vld [vmem:[%s9037_s16 + $0xe0] sm:$0xff] }
 0x104   : > { %v1711_v17 = vor.u32 %v1710_v29, %v1707_v19  ;;  %v1965_v48 = vrot.slane %v1891_v44, 4  ;;  %v1966_v18 = vrot.slane %v1892_v23, 4  ;;  %607 = vst.msk [vmem:[#allocation2 + $0xc0] sm:$0xf0] %vm517_vm2, %v563_v13  ;;  %v734_v32 = vsel %vm649_vm5, %v725_v43, %v733_v52 }
 0x105   : > { %608 = vst.msk [vmem:[#allocation2 + $0xc8] sm:$0xf] %vm498_vm1, %v563_v13  ;;  %v2251_v5 = vshrl.u32 %v2068_v31, 16  ;;  %v2254_v2 = vshll.u32 %v2068_v31, 16  ;;  %v436_v62 = vadd.f32 %v9562_v3, %v9494_v38  ;;  %1457 = vrot.lane.b32.xlu0 %v1351_v11, %s8835_s20  ;;  %v1368_v54 = vsel %vm1164_vm3, %v1359_v7, %v1367_v6 }
 0x106   : > { %v1719_v56 = vor.u32 %v1718_v36, %v1715_v12  ;;  %942 = vst.msk [vmem:[#allocation3 + $0x20] sm:$0xff] %vm492_vm0, %v734_v32  ;;  %v2259_v8 = vshrl.u32 %v2069_v15, 16  ;;  %v2262_v26 = vshll.u32 %v2069_v15, 16  ;;  %v9575_v38 = vrot.slane %v736_v47, 3 }
 0x107   : > { %1089 = vrot.lane.b32.xlu1 %v9533_v28, %s8834_s19  ;;  %1120 = vst.msk [vmem:[#allocation3 + $0x20] sm:$0xff] %vm1115_vm6, %v9525_v10  ;;  %v2253_v43 = vrot.slane %v2251_v5, 4  ;;  %v2256_v52 = vrot.slane %v2254_v2, 5  ;;  %v9579_v39 = vrot.slane %v739_v46, 4  ;;  %v1967_v40 = vsel %vm1018_vm4, %v1965_v48, %v1966_v18  ;;  %v9586_v10 = vpop.permute.xlu1 %1816  ;;  %v2361_v53 = vpop.permute.xlu0 %2360 }
 0x108   : > { %v1720_v22 = vsel %vm649_vm5, %v1711_v17, %v1719_v56  ;;  %v2261_v28 = vrot.slane %v2259_v8, 4  ;;  %v2264_v33 = vrot.slane %v2262_v26, 5  ;;  %1490 = vst.msk [vmem:[#allocation3 + $0x20] sm:$0xff] %vm1485_vm7, %v9537_v20  ;;  %v747_v46 = vshll.u32 %v9463_v25, 16  ;;  %v9604_v25 = vld [vmem:[%s11316_s1] ss:$0 sm:$0xff] }
 0x109   : > { %v2257_v47 = vor.u32 %v2256_v52, %v2253_v43  ;;  %v437_v59 = vadd.f32 %v9562_v3, %v9497_v21  ;;  %1859 = vst.msk [vmem:[#allocation3 + $0x20] sm:$0xff] %vm1854_vm8, %v1815_v9  ;;  %1826 = vrot.lane.b32.xlu0 %v1720_v22, %s8838_s23  ;;  %v742_v37 = vor.u32 %v9579_v39, %v9575_v38  ;;  %v468_v34 = vmax.f32 %v436_v62, 0.0 }
 0x10a   : > { %v2265_v20 = vor.u32 %v2264_v33, %v2261_v28  ;;  %2036 = vst.msk [vmem:[#allocation3 + $0x20] sm:$0xff] %vm2031_vm9, %v1992_v14  ;;  %v400_v1 = vmul.f32 %v9604_v25, %v361_v4  ;;  %v749_v21 = vrot.slane %v747_v46, 4  ;;  %v753_v60 = vshrl.u32 %v9588_v55, 16 }
 0x10b   : > { %1459 = vrot.lane.b32.xlu1 %v1368_v54, %s8835_s20  ;;  %v469_v41 = vmax.f32 %v437_v59, 0.0  ;;  %2405 = vst.msk [vmem:[#allocation3 + $0x20] sm:$0xff] %vm2400_vm10, %v2361_v53  ;;  %v756_v16 = vshll.u32 %v9588_v55, 16  ;;  %v1524_v35 = vld [vmem:[#allocation2 + $0xc0] sm:$0xf8]  ;;  %v9614_v49 = vadd.f32 %v9562_v3, %v9505_v58  ;;  %v9620_v50 = vmul.f32 %v9604_v25, %v362_v27  ;;  %v2731_v29 = vpop.permute.xlu0 %2730  ;;  %v1994_v13 = vpop.permute.xlu1 %1993 }
 0x10c   : > { %v1525_v42 = vld [vmem:[#allocation2 + $0xc8] sm:$0xf]  ;;  %v1893_v44 = vld [vmem:[#allocation2 + $0xc0] sm:$0xf0]  ;;  %v2266_v45 = vsel %vm1164_vm3, %v2257_v47, %v2265_v20  ;;  %v9617_v51 = vadd.f32 %v9562_v3, %v400_v1  ;;  %v1722_v23 = vshrl.u32 %v1524_v35, 16  ;;  %v1725_v9 = vshll.u32 %v1524_v35, 16 }
 0x10d   : > { %v1730_v61 = vshrl.u32 %v1525_v42, 16  ;;  %v1733_v7 = vshll.u32 %v1525_v42, 16  ;;  %v1894_v19 = vld [vmem:[#allocation2 + $0xc8] sm:$0xf]  ;;  %2003 = vrot.lane.b32.xlu0 %v1967_v40, %s8836_s21  ;;  %v1968_v63 = vrot.slane %v1893_v44, 4  ;;  %v750_v58 = vor.u32 %v749_v21, %v746_v24  ;;  %2775 = vst.msk [vmem:[#allocation3 + $0x20] sm:$0xff] %vm2770_vm11, %v2731_v29 }
 0x10e   : > { %v1969_v31 = vrot.slane %v1894_v19, 4  ;;  %v2070_v11 = vld [vmem:[#allocation2 + $0xc0] sm:$0xf0]  ;;  %v2071_v6 = vld [vmem:[#allocation2 + $0xc8] sm:$0x1f]  ;;  %v488_v12 = vpack.c.bf16 %v469_v41, %v468_v34  ;;  %v1724_v15 = vrot.slane %v1722_v23, 3 }
 0x10f   : > { %v1727_v17 = vrot.slane %v1725_v9, 4  ;;  %v1732_v36 = vrot.slane %v1730_v61, 3  ;;  %v1735_v48 = vrot.slane %v1733_v7, 4  ;;  %v2438_v18 = vld [vmem:[#allocation2 + $0xc0] sm:$0xf8]  ;;  %v2268_v5 = vshrl.u32 %v2070_v11, 16  ;;  %v2908_v38 = vpop.permute.xlu0 %2907  ;;  %v2363_v1 = vpop.permute.xlu1 %2362 }
 0x110   : > { %v1970_v32 = vsel %vm1018_vm4, %v1968_v63, %v1969_v31  ;;  %v2271_v2 = vshll.u32 %v2070_v11, 16  ;;  %v2276_v62 = vshrl.u32 %v2071_v6, 16  ;;  %v2439_v14 = vld [vmem:[#allocation2 + $0xc8] sm:$0xf]  ;;  %v2279_v8 = vshll.u32 %v2071_v6, 16  ;;  %2952 = vst.msk [vmem:[#allocation3 + $0x20] sm:$0xff] %vm2947_vm12, %v2908_v38 }
 0x111   : > { %v1728_v54 = vor.u32 %v1727_v17, %v1724_v15  ;;  %v1736_v56 = vor.u32 %v1735_v48, %v1732_v36  ;;  %v751_v26 = vsel %vm649_vm5, %v742_v37, %v750_v58  ;;  %v9626_v43 = vld [vmem:[#allocation2 + $0xc0] sm:$0xf0]  ;;  %v9628_v52 = vld [vmem:[#allocation2 + $0xc8] sm:$0xf]  ;;  %2372 = vrot.lane.b32.xlu0 %v2266_v45, %s8839_s24  ;;  %v2270_v39 = vrot.slane %v2268_v5, 4 }
 0x112   : > { %v2273_v4 = vrot.slane %v2271_v2, 5  ;;  %v2278_v22 = vrot.slane %v2276_v62, 4  ;;  %943 = vst.msk [vmem:[#allocation3 + $0x28] sm:$0xff] %vm492_vm0, %v751_v26  ;;  %v2621_v40 = vshrl.u32 %v2438_v18, 16  ;;  %v2984_v28 = vld [vmem:[#allocation2 + $0xc0] sm:$0xf0] }
 0x113   : > { %v1737_v33 = vsel %vm649_vm5, %v1728_v54, %v1736_v56  ;;  %v2281_v47 = vrot.slane %v2279_v8, 5  ;;  %1121 = vst.msk [vmem:[#allocation3 + $0x28] sm:$0xff] %vm1115_vm6, %v9535_v30  ;;  %v2624_v24 = vshll.u32 %v2438_v18, 16  ;;  %v2629_v46 = vshrl.u32 %v2439_v14, 16  ;;  %v2985_v59 = vld [vmem:[#allocation2 + $0xc8] sm:$0x1f]  ;;  %v3277_v45 = vpop.permute.xlu0 %3276 }
 0x114   : > { %1828 = vrot.lane.b32.xlu1 %v1737_v33, %s8838_s23  ;;  %v2274_v53 = vor.u32 %v2273_v4, %v2270_v39  ;;  %v2623_v27 = vrot.slane %v2621_v40, 3  ;;  %v2632_v20 = vshll.u32 %v2439_v14, 16  ;;  %v564_v37 = vrot.slane %v488_v12, 4  ;;  %1491 = vst.msk [vmem:[#allocation3 + $0x28] sm:$0xff] %vm1485_vm7, %v9544_v57  ;;  %v978_v34 = vld [vmem:[#allocation2 + $0xc0] sm:$0xf0] }
 0x115   : > { %v363_v21 = vld [vmem:[%s9037_s16 + $0xe8] sm:$0xff]  ;;  %v2282_v41 = vor.u32 %v2281_v47, %v2278_v22  ;;  %v2626_v35 = vrot.slane %v2624_v24, 4  ;;  %v2631_v42 = vrot.slane %v2629_v46, 3  ;;  %v2881_v30 = vrot.slane %v9626_v43, 4  ;;  %1860 = vst.msk [vmem:[#allocation3 + $0x28] sm:$0xff] %vm1854_vm8, %v9586_v10 }
 0x116   : > { %v979_v44 = vld [vmem:[#allocation2 + $0xc8] sm:$0xf]  ;;  %v2634_v23 = vrot.slane %v2632_v20, 4  ;;  %609 = vst.msk [vmem:[#allocation2 + $0xd0] sm:$0xf0] %vm517_vm2, %v564_v37  ;;  %v2882_v57 = vrot.slane %v9628_v52, 4  ;;  %v402_v31 = vmul.f32 %v9604_v25, %v363_v21  ;;  %v9673_v33 = vadd.f32 %v9562_v3, %v9620_v50 }
 0x117   : > { %610 = vst.msk [vmem:[#allocation2 + $0xd8] sm:$0xf] %vm498_vm1, %v564_v37  ;;  %v3167_v9 = vshrl.u32 %v2984_v28, 16  ;;  %v3170_v61 = vshll.u32 %v2984_v28, 16  ;;  %v1156_v7 = vld [vmem:[#allocation2 + $0xc0] sm:$0xf0]  ;;  %v2627_v19 = vor.u32 %v2626_v35, %v2623_v27  ;;  %v2283_v11 = vsel %vm1164_vm3, %v2274_v53, %v2282_v41  ;;  %v9654_v48 = vpop.permute.xlu0 %1079 }
 0x118   : > { %2037 = vst.msk [vmem:[#allocation3 + $0x28] sm:$0xff] %vm2031_vm9, %v1994_v13  ;;  %v3175_v29 = vshrl.u32 %v2985_v59, 16  ;;  %v3178_v63 = vshll.u32 %v2985_v59, 16  ;;  %v9649_v10 = vld [vmem:[#allocation2 + $0xc8] sm:$0x1f]  ;;  %2005 = vrot.lane.b32.xlu1 %v1970_v32, %s8836_s21  ;;  %v2635_v6 = vor.u32 %v2634_v23, %v2631_v42  ;;  %v1055_v17 = vrot.slane %v978_v34, 4 }
 0x119   : > { %3321 = vst.msk [vmem:[#allocation3 + $0x20] sm:$0xff] %vm3316_vm13, %v3277_v45  ;;  %v3169_v58 = vrot.slane %v3167_v9, 4  ;;  %v3172_v12 = vrot.slane %v3170_v61, 5  ;;  %v1056_v36 = vrot.slane %v979_v44, 4  ;;  %v1370_v2 = vshrl.u32 %v1156_v7, 16  ;;  %v2733_v14 = vpop.permute.xlu1 %2732 }
 0x11a   : > { %2406 = vst.msk [vmem:[#allocation3 + $0x28] sm:$0xff] %vm2400_vm10, %v2363_v1  ;;  %v3177_v13 = vrot.slane %v3175_v29, 4  ;;  %v3180_v15 = vrot.slane %v3178_v63, 5  ;;  %v2636_v18 = vsel %vm649_vm5, %v2627_v19, %v2635_v6  ;;  %v1373_v62 = vshll.u32 %v1156_v7, 16 }
 0x11b   : > { %v3173_v5 = vor.u32 %v3172_v12, %v3169_v58  ;;  %2742 = vrot.lane.b32.xlu0 %v2636_v18, %s8840_s25  ;;  %v2883_v32 = vsel %vm1018_vm4, %v2881_v30, %v2882_v57  ;;  %v1378_v56 = vshrl.u32 %v9649_v10, 16  ;;  %v1381_v8 = vshll.u32 %v9649_v10, 16  ;;  %2776 = vst.msk [vmem:[#allocation3 + $0x28] sm:$0xff] %vm2770_vm11, %v2733_v14  ;;  %v9678_v27 = vpop.permute.xlu0 %1449 }
 0x11c   : > { %v3181_v54 = vor.u32 %v3180_v15, %v3177_v13  ;;  %2374 = vrot.lane.b32.xlu1 %v2283_v11, %s8839_s24  ;;  %v9663_v26 = vrot.slane %v1370_v2, 4  ;;  %v9665_v43 = vrot.slane %v1373_v62, 5  ;;  %v470_v52 = vmax.f32 %v9614_v49, 0.0 }
 0x11d   : > { %v471_v38 = vmax.f32 %v9617_v51, 0.0  ;;  %v2440_v39 = vld [vmem:[#allocation2 + $0xd0] sm:$0xf8]  ;;  %v1057_v28 = vsel %vm1018_vm4, %v1055_v17, %v1056_v36  ;;  %v9676_v47 = vadd.f32 %v9562_v3, %v402_v31  ;;  %v2910_v51 = vpop.permute.xlu1 %2909  ;;  %v1380_v18 = vrot.slane %v1378_v56, 4 }
 0x11e   : > { %v2441_v4 = vld [vmem:[#allocation2 + $0xd8] sm:$0xf]  ;;  %v2809_v22 = vld [vmem:[#allocation2 + $0xd0] sm:$0xf0]  ;;  %v3182_v40 = vsel %vm1164_vm3, %v3173_v5, %v3181_v54  ;;  %v2638_v24 = vshrl.u32 %v2440_v39, 16  ;;  %v2641_v46 = vshll.u32 %v2440_v39, 16  ;;  %v1376_v50 = vor.u32 %v9665_v43, %v9663_v26 }
 0x11f   : > { %v2646_v59 = vshrl.u32 %v2441_v4, 16  ;;  %v2649_v49 = vshll.u32 %v2441_v4, 16  ;;  %v2810_v53 = vld [vmem:[#allocation2 + $0xd8] sm:$0xf]  ;;  %2919 = vrot.lane.b32.xlu0 %v2883_v32, %s8837_s22  ;;  %v2884_v20 = vrot.slane %v2809_v22, 4  ;;  %v9683_v21 = vpack.c.bf16 %v471_v38, %v470_v52  ;;  %2953 = vst.msk [vmem:[#allocation3 + $0x28] sm:$0xff] %vm2947_vm12, %v2910_v51 }
 0x120   : > { %v2885_v37 = vrot.slane %v2810_v53, 4  ;;  %v2986_v34 = vld [vmem:[#allocation2 + $0xd0] sm:$0xf0]  ;;  %v2987_v1 = vld [vmem:[#allocation2 + $0xd8] sm:$0x1f]  ;;  %v2640_v41 = vrot.slane %v2638_v24, 3 }
 0x121   : > { %v2643_v35 = vrot.slane %v2641_v46, 4  ;;  %v2648_v42 = vrot.slane %v2646_v59, 3  ;;  %v2651_v30 = vrot.slane %v2649_v49, 4  ;;  %v980_v44 = vld [vmem:[#allocation2 + $0xd0] sm:$0xf0]  ;;  %v3184_v23 = vshrl.u32 %v2986_v34, 16  ;;  %v3279_v11 = vpop.permute.xlu1 %3278 }
 0x122   : > { %v2886_v45 = vsel %vm1018_vm4, %v2884_v20, %v2885_v37  ;;  %v3187_v57 = vshll.u32 %v2986_v34, 16  ;;  %v3192_v9 = vshrl.u32 %v2987_v1, 16  ;;  %v981_v61 = vld [vmem:[#allocation2 + $0xd8] sm:$0xf]  ;;  %v3337_v7 = vld [vmem:[#allocation3 + $0x20] sm:$0xff]  ;;  %v3195_v63 = vshll.u32 %v2987_v1, 16 }
 0x123   : > { %v2644_v19 = vor.u32 %v2643_v35, %v2640_v41  ;;  %v2652_v29 = vor.u32 %v2651_v30, %v2648_v42  ;;  %v1058_v10 = vrot.slane %v980_v44, 4  ;;  %v1158_v31 = vld [vmem:[#allocation2 + $0xd0] sm:$0xf0]  ;;  %8617 = vmatprep.mubr.msk.bf16.mxu0 %vm3376_vm14, %v3337_v7  ;;  %3288 = vrot.lane.b32.xlu0 %v3182_v40, %s8841_s26  ;;  %v3186_v6 = vrot.slane %v3184_v23, 4  ;;  %v1159_v15 = vld [vmem:[#allocation2 + $0xd8] sm:$0x1f]  ;;  %v9691_v62 = vpop.permute.xlu0 %1818 }
 0x124   : > { %v3189_v58 = vrot.slane %v3187_v57, 5  ;;  %v3194_v12 = vrot.slane %v3192_v9, 4  ;;  %v1059_v13 = vrot.slane %v981_v61, 4  ;;  %3322 = vst.msk [vmem:[#allocation3 + $0x28] sm:$0xff] %vm3316_vm13, %v3279_v11  ;;  %v3197_v36 = vrot.slane %v3195_v63, 5 }
 0x125   : > { %v2653_v17 = vsel %vm649_vm5, %v2644_v19, %v2652_v29  ;;  %v1383_v5 = vrot.slane %v1381_v8, 5  ;;  %v1526_v2 = vld [vmem:[#allocation2 + $0xd0] sm:$0xf8]  ;;  %v1387_v54 = vshrl.u32 %v1158_v31, 16  ;;  %v1390_v26 = vshll.u32 %v1158_v31, 16  ;;  %v9697_v22 = vpop.permute.xlu1 %1081 }
 0x126   : > { %2744 = vrot.lane.b32.xlu1 %v2653_v17, %s8840_s25  ;;  %v3190_v14 = vor.u32 %v3189_v58, %v3186_v6  ;;  %v9695_v32 = vsel %vm1018_vm4, %v1058_v10, %v1059_v13  ;;  %v3198_v43 = vor.u32 %v3197_v36, %v3194_v12  ;;  %v1395_v38 = vshrl.u32 %v1159_v15, 16  ;;  %v1527_v4 = vld [vmem:[#allocation2 + $0xd8] sm:$0xf]  ;;  %v1895_v46 = vld [vmem:[#allocation2 + $0xd0] sm:$0xf0] }
 0x127   : > { %v1384_v52 = vor.u32 %v1383_v5, %v1380_v18  ;;  %v1398_v39 = vshll.u32 %v1159_v15, 16  ;;  %1091 = vrot.lane.b32.xlu0 %v1057_v28, %s8834_s19  ;;  %v1389_v56 = vrot.slane %v1387_v54, 4  ;;  %v1392_v8 = vrot.slane %v1390_v26, 5  ;;  %v1896_v20 = vld [vmem:[#allocation2 + $0xd8] sm:$0xf]  ;;  %v9706_v7 = vpop.permute.xlu0 %1995 }
 0x128   : > { %v1739_v40 = vshrl.u32 %v1526_v2, 16  ;;  %v1742_v24 = vshll.u32 %v1526_v2, 16  ;;  %v3199_v59 = vsel %vm1164_vm3, %v3190_v14, %v3198_v43  ;;  %v1397_v53 = vrot.slane %v1395_v38, 4  ;;  %v2072_v37 = vld [vmem:[#allocation2 + $0xd0] sm:$0xf0]  ;;  %v364_v2 = vld [vmem:[%s9037_s16 + $0xf0] sm:$0xff] }
 0x129   : > { %v1385_v49 = vsel %vm1164_vm3, %v1376_v50, %v1384_v52  ;;  %v1400_v51 = vrot.slane %v1398_v39, 5  ;;  %v1393_v34 = vor.u32 %v1392_v8, %v1389_v56  ;;  %v1747_v35 = vshrl.u32 %v1527_v4, 16  ;;  %v2073_v28 = vld [vmem:[#allocation2 + $0xd8] sm:$0x1f]  ;;  %v630_v57 = vld [vmem:[#allocation2 + $0x68] sm:$0xf]  ;;  %v9704_v61 = vpop.permute.xlu1 %1451 }
 0x12a   : > { %2921 = vrot.lane.b32.xlu1 %v2886_v45, %s8837_s22  ;;  %v1741_v1 = vrot.slane %v1739_v40, 3  ;;  %v1744_v41 = vrot.slane %v1742_v24, 4  ;;  %v1750_v30 = vshll.u32 %v1527_v4, 16  ;;  %v565_v44 = vrot.slane %v9683_v21, 4  ;;  %v631_v9 = vld [vmem:[#allocation2 + $0x70] sm:$0xf8] }
 0x12b   : > { %v1401_v42 = vor.u32 %v1400_v51, %v1397_v53  ;;  %v1971_v23 = vrot.slane %v1895_v46, 4  ;;  %v3338_v50 = vld [vmem:[#allocation3 + $0x28] sm:$0xff]  ;;  %1461 = vrot.lane.b32.xlu0 %v1385_v49, %s8835_s20  ;;  %v1749_v19 = vrot.slane %v1747_v35, 3  ;;  %v1972_v29 = vrot.slane %v1896_v20, 4  ;;  %v9717_v15 = vld [vmem:[#allocation2 + $0x78] sm:$0xf]  ;;  %v9725_v56 = vpop.permute.xlu0 %2364 }
 0x12c   : > { %v1745_v45 = vor.u32 %v1744_v41, %v1741_v1  ;;  %v2285_v63 = vshrl.u32 %v2072_v37, 16  ;;  %8618 = vmatmul.mubr.msk.bf16.gmra.mrb[8].mxu0 %vm3376_vm14, %v3338_v50  ;;  %v1752_v21 = vrot.slane %v1750_v30, 4  ;;  %611 = vst.msk [vmem:[#allocation2 + $0xe0] sm:$0xf0] %vm517_vm2, %v565_v44  ;;  %v2288_v31 = vshll.u32 %v2072_v37, 16  ;;  %v365_v8 = vld [vmem:[%s9037_s16 + $0xf8] sm:$0xff] }
 0x12d   : > { %v1402_v10 = vsel %vm1164_vm3, %v1393_v34, %v1401_v42  ;;  %612 = vst.msk [vmem:[#allocation2 + $0xe8] sm:$0xf] %vm498_vm1, %v565_v44  ;;  %v2293_v11 = vshrl.u32 %v2073_v28, 16  ;;  %v1973_v6 = vsel %vm1018_vm4, %v1971_v23, %v1972_v29  ;;  %v2296_v12 = vshll.u32 %v2073_v28, 16 }
 0x12e   : > { %3290 = vrot.lane.b32.xlu1 %v3199_v59, %s8841_s26  ;;  %v2287_v58 = vrot.slane %v2285_v63, 4  ;;  %v755_v13 = vrot.slane %v753_v60, 3  ;;  %v1753_v17 = vor.u32 %v1752_v21, %v1749_v19  ;;  %v2290_v36 = vrot.slane %v2288_v31, 5  ;;  %v9722_v52 = vpop.permute.xlu1 %1820 }
 0x12f   : > { %v2295_v18 = vrot.slane %v2293_v11, 4  ;;  %v758_v5 = vrot.slane %v756_v16, 4  ;;  %v2298_v14 = vrot.slane %v2296_v12, 5  ;;  %v761_v54 = vshrl.u32 %v630_v57, 16 }
 0x130   : > { %v764_v26 = vshll.u32 %v630_v57, 16  ;;  %v770_v43 = vshrl.u32 %v631_v9, 16  ;;  %v1754_v38 = vsel %vm649_vm5, %v1745_v45, %v1753_v17  ;;  %v2291_v39 = vor.u32 %v2290_v36, %v2287_v58 }
 0x131   : > { %v759_v60 = vor.u32 %v758_v5, %v755_v13  ;;  %v773_v4 = vshll.u32 %v631_v9, 16  ;;  %1830 = vrot.lane.b32.xlu0 %v1754_v38, %s8838_s23  ;;  %v2299_v55 = vor.u32 %v2298_v14, %v2295_v18  ;;  %v763_v16 = vrot.slane %v761_v54, 3 }
 0x132   : > { %1093 = vrot.lane.b32.xlu1 %v9695_v32, %s8834_s19  ;;  %v766_v40 = vrot.slane %v764_v26, 4  ;;  %v9731_v24 = vrot.slane %v770_v43, 3  ;;  %v778_v59 = vshrl.u32 %v9717_v15, 16  ;;  %v781_v49 = vshll.u32 %v9717_v15, 16  ;;  %v9745_v23 = vpop.permute.xlu1 %1997 }
 0x133   : > { %v9733_v46 = vrot.slane %v773_v4, 4  ;;  %v472_v53 = vmax.f32 %v9673_v33, 0.0  ;;  %v1528_v51 = vld [vmem:[#allocation2 + $0xe0] sm:$0xf8]  ;;  %v2300_v32 = vsel %vm1164_vm3, %v2291_v39, %v2299_v55  ;;  %v9740_v1 = vmul.f32 %v9604_v25, %v364_v2 }
 0x134   : > { %v1529_v20 = vld [vmem:[#allocation2 + $0xe8] sm:$0xf]  ;;  %v1897_v37 = vld [vmem:[#allocation2 + $0xe0] sm:$0xf0]  ;;  %v767_v34 = vor.u32 %v766_v40, %v763_v16  ;;  %v9743_v41 = vmul.f32 %v9604_v25, %v365_v8  ;;  %v1756_v35 = vshrl.u32 %v1528_v51, 16  ;;  %v1759_v28 = vshll.u32 %v1528_v51, 16 }
 0x135   : > { %v1764_v42 = vshrl.u32 %v1529_v20, 16  ;;  %v1767_v30 = vshll.u32 %v1529_v20, 16  ;;  %v1898_v44 = vld [vmem:[#allocation2 + $0xe8] sm:$0xf]  ;;  %2007 = vrot.lane.b32.xlu0 %v1973_v6, %s8836_s21  ;;  %v1974_v57 = vrot.slane %v1897_v37, 4  ;;  %v776_v25 = vor.u32 %v9733_v46, %v9731_v24  ;;  %v2735_v11 = vpop.permute.xlu0 %2734 }
 0x136   : > { %1463 = vrot.lane.b32.xlu1 %v1402_v10, %s8835_s20  ;;  %v1975_v9 = vrot.slane %v1898_v44, 4  ;;  %v2074_v50 = vld [vmem:[#allocation2 + $0xe0] sm:$0xf0]  ;;  %v2075_v45 = vld [vmem:[#allocation2 + $0xe8] sm:$0x1f]  ;;  %v768_v19 = vsel %vm649_vm5, %v759_v60, %v767_v34  ;;  %v1758_v29 = vrot.slane %v1756_v35, 3  ;;  %v2367_v4 = vpop.permute.xlu1 %2366 }
 0x137   : > { %v1761_v63 = vrot.slane %v1759_v28, 4  ;;  %v1766_v21 = vrot.slane %v1764_v42, 3  ;;  %v1769_v31 = vrot.slane %v1767_v30, 4  ;;  %944 = vst.msk [vmem:[#allocation3 + $0x30] sm:$0xff] %vm492_vm0, %v768_v19  ;;  %v2302_v58 = vshrl.u32 %v2074_v50, 16 }
 0x138   : > { %v1976_v10 = vsel %vm1018_vm4, %v1974_v57, %v1975_v9  ;;  %v2305_v6 = vshll.u32 %v2074_v50, 16  ;;  %v2310_v12 = vshrl.u32 %v2075_v45, 16  ;;  %1122 = vst.msk [vmem:[#allocation3 + $0x30] sm:$0xff] %vm1115_vm6, %v9654_v48  ;;  %v2442_v13 = vld [vmem:[#allocation2 + $0xe0] sm:$0xf8]  ;;  %v2313_v36 = vshll.u32 %v2075_v45, 16 }
 0x139   : > { %v1762_v15 = vor.u32 %v1761_v63, %v1758_v29  ;;  %v1770_v17 = vor.u32 %v1769_v31, %v1766_v21  ;;  %v780_v18 = vrot.slane %v778_v59, 3  ;;  %v2443_v5 = vld [vmem:[#allocation2 + $0xe8] sm:$0xf]  ;;  %1492 = vst.msk [vmem:[#allocation3 + $0x30] sm:$0xff] %vm1485_vm7, %v9678_v27  ;;  %2376 = vrot.lane.b32.xlu0 %v2300_v32, %s8839_s24  ;;  %v2304_v2 = vrot.slane %v2302_v58, 4  ;;  %v2912_v27 = vpop.permute.xlu0 %2911 }
 0x13a   : > { %v2307_v14 = vrot.slane %v2305_v6, 5  ;;  %v2312_v54 = vrot.slane %v2310_v12, 4  ;;  %v783_v26 = vrot.slane %v781_v49, 4  ;;  %1861 = vst.msk [vmem:[#allocation3 + $0x30] sm:$0xff] %vm1854_vm8, %v9691_v62  ;;  %v2315_v43 = vrot.slane %v2313_v36, 5 }
 0x13b   : > { %v1771_v48 = vsel %vm649_vm5, %v1762_v15, %v1770_v17  ;;  %v2655_v38 = vshrl.u32 %v2442_v13, 16  ;;  %v2658_v39 = vshll.u32 %v2442_v13, 16  ;;  %v2811_v60 = vld [vmem:[#allocation2 + $0xe0] sm:$0xf0]  ;;  %2038 = vst.msk [vmem:[#allocation3 + $0x30] sm:$0xff] %vm2031_vm9, %v9706_v7  ;;  %v2663_v16 = vshrl.u32 %v2443_v5, 16 }
 0x13c   : > { %1832 = vrot.lane.b32.xlu1 %v1771_v48, %s8838_s23  ;;  %v2308_v8 = vor.u32 %v2307_v14, %v2304_v2  ;;  %v784_v55 = vor.u32 %v783_v26, %v780_v18  ;;  %v2666_v40 = vshll.u32 %v2443_v5, 16  ;;  %v2812_v24 = vld [vmem:[#allocation2 + $0xe8] sm:$0xf]  ;;  %v2988_v46 = vld [vmem:[#allocation2 + $0xe0] sm:$0xf0]  ;;  %2407 = vst.msk [vmem:[#allocation3 + $0x30] sm:$0xff] %vm2400_vm10, %v9725_v56  ;;  %v2316_v62 = vor.u32 %v2315_v43, %v2312_v54 }
 0x13d   : > { %v2657_v59 = vrot.slane %v2655_v38, 3  ;;  %v2660_v49 = vrot.slane %v2658_v39, 4  ;;  %v473_v51 = vmax.f32 %v9676_v47, 0.0  ;;  %v2989_v20 = vld [vmem:[#allocation2 + $0xe8] sm:$0x1f]  ;;  %2777 = vst.msk [vmem:[#allocation3 + $0x30] sm:$0xff] %vm2770_vm11, %v2735_v11  ;;  %v9778_v30 = vadd.f32 %v9562_v3, %v9740_v1  ;;  %v3281_v44 = vpop.permute.xlu0 %3280 }
 0x13e   : > { %v785_v7 = vsel %vm649_vm5, %v776_v25, %v784_v55  ;;  %v2665_v37 = vrot.slane %v2663_v16, 3  ;;  %v2668_v32 = vrot.slane %v2666_v40, 4  ;;  %v2887_v34 = vrot.slane %v2811_v60, 4  ;;  %v9770_v35 = vld [vmem:[#allocation2 + $0xe0] sm:$0xf0]  ;;  %2954 = vst.msk [vmem:[#allocation3 + $0x30] sm:$0xff] %vm2947_vm12, %v2912_v27 }
 0x13f   : > { %v1160_v28 = vld [vmem:[#allocation2 + $0xe0] sm:$0xf0]  ;;  %945 = vst.msk [vmem:[#allocation3 + $0x38] sm:$0xff] %vm492_vm0, %v785_v7  ;;  %v2661_v56 = vor.u32 %v2660_v49, %v2657_v59  ;;  %v490_v42 = vpack.c.bf16 %v473_v51, %v472_v53  ;;  %v2888_v47 = vrot.slane %v2812_v24, 4  ;;  %v3201_v9 = vshrl.u32 %v2988_v46, 16 }
 0x140   : > { %2009 = vrot.lane.b32.xlu1 %v1976_v10, %s8836_s21  ;;  %1123 = vst.msk [vmem:[#allocation3 + $0x38] sm:$0xff] %vm1115_vm6, %v9697_v22  ;;  %v2669_v57 = vor.u32 %v2668_v32, %v2665_v37  ;;  %v3204_v50 = vshll.u32 %v2988_v46, 16  ;;  %v3209_v45 = vshrl.u32 %v2989_v20, 16  ;;  %v2317_v33 = vsel %vm1164_vm3, %v2308_v8, %v2316_v62  ;;  %v983_v25 = vld [vmem:[#allocation2 + $0xe8] sm:$0xf]  ;;  %v2737_v63 = vpop.permute.xlu1 %2736 }
 0x141   : > { %3323 = vst.msk [vmem:[#allocation3 + $0x30] sm:$0xff] %vm3316_vm13, %v3281_v44  ;;  %v566_v53 = vrot.slane %v490_v42, 4  ;;  %v2889_v1 = vsel %vm1018_vm4, %v2887_v34, %v2888_v47  ;;  %v3212_v19 = vshll.u32 %v2989_v20, 16  ;;  %v1161_v29 = vld [vmem:[#allocation2 + $0xe8] sm:$0x1f]  ;;  %v3203_v21 = vrot.slane %v3201_v9, 4  ;;  %v9817_v46 = vpop.permute.xlu0 %1083 }
 0x142   : > { %1493 = vst.msk [vmem:[#allocation3 + $0x38] sm:$0xff] %vm1485_vm7, %v9704_v61  ;;  %v2670_v22 = vsel %vm649_vm5, %v2661_v56, %v2669_v57  ;;  %v3206_v31 = vrot.slane %v3204_v50, 5  ;;  %v3211_v11 = vrot.slane %v3209_v45, 4  ;;  %v633_v10 = vld [vmem:[#allocation2 + $0x80] sm:$0xf8]  ;;  %v1061_v58 = vrot.slane %v9770_v35, 4 }
 0x143   : > { %1862 = vst.msk [vmem:[#allocation3 + $0x38] sm:$0xff] %vm1854_vm8, %v9722_v52  ;;  %2746 = vrot.lane.b32.xlu0 %v2670_v22, %s8840_s25  ;;  %v3214_v61 = vrot.slane %v3212_v19, 5  ;;  %v1404_v6 = vshrl.u32 %v1160_v28, 16  ;;  %v1407_v12 = vshll.u32 %v1160_v28, 16  ;;  %v9797_v13 = vld [vmem:[#allocation2 + $0x88] sm:$0xf]  ;;  %v443_v36 = vadd.f32 %v9562_v3, %v9743_v41 }
 0x144   : > { %613 = vst.msk [vmem:[#allocation2 + $0xf0] sm:$0xf0] %vm517_vm2, %v566_v53  ;;  %2378 = vrot.lane.b32.xlu1 %v2317_v33, %s8839_s24  ;;  %v3207_v52 = vor.u32 %v3206_v31, %v3203_v21  ;;  %v1412_v15 = vshrl.u32 %v1161_v29, 16  ;;  %v1415_v17 = vshll.u32 %v1161_v29, 16  ;;  %v9803_v18 = vld [vmem:[#allocation2 + $0x90] sm:$0xf8]  ;;  %v2914_v14 = vpop.permute.xlu1 %2913 }
 0x145   : > { %614 = vst.msk [vmem:[#allocation2 + $0xf8] sm:$0xf] %vm498_vm1, %v566_v53  ;;  %v3215_v5 = vor.u32 %v3214_v61, %v3211_v11  ;;  %v1409_v2 = vrot.slane %v1407_v12, 5  ;;  %v1062_v54 = vrot.slane %v983_v25, 4  ;;  %v474_v43 = vmax.f32 %v9778_v30, 0.0 }
 0x146   : > { %2039 = vst.msk [vmem:[#allocation3 + $0x38] sm:$0xff] %vm2031_vm9, %v9745_v23  ;;  %v1406_v23 = vrot.slane %v1404_v6, 4  ;;  %v1414_v26 = vrot.slane %v1412_v15, 4  ;;  %v1417_v48 = vrot.slane %v1415_v17, 5  ;;  %v475_v38 = vmax.f32 %v443_v36, 0.0 }
 0x147   : > { %2408 = vst.msk [vmem:[#allocation3 + $0x38] sm:$0xff] %vm2400_vm10, %v2367_v4  ;;  %2923 = vrot.lane.b32.xlu0 %v2889_v1, %s8837_s22  ;;  %v787_v39 = vshrl.u32 %v633_v10, 16  ;;  %v790_v3 = vshll.u32 %v633_v10, 16  ;;  %v3216_v60 = vsel %vm1164_vm3, %v3207_v52, %v3215_v5  ;;  %v795_v8 = vshrl.u32 %v9797_v13, 16 }
 0x148   : > { %2778 = vst.msk [vmem:[#allocation3 + $0x38] sm:$0xff] %vm2770_vm11, %v2737_v63  ;;  %v3339_v41 = vld [vmem:[#allocation3 + $0x30] sm:$0xff]  ;;  %v1410_v4 = vor.u32 %v1409_v2, %v1406_v23  ;;  %v1418_v27 = vor.u32 %v1417_v48, %v1414_v26  ;;  %v3283_v55 = vpop.permute.xlu1 %3282  ;;  %v798_v24 = vshll.u32 %v9797_v13, 16  ;;  %v804_v62 = vshrl.u32 %v9803_v18, 16 }
 0x149   : > { %2955 = vst.msk [vmem:[#allocation3 + $0x38] sm:$0xff] %vm2947_vm12, %v2914_v14  ;;  %8621 = vmatprep.mubr.msk.bf16.mxu0 %vm3376_vm14, %v3339_v41  ;;  %v9812_v16 = vrot.slane %v787_v39, 3  ;;  %v9814_v40 = vrot.slane %v790_v3, 4  ;;  %v1063_v20 = vsel %vm1018_vm4, %v1061_v58, %v1062_v54  ;;  %v9824_v30 = vpack.c.bf16 %v475_v38, %v474_v43 }
 0x14a   : > { %3324 = vst.msk [vmem:[#allocation3 + $0x38] sm:$0xff] %vm3316_vm13, %v3283_v55  ;;  %v1419_v47 = vsel %vm1164_vm3, %v1410_v4, %v1418_v27  ;;  %v807_v44 = vshll.u32 %v9803_v18, 16 }
 0x14b   : > { %v2444_v59 = vld [vmem:[#allocation2 + $0xf0] sm:$0xf8]  ;;  %3292 = vrot.lane.b32.xlu0 %v3216_v60, %s8841_s26  ;;  %v9828_v61 = vpop.permute.xlu0 %1453  ;;  %v793_v43 = vor.u32 %v9814_v40, %v9812_v16 }
 0x14c   : > { %v2445_v49 = vld [vmem:[#allocation2 + $0xf8] sm:$0xf]  ;;  %v2813_v51 = vld [vmem:[#allocation2 + $0xf0] sm:$0xf0]  ;;  %v2672_v7 = vshrl.u32 %v2444_v59, 16  ;;  %v2675_v37 = vshll.u32 %v2444_v59, 16 }
 0x14d   : > { %v2680_v32 = vshrl.u32 %v2445_v49, 16  ;;  %v2683_v34 = vshll.u32 %v2445_v49, 16  ;;  %v2814_v35 = vld [vmem:[#allocation2 + $0xf8] sm:$0xf]  ;;  %v2890_v28 = vrot.slane %v2813_v51, 4 }
 0x14e   : > { %v2990_v56 = vld [vmem:[#allocation2 + $0xf0] sm:$0xf0]  ;;  %v2991_v42 = vld [vmem:[#allocation2 + $0xf8] sm:$0x1f]  ;;  %v2674_v57 = vrot.slane %v2672_v7, 3  ;;  %v2677_v9 = vrot.slane %v2675_v37, 4 }
 0x14f   : > { %v2682_v50 = vrot.slane %v2680_v32, 3  ;;  %v2685_v45 = vrot.slane %v2683_v34, 4  ;;  %v984_v33 = vld [vmem:[#allocation2 + $0xf0] sm:$0xf0]  ;;  %v2891_v53 = vrot.slane %v2814_v35, 4  ;;  %v3218_v1 = vshrl.u32 %v2990_v56, 16  ;;  %1095 = vrot.lane.b32.xlu0 %v1063_v20, %s8834_s19 }
 0x150   : > { %v3221_v19 = vshll.u32 %v2990_v56, 16  ;;  %v3226_v25 = vshrl.u32 %v2991_v42, 16  ;;  %v985_v29 = vld [vmem:[#allocation2 + $0xf8] sm:$0xf]  ;;  %v2678_v63 = vor.u32 %v2677_v9, %v2674_v57  ;;  %v3229_v21 = vshll.u32 %v2991_v42, 16  ;;  %v9843_v57 = vpop.permute.xlu1 %1085 }
 0x151   : > { %v2686_v22 = vor.u32 %v2685_v45, %v2682_v50  ;;  %v1064_v31 = vrot.slane %v984_v33, 4  ;;  %v1162_v11 = vld [vmem:[#allocation2 + $0xf0] sm:$0xf0]  ;;  %v1163_v10 = vld [vmem:[#allocation2 + $0xf8] sm:$0x1f]  ;;  %v3220_v58 = vrot.slane %v3218_v1, 4  ;;  %v2892_v38 = vsel %vm1018_vm4, %v2890_v28, %v2891_v53  ;;  %v9838_v35 = vpop.permute.xlu0 %1822 }
 0x152   : > { %v3223_v6 = vrot.slane %v3221_v19, 5  ;;  %v3228_v12 = vrot.slane %v3226_v25, 4  ;;  %v1065_v52 = vrot.slane %v985_v29, 4  ;;  %v1530_v15 = vld [vmem:[#allocation2 + $0xf0] sm:$0xf8]  ;;  %v3231_v36 = vrot.slane %v3229_v21, 5 }
 0x153   : > { %v2687_v17 = vsel %vm649_vm5, %v2678_v63, %v2686_v22  ;;  %v1421_v5 = vshrl.u32 %v1162_v11, 16  ;;  %v1424_v23 = vshll.u32 %v1162_v11, 16  ;;  %v1531_v2 = vld [vmem:[#allocation2 + $0xf8] sm:$0xf]  ;;  %v1429_v26 = vshrl.u32 %v1163_v10, 16  ;;  %1465 = vrot.lane.b32.xlu0 %v1419_v47, %s8835_s20 }
 0x154   : > { %v3340_v14 = vld [vmem:[#allocation3 + $0x38] sm:$0xff]  ;;  %2748 = vrot.lane.b32.xlu1 %v2687_v17, %s8840_s25  ;;  %v3224_v54 = vor.u32 %v3223_v6, %v3220_v58  ;;  %v1432_v48 = vshll.u32 %v1163_v10, 16  ;;  %v3232_v39 = vor.u32 %v3231_v36, %v3228_v12  ;;  %v1066_v3 = vsel %vm1018_vm4, %v1064_v31, %v1065_v52  ;;  %v1899_v60 = vld [vmem:[#allocation2 + $0xf0] sm:$0xf0] }
 0x155   : > { %8622 = vmatmul.mubr.msk.bf16.gmra.mrb[12].mxu0 %vm3376_vm14, %v3340_v14  ;;  %v1773_v41 = vshrl.u32 %v1530_v15, 16  ;;  %v1900_v4 = vld [vmem:[#allocation2 + $0xf8] sm:$0xf]  ;;  %v1423_v27 = vrot.slane %v1421_v5, 4  ;;  %v1426_v55 = vrot.slane %v1424_v23, 5  ;;  %v1776_v59 = vshll.u32 %v1530_v15, 16  ;;  %v2000_v5 = vpop.permute.xlu0 %1999 }
 0x156   : > { %v1781_v49 = vshrl.u32 %v1531_v2, 16  ;;  %v2076_v51 = vld [vmem:[#allocation2 + $0xf0] sm:$0xf0]  ;;  %v1431_v20 = vrot.slane %v1429_v26, 4  ;;  %v1434_v7 = vrot.slane %v1432_v48, 5  ;;  %v1784_v32 = vshll.u32 %v1531_v2, 16 }
 0x157   : > { %v1775_v37 = vrot.slane %v1773_v41, 3  ;;  %v2077_v34 = vld [vmem:[#allocation2 + $0xf8] sm:$0x1f]  ;;  %v3233_v28 = vsel %vm1164_vm3, %v3224_v54, %v3232_v39  ;;  %v1778_v56 = vrot.slane %v1776_v59, 4  ;;  %v567_v47 = vrot.slane %v9824_v30, 4  ;;  %v9863_v54 = vpop.permute.xlu1 %1455 }
 0x158   : > { %2925 = vrot.lane.b32.xlu1 %v2892_v38, %s8837_s22  ;;  %v1783_v42 = vrot.slane %v1781_v49, 3  ;;  %v1786_v9 = vrot.slane %v1784_v32, 4  ;;  %v1977_v50 = vrot.slane %v1899_v60, 4  ;;  %v1978_v45 = vrot.slane %v1900_v4, 4  ;;  %v636_v53 = vld [vmem:[#allocation2 + $0x98] sm:$0xf] }
 0x159   : > { %v2319_v33 = vshrl.u32 %v2076_v51, 16  ;;  %v1427_v1 = vor.u32 %v1426_v55, %v1423_v27  ;;  %v1779_v19 = vor.u32 %v1778_v56, %v1775_v37  ;;  %615 = vst.msk [vmem:[#allocation2 + $0x100] sm:$0xf0] %vm517_vm2, %v567_v47  ;;  %v2322_v25 = vshll.u32 %v2076_v51, 16  ;;  %v9847_v63 = vld [vmem:[#allocation2 + $0x110] sm:$0xf8]  ;;  %v2369_v32 = vpop.permute.xlu0 %2368 }
 0x15a   : > { %616 = vst.msk [vmem:[#allocation2 + $0x108] sm:$0xf] %vm498_vm1, %v567_v47  ;;  %v2327_v29 = vshrl.u32 %v2077_v34, 16  ;;  %v1435_v22 = vor.u32 %v1434_v7, %v1431_v20  ;;  %v1787_v21 = vor.u32 %v1786_v9, %v1783_v42  ;;  %v2330_v31 = vshll.u32 %v2077_v34, 16  ;;  %v9849_v11 = vld [vmem:[#allocation2 + $0x118] sm:$0xf] }
 0x15b   : > { %v2321_v30 = vrot.slane %v2319_v33, 4  ;;  %v2324_v10 = vrot.slane %v2322_v25, 5  ;;  %v797_v6 = vrot.slane %v795_v8, 3  ;;  %v800_v12 = vrot.slane %v798_v24, 4 }
 0x15c   : > { %3294 = vrot.lane.b32.xlu1 %v3233_v28, %s8841_s26  ;;  %v2329_v58 = vrot.slane %v2327_v29, 4  ;;  %v1788_v52 = vsel %vm649_vm5, %v1779_v19, %v1787_v21  ;;  %v2332_v15 = vrot.slane %v2330_v31, 5  ;;  %v806_v17 = vrot.slane %v804_v62, 3  ;;  %v8679_v29 = vld [vmem:[%s11322_s7] sm:$0xff]  }
 0x15d   : > { %v809_v36 = vrot.slane %v807_v44, 4  ;;  %1834 = vrot.lane.b32.xlu0 %v1788_v52, %s8838_s23  ;;  %v1979_v23 = vsel %vm1018_vm4, %v1977_v50, %v1978_v45  ;;  %v801_v2 = vor.u32 %v800_v12, %v797_v6  ;;  %v812_v14 = vshrl.u32 %v636_v53, 16 }
 0x15e   : > { %v815_v8 = vshll.u32 %v636_v53, 16  ;;  %v2325_v13 = vor.u32 %v2324_v10, %v2321_v30  ;;  %v2333_v24 = vor.u32 %v2332_v15, %v2329_v58  ;;  %v2706_v26 = vshrl.u32 %v9847_v63, 16 }
 0x15f   : > { %v2709_v48 = vshll.u32 %v9847_v63, 16  ;;  %v802_v18 = vsel %vm649_vm5, %v793_v43, %v801_v2  ;;  %v814_v62 = vrot.slane %v812_v14, 3  ;;  %v2714_v38 = vshrl.u32 %v9849_v11, 16 }
 0x160   : > { %1097 = vrot.lane.b32.xlu1 %v1066_v3, %s8834_s19  ;;  %v817_v44 = vrot.slane %v815_v8, 4  ;;  %v1436_v39 = vsel %vm1164_vm3, %v1427_v1, %v1435_v22  ;;  %v1532_v41 = vld [vmem:[#allocation2 + $0x100] sm:$0xf8]  ;;  %946 = vst.msk [vmem:[#allocation3 + $0x40] sm:$0xff] %vm492_vm0, %v802_v18  ;;  %v810_v27 = vor.u32 %v809_v36, %v806_v17  ;;  %v2334_v51 = vsel %vm1164_vm3, %v2325_v13, %v2333_v24  ;;  %v2817_v17 = vld [vmem:[#allocation2 + $0x110] sm:$0xf0] }
 0x161   : > { %v1533_v60 = vld [vmem:[#allocation2 + $0x108] sm:$0xf]  ;;  %v1901_v4 = vld [vmem:[#allocation2 + $0x100] sm:$0xf0]  ;;  %v1790_v55 = vshrl.u32 %v1532_v41, 16  ;;  %v1793_v59 = vshll.u32 %v1532_v41, 16  ;;  %2011 = vrot.lane.b32.xlu0 %v1979_v23, %s8836_s21 }
 0x162   : > { %v1798_v3 = vshrl.u32 %v1533_v60, 16  ;;  %v1801_v49 = vshll.u32 %v1533_v60, 16  ;;  %v1902_v16 = vld [vmem:[#allocation2 + $0x108] sm:$0xf]  ;;  %1124 = vst.msk [vmem:[#allocation3 + $0x40] sm:$0xff] %vm1115_vm6, %v9817_v46  ;;  %v1980_v40 = vrot.slane %v1901_v4, 4  ;;  %v818_v37 = vor.u32 %v817_v44, %v814_v62  ;;  %v1825_v46 = vpop.permute.xlu1 %1824 }
 0x163   : > { %v1981_v43 = vrot.slane %v1902_v16, 4  ;;  %v2078_v20 = vld [vmem:[#allocation2 + $0x100] sm:$0xf0]  ;;  %v2079_v7 = vld [vmem:[#allocation2 + $0x108] sm:$0x1f]  ;;  %1494 = vst.msk [vmem:[#allocation3 + $0x40] sm:$0xff] %vm1485_vm7, %v9828_v61 }
 0x164   : > { %1467 = vrot.lane.b32.xlu1 %v1436_v39, %s8835_s20  ;;  %v1792_v34 = vrot.slane %v1790_v55, 3  ;;  %v1795_v28 = vrot.slane %v1793_v59, 4  ;;  %v1800_v56 = vrot.slane %v1798_v3, 3  ;;  %v1803_v42 = vrot.slane %v1801_v49, 4  ;;  %v2446_v47 = vld [vmem:[#allocation2 + $0x100] sm:$0xf8] }
 0x165   : > { %1863 = vst.msk [vmem:[#allocation3 + $0x40] sm:$0xff] %vm1854_vm8, %v9838_v35  ;;  %v9885_v9 = vsel %vm1018_vm4, %v1980_v40, %v1981_v43  ;;  %v2336_v50 = vshrl.u32 %v2078_v20, 16  ;;  %v2339_v45 = vshll.u32 %v2078_v20, 16  ;;  %v2344_v33 = vshrl.u32 %v2079_v7, 16  ;;  %v2447_v53 = vld [vmem:[#allocation2 + $0x108] sm:$0xf]  ;;  %2380 = vrot.lane.b32.xlu0 %v2334_v51, %s8839_s24 }
 0x166   : > { %2040 = vst.msk [vmem:[#allocation3 + $0x40] sm:$0xff] %vm2031_vm9, %v2000_v5  ;;  %v8678_v61 = vld [vmem:[%s11322_s7 + $0x40] sm:$0xff]   ;;  %v1796_v1 = vor.u32 %v1795_v28, %v1792_v34  ;;  %v1804_v19 = vor.u32 %v1803_v42, %v1800_v56  ;;  %v2347_v25 = vshll.u32 %v2079_v7, 16  ;;  %v819_v35 = vsel %vm649_vm5, %v810_v27, %v818_v37  ;;  %v2815_v10 = vld [vmem:[#allocation2 + $0x100] sm:$0xf0]  ;;  %v2002_v5 = vpop.permute.xlu1 %2001  ;;  %v8682_v43 = vld [vmem:[%s11322_s7 + $0x50] sm:$0xff]  }
 0x167   : > { %2409 = vst.msk [vmem:[#allocation3 + $0x40] sm:$0xff] %vm2400_vm10, %v2369_v32  ;;  %v2338_v22 = vrot.slane %v2336_v50, 4  ;;  %v2341_v21 = vrot.slane %v2339_v45, 5  ;;  %v2346_v30 = vrot.slane %v2344_v33, 4  ;;  %v2689_v31 = vshrl.u32 %v2446_v47, 16  ;;  %8155 = vmatprep.subr.bf16.mxu0 %v8678_v61  ;;  %8641 = vmatprep.subr.bf16.mxu1 %v8678_v61  ;;  %v8680_v24 = vld [vmem:[%s11322_s7 + $0x48] sm:$0xff]   ;;  %v2739_v27 = vpop.permute.xlu0 %2738 }
 0x168   : > { %947 = vst.msk [vmem:[#allocation3 + $0x48] sm:$0xff] %vm492_vm0, %v819_v35  ;;  %v1805_v58 = vsel %vm649_vm5, %v1796_v1, %v1804_v19  ;;  %v2349_v6 = vrot.slane %v2347_v25, 5  ;;  %v2692_v12 = vshll.u32 %v2446_v47, 16  ;;  %v2697_v52 = vshrl.u32 %v2447_v53, 16  ;;  %v2816_v15 = vld [vmem:[#allocation2 + $0x108] sm:$0xf]  ;;  %8156 = vmatpush3.bf16.msra.mxu0 %v8679_v29  ;;  %8649 = vmatpush3.bf16.msra.mxu1 %v8679_v29 }
 0x169   : > { %1125 = vst.msk [vmem:[#allocation3 + $0x48] sm:$0xff] %vm1115_vm6, %v9843_v57  ;;  %v2818_v36 = vld [vmem:[#allocation2 + $0x118] sm:$0xf]  ;;  %1836 = vrot.lane.b32.xlu1 %v1805_v58, %s8838_s23  ;;  %v2342_v23 = vor.u32 %v2341_v21, %v2338_v22  ;;  %v2691_v2 = vrot.slane %v2689_v31, 3  ;;  %v2700_v14 = vshll.u32 %v2447_v53, 16  ;;  %v2708_v8 = vrot.slane %v2706_v26, 3  ;;  %8157 = vmatprep.subr.bf16.mxu0 %v8680_v24 }
 0x16a   : > { %1495 = vst.msk [vmem:[#allocation3 + $0x48] sm:$0xff] %vm1485_vm7, %v9863_v54  ;;  %v2992_v57 = vld [vmem:[#allocation2 + $0x100] sm:$0xf0]  ;;  %v2993_v13 = vld [vmem:[#allocation2 + $0x108] sm:$0x1f]  ;;  %v2350_v18 = vor.u32 %v2349_v6, %v2346_v30  ;;  %v2694_v62 = vrot.slane %v2692_v12, 4  ;;  %8642 = vmatprep.subr.bf16.mxu1 %v8680_v24  ;;  %v2371_v3 = vpop.permute.xlu1 %2370 }
 0x16b   : > { %v2699_v44 = vrot.slane %v2697_v52, 3  ;;  %v2711_v39 = vrot.slane %v2709_v48, 4  ;;  %1864 = vst.msk [vmem:[#allocation3 + $0x48] sm:$0xff] %vm1854_vm8, %v1825_v46  ;;  %v8681_v26 = vld [vmem:[%s11322_s7 + $0x8] sm:$0xff]   ;;  %v2702_v41 = vrot.slane %v2700_v14, 4  ;;  %v2716_v54 = vrot.slane %v2714_v38, 3  ;;  %v2916_v46 = vpop.permute.xlu0 %2915 }
 0x16c   : > { %v2717_v60 = vshll.u32 %v9849_v11, 16  ;;  %v2893_v4 = vrot.slane %v2815_v10, 4  ;;  %2041 = vst.msk [vmem:[#allocation3 + $0x48] sm:$0xff] %vm2031_vm9, %v2002_v5  ;;  %v2351_v63 = vsel %vm1164_vm3, %v2342_v23, %v2350_v18  ;;  %v2695_v48 = vor.u32 %v2694_v62, %v2691_v2  ;;  %8158 = vmatpush3.bf16.msra.mxu0 %v8681_v26  ;;  %8650 = vmatpush3.bf16.msra.mxu1 %v8681_v26  ;;  %v2994_v40 = vld [vmem:[#allocation2 + $0x110] sm:$0xf0]  ;;  %v8683_v34 = vld [vmem:[%s11322_s7 + $0x10] sm:$0xff]  }
 0x16d   : > { %v2712_v55 = vor.u32 %v2711_v39, %v2708_v8  ;;  %v2894_v59 = vrot.slane %v2816_v15, 4  ;;  %2779 = vst.msk [vmem:[#allocation3 + $0x40] sm:$0xff] %vm2770_vm11, %v2739_v27  ;;  %2013 = vrot.lane.b32.xlu1 %v9885_v9, %s8836_s21  ;;  %v2703_v11 = vor.u32 %v2702_v41, %v2699_v44  ;;  %v2896_v49 = vrot.slane %v2817_v17, 4  ;;  %v2995_v32 = vld [vmem:[#allocation2 + $0x118] sm:$0x1f]  ;;  %8159 = vmatprep.subr.bf16.mxu0 %v8682_v43  ;;  %v8684_v22 = vld [vmem:[%s11322_s7 + $0x58] sm:$0xff]  }
 0x16e   : > { %v2719_v38 = vrot.slane %v2717_v60, 4  ;;  %v2897_v16 = vrot.slane %v2818_v36, 4  ;;  %2410 = vst.msk [vmem:[#allocation3 + $0x48] sm:$0xff] %vm2400_vm10, %v2371_v3  ;;  %v3235_v20 = vshrl.u32 %v2992_v57, 16  ;;  %v3238_v7 = vshll.u32 %v2992_v57, 16  ;;  %8643 = vmatprep.subr.bf16.mxu1 %v8682_v43  ;;  %v2741_v61 = vpop.permute.xlu1 %2740  ;;  %v8685_v6 = vld [vmem:[%s11322_s7 + $0x18] sm:$0xff]  }
 0x16f   : > { %v2895_v51 = vsel %vm1018_vm4, %v2893_v4, %v2894_v59  ;;  %v3243_v37 = vshrl.u32 %v2993_v13, 16  ;;  %v2704_v28 = vsel %vm649_vm5, %v2695_v48, %v2703_v11  ;;  %v3246_v47 = vshll.u32 %v2993_v13, 16  ;;  %v637_v9 = vld [vmem:[#allocation2 + $0xa0] sm:$0xf8]  ;;  %2956 = vst.msk [vmem:[#allocation3 + $0x40] sm:$0xff] %vm2947_vm12, %v2916_v46  ;;  %v3285_v17 = vpop.permute.xlu0 %3284  ;;  %v8686_v39 = vld [vmem:[%s11322_s7 + $0x60] sm:$0xff]  }
 0x170   : > { %v2720_v56 = vor.u32 %v2719_v38, %v2716_v54  ;;  %v9933_v42 = vsel %vm1018_vm4, %v2896_v49, %v2897_v16  ;;  %2750 = vrot.lane.b32.xlu0 %v2704_v28, %s8840_s25  ;;  %v3237_v50 = vrot.slane %v3235_v20, 4  ;;  %v3240_v45 = vrot.slane %v3238_v7, 5  ;;  %8160 = vmatpush3.bf16.msra.mxu0 %v8683_v34  ;;  %2780 = vst.msk [vmem:[#allocation3 + $0x48] sm:$0xff] %vm2770_vm11, %v2741_v61  ;;  %v638_v29 = vld [vmem:[#allocation2 + $0xa8] sm:$0xf]  ;;  %v8687_v27 = vld [vmem:[%s11322_s7 + $0x20] sm:$0xff]  }
 0x171   : > { %v3245_v33 = vrot.slane %v3243_v37, 4  ;;  %v3252_v53 = vshrl.u32 %v2994_v40, 16  ;;  %2382 = vrot.lane.b32.xlu1 %v2351_v63, %s8839_s24  ;;  %v3248_v19 = vrot.slane %v3246_v47, 5  ;;  %v3255_v25 = vshll.u32 %v2994_v40, 16  ;;  %8651 = vmatpush3.bf16.msra.mxu1 %v8683_v34  ;;  %v639_v58 = vld [vmem:[#allocation2 + $0xb0] sm:$0xf8] }
 0x172   : > { %v2721_v1 = vsel %vm649_vm5, %v2712_v55, %v2720_v56  ;;  %v3260_v35 = vshrl.u32 %v2995_v32, 16  ;;  %v3241_v21 = vor.u32 %v3240_v45, %v3237_v50  ;;  %v3263_v31 = vshll.u32 %v2995_v32, 16  ;;  %8161 = vmatprep.subr.bf16.mxu0 %v8684_v22  ;;  %8644 = vmatprep.subr.bf16.mxu1 %v8684_v22  ;;  %v2918_v23 = vpop.permute.xlu1 %2917  ;;  %3325 = vst.msk [vmem:[#allocation3 + $0x40] sm:$0xff] %vm3316_vm13, %v3285_v17  ;;  %v640_v57 = vld [vmem:[#allocation2 + $0xb8] sm:$0xf]  ;;  %v8688_v20 = vld [vmem:[%s11322_s7 + $0x68] sm:$0xff]  }
 0x173   : > { %v3254_v30 = vrot.slane %v3252_v53, 4  ;;  %v821_v10 = vshrl.u32 %v637_v9, 16  ;;  %v3249_v12 = vor.u32 %v3248_v19, %v3245_v33  ;;  %v3257_v52 = vrot.slane %v3255_v25, 5  ;;  %2957 = vst.msk [vmem:[#allocation3 + $0x48] sm:$0xff] %vm2947_vm12, %v2918_v23  ;;  %v641_v44 = vld [vmem:[#allocation2 + $0xc0] sm:$0xf8]  ;;  %v1088_v48 = vpop.permute.xlu0 %1087 }
 0x174   : > { %v3262_v15 = vrot.slane %v3260_v35, 4  ;;  %v824_v36 = vshll.u32 %v637_v9, 16  ;;  %2927 = vrot.lane.b32.xlu0 %v2895_v51, %s8837_s22  ;;  %v3265_v5 = vrot.slane %v3263_v31, 5  ;;  %v829_v14 = vshrl.u32 %v638_v29, 16  ;;  %8162 = vmatpush3.bf16.msra.mxu0 %v8685_v6  ;;  %v642_v4 = vld [vmem:[#allocation2 + $0xc8] sm:$0xf] }
 0x175   : > { %v823_v2 = vrot.slane %v821_v10, 3  ;;  %v832_v8 = vshll.u32 %v638_v29, 16  ;;  %2752 = vrot.lane.b32.xlu1 %v2721_v1, %s8840_s25  ;;  %v3250_v13 = vsel %vm1164_vm3, %v3241_v21, %v3249_v12  ;;  %v3258_v24 = vor.u32 %v3257_v52, %v3254_v30  ;;  %8652 = vmatpush3.bf16.msra.mxu1 %v8685_v6  ;;  %v643_v11 = vld [vmem:[#allocation2 + $0xd0] sm:$0xf8]  ;;  %v644_v51 = vld [vmem:[#allocation2 + $0xd8] sm:$0xf] }
 0x176   : > { %v826_v18 = vrot.slane %v824_v36, 4  ;;  %v838_v62 = vshrl.u32 %v639_v58, 16  ;;  %v3266_v26 = vor.u32 %v3265_v5, %v3262_v15  ;;  %v831_v41 = vrot.slane %v829_v14, 3  ;;  %8163 = vmatprep.subr.bf16.mxu0 %v8686_v39  ;;  %8645 = vmatprep.subr.bf16.mxu1 %v8686_v39  ;;  %v3287_v49 = vpop.permute.xlu1 %3286  ;;  %v8689_v7 = vld [vmem:[%s11322_s7 + $0x28] sm:$0xff]   ;;  %v8690_v56 = vld [vmem:[%s11322_s7 + $0x70] sm:$0xff]   ;;  %v8692_v15 = vld [vmem:[%s11322_s7 + $0x78] sm:$0xff]  }
 0x177   : > { %v834_v54 = vrot.slane %v832_v8, 4  ;;  %v841_v60 = vshll.u32 %v639_v58, 16  ;;  %v846_v59 = vshrl.u32 %v640_v57, 16  ;;  %v849_v3 = vshll.u32 %v640_v57, 16  ;;  %3326 = vst.msk [vmem:[#allocation3 + $0x48] sm:$0xff] %vm3316_vm13, %v3287_v49  ;;  %v1458_v33 = vpop.permute.xlu0 %1457  ;;  %v8691_v31 = vld [vmem:[%s11322_s7 + $0x30] sm:$0xff]  }
 0x178   : > { %v827_v63 = vor.u32 %v826_v18, %v823_v2  ;;  %v840_v55 = vrot.slane %v838_v62, 3  ;;  %3296 = vrot.lane.b32.xlu0 %v3250_v13, %s8841_s26  ;;  %v3267_v38 = vsel %vm1164_vm3, %v3258_v24, %v3266_v26  ;;  %v855_v43 = vshrl.u32 %v641_v44, 16  ;;  %8164 = vmatpush3.bf16.msra.mxu0 %v8687_v27  ;;  %v645_v45 = vld [vmem:[#allocation2 + $0xe0] sm:$0xf8]  ;;  %v646_v25 = vld [vmem:[#allocation2 + $0xe8] sm:$0xf] }
 0x179   : > { %v835_v16 = vor.u32 %v834_v54, %v831_v41  ;;  %v843_v40 = vrot.slane %v841_v60, 4  ;;  %2929 = vrot.lane.b32.xlu1 %v9933_v42, %s8837_s22  ;;  %v848_v37 = vrot.slane %v846_v59, 3  ;;  %v851_v32 = vrot.slane %v849_v3, 4  ;;  %8653 = vmatpush3.bf16.msra.mxu1 %v8687_v27  ;;  %v3341_v53 = vld [vmem:[#allocation3 + $0x40] sm:$0xff]  ;;  %v647_v52 = vld [vmem:[#allocation2 + $0xf0] sm:$0xf8] }
 0x17a   : > { %v858_v34 = vshll.u32 %v641_v44, 16  ;;  %v863_v28 = vshrl.u32 %v642_v4, 16  ;;  %v857_v9 = vrot.slane %v855_v43, 3  ;;  %v866_v50 = vshll.u32 %v642_v4, 16  ;;  %8165 = vmatprep.subr.bf16.mxu0 %v8688_v20  ;;  %8646 = vmatprep.subr.bf16.mxu1 %v8688_v20  ;;  %v1090_v35 = vpop.permute.xlu1 %1089  ;;  %v648_v2 = vld [vmem:[#allocation2 + $0xf8] sm:$0xf] }
 0x17b   : > { %v836_v47 = vsel %vm649_vm5, %v827_v63, %v835_v16  ;;  %v844_v46 = vor.u32 %v843_v40, %v840_v55  ;;  %v852_v42 = vor.u32 %v851_v32, %v848_v37  ;;  %v872_v19 = vshrl.u32 %v643_v11, 16  ;;  %8625 = vmatprep.mubr.msk.bf16.mxu0 %vm3376_vm14, %v3341_v53  ;;  %v1827_v14 = vpop.permute.xlu0 %1826  ;;  %v8693_v18 = vld [vmem:[%s11322_s7 + $0x38] sm:$0xff]   ;;  %v4174_v60 = vld [vmem:[#allocation4] sm:$0xf0]  ;;  %v4175_v4 = vld [vmem:[#allocation4 + $0x8] sm:$0xf] }
 0x17c   : > { %948 = vst.msk [vmem:[#allocation3 + $0x50] sm:$0xff] %vm492_vm0, %v836_v47  ;;  %v860_v61 = vrot.slane %v858_v34, 4  ;;  %v865_v1 = vrot.slane %v863_v28, 3  ;;  %v868_v29 = vrot.slane %v866_v50, 4  ;;  %v875_v22 = vshll.u32 %v643_v11, 16  ;;  %8166 = vmatpush3.bf16.msra.mxu0 %v8689_v7 }
 0x17d   : > { %1126 = vst.msk [vmem:[#allocation3 + $0x50] sm:$0xff] %vm1115_vm6, %v1088_v48  ;;  %v880_v21 = vshrl.u32 %v644_v51, 16  ;;  %v883_v30 = vshll.u32 %v644_v51, 16  ;;  %3298 = vrot.lane.b32.xlu1 %v3267_v38, %s8841_s26  ;;  %v853_v10 = vsel %vm649_vm5, %v844_v46, %v852_v42  ;;  %v874_v6 = vrot.slane %v872_v19, 3  ;;  %8167 = vmatprep.subr.bf16.mxu0 %v8690_v56  ;;  %v3838_v59 = vld [vmem:[#allocation4] sm:$0xf8] }
 0x17e   : > { %1496 = vst.msk [vmem:[#allocation3 + $0x50] sm:$0xff] %vm1485_vm7, %v1458_v33  ;;  %v861_v58 = vor.u32 %v860_v61, %v857_v9  ;;  %v889_v12 = vshrl.u32 %v645_v45, 16  ;;  %v869_v17 = vor.u32 %v868_v29, %v865_v1  ;;  %v877_v36 = vrot.slane %v875_v22, 4  ;;  %8654 = vmatpush3.bf16.msra.mxu1 %v8689_v7  ;;  %v1460_v62 = vpop.permute.xlu1 %1459  ;;  %v3342_v44 = vld [vmem:[#allocation3 + $0x48] sm:$0xff] }
 0x17f   : > { %949 = vst.msk [vmem:[#allocation3 + $0x58] sm:$0xff] %vm492_vm0, %v853_v10  ;;  %v882_v5 = vrot.slane %v880_v21, 3  ;;  %v885_v23 = vrot.slane %v883_v30, 4  ;;  %v892_v57 = vshll.u32 %v645_v45, 16  ;;  %v897_v13 = vshrl.u32 %v646_v25, 16  ;;  %8647 = vmatprep.subr.bf16.mxu1 %v8690_v56  ;;  %8626 = vmatmul.mubr.msk.bf16.gmra.mrb[16].mxu0 %vm3376_vm14, %v3342_v44  ;;  %v2004_v40 = vpop.permute.xlu0 %2003  ;;  %v8694_v10 = vld [vmem:[%s11322_s7 + $0xc0] sm:$0xff]  }
 0x180   : > { %1127 = vst.msk [vmem:[#allocation3 + $0x58] sm:$0xff] %vm1115_vm6, %v1090_v35  ;;  %v891_v8 = vrot.slane %v889_v12, 3  ;;  %v900_v24 = vshll.u32 %v646_v25, 16  ;;  %v870_v39 = vsel %vm649_vm5, %v861_v58, %v869_v17  ;;  %v878_v26 = vor.u32 %v877_v36, %v874_v6  ;;  %8168 = vmatpush3.bf16.msra.mxu0 %v8691_v31  ;;  %v3839_v16 = vld [vmem:[#allocation4 + $0x8] sm:$0xf] }
 0x181   : > { %1865 = vst.msk [vmem:[#allocation3 + $0x50] sm:$0xff] %vm1854_vm8, %v1827_v14  ;;  %v886_v41 = vor.u32 %v885_v23, %v882_v5  ;;  %v906_v54 = vshrl.u32 %v647_v52, 16  ;;  %v894_v27 = vrot.slane %v892_v57, 4  ;;  %v899_v63 = vrot.slane %v897_v13, 3  ;;  %8169 = vmatprep.subr.bf16.mxu0 %v8692_v15  ;;  %v4319_v14 = vld [vmem:[#allocation4 + $0x8] sm:$0x1f] }
 0x182   : > { %1497 = vst.msk [vmem:[#allocation3 + $0x58] sm:$0xff] %vm1485_vm7, %v1460_v62  ;;  %v902_v48 = vrot.slane %v900_v24, 4  ;;  %v909_v55 = vshll.u32 %v647_v52, 16  ;;  %v914_v38 = vshrl.u32 %v648_v2, 16  ;;  %v917_v49 = vshll.u32 %v648_v2, 16  ;;  %8655 = vmatpush3.bf16.msra.mxu1 %v8691_v31 }
 0x183   : > { %950 = vst.msk [vmem:[#allocation3 + $0x60] sm:$0xff] %vm492_vm0, %v870_v39  ;;  %v887_v3 = vsel %vm649_vm5, %v878_v26, %v886_v41  ;;  %v908_v11 = vrot.slane %v906_v54, 3  ;;  %v895_v43 = vor.u32 %v894_v27, %v891_v8  ;;  %v4238_v7 = vrot.slane %v4174_v60, 4  ;;  %8648 = vmatprep.subr.bf16.mxu1 %v8692_v15  ;;  %v2373_v53 = vpop.permute.xlu0 %2372  ;;  %v4318_v2 = vld [vmem:[#allocation4] sm:$0xf0] }
 0x184   : > { %951 = vst.msk [vmem:[#allocation3 + $0x68] sm:$0xff] %vm492_vm0, %v887_v3  ;;  %v903_v51 = vor.u32 %v902_v48, %v899_v63  ;;  %v911_v20 = vrot.slane %v909_v55, 4  ;;  %v916_v37 = vrot.slane %v914_v38, 3  ;;  %v919_v32 = vrot.slane %v917_v49, 4  ;;  %8170 = vmatpush3.bf16.msra.mxu0 %v8693_v18 }
 0x185   : > { %2042 = vst.msk [vmem:[#allocation3 + $0x50] sm:$0xff] %vm2031_vm9, %v2004_v40  ;;  %v4239_v34 = vrot.slane %v4175_v4, 4  ;;  %v3871_v28 = vshrl.u32 %v3838_v59, 16  ;;  %v3874_v46 = vshll.u32 %v3838_v59, 16  ;;  %v3879_v9 = vshrl.u32 %v3839_v16, 16  ;;  %8267 = vmatprep.subr.bf16.mxu0 %v8694_v10 }
 0x186   : > { %v904_v56 = vsel %vm649_vm5, %v895_v43, %v903_v51  ;;  %v912_v47 = vor.u32 %v911_v20, %v908_v11  ;;  %v920_v50 = vor.u32 %v919_v32, %v916_v37  ;;  %v3882_v33 = vshll.u32 %v3839_v16, 16  ;;  %8656 = vmatpush3.bf16.msra.mxu1 %v8693_v18  ;;  %2411 = vst.msk [vmem:[#allocation3 + $0x50] sm:$0xff] %vm2400_vm10, %v2373_v53  ;;  %v1829_v35 = vpop.permute.xlu1 %1828  ;;  %v10040_v16 = vld [vmem:[%s11319_s4] ss:$0 sm:$0xff] }
 0x187   : > { %952 = vst.msk [vmem:[#allocation3 + $0x70] sm:$0xff] %vm492_vm0, %v904_v56  ;;  %v10000_v45 = vsel %vm1018_vm4, %v4238_v7, %v4239_v34  ;;  %v3873_v42 = vrot.slane %v3871_v28, 3  ;;  %v3876_v61 = vrot.slane %v3874_v46, 4  ;;  %v3881_v1 = vrot.slane %v3879_v9, 3  ;;  %v10045_v43 = vld [vmem:[%s11320_s5] ss:$0 sm:$0xff] }
 0x188   : > { %v921_v19 = vsel %vm649_vm5, %v912_v47, %v920_v50  ;;  %v3884_v25 = vrot.slane %v3882_v33, 4  ;;  %1866 = vst.msk [vmem:[#allocation3 + $0x58] sm:$0xff] %vm1854_vm8, %v1829_v35  ;;  %v4351_v8 = vshrl.u32 %v4318_v2, 16  ;;  %v4354_v57 = vshll.u32 %v4318_v2, 16  ;;  %v10052_v37 = vld [vmem:[%s11321_s6] ss:$0 sm:$0xff] }
 0x189   : > { %953 = vst.msk [vmem:[#allocation3 + $0x78] sm:$0xff] %vm492_vm0, %v921_v19  ;;  %v3877_v29 = vor.u32 %v3876_v61, %v3873_v42  ;;  %v4359_v13 = vshrl.u32 %v4319_v14, 16  ;;  %v4362_v24 = vshll.u32 %v4319_v14, 16 }
 0x18a   : > { %v3885_v22 = vor.u32 %v3884_v25, %v3881_v1  ;;  %v2006_v30 = vpop.permute.xlu1 %2005  ;;  %v4353_v18 = vrot.slane %v4351_v8, 4  ;;  %v4356_v62 = vrot.slane %v4354_v57, 5 }
 0x18b   : > { %2043 = vst.msk [vmem:[#allocation3 + $0x58] sm:$0xff] %vm2031_vm9, %v2006_v30  ;;  %v4361_v44 = vrot.slane %v4359_v13, 4  ;;  %v4364_v39 = vrot.slane %v4362_v24, 5 }
 0x18c   : > { %v10007_v21 = vsel %vm649_vm5, %v3877_v29, %v3885_v22  ;;  %v4357_v54 = vor.u32 %v4356_v62, %v4353_v18 }
 0x18d   : > { %v2743_v31 = vpop.permute.xlu0 %2742  ;;  %v4365_v60 = vor.u32 %v4364_v39, %v4361_v44 }
 0x18e   : > { %v2375_v58 = vpop.permute.xlu1 %2374  ;;  %2781 = vst.msk [vmem:[#allocation3 + $0x50] sm:$0xff] %vm2770_vm11, %v2743_v31 }
 0x18f   : > { %2412 = vst.msk [vmem:[#allocation3 + $0x58] sm:$0xff] %vm2400_vm10, %v2375_v58  ;;  %v10026_v4 = vsel %vm1164_vm3, %v4357_v54, %v4365_v60 }
 0x191   : > { %v2920_v6 = vpop.permute.xlu0 %2919 }
 0x192   : > { %2958 = vst.msk [vmem:[#allocation3 + $0x50] sm:$0xff] %vm2947_vm12, %v2920_v6 }
 0x195   : > { %v3289_v12 = vpop.permute.xlu0 %3288 }
 0x196   : > { %3327 = vst.msk [vmem:[#allocation3 + $0x50] sm:$0xff] %vm3316_vm13, %v3289_v12 }
 0x198   : > { %v2745_v52 = vpop.permute.xlu1 %2744 }
 0x199   : > { %2782 = vst.msk [vmem:[#allocation3 + $0x58] sm:$0xff] %vm2770_vm11, %v2745_v52  ;;  %v1092_v15 = vpop.permute.xlu0 %1091 }
 0x19a   : > { %1128 = vst.msk [vmem:[#allocation3 + $0x60] sm:$0xff] %vm1115_vm6, %v1092_v15 }
 0x19c   : > { %v2922_v17 = vpop.permute.xlu1 %2921 }
 0x19d   : > { %2959 = vst.msk [vmem:[#allocation3 + $0x58] sm:$0xff] %vm2947_vm12, %v2922_v17  ;;  %v1462_v36 = vpop.permute.xlu0 %1461  ;;  %v3343_v5 = vld [vmem:[#allocation3 + $0x50] sm:$0xff] }
 0x19e   : > { %1498 = vst.msk [vmem:[#allocation3 + $0x60] sm:$0xff] %vm1485_vm7, %v1462_v36  ;;  %8629 = vmatprep.mubr.msk.bf16.mxu0 %vm3376_vm14, %v3343_v5 }
 0x1a0   : > { %v3291_v23 = vpop.permute.xlu1 %3290 }
 0x1a1   : > { %3328 = vst.msk [vmem:[#allocation3 + $0x58] sm:$0xff] %vm3316_vm13, %v3291_v23 }
 0x1a3   : > { %v1831_v41 = vpop.permute.xlu0 %1830 }
 0x1a4   : > { %v1094_v26 = vpop.permute.xlu1 %1093  ;;  %1867 = vst.msk [vmem:[#allocation3 + $0x60] sm:$0xff] %vm1854_vm8, %v1831_v41 }
 0x1a5   : > { %1129 = vst.msk [vmem:[#allocation3 + $0x68] sm:$0xff] %vm1115_vm6, %v1094_v26 }
 0x1a7   : > { %v2008_v48 = vpop.permute.xlu0 %2007 }
 0x1a8   : > { %v1464_v27 = vpop.permute.xlu1 %1463  ;;  %v3344_v63 = vld [vmem:[#allocation3 + $0x58] sm:$0xff]  ;;  %2044 = vst.msk [vmem:[#allocation3 + $0x60] sm:$0xff] %vm2031_vm9, %v2008_v48 }
 0x1a9   : > { %1499 = vst.msk [vmem:[#allocation3 + $0x68] sm:$0xff] %vm1485_vm7, %v1464_v27  ;;  %8630 = vmatmul.mubr.msk.bf16.gmra.mrb[20].mxu0 %vm3376_vm14, %v3344_v63 }
 0x1ab   : > { %v2377_v55 = vpop.permute.xlu0 %2376 }
 0x1ac   : > { %2413 = vst.msk [vmem:[#allocation3 + $0x60] sm:$0xff] %vm2400_vm10, %v2377_v55 }
 0x1ae   : > { %v1833_v59 = vpop.permute.xlu1 %1832 }
 0x1af   : > { %1868 = vst.msk [vmem:[#allocation3 + $0x68] sm:$0xff] %vm1854_vm8, %v1833_v59 }
 0x1b2   : > { %v2010_v3 = vpop.permute.xlu1 %2009 }
 0x1b3   : > { %2045 = vst.msk [vmem:[#allocation3 + $0x68] sm:$0xff] %vm2031_vm9, %v2010_v3 }
 0x1b5   : > { %v2747_v11 = vpop.permute.xlu0 %2746 }
 0x1b6   : > { %v2379_v38 = vpop.permute.xlu1 %2378  ;;  %2783 = vst.msk [vmem:[#allocation3 + $0x60] sm:$0xff] %vm2770_vm11, %v2747_v11  ;;  %v8611_v40 = vpop.f32.mrb[0].mxu0 }
 0x1b7   : > { %2414 = vst.msk [vmem:[#allocation3 + $0x68] sm:$0xff] %vm2400_vm10, %v2379_v38  ;;  %v3472_v20 = vadd.f32 %v8611_v40, %v10040_v16  ;;  %v3463_v7 = vpop.f32.mrb[1].mxu0 }
 0x1b8   : > { %v3464_v32 = vadd.f32 %v10040_v16, %v3463_v7  ;;  %v8612_v34 = vpop.f32.mrb[2].mxu0 }
 0x1b9   : > { %v2924_v49 = vpop.permute.xlu0 %2923  ;;  %v3599_v28 = vmul.f32 %v10045_v43, %v3472_v20  ;;  %v3475_v56 = vadd.f32 %v8612_v34, %v10040_v16  ;;  %v3466_v47 = vpop.f32.mrb[3].mxu0 }
 0x1ba   : > { %2960 = vst.msk [vmem:[#allocation3 + $0x60] sm:$0xff] %vm2947_vm12, %v2924_v49  ;;  %v3597_v46 = vmul.f32 %v10045_v43, %v3464_v32  ;;  %v3467_v9 = vadd.f32 %v10040_v16, %v3466_v47 }
 0x1bb   : > { %v3638_v42 = vadd.f32 %v10052_v37, %v3599_v28  ;;  %v3600_v33 = vmul.f32 %v10045_v43, %v3475_v56 }
 0x1bc   : > { %v3636_v53 = vadd.f32 %v10052_v37, %v3597_v46  ;;  %v3598_v61 = vmul.f32 %v10045_v43, %v3467_v9 }
 0x1bd   : > { %v3293_v51 = vpop.permute.xlu0 %3292  ;;  %v3639_v1 = vadd.f32 %v10052_v37, %v3600_v33  ;;  %v3670_v22 = vmax.f32 %v3638_v42, 0.0 }
 0x1be   : > { %3329 = vst.msk [vmem:[#allocation3 + $0x60] sm:$0xff] %vm3316_vm13, %v3293_v51  ;;  %v3637_v25 = vadd.f32 %v10052_v37, %v3598_v61  ;;  %v3668_v31 = vmax.f32 %v3636_v53, 0.0 }
 0x1bf   : > { %v3671_v30 = vmax.f32 %v3639_v1, 0.0 }
 0x1c0   : > { %v3669_v10 = vmax.f32 %v3637_v25, 0.0 }
 0x1c1   : > { %v1096_v50 = vpop.permute.xlu0 %1095  ;;  %v3701_v58 = vpack.c.bf16 %v3671_v30, %v3670_v22 }
 0x1c2   : > { %1130 = vst.msk [vmem:[#allocation3 + $0x70] sm:$0xff] %vm1115_vm6, %v1096_v50  ;;  %v3700_v12 = vpack.c.bf16 %v3669_v10, %v3668_v31 }
 0x1c3   : > { %v3774_v52 = vrot.slane %v3701_v58, 4 }
 0x1c4   : > { %v3773_v15 = vrot.slane %v3700_v12, 4 }
 0x1c5   : > { %v1466_v35 = vpop.permute.xlu0 %1465  ;;  %v3345_v29 = vld [vmem:[#allocation3 + $0x60] sm:$0xff]  ;;  %3808 = vst [vmem:[#allocation4 + $0x28] ss:$-4 sps:$4 sm:$0xff] %v3774_v52  }
 0x1c6   : > { %v2749_v19 = vpop.permute.xlu1 %2748  ;;  %1500 = vst.msk [vmem:[#allocation3 + $0x70] sm:$0xff] %vm1485_vm7, %v1466_v35  ;;  %8633 = vmatprep.mubr.msk.bf16.mxu0 %vm3376_vm14, %v3345_v29  ;;  %3806 = vst [vmem:[#allocation4 + $0x18] ss:$-4 sps:$4 sm:$0xff] %v3773_v15  }
 0x1c7   : > { %2784 = vst.msk [vmem:[#allocation3 + $0x68] sm:$0xff] %vm2770_vm11, %v2749_v19 }
 0x1ca   : > { %v2926_v6 = vpop.permute.xlu1 %2925 }
 0x1cb   : > { %2961 = vst.msk [vmem:[#allocation3 + $0x68] sm:$0xff] %vm2947_vm12, %v2926_v6 }
 0x1cc   : > { %v5471_v8 = vld [vmem:[#allocation4 + $0x20] sm:$0xf8]  ;;  %v5472_v57 = vld [vmem:[#allocation4 + $0x28] sm:$0xf] }
 0x1cd   : > { %v5504_v24 = vshrl.u32 %v5471_v8, 16  ;;  %v5507_v18 = vshll.u32 %v5471_v8, 16  ;;  %v5512_v62 = vshrl.u32 %v5472_v57, 16  ;;  %v5515_v44 = vshll.u32 %v5472_v57, 16  ;;  %v10077_v39 = vld [vmem:[#allocation4 + $0x20] sm:$0xf8] }
 0x1ce   : > { %v3295_v17 = vpop.permute.xlu1 %3294  ;;  %v3840_v63 = vld [vmem:[#allocation4 + $0x10] sm:$0xf8]  ;;  %v10082_v3 = vld [vmem:[#allocation4 + $0x18] sm:$0xf]  ;;  %v3905_v11 = vshrl.u32 %v10077_v39, 16 }
 0x1cf   : > { %3330 = vst.msk [vmem:[#allocation3 + $0x68] sm:$0xff] %vm3316_vm13, %v3295_v17  ;;  %v1835_v36 = vpop.permute.xlu0 %1834  ;;  %v5506_v26 = vrot.slane %v5504_v24, 3  ;;  %v5509_v41 = vrot.slane %v5507_v18, 4  ;;  %v5514_v54 = vrot.slane %v5512_v62, 3  ;;  %v5517_v60 = vrot.slane %v5515_v44, 4 }
 0x1d0   : > { %1869 = vst.msk [vmem:[#allocation3 + $0x70] sm:$0xff] %vm1854_vm8, %v1835_v36  ;;  %v10080_v59 = vld [vmem:[#allocation4 + $0x10] sm:$0xf0]  ;;  %v3841_v38 = vld [vmem:[#allocation4 + $0x18] sm:$0xf]  ;;  %v5055_v40 = vrot.slane %v10082_v3, 4 }
 0x1d1   : > { %v5510_v48 = vor.u32 %v5509_v41, %v5506_v26  ;;  %v5518_v55 = vor.u32 %v5517_v60, %v5514_v54  ;;  %v5054_v49 = vrot.slane %v10080_v59, 4  ;;  %v3888_v20 = vshrl.u32 %v3840_v63, 16  ;;  %v4176_v56 = vld [vmem:[#allocation4 + $0x10] sm:$0xf0]  ;;  %v4177_v47 = vld [vmem:[#allocation4 + $0x18] sm:$0xf] }
 0x1d2   : > { %v1098_v5 = vpop.permute.xlu1 %1097  ;;  %v3891_v46 = vshll.u32 %v3840_v63, 16  ;;  %v4241_v42 = vrot.slane %v4176_v56, 4  ;;  %v4242_v33 = vrot.slane %v4177_v47, 4  ;;  %v3896_v35 = vshrl.u32 %v3841_v38, 16  ;;  %v4178_v29 = vld [vmem:[#allocation4 + $0x20] sm:$0xf0] }
 0x1d3   : > { %1131 = vst.msk [vmem:[#allocation3 + $0x78] sm:$0xff] %vm1115_vm6, %v1098_v5  ;;  %v2012_v23 = vpop.permute.xlu0 %2011  ;;  %v8615_v51 = vpop.f32.mrb[4].mxu0  ;;  %v5519_v7 = vsel %vm649_vm5, %v5510_v48, %v5518_v55  ;;  %v3890_v53 = vrot.slane %v3888_v20, 3  ;;  %v3899_v58 = vshll.u32 %v3841_v38, 16  ;;  %v4179_v6 = vld [vmem:[#allocation4 + $0x28] sm:$0xf] }
 0x1d4   : > { %2046 = vst.msk [vmem:[#allocation3 + $0x70] sm:$0xff] %vm2031_vm9, %v2012_v23  ;;  %v3488_v34 = vadd.f32 %v8615_v51, %v10040_v16  ;;  %v3479_v28 = vpop.f32.mrb[5].mxu0  ;;  %5791 = vst [vmem:[#allocation5 + $0x30] sm:$0xff] %v5519_v7  ;;  %v3893_v25 = vrot.slane %v3891_v46, 4  ;;  %v10096_v10 = vsel %vm1018_vm4, %v4241_v42, %v4242_v33  ;;  %v3898_v36 = vrot.slane %v3896_v35, 3 }
 0x1d5   : > { %v3480_v9 = vadd.f32 %v10040_v16, %v3479_v28  ;;  %v8616_v50 = vpop.f32.mrb[6].mxu0  ;;  %v3843_v5 = vld [vmem:[#allocation4 + $0x28] sm:$0xf]  ;;  %v4244_v8 = vrot.slane %v4178_v29, 4  ;;  %v4654_v57 = vld [vmem:[#allocation4 + $0x10] sm:$0xf8] }
 0x1d6   : > { %v1468_v2 = vpop.permute.xlu1 %1467  ;;  %v3346_v14 = vld [vmem:[#allocation3 + $0x68] sm:$0xff]  ;;  %v3603_v61 = vmul.f32 %v10045_v43, %v3488_v34  ;;  %v3491_v1 = vadd.f32 %v8616_v50, %v10040_v16  ;;  %v3482_v19 = vpop.f32.mrb[7].mxu0  ;;  %v3894_v17 = vor.u32 %v3893_v25, %v3890_v53  ;;  %v4245_v18 = vrot.slane %v4179_v6, 4  ;;  %v4655_v63 = vld [vmem:[#allocation4 + $0x18] sm:$0xf] }
 0x1d7   : > { %1501 = vst.msk [vmem:[#allocation3 + $0x78] sm:$0xff] %vm1485_vm7, %v1468_v2  ;;  %8634 = vmatmul.mubr.msk.bf16.gmra.mrb[24].mxu0 %vm3376_vm14, %v3346_v14  ;;  %v2381_v13 = vpop.permute.xlu0 %2380  ;;  %v3601_v30 = vmul.f32 %v10045_v43, %v3480_v9  ;;  %v3483_v31 = vadd.f32 %v10040_v16, %v3482_v19  ;;  %v3901_v14 = vrot.slane %v3899_v58, 4  ;;  %v3907_v62 = vrot.slane %v3905_v11, 3  ;;  %v4656_v34 = vld [vmem:[#allocation4 + $0x20] sm:$0xf8] }
 0x1d8   : > { %2415 = vst.msk [vmem:[#allocation3 + $0x70] sm:$0xff] %vm2400_vm10, %v2381_v13  ;;  %v3642_v52 = vadd.f32 %v10052_v37, %v3603_v61  ;;  %v3604_v15 = vmul.f32 %v10045_v43, %v3491_v1  ;;  %v3908_v60 = vshll.u32 %v10077_v39, 16  ;;  %v10109_v55 = vsel %vm1018_vm4, %v4244_v8, %v4245_v18  ;;  %v4657_v9 = vld [vmem:[#allocation4 + $0x28] sm:$0xf]  ;;  %v4320_v1 = vld [vmem:[#allocation4 + $0x10] sm:$0xf0] }
 0x1d9   : > { %v3640_v23 = vadd.f32 %v10052_v37, %v3601_v30  ;;  %v3602_v2 = vmul.f32 %v10045_v43, %v3483_v31  ;;  %v3902_v54 = vor.u32 %v3901_v14, %v3898_v36  ;;  %v3913_v38 = vshrl.u32 %v3843_v5, 16 }
 0x1da   : > { %v3674_v13 = vmax.f32 %v3642_v52, 0.0  ;;  %v3643_v24 = vadd.f32 %v10052_v37, %v3604_v15  ;;  %v3916_v51 = vshll.u32 %v3843_v5, 16  ;;  %v3910_v7 = vrot.slane %v3908_v60, 4 }
 0x1db   : > { %v1837_v27 = vpop.permute.xlu1 %1836  ;;  %v3672_v26 = vmax.f32 %v3640_v23, 0.0  ;;  %v3641_v41 = vadd.f32 %v10052_v37, %v3602_v2  ;;  %v10113_v20 = vsel %vm649_vm5, %v3894_v17, %v3902_v54  ;;  %v3915_v28 = vrot.slane %v3913_v38, 3 }
 0x1dc   : > { %1870 = vst.msk [vmem:[#allocation3 + $0x78] sm:$0xff] %vm1854_vm8, %v1837_v27  ;;  %v3675_v48 = vmax.f32 %v3643_v24, 0.0  ;;  %v3918_v56 = vrot.slane %v3916_v51, 4  ;;  %v4690_v47 = vshll.u32 %v4654_v57, 16  ;;  %v3911_v42 = vor.u32 %v3910_v7, %v3907_v62  ;;  %v10125_v51 = vld [vmem:[#allocation4 + $0x20] sm:$0xf0] }
 0x1dd   : > { %v3673_v11 = vmax.f32 %v3641_v41, 0.0  ;;  %v4695_v53 = vshrl.u32 %v4655_v63, 16  ;;  %v4698_v29 = vshll.u32 %v4655_v63, 16  ;;  %v4704_v58 = vshrl.u32 %v4656_v34, 16 }
 0x1de   : > { %v3703_v39 = vpack.c.bf16 %v3675_v48, %v3674_v13  ;;  %v3919_v25 = vor.u32 %v3918_v56, %v3915_v28  ;;  %v4692_v35 = vrot.slane %v4690_v47, 4  ;;  %v4707_v6 = vshll.u32 %v4656_v34, 16 }
 0x1df   : > { %v2014_v32 = vpop.permute.xlu1 %2013  ;;  %v3702_v50 = vpack.c.bf16 %v3673_v11, %v3672_v26  ;;  %v4697_v31 = vrot.slane %v4695_v53, 3  ;;  %v4700_v15 = vrot.slane %v4698_v29, 4  ;;  %v4712_v17 = vshrl.u32 %v4657_v9, 16 }
 0x1e0   : > { %2047 = vst.msk [vmem:[#allocation3 + $0x78] sm:$0xff] %vm2031_vm9, %v2014_v32  ;;  %v4687_v32 = vshrl.u32 %v4654_v57, 16  ;;  %v3776_v19 = vrot.slane %v3703_v39, 4  ;;  %v4706_v36 = vrot.slane %v4704_v58, 3  ;;  %v4709_v5 = vrot.slane %v4707_v6, 4 }
 0x1e1   : > { %v3775_v30 = vrot.slane %v3702_v50, 4  ;;  %v4715_v23 = vshll.u32 %v4657_v9, 16  ;;  %v4368_v2 = vshrl.u32 %v4320_v1, 16  ;;  %v4701_v8 = vor.u32 %v4700_v15, %v4697_v31  ;;  %v10138_v39 = vld [vmem:[#allocation4 + $0x28] sm:$0x1f]  ;;  %v8695_v50 = vld [vmem:[%s11322_s7 + $0x80] sm:$0xff]  }
 0x1e2   : > { %v2751_v22 = vpop.permute.xlu0 %2750  ;;  %v4689_v33 = vrot.slane %v4687_v32, 3  ;;  %3812 = vst [vmem:[#allocation4 + $0x48] ss:$-4 sps:$4 sm:$0xff] %v3776_v19   ;;  %v4714_v57 = vrot.slane %v4712_v17, 3  ;;  %v4371_v13 = vshll.u32 %v4320_v1, 16  ;;  %v4710_v18 = vor.u32 %v4709_v5, %v4706_v36 }
 0x1e3   : > { %v2383_v12 = vpop.permute.xlu1 %2382  ;;  %2785 = vst.msk [vmem:[#allocation3 + $0x70] sm:$0xff] %vm2770_vm11, %v2751_v22  ;;  %v4321_v22 = vld [vmem:[#allocation4 + $0x18] sm:$0x1f]  ;;  %3810 = vst [vmem:[#allocation4 + $0x38] ss:$-4 sps:$4 sm:$0xff] %v3775_v30   ;;  %v4717_v62 = vrot.slane %v4715_v23, 4  ;;  %v5056_v32 = vsel %vm1018_vm4, %v5054_v49, %v5055_v40 }
 0x1e4   : > { %2416 = vst.msk [vmem:[#allocation3 + $0x78] sm:$0xff] %vm2400_vm10, %v2383_v12  ;;  %v10118_v12 = vsel %vm649_vm5, %v3911_v42, %v3919_v25  ;;  %v4693_v52 = vor.u32 %v4692_v35, %v4689_v33  ;;  %v4376_v24 = vshrl.u32 %v4321_v22, 16  ;;  %v4379_v26 = vshll.u32 %v4321_v22, 16  ;;  %5118 = vst [vmem:[#allocation5 + $0x20] sm:$0xff] %v5056_v32 }
 0x1e5   : > { %v4373_v54 = vrot.slane %v4371_v13, 5  ;;  %v4718_v63 = vor.u32 %v4717_v62, %v4714_v57  ;;  %v4385_v47 = vshrl.u32 %v10125_v51, 16  ;;  %v4388_v59 = vshll.u32 %v10125_v51, 16  ;;  %v8697_v57 = vld [vmem:[%s11322_s7 + $0x88] sm:$0xff]  }
 0x1e6   : > { %v2928_v44 = vpop.permute.xlu0 %2927  ;;  %v10122_v41 = vsel %vm649_vm5, %v4693_v52, %v4701_v8  ;;  %v4378_v60 = vrot.slane %v4376_v24, 4  ;;  %v4381_v48 = vrot.slane %v4379_v26, 5  ;;  %v4393_v49 = vshrl.u32 %v10138_v39, 16 }
 0x1e7   : > { %v2753_v27 = vpop.permute.xlu1 %2752  ;;  %2962 = vst.msk [vmem:[#allocation3 + $0x70] sm:$0xff] %vm2947_vm12, %v2928_v44  ;;  %v4370_v44 = vrot.slane %v4368_v2, 4  ;;  %v10128_v11 = vsel %vm649_vm5, %v4710_v18, %v4718_v63  ;;  %v10148_v42 = vrot.slane %v4385_v47, 4  ;;  %v4396_v33 = vshll.u32 %v10138_v39, 16  ;;  %v8703_v39 = vld [vmem:[%s11322_s7 + $0xa0] sm:$0xff]  }
 0x1e8   : > { %2786 = vst.msk [vmem:[#allocation3 + $0x78] sm:$0xff] %vm2770_vm11, %v2753_v27  ;;  %v4382_v7 = vor.u32 %v4381_v48, %v4378_v60 }
 0x1e9   : > { %v4374_v38 = vor.u32 %v4373_v54, %v4370_v44  ;;  %v3846_v56 = vld [vmem:[#allocation4 + $0x40] sm:$0xf8]  ;;  %v3847_v40 = vld [vmem:[#allocation4 + $0x48] sm:$0xf] }
 0x1ea   : > { %v3297_v46 = vpop.permute.xlu0 %3296  ;;  %v3939_v3 = vshrl.u32 %v3846_v56, 16  ;;  %v3845_v9 = vld [vmem:[#allocation4 + $0x38] sm:$0xf]  ;;  %v4658_v53 = vld [vmem:[#allocation4 + $0x30] sm:$0xf8]  ;;  %v3947_v8 = vshrl.u32 %v3847_v40, 16 }
 0x1eb   : > { %v2930_v61 = vpop.permute.xlu1 %2929  ;;  %3331 = vst.msk [vmem:[#allocation3 + $0x70] sm:$0xff] %vm3316_vm13, %v3297_v46  ;;  %v10136_v34 = vsel %vm1164_vm3, %v4374_v38, %v4382_v7  ;;  %v3844_v46 = vld [vmem:[#allocation4 + $0x30] sm:$0xf8]  ;;  %v4181_v1 = vld [vmem:[#allocation4 + $0x38] sm:$0xf]  ;;  %v3930_v30 = vshrl.u32 %v3845_v9, 16 }
 0x1ec   : > { %2963 = vst.msk [vmem:[#allocation3 + $0x78] sm:$0xff] %vm2947_vm12, %v2930_v61  ;;  %v4180_v61 = vld [vmem:[#allocation4 + $0x30] sm:$0xf0]  ;;  %v4248_v25 = vrot.slane %v4181_v1, 4  ;;  %v3922_v35 = vshrl.u32 %v3844_v46, 16  ;;  %v3925_v29 = vshll.u32 %v3844_v46, 16 }
 0x1ed   : > { %v4247_v19 = vrot.slane %v4180_v61, 4  ;;  %v4182_v22 = vld [vmem:[#allocation4 + $0x40] sm:$0xf0]  ;;  %v3933_v31 = vshll.u32 %v3845_v9, 16  ;;  %v4183_v58 = vld [vmem:[#allocation4 + $0x48] sm:$0xf] }
 0x1ee   : > { %v4250_v6 = vrot.slane %v4182_v22, 4  ;;  %v3941_v52 = vrot.slane %v3939_v3, 3  ;;  %v3924_v17 = vrot.slane %v3922_v35, 3  ;;  %v3927_v36 = vrot.slane %v3925_v29, 4  ;;  %v4659_v63 = vld [vmem:[#allocation4 + $0x38] sm:$0xf] }
 0x1ef   : > { %v3299_v14 = vpop.permute.xlu1 %3298  ;;  %v10155_v15 = vsel %vm1018_vm4, %v4247_v19, %v4248_v25  ;;  %v4251_v5 = vrot.slane %v4183_v58, 4  ;;  %v3932_v23 = vrot.slane %v3930_v30, 3  ;;  %v3935_v2 = vrot.slane %v3933_v31, 4  ;;  %v8700_v25 = vld [vmem:[%s11322_s7 + $0xd8] sm:$0xff]   ;;  %v4660_v22 = vld [vmem:[#allocation4 + $0x40] sm:$0xf8] }
 0x1f0   : > { %3332 = vst.msk [vmem:[#allocation3 + $0x78] sm:$0xff] %vm3316_vm13, %v3299_v14  ;;  %v3942_v14 = vshll.u32 %v3846_v56, 16  ;;  %v3928_v24 = vor.u32 %v3927_v36, %v3924_v17  ;;  %v3950_v62 = vshll.u32 %v3847_v40, 16  ;;  %v4721_v44 = vshrl.u32 %v4658_v53, 16 }
 0x1f1   : > { %v10163_v18 = vsel %vm1018_vm4, %v4250_v6, %v4251_v5  ;;  %v3936_v54 = vor.u32 %v3935_v2, %v3932_v23  ;;  %v4729_v35 = vshrl.u32 %v4659_v63, 16  ;;  %v4732_v29 = vshll.u32 %v4659_v63, 16 }
 0x1f2   : > { %v3347_v27 = vld [vmem:[#allocation3 + $0x70] sm:$0xff]  ;;  %v3944_v60 = vrot.slane %v3942_v14, 4  ;;  %v3952_v7 = vrot.slane %v3950_v62, 4  ;;  %v4723_v32 = vrot.slane %v4721_v44, 3  ;;  %v4398_v62 = vrot.slane %v4396_v33, 5 }
 0x1f3   : > { %8637 = vmatprep.mubr.msk.bf16.mxu0 %vm3376_vm14, %v3347_v27  ;;  %v3949_v27 = vrot.slane %v3947_v8, 3  ;;  %v10173_v3 = vsel %vm649_vm5, %v3928_v24, %v3936_v54  ;;  %v4731_v5 = vrot.slane %v4729_v35, 3  ;;  %v4734_v23 = vrot.slane %v4732_v29, 4  ;;  %v8701_v8 = vld [vmem:[%s11322_s7 + $0x98] sm:$0xff]   ;;  %v4325_v54 = vld [vmem:[#allocation4 + $0x38] sm:$0x1f] }
 0x1f4   : > { %v3945_v40 = vor.u32 %v3944_v60, %v3941_v52  ;;  %v4661_v52 = vld [vmem:[#allocation4 + $0x48] sm:$0xf]  ;;  %v4738_v44 = vshrl.u32 %v4660_v22, 16  ;;  %v4741_v51 = vshll.u32 %v4660_v22, 16  ;;  %v8705_v35 = vld [vmem:[%s11322_s7 + $0xa8] sm:$0xff]  }
 0x1f5   : > { %v3953_v61 = vor.u32 %v3952_v7, %v3949_v27  ;;  %v4735_v24 = vor.u32 %v4734_v23, %v4731_v5 }
 0x1f6   : > { %v4740_v63 = vrot.slane %v4738_v44, 3  ;;  %v4743_v33 = vrot.slane %v4741_v51, 4 }
 0x1f7   : > { %v3348_v28 = vld [vmem:[#allocation3 + $0x78] sm:$0xff]  ;;  %v10188_v58 = vsel %vm649_vm5, %v3945_v40, %v3953_v61  ;;  %v4410_v61 = vshrl.u32 %v4325_v54, 16 }
 0x1f8   : > { %8638 = vmatmul.mubr.msk.bf16.gmra.mrb[28].mxu0 %vm3376_vm14, %v3348_v28  ;;  %v4724_v28 = vshll.u32 %v4658_v53, 16 }
 0x1f9   : > { %7149 = vmatprep.mubr.bf16.mxu0 %v10000_v45  ;;  %v8696_v45 = vld [vmem:[%s11322_s7 + $0xc8] sm:$0xff]   ;;  %v4412_v22 = vrot.slane %v4410_v61, 4 }
 0x1fa   : > { %v4726_v53 = vrot.slane %v4724_v28, 4 }
 0x1fc   : > { %v4727_v6 = vor.u32 %v4726_v53, %v4723_v32  ;;  %v4749_v32 = vshll.u32 %v4661_v52, 16 }
 0x1ff   : > { %v8619_v13 = vpop.f32.mrb[8].mxu0 }
 0x200   : > { %7150 = vmatmul.mubr.bf16.vlgmr.msra.gmra.mrb[32].mxu0 %v10007_v21  ;;  %v3504_v21 = vadd.f32 %v8619_v13, %v10040_v16  ;;  %v3495_v26 = vpop.f32.mrb[9].mxu0 }
 0x201   : > { %7157 = vmatprep.mubr.bf16.mxu0 %v10096_v10  ;;  %8268 = vmatpush3.bf16.msra.mxu0 %v8695_v50  ;;  %v8698_v10 = vld [vmem:[%s11322_s7 + $0xd0] sm:$0xff]   ;;  %v3496_v48 = vadd.f32 %v10040_v16, %v3495_v26  ;;  %v8620_v38 = vpop.f32.mrb[10].mxu0 }
 0x202   : > { %8269 = vmatprep.subr.bf16.mxu0 %v8696_v45  ;;  %v3607_v56 = vmul.f32 %v10045_v43, %v3504_v21  ;;  %v3507_v47 = vadd.f32 %v8620_v38, %v10040_v16  ;;  %v3498_v46 = vpop.f32.mrb[11].mxu0  ;;  %v8699_v45 = vld [vmem:[%s11322_s7 + $0x90] sm:$0xff]   ;;  %v4324_v21 = vld [vmem:[#allocation4 + $0x30] sm:$0xf0] }
 0x203   : > { %v3605_v9 = vmul.f32 %v10045_v43, %v3496_v48  ;;  %v3499_v50 = vadd.f32 %v10040_v16, %v3498_v46  ;;  %v4326_v48 = vld [vmem:[#allocation4 + $0x40] sm:$0xf0]  ;;  %v4402_v46 = vshrl.u32 %v4324_v21, 16  ;;  %v4405_v40 = vshll.u32 %v4324_v21, 16  ;;  %v10239_v21 = vld [vmem:[#allocation4 + $0x18] sm:$0x1f] }
 0x204   : > { %v3646_v1 = vadd.f32 %v10052_v37, %v3607_v56  ;;  %v3608_v19 = vmul.f32 %v10045_v43, %v3507_v47  ;;  %v8704_v56 = vld [vmem:[%s11322_s7 + $0xe8] sm:$0xff]  }
 0x205   : > { %8270 = vmatpush3.bf16.msra.mxu0 %v8697_v57  ;;  %v3644_v30 = vadd.f32 %v10052_v37, %v3605_v9  ;;  %v3606_v31 = vmul.f32 %v10045_v43, %v3499_v50  ;;  %v4390_v57 = vrot.slane %v4388_v59, 5  ;;  %v4746_v59 = vshrl.u32 %v4661_v52, 16 }
 0x206   : > { %8271 = vmatprep.subr.bf16.mxu0 %v8698_v10  ;;  %v3678_v17 = vmax.f32 %v3646_v1, 0.0  ;;  %v3647_v36 = vadd.f32 %v10052_v37, %v3608_v19  ;;  %v4744_v50 = vor.u32 %v4743_v33, %v4740_v63  ;;  %v4404_v53 = vrot.slane %v4402_v46, 4  ;;  %v8709_v63 = vld [vmem:[%s11322_s7 + $0xb8] sm:$0xff]  }
 0x207   : > { %v3676_v2 = vmax.f32 %v3644_v30, 0.0  ;;  %v3645_v14 = vadd.f32 %v10052_v37, %v3606_v31  ;;  %v4391_v10 = vor.u32 %v4390_v57, %v10148_v42  ;;  %v4748_v7 = vrot.slane %v4746_v59, 3  ;;  %v4327_v42 = vld [vmem:[#allocation4 + $0x48] sm:$0x1f]  ;;  %v5951_v57 = vld [vmem:[#allocation4 + $0x20] sm:$0xf0] }
 0x208   : > { %7158 = vmatmul.mubr.bf16.gmra.mrb[36].mxu0 %v10113_v20  ;;  %v4395_v20 = vrot.slane %v4393_v49, 4  ;;  %v3679_v13 = vmax.f32 %v3647_v36, 0.0  ;;  %v10208_v49 = vsel %vm649_vm5, %v4727_v6, %v4735_v24  ;;  %v4407_v1 = vrot.slane %v4405_v40, 5  ;;  %v8708_v24 = vld [vmem:[%s11322_s7 + $0xf8] sm:$0xff]  }
 0x209   : > { %7165 = vmatprep.mubr.bf16.mxu0 %v10109_v55  ;;  %8272 = vmatpush3.bf16.msra.mxu0 %v8699_v45  ;;  %v8702_v55 = vld [vmem:[%s11322_s7 + $0xe0] sm:$0xff]   ;;  %v3677_v26 = vmax.f32 %v3645_v14, 0.0  ;;  %v4751_v45 = vrot.slane %v4749_v32, 4  ;;  %v4413_v19 = vshll.u32 %v4325_v54, 16  ;;  %v4422_v30 = vshll.u32 %v4326_v48, 16 }
 0x20a   : > { %8273 = vmatprep.subr.bf16.mxu0 %v8700_v25  ;;  %v3705_v60 = vpack.c.bf16 %v3679_v13, %v3678_v17  ;;  %v4399_v27 = vor.u32 %v4398_v62, %v4395_v20  ;;  %v4419_v25 = vshrl.u32 %v4326_v48, 16  ;;  %v4427_v31 = vshrl.u32 %v4327_v42, 16  ;;  %v8707_v20 = vld [vmem:[%s11322_s7 + $0xb0] sm:$0xff]   ;;  %v10249_v48 = vld [vmem:[#allocation4 + $0x20] sm:$0xf0] }
 0x20b   : > { %v3704_v38 = vpack.c.bf16 %v3677_v26, %v3676_v2  ;;  %v4752_v29 = vor.u32 %v4751_v45, %v4748_v7  ;;  %v4408_v6 = vor.u32 %v4407_v1, %v4404_v53  ;;  %v4415_v52 = vrot.slane %v4413_v19, 5  ;;  %v5134_v2 = vld [vmem:[#allocation4 + $0x10] sm:$0xf0] }
 0x20c   : > { %v3778_v28 = vrot.slane %v3705_v60, 4  ;;  %v10217_v47 = vsel %vm1164_vm3, %v4391_v10, %v4399_v27  ;;  %v4421_v17 = vrot.slane %v4419_v25, 4  ;;  %v4430_v36 = vshll.u32 %v4327_v42, 16 }
 0x20d   : > { %8274 = vmatpush3.bf16.msra.mxu0 %v8701_v8  ;;  %v3777_v9 = vrot.slane %v3704_v38, 4  ;;  %v4424_v5 = vrot.slane %v4422_v30, 5  ;;  %v4429_v23 = vrot.slane %v4427_v31, 4  ;;  %v4416_v14 = vor.u32 %v4415_v52, %v4412_v22 }
 0x20e   : > { %8275 = vmatprep.subr.bf16.mxu0 %v8702_v55  ;;  %3816 = vst [vmem:[#allocation4 + $0x68] ss:$-4 sps:$4 sm:$0xff] %v3778_v28   ;;  %v4432_v8 = vrot.slane %v4430_v36, 5  ;;  %v5952_v55 = vld [vmem:[#allocation4 + $0x28] sm:$0x1f]  ;;  %v5167_v26 = vshrl.u32 %v5134_v2, 16 }
 0x20f   : > { %3814 = vst [vmem:[#allocation4 + $0x58] ss:$-4 sps:$4 sm:$0xff] %v3777_v9   ;;  %v4425_v13 = vor.u32 %v4424_v5, %v4421_v17  ;;  %v10237_v62 = vsel %vm1164_vm3, %v4408_v6, %v4416_v14  ;;  %v5170_v10 = vshll.u32 %v5134_v2, 16  ;;  %v5984_v51 = vshrl.u32 %v5951_v57, 16 }
 0x210   : > { %7166 = vmatmul.mubr.bf16.gmra.mrb[40].mxu0 %v10118_v12  ;;  %v8706_v12 = vld [vmem:[%s11322_s7 + $0xf0] sm:$0xff]   ;;  %v4433_v44 = vor.u32 %v4432_v8, %v4429_v23  ;;  %v5987_v59 = vshll.u32 %v5951_v57, 16  ;;  %v5992_v60 = vshrl.u32 %v5952_v55, 16  ;;  %v5995_v27 = vshll.u32 %v5952_v55, 16 }
 0x211   : > { %7173 = vmatprep.mubr.bf16.mxu0 %v10155_v15  ;;  %8276 = vmatpush3.bf16.msra.mxu0 %v8703_v39  ;;  %v10228_v15 = vsel %vm649_vm5, %v4744_v50, %v4752_v29  ;;  %v5175_v38 = vshrl.u32 %v10239_v21, 16  ;;  %v10252_v39 = vrot.slane %v5167_v26, 4  ;;  %v10256_v33 = vrot.slane %v5984_v51, 4 }
 0x212   : > { %8277 = vmatprep.subr.bf16.mxu0 %v8704_v56  ;;  %v10243_v54 = vsel %vm1164_vm3, %v4425_v13, %v4433_v44  ;;  %v10258_v7 = vrot.slane %v5987_v59, 5  ;;  %v10262_v42 = vrot.slane %v5995_v27, 5  ;;  %v5178_v56 = vshll.u32 %v10239_v21, 16  ;;  %v4993_v21 = vld [vmem:[#allocation4 + $0x28] sm:$0xf] }
 0x213   : > { %v5184_v46 = vshrl.u32 %v10249_v48, 16  ;;  %v10266_v50 = vrot.slane %v5175_v38, 4  ;;  %v5187_v45 = vshll.u32 %v10249_v48, 16  ;;  %v8711_v38 = vld [vmem:[%s11322_s7 + $0x100] sm:$0xff]  }
 0x215   : > { %8278 = vmatpush3.bf16.msra.mxu0 %v8705_v35  ;;  %v3850_v40 = vld [vmem:[#allocation4 + $0x60] sm:$0xf8]  ;;  %v3851_v9 = vld [vmem:[#allocation4 + $0x68] sm:$0xf] }
 0x216   : > { %8279 = vmatprep.subr.bf16.mxu0 %v8706_v12  ;;  %v3848_v32 = vld [vmem:[#allocation4 + $0x50] sm:$0xf8]  ;;  %v3849_v28 = vld [vmem:[#allocation4 + $0x58] sm:$0xf]  ;;  %v4186_v12 = vld [vmem:[#allocation4 + $0x60] sm:$0xf0] }
 0x217   : > { %v4662_v61 = vld [vmem:[#allocation4 + $0x50] sm:$0xf8]  ;;  %v4185_v1 = vld [vmem:[#allocation4 + $0x58] sm:$0xf]  ;;  %v3956_v19 = vshrl.u32 %v3848_v32, 16  ;;  %v3959_v25 = vshll.u32 %v3848_v32, 16 }
 0x218   : > { %7174 = vmatmul.mubr.bf16.gmra.mrb[44].mxu0 %v10173_v3  ;;  %v10254_v3 = vrot.slane %v5170_v10, 5  ;;  %v4184_v53 = vld [vmem:[#allocation4 + $0x50] sm:$0xf0]  ;;  %v4254_v22 = vrot.slane %v4185_v1, 4  ;;  %v3964_v30 = vshrl.u32 %v3849_v28, 16  ;;  %v3967_v31 = vshll.u32 %v3849_v28, 16 }
 0x219   : > { %7181 = vmatprep.mubr.bf16.mxu0 %v10163_v18  ;;  %8280 = vmatpush3.bf16.msra.mxu0 %v8707_v20  ;;  %v10260_v18 = vrot.slane %v5992_v60, 4  ;;  %v4253_v29 = vrot.slane %v4184_v53, 4  ;;  %v3958_v6 = vrot.slane %v3956_v19, 3  ;;  %v3961_v52 = vrot.slane %v3959_v25, 4  ;;  %v4187_v17 = vld [vmem:[#allocation4 + $0x68] sm:$0xf] }
 0x21a   : > { %8281 = vmatprep.subr.bf16.mxu0 %v8708_v24  ;;  %v5173_v35 = vor.u32 %v10254_v3, %v10252_v39  ;;  %v4256_v36 = vrot.slane %v4186_v12, 4  ;;  %v3973_v5 = vshrl.u32 %v3850_v40, 16  ;;  %v4663_v23 = vld [vmem:[#allocation4 + $0x58] sm:$0xf]  ;;  %v3966_v14 = vrot.slane %v3964_v30, 3 }
 0x21b   : > { %v4255_v2 = vsel %vm1018_vm4, %v4253_v29, %v4254_v22  ;;  %v3969_v8 = vrot.slane %v3967_v31, 4  ;;  %v4257_v57 = vrot.slane %v4187_v17, 4  ;;  %v3962_v20 = vor.u32 %v3961_v52, %v3958_v6  ;;  %v4664_v24 = vld [vmem:[#allocation4 + $0x60] sm:$0xf8]  ;;  %v4665_v32 = vld [vmem:[#allocation4 + $0x68] sm:$0xf] }
 0x21c   : > { %7189 = vmatprep.mubr.bf16.mxu1 %v4255_v2  ;;  %v3975_v13 = vrot.slane %v3973_v5, 3  ;;  %v3976_v55 = vshll.u32 %v3850_v40, 16  ;;  %v3984_v10 = vshll.u32 %v3851_v9, 16  ;;  %v4755_v51 = vshrl.u32 %v4662_v61, 16  ;;  %v4328_v2 = vld [vmem:[#allocation4 + $0x50] sm:$0xf0] }
 0x21d   : > { %8282 = vmatpush3.bf16.msra.mxu0 %v8709_v63  ;;  %v3970_v44 = vor.u32 %v3969_v8, %v3966_v14  ;;  %v4258_v26 = vsel %vm1018_vm4, %v4256_v36, %v4257_v57  ;;  %v4758_v27 = vshll.u32 %v4662_v61, 16  ;;  %v4763_v63 = vshrl.u32 %v4663_v23, 16 }
 0x21e   : > { %v3978_v59 = vrot.slane %v3976_v55, 4  ;;  %v3986_v40 = vrot.slane %v3984_v10, 4  ;;  %v4757_v53 = vrot.slane %v4755_v51, 3  ;;  %v4766_v1 = vshll.u32 %v4663_v23, 16 }
 0x21f   : > { %v3971_v28 = vsel %vm649_vm5, %v3962_v20, %v3970_v44  ;;  %v4765_v29 = vrot.slane %v4763_v63, 3  ;;  %v4772_v22 = vshrl.u32 %v4664_v24, 16  ;;  %v4775_v6 = vshll.u32 %v4664_v24, 16  ;;  %v4330_v63 = vld [vmem:[#allocation4 + $0x60] sm:$0xf0] }
 0x220   : > { %7182 = vmatmul.mubr.bf16.gmra.mrb[48].mxu0 %v10188_v58  ;;  %v8710_v58 = vld [vmem:[%s11322_s7 + $0x140] sm:$0xff]   ;;  %7190 = vmatmul.mubr.bf16.vlgmr.msra.gmra.mrb[0].mxu1 %v3971_v28  ;;  %v3979_v25 = vor.u32 %v3978_v59, %v3975_v13  ;;  %v4768_v12 = vrot.slane %v4766_v1, 4  ;;  %v4780_v23 = vshrl.u32 %v4665_v32, 16  ;;  %v4783_v10 = vshll.u32 %v4665_v32, 16 }
 0x221   : > { %7310 = vmatprep.mubr.bf16.mxu0 %v10122_v41  ;;  %v3981_v41 = vshrl.u32 %v3851_v9, 16  ;;  %8379 = vmatprep.subr.bf16.mxu1 %v8710_v58  ;;  %v4760_v9 = vrot.slane %v4758_v27, 4  ;;  %v4774_v5 = vrot.slane %v4772_v22, 3  ;;  %v4777_v13 = vrot.slane %v4775_v6, 4  ;;  %v5137_v6 = vld [vmem:[#allocation4 + $0x28] sm:$0x1f] }
 0x222   : > { %7197 = vmatprep.mubr.bf16.mxu1 %v4258_v26  ;;  %8380 = vmatpush3.bf16.msra.mxu1 %v8711_v38  ;;  %v4769_v58 = vor.u32 %v4768_v12, %v4765_v29  ;;  %v4782_v55 = vrot.slane %v4780_v23, 3  ;;  %v4436_v27 = vshrl.u32 %v4328_v2, 16  ;;  %v4785_v28 = vrot.slane %v4783_v10, 4 }
 0x223   : > { %v3983_v60 = vrot.slane %v3981_v41, 3  ;;  %v4761_v36 = vor.u32 %v4760_v9, %v4757_v53  ;;  %v4329_v41 = vld [vmem:[#allocation4 + $0x58] sm:$0x1f]  ;;  %v4331_v9 = vld [vmem:[#allocation4 + $0x68] sm:$0x1f]  ;;  %v4456_v12 = vshll.u32 %v4330_v63, 16 }
 0x224   : > { %v4786_v29 = vor.u32 %v4785_v28, %v4782_v55  ;;  %v4447_v22 = vshll.u32 %v4329_v41, 16 }
 0x225   : > { %v3987_v31 = vor.u32 %v3986_v40, %v3983_v60  ;;  %v10294_v26 = vsel %vm649_vm5, %v4761_v36, %v4769_v58  ;;  %v4778_v60 = vor.u32 %v4777_v13, %v4774_v5  ;;  %v4439_v40 = vshll.u32 %v4328_v2, 16 }
 0x226   : > { %v4449_v36 = vrot.slane %v4447_v22, 5  ;;  %v4458_v2 = vrot.slane %v4456_v12, 5  ;;  %v5180_v58 = vrot.slane %v5178_v56, 5  ;;  %v5192_v56 = vshrl.u32 %v5137_v6, 16 }
 0x227   : > { %v3988_v57 = vsel %vm649_vm5, %v3979_v25, %v3987_v31  ;;  %v4444_v25 = vshrl.u32 %v4329_v41, 16  ;;  %v4453_v31 = vshrl.u32 %v4330_v63, 16  ;;  %v5186_v41 = vrot.slane %v5184_v46, 4 }
 0x228   : > { %v8623_v19 = vpop.f32.mrb[12].mxu0  ;;  %7311 = vmatmul.mubr.bf16.vlgmr.msra.gmra.mrb[52].mxu0 %v10026_v4  ;;  %7198 = vmatmul.mubr.bf16.gmra.mrb[4].mxu1 %v3988_v57  ;;  %v4464_v57 = vshll.u32 %v4331_v9, 16  ;;  %v5194_v48 = vrot.slane %v5192_v56, 4  ;;  %v5998_v22 = vor.u32 %v10262_v42, %v10260_v18 }
 0x229   : > { %v3520_v61 = vadd.f32 %v8623_v19, %v10040_v16  ;;  %v3511_v30 = vpop.f32.mrb[13].mxu0  ;;  %7318 = vmatprep.mubr.bf16.mxu0 %v10128_v11  ;;  %v4438_v19 = vrot.slane %v4436_v27, 4  ;;  %v4455_v23 = vrot.slane %v4453_v31, 4 }
 0x22a   : > { %v3512_v52 = vadd.f32 %v10040_v16, %v3511_v30  ;;  %v8624_v17 = vpop.f32.mrb[14].mxu0  ;;  %v4446_v30 = vrot.slane %v4444_v25, 4  ;;  %v4466_v10 = vrot.slane %v4464_v57, 5 }
 0x22b   : > { %v3611_v14 = vmul.f32 %v10045_v43, %v3520_v61  ;;  %v3523_v4 = vadd.f32 %v8624_v17, %v10040_v16  ;;  %v3514_v8 = vpop.f32.mrb[15].mxu0  ;;  %v4459_v13 = vor.u32 %v4458_v2, %v4455_v23 }
 0x22c   : > { %v3609_v20 = vmul.f32 %v10045_v43, %v3512_v52  ;;  %v3515_v11 = vadd.f32 %v10040_v16, %v3514_v8  ;;  %v4450_v8 = vor.u32 %v4449_v36, %v4446_v30 }
 0x22d   : > { %v3650_v24 = vadd.f32 %v10052_v37, %v3611_v14  ;;  %v3612_v44 = vmul.f32 %v10045_v43, %v3523_v4  ;;  %v4461_v14 = vshrl.u32 %v4331_v9, 16  ;;  %v5807_v4 = vld [vmem:[#allocation4 + $0x20] sm:$0xf0] }
 0x22e   : > { %v3648_v51 = vadd.f32 %v10052_v37, %v3609_v20  ;;  %v3610_v59 = vmul.f32 %v10045_v43, %v3515_v11  ;;  %v4441_v43 = vrot.slane %v4439_v40, 5  ;;  %v5808_v20 = vld [vmem:[#allocation4 + $0x28] sm:$0xf]  ;;  %v5871_v27 = vrot.slane %v5807_v4, 4  ;;  %v5809_v40 = vld [vmem:[#allocation4 + $0x30] sm:$0xf0] }
 0x22f   : > { %v3682_v38 = vmax.f32 %v3650_v24, 0.0  ;;  %v3651_v16 = vadd.f32 %v10052_v37, %v3612_v44  ;;  %v4463_v55 = vrot.slane %v4461_v14, 4  ;;  %v4992_v24 = vld [vmem:[#allocation4 + $0x20] sm:$0xf0]  ;;  %v5872_v63 = vrot.slane %v5808_v20, 4 }
 0x230   : > { %v3680_v53 = vmax.f32 %v3648_v51, 0.0  ;;  %v3649_v1 = vadd.f32 %v10052_v37, %v3610_v59  ;;  %7319 = vmatmul.mubr.bf16.gmra.mrb[56].mxu0 %v10136_v34  ;;  %v10303_v37 = vsel %vm649_vm5, %v4778_v60, %v4786_v29  ;;  %v4442_v17 = vor.u32 %v4441_v43, %v4438_v19  ;;  %v8712_v34 = vld [vmem:[%s11322_s7 + $0x148] sm:$0xff]   ;;  %v5810_v19 = vld [vmem:[#allocation4 + $0x38] sm:$0xf] }
 0x231   : > { %v3683_v32 = vmax.f32 %v3651_v16, 0.0  ;;  %7326 = vmatprep.mubr.bf16.mxu0 %v10208_v49  ;;  %8381 = vmatprep.subr.bf16.mxu1 %v8712_v34  ;;  %v5181_v51 = vor.u32 %v5180_v58, %v10266_v50  ;;  %v5189_v59 = vrot.slane %v5187_v45, 5  ;;  %v5195_v60 = vshll.u32 %v5137_v6, 16 }
 0x232   : > { %v3681_v61 = vmax.f32 %v3649_v1, 0.0  ;;  %v10313_v44 = vsel %vm1164_vm3, %v4442_v17, %v4450_v8  ;;  %v4467_v46 = vor.u32 %v4466_v10, %v4463_v55  ;;  %v5057_v50 = vrot.slane %v4992_v24, 4 }
 0x233   : > { %v3707_v52 = vpack.c.bf16 %v3683_v32, %v3682_v38  ;;  %v5138_v38 = vld [vmem:[#allocation4 + $0x30] sm:$0xf0]  ;;  %v5182_v16 = vsel %vm1164_vm3, %v5173_v35, %v5181_v51  ;;  %v5190_v28 = vor.u32 %v5189_v59, %v5186_v41  ;;  %v5197_v45 = vrot.slane %v5195_v60, 5  ;;  %v10329_v32 = vld [vmem:[#allocation4 + $0x38] sm:$0x1f]  ;;  %v8713_v51 = vld [vmem:[%s11322_s7 + $0x108] sm:$0xff]  }
 0x234   : > { %v3706_v5 = vpack.c.bf16 %v3681_v61, %v3680_v53  ;;  %5454 = vst [vmem:[#allocation5 + $0x28] sm:$0xff] %v5182_v16  ;;  %v5873_v53 = vsel %vm1018_vm4, %v5871_v27, %v5872_v63  ;;  %v5058_v1 = vrot.slane %v4993_v21, 4  ;;  %v5874_v3 = vrot.slane %v5809_v40, 4  ;;  %v8714_v59 = vld [vmem:[%s11322_s7 + $0x150] sm:$0xff]   ;;  %8382 = vmatpush3.bf16.msra.mxu1 %v8713_v51 }
 0x235   : > { %v3780_v49 = vrot.slane %v3707_v52, 4  ;;  %5935 = vst [vmem:[#allocation5 + $0x38] sm:$0xff] %v5873_v53  ;;  %v5198_v25 = vor.u32 %v5197_v45, %v5194_v48  ;;  %v5201_v35 = vshrl.u32 %v5138_v38, 16  ;;  %v5875_v9 = vrot.slane %v5810_v19, 4  ;;  %8383 = vmatprep.subr.bf16.mxu1 %v8714_v59 }
 0x236   : > { %v3779_v11 = vrot.slane %v3706_v5, 4  ;;  %v5059_v39 = vsel %vm1018_vm4, %v5057_v50, %v5058_v1  ;;  %v5204_v29 = vshll.u32 %v5138_v38, 16  ;;  %v5990_v43 = vor.u32 %v10258_v7, %v10256_v33  ;;  %v8715_v50 = vld [vmem:[%s11322_s7 + $0x110] sm:$0xff]   ;;  %v8716_v1 = vld [vmem:[%s11322_s7 + $0x158] sm:$0xff]  }
 0x237   : > { %3820 = vst [vmem:[#allocation4 + $0x88] ss:$-4 sps:$4 sm:$0xff] %v3780_v49   ;;  %5119 = vst [vmem:[#allocation5 + $0x70] sm:$0xff] %v5059_v39  ;;  %v5876_v61 = vsel %vm1018_vm4, %v5874_v3, %v5875_v9  ;;  %v5209_v31 = vshrl.u32 %v10329_v32, 16  ;;  %v10341_v12 = vrot.slane %v5201_v35, 4  ;;  %v5212_v17 = vshll.u32 %v10329_v32, 16 }
 0x238   : > { %3818 = vst [vmem:[#allocation4 + $0x78] ss:$-4 sps:$4 sm:$0xff] %v3779_v11   ;;  %7327 = vmatmul.mubr.bf16.gmra.mrb[60].mxu0 %v10217_v47  ;;  %v10326_v47 = vsel %vm1164_vm3, %v4459_v13, %v4467_v46  ;;  %5936 = vst [vmem:[#allocation5 + $0x88] sm:$0xff] %v5876_v61  ;;  %v5999_v30 = vsel %vm1164_vm3, %v5990_v43, %v5998_v22  ;;  %v10343_v6 = vrot.slane %v5204_v29, 5  ;;  %8384 = vmatpush3.bf16.msra.mxu1 %v8715_v50 }
 0x239   : > { %7334 = vmatprep.mubr.bf16.mxu0 %v10228_v15  ;;  %v5199_v15 = vsel %vm1164_vm3, %v5190_v28, %v5198_v25  ;;  %6271 = vst [vmem:[#allocation5 + $0x40] sm:$0xff] %v5999_v30  ;;  %v10345_v52 = vrot.slane %v5209_v31, 4  ;;  %8385 = vmatprep.subr.bf16.mxu1 %v8716_v1 }
 0x23a   : > { %5455 = vst [vmem:[#allocation5 + $0x78] sm:$0xff] %v5199_v15  ;;  %v5207_v23 = vor.u32 %v10343_v6, %v10341_v12 }
 0x23e   : > { %v4190_v8 = vld [vmem:[#allocation4 + $0x80] sm:$0xf0]  ;;  %v4191_v13 = vld [vmem:[#allocation4 + $0x88] sm:$0xf] }
 0x23f   : > { %v3852_v33 = vld [vmem:[#allocation4 + $0x70] sm:$0xf8]  ;;  %v3853_v7 = vld [vmem:[#allocation4 + $0x78] sm:$0xf]  ;;  %v4669_v21 = vld [vmem:[#allocation4 + $0x88] sm:$0xf] }
 0x240   : > { %7335 = vmatmul.mubr.bf16.gmra.mrb[64].mxu0 %v10237_v62  ;;  %v4666_v18 = vld [vmem:[#allocation4 + $0x70] sm:$0xf8]  ;;  %v4667_v42 = vld [vmem:[#allocation4 + $0x78] sm:$0xf]  ;;  %v3990_v62 = vshrl.u32 %v3852_v33, 16  ;;  %v3993_v5 = vshll.u32 %v3852_v33, 16 }
 0x241   : > { %7342 = vmatprep.mubr.bf16.mxu0 %v10294_v26  ;;  %v4188_v36 = vld [vmem:[#allocation4 + $0x70] sm:$0xf0]  ;;  %v4189_v34 = vld [vmem:[#allocation4 + $0x78] sm:$0xf]  ;;  %v4668_v26 = vld [vmem:[#allocation4 + $0x80] sm:$0xf8] }
 0x242   : > { %v4259_v2 = vrot.slane %v4188_v36, 4  ;;  %v4260_v14 = vrot.slane %v4189_v34, 4  ;;  %v3998_v4 = vshrl.u32 %v3853_v7, 16  ;;  %v4001_v49 = vshll.u32 %v3853_v7, 16  ;;  %v3854_v63 = vld [vmem:[#allocation4 + $0x80] sm:$0xf8] }
 0x243   : > { %v3992_v57 = vrot.slane %v3990_v62, 3  ;;  %v3995_v58 = vrot.slane %v3993_v5, 4  ;;  %v4789_v20 = vshrl.u32 %v4666_v18, 16  ;;  %v4792_v11 = vshll.u32 %v4666_v18, 16  ;;  %v3855_v40 = vld [vmem:[#allocation4 + $0x88] sm:$0xf] }
 0x244   : > { %v4261_v55 = vsel %vm1018_vm4, %v4259_v2, %v4260_v14  ;;  %v4000_v41 = vrot.slane %v3998_v4, 3  ;;  %v4003_v24 = vrot.slane %v4001_v49, 4  ;;  %v4797_v10 = vshrl.u32 %v4667_v42, 16  ;;  %v4332_v19 = vld [vmem:[#allocation4 + $0x70] sm:$0xf0] }
 0x245   : > { %7205 = vmatprep.mubr.bf16.mxu1 %v4261_v55  ;;  %v3996_v56 = vor.u32 %v3995_v58, %v3992_v57  ;;  %v4791_v60 = vrot.slane %v4789_v20, 3  ;;  %v4800_v27 = vshll.u32 %v4667_v42, 16  ;;  %v4262_v16 = vrot.slane %v4190_v8, 4  ;;  %v4333_v9 = vld [vmem:[#allocation4 + $0x78] sm:$0x1f]  ;;  %v8717_v7 = vld [vmem:[%s11322_s7 + $0x118] sm:$0xff]  }
 0x246   : > { %v4004_v38 = vor.u32 %v4003_v24, %v4000_v41  ;;  %v4799_v46 = vrot.slane %v4797_v10, 3  ;;  %v4263_v28 = vrot.slane %v4191_v13, 4  ;;  %v4806_v53 = vshrl.u32 %v4668_v26, 16  ;;  %v4334_v18 = vld [vmem:[#allocation4 + $0x80] sm:$0xf0]  ;;  %8386 = vmatpush3.bf16.msra.mxu1 %v8717_v7 }
 0x247   : > { %v4802_v45 = vrot.slane %v4800_v27, 4  ;;  %v4814_v3 = vshrl.u32 %v4669_v21, 16  ;;  %v4817_v35 = vshll.u32 %v4669_v21, 16  ;;  %v4007_v22 = vshrl.u32 %v3854_v63, 16  ;;  %v4335_v4 = vld [vmem:[#allocation4 + $0x88] sm:$0x1f] }
 0x248   : > { %7343 = vmatmul.mubr.bf16.gmra.mrb[68].mxu0 %v10243_v54  ;;  %v4794_v54 = vrot.slane %v4792_v11, 4  ;;  %v4005_v25 = vsel %vm649_vm5, %v3996_v56, %v4004_v38  ;;  %v4264_v39 = vsel %vm1018_vm4, %v4262_v16, %v4263_v28  ;;  %v4808_v29 = vrot.slane %v4806_v53, 3  ;;  %v4994_v53 = vld [vmem:[#allocation4 + $0x30] sm:$0xf0] }
 0x249   : > { %7350 = vmatprep.mubr.bf16.mxu0 %v10303_v37  ;;  %v4809_v37 = vshll.u32 %v4668_v26, 16  ;;  %7206 = vmatmul.mubr.bf16.gmra.mrb[8].mxu1 %v4005_v25  ;;  %v4803_v15 = vor.u32 %v4802_v45, %v4799_v46  ;;  %v4816_v61 = vrot.slane %v4814_v3, 3  ;;  %v4819_v30 = vrot.slane %v4817_v35, 4  ;;  %v4995_v35 = vld [vmem:[#allocation4 + $0x38] sm:$0xf] }
 0x24a   : > { %v4795_v48 = vor.u32 %v4794_v54, %v4791_v60  ;;  %7213 = vmatprep.mubr.bf16.mxu1 %v4264_v39  ;;  %v4010_v31 = vshll.u32 %v3854_v63, 16  ;;  %v4015_v33 = vshrl.u32 %v3855_v40, 16  ;;  %v4009_v34 = vrot.slane %v4007_v22, 3  ;;  %v10376_v54 = vld [vmem:[%s11319_s4] ss:$0 sm:$0xff] }
 0x24b   : > { %v4811_v43 = vrot.slane %v4809_v37, 4  ;;  %v4018_v62 = vshll.u32 %v3855_v40, 16  ;;  %v4820_v5 = vor.u32 %v4819_v30, %v4816_v61  ;;  %v4470_v14 = vshrl.u32 %v4332_v19, 16  ;;  %v10384_v37 = vld [vmem:[%s11320_s5] ss:$0 sm:$0xff] }
 0x24c   : > { %v4804_v42 = vsel %vm649_vm5, %v4795_v48, %v4803_v15  ;;  %v4012_v26 = vrot.slane %v4010_v31, 4  ;;  %v4017_v2 = vrot.slane %v4015_v33, 3  ;;  %v4473_v8 = vshll.u32 %v4332_v19, 16  ;;  %v10397_v61 = vld [vmem:[%s11321_s6] ss:$0 sm:$0xff] }
 0x24d   : > { %v4812_v36 = vor.u32 %v4811_v43, %v4808_v29  ;;  %v4020_v49 = vrot.slane %v4018_v62, 4  ;;  %v4478_v57 = vshrl.u32 %v4333_v9, 16  ;;  %v4481_v58 = vshll.u32 %v4333_v9, 16  ;;  %v5140_v9 = vld [vmem:[#allocation4 + $0x40] sm:$0xf0] }
 0x24e   : > { %v4013_v11 = vor.u32 %v4012_v26, %v4009_v34  ;;  %v4472_v13 = vrot.slane %v4470_v14, 4  ;;  %v4487_v55 = vshrl.u32 %v4334_v18, 16  ;;  %v4475_v24 = vrot.slane %v4473_v8, 5  ;;  %v5141_v33 = vld [vmem:[#allocation4 + $0x48] sm:$0x1f] }
 0x24f   : > { %v4821_v20 = vsel %vm649_vm5, %v4812_v36, %v4820_v5  ;;  %v4021_v41 = vor.u32 %v4020_v49, %v4017_v2  ;;  %v4480_v10 = vrot.slane %v4478_v57, 4  ;;  %v4490_v21 = vshll.u32 %v4334_v18, 16  ;;  %v5473_v36 = vld [vmem:[#allocation4 + $0x30] sm:$0xf8]  ;;  %v5474_v26 = vld [vmem:[#allocation4 + $0x38] sm:$0xf] }
 0x250   : > { %7351 = vmatmul.mubr.bf16.gmra.mrb[72].mxu0 %v10313_v44  ;;  %v4483_v44 = vrot.slane %v4481_v58, 5  ;;  %v4489_v59 = vrot.slane %v4487_v55, 4  ;;  %v4495_v56 = vshrl.u32 %v4335_v4, 16  ;;  %v4498_v60 = vshll.u32 %v4335_v4, 16 }
 0x251   : > { %7358 = vmatprep.mubr.bf16.mxu0 %v4804_v42  ;;  %v4022_v38 = vsel %vm649_vm5, %v4013_v11, %v4021_v41  ;;  %v4476_v46 = vor.u32 %v4475_v24, %v4472_v13  ;;  %v4492_v40 = vrot.slane %v4490_v21, 5  ;;  %v5214_v3 = vrot.slane %v5212_v17, 5  ;;  %v5811_v11 = vld [vmem:[#allocation4 + $0x40] sm:$0xf0] }
 0x252   : > { %v8627_v51 = vpop.f32.mrb[16].mxu0  ;;  %v4484_v16 = vor.u32 %v4483_v44, %v4480_v10  ;;  %7214 = vmatmul.mubr.bf16.gmra.mrb[12].mxu1 %v4022_v38  ;;  %v4497_v48 = vrot.slane %v4495_v56, 4  ;;  %v4500_v45 = vrot.slane %v4498_v60, 5  ;;  %v5060_v31 = vrot.slane %v4994_v53, 4  ;;  %v5143_v38 = vld [vmem:[#allocation4 + $0x58] sm:$0x1f] }
 0x253   : > { %v3536_v27 = vadd.f32 %v10376_v54, %v8627_v51  ;;  %v3527_v63 = vpop.f32.mrb[17].mxu0  ;;  %v4493_v43 = vor.u32 %v4492_v40, %v4489_v59  ;;  %v5215_v17 = vor.u32 %v5214_v3, %v10345_v52  ;;  %v5061_v42 = vrot.slane %v4995_v35, 4  ;;  %v4996_v51 = vld [vmem:[#allocation4 + $0x40] sm:$0xf0]  ;;  %v5142_v59 = vld [vmem:[#allocation4 + $0x50] sm:$0xf0] }
 0x254   : > { %v3528_v28 = vadd.f32 %v10376_v54, %v3527_v63  ;;  %v8628_v50 = vpop.f32.mrb[18].mxu0  ;;  %v4485_v39 = vsel %vm1164_vm3, %v4476_v46, %v4484_v16  ;;  %v4501_v22 = vor.u32 %v4500_v45, %v4497_v48  ;;  %v5218_v52 = vshrl.u32 %v5140_v9, 16  ;;  %v4997_v63 = vld [vmem:[#allocation4 + $0x48] sm:$0xf] }
 0x255   : > { %v3615_v1 = vmul.f32 %v10384_v37, %v3536_v27  ;;  %v3539_v19 = vadd.f32 %v10376_v54, %v8628_v50  ;;  %v3530_v25 = vpop.f32.mrb[19].mxu0  ;;  %v5216_v5 = vsel %vm1164_vm3, %v5207_v23, %v5215_v17  ;;  %v5062_v4 = vsel %vm1018_vm4, %v5060_v31, %v5061_v42  ;;  %v5812_v23 = vld [vmem:[#allocation4 + $0x48] sm:$0xf]  ;;  %v8719_v42 = vld [vmem:[%s11322_s7 + $0x120] sm:$0xff]  }
 0x256   : > { %v3613_v15 = vmul.f32 %v10384_v37, %v3528_v28  ;;  %v3531_v29 = vadd.f32 %v10376_v54, %v3530_v25  ;;  %v10405_v18 = vsel %vm1164_vm3, %v4493_v43, %v4501_v22  ;;  %5456 = vst [vmem:[#allocation5 + $0xc8] sm:$0xff] %v5216_v5  ;;  %v5221_v49 = vshll.u32 %v5140_v9, 16  ;;  %5120 = vst [vmem:[#allocation5 + $0xc0] sm:$0xff] %v5062_v4  ;;  %v8723_v5 = vld [vmem:[%s11322_s7 + $0x1c0] sm:$0xff]   ;;  %v8726_v4 = vld [vmem:[%s11322_s7 + $0x1c8] sm:$0xff]  }
 0x257   : > { %v3654_v30 = vadd.f32 %v10397_v61, %v3615_v1  ;;  %v3616_v32 = vmul.f32 %v10384_v37, %v3539_v19  ;;  %v5220_v57 = vrot.slane %v5218_v52, 4  ;;  %v5226_v58 = vshrl.u32 %v5141_v33, 16  ;;  %v8718_v1 = vld [vmem:[%s11322_s7 + $0x160] sm:$0xff]   ;;  %8491 = vmatprep.subr.bf16.mxu0 %v8723_v5 }
 0x258   : > { %7359 = vmatmul.mubr.bf16.gmra.mrb[76].mxu0 %v10326_v47  ;;  %v3652_v7 = vadd.f32 %v10397_v61, %v3613_v15  ;;  %v3614_v47 = vmul.f32 %v10384_v37, %v3531_v29  ;;  %v5223_v55 = vrot.slane %v5221_v49, 5  ;;  %v5521_v12 = vshrl.u32 %v5473_v36, 16  ;;  %8387 = vmatprep.subr.bf16.mxu1 %v8718_v1 }
 0x259   : > { %7366 = vmatprep.mubr.bf16.mxu0 %v4821_v20  ;;  %v3686_v34 = vmax.f32 %v3654_v30, 0.0  ;;  %v3655_v62 = vadd.f32 %v10397_v61, %v3616_v32  ;;  %v5229_v20 = vshll.u32 %v5141_v33, 16  ;;  %v5524_v6 = vshll.u32 %v5473_v36, 16  ;;  %v5813_v32 = vld [vmem:[#allocation4 + $0x50] sm:$0xf0]  ;;  %v8720_v36 = vld [vmem:[%s11322_s7 + $0x168] sm:$0xff]   ;;  %8388 = vmatpush3.bf16.msra.mxu1 %v8719_v42 }
 0x25a   : > { %v3684_v2 = vmax.f32 %v3652_v7, 0.0  ;;  %v3653_v14 = vadd.f32 %v10397_v61, %v3614_v47  ;;  %v5228_v24 = vrot.slane %v5226_v58, 4  ;;  %v5529_v44 = vshrl.u32 %v5474_v26, 16  ;;  %v5814_v7 = vld [vmem:[#allocation4 + $0x58] sm:$0xf]  ;;  %8389 = vmatprep.subr.bf16.mxu1 %v8720_v36  ;;  %v8722_v58 = vld [vmem:[%s11322_s7 + $0x170] sm:$0xff]  }
 0x25b   : > { %v3687_v8 = vmax.f32 %v3655_v62, 0.0  ;;  %v5231_v10 = vrot.slane %v5229_v20, 5  ;;  %v5224_v56 = vor.u32 %v5223_v55, %v5220_v57  ;;  %v5523_v60 = vrot.slane %v5521_v12, 3  ;;  %v5475_v47 = vld [vmem:[#allocation4 + $0x40] sm:$0xf8]  ;;  %v8724_v12 = vld [vmem:[%s11322_s7 + $0x130] sm:$0xff]  }
 0x25c   : > { %v3685_v13 = vmax.f32 %v3653_v14, 0.0  ;;  %v5526_v27 = vrot.slane %v5524_v6, 4  ;;  %v5531_v28 = vrot.slane %v5529_v44, 3  ;;  %v5532_v50 = vshll.u32 %v5474_v26, 16  ;;  %v8725_v14 = vld [vmem:[%s11322_s7 + $0x180] sm:$0xff]  }
 0x25d   : > { %v3709_v41 = vpack.c.bf16 %v3687_v8, %v3686_v34  ;;  %v5232_v16 = vor.u32 %v5231_v10, %v5228_v24  ;;  %v5877_v45 = vrot.slane %v5811_v11, 4  ;;  %v5878_v53 = vrot.slane %v5812_v23, 4  ;;  %v10439_v57 = vld [vmem:[#allocation4 + $0x48] sm:$0xf]  ;;  %8492 = vmatpush3.bf16.msra.mxu0 %v8725_v14 }
 0x25e   : > { %v3708_v21 = vpack.c.bf16 %v3685_v13, %v3684_v2  ;;  %v5527_v48 = vor.u32 %v5526_v27, %v5523_v60  ;;  %v5534_v25 = vrot.slane %v5532_v50, 4  ;;  %v5064_v3 = vrot.slane %v4997_v63, 4  ;;  %v8721_v2 = vld [vmem:[%s11322_s7 + $0x128] sm:$0xff]   ;;  %8493 = vmatprep.subr.bf16.mxu0 %v8726_v4  ;;  %v8732_v4 = vld [vmem:[%s11322_s7 + $0x1d8] sm:$0xff]  }
 0x25f   : > { %v3782_v46 = vrot.slane %v3709_v41, 4  ;;  %v5233_v19 = vsel %vm1164_vm3, %v5224_v56, %v5232_v16  ;;  %v5879_v35 = vsel %vm1018_vm4, %v5877_v45, %v5878_v53  ;;  %v5235_v9 = vshrl.u32 %v5142_v59, 16  ;;  %8390 = vmatpush3.bf16.msra.mxu1 %v8721_v2 }
 0x260   : > { %7367 = vmatmul.mubr.bf16.gmra.mrb[80].mxu0 %v4485_v39  ;;  %v3781_v40 = vrot.slane %v3708_v21, 4  ;;  %v5063_v39 = vrot.slane %v4996_v51, 4  ;;  %5457 = vst [vmem:[#allocation5 + $0x118] sm:$0xff] %v5233_v19  ;;  %v5238_v15 = vshll.u32 %v5142_v59, 16  ;;  %v5243_v29 = vshrl.u32 %v5143_v38, 16  ;;  %5937 = vst [vmem:[#allocation5 + $0xd8] sm:$0xff] %v5879_v35  ;;  %8391 = vmatprep.subr.bf16.mxu1 %v8722_v58 }
 0x261   : > { %3824 = vst [vmem:[#allocation4 + $0xa8] ss:$-4 sps:$4 sm:$0xff] %v3782_v46   ;;  %v5535_v43 = vor.u32 %v5534_v25, %v5531_v28  ;;  %v5246_v30 = vshll.u32 %v5143_v38, 16  ;;  %v5237_v17 = vrot.slane %v5235_v9, 4  ;;  %v5880_v26 = vrot.slane %v5813_v32, 4 }
 0x262   : > { %3822 = vst [vmem:[#allocation4 + $0x98] ss:$-4 sps:$4 sm:$0xff] %v3781_v40   ;;  %v5065_v22 = vsel %vm1018_vm4, %v5063_v39, %v5064_v3  ;;  %v5240_v31 = vrot.slane %v5238_v15, 5  ;;  %v5245_v33 = vrot.slane %v5243_v29, 4  ;;  %v5881_v8 = vrot.slane %v5814_v7, 4  ;;  %v8727_v29 = vld [vmem:[%s11322_s7 + $0x188] sm:$0xff]  }
 0x263   : > { %5121 = vst [vmem:[#allocation5 + $0x110] sm:$0xff] %v5065_v22  ;;  %v5536_v34 = vsel %vm649_vm5, %v5527_v48, %v5535_v43  ;;  %v5248_v62 = vrot.slane %v5246_v30, 5  ;;  %v5538_v20 = vshrl.u32 %v5475_v47, 16  ;;  %v5541_v11 = vshll.u32 %v5475_v47, 16  ;;  %8392 = vmatpush3.bf16.msra.mxu1 %v8724_v12  ;;  %v8728_v43 = vld [vmem:[%s11322_s7 + $0x1d0] sm:$0xff]   ;;  %8494 = vmatpush3.bf16.msra.mxu0 %v8727_v29 }
 0x264   : > { %5792 = vst [vmem:[#allocation5 + $0x80] sm:$0xff] %v5536_v34  ;;  %v5241_v52 = vor.u32 %v5240_v31, %v5237_v17  ;;  %v5882_v55 = vsel %vm1018_vm4, %v5880_v26, %v5881_v8  ;;  %v5546_v6 = vshrl.u32 %v10439_v57, 16  ;;  %v5549_v21 = vshll.u32 %v10439_v57, 16  ;;  %v8730_v31 = vld [vmem:[%s11322_s7 + $0x178] sm:$0xff]   ;;  %8495 = vmatprep.subr.bf16.mxu0 %v8728_v43 }
 0x265   : > { %v5249_v49 = vor.u32 %v5248_v62, %v5245_v33  ;;  %5938 = vst [vmem:[#allocation5 + $0x128] sm:$0xff] %v5882_v55  ;;  %v10450_v23 = vrot.slane %v5538_v20, 3  ;;  %v10452_v41 = vrot.slane %v5541_v11, 4  ;;  %v8731_v33 = vld [vmem:[%s11322_s7 + $0x138] sm:$0xff]   ;;  %v8729_v62 = vld [vmem:[%s11322_s7 + $0x190] sm:$0xff]   ;;  %8393 = vmatprep.subr.bf16.mxu1 %v8730_v31 }
 0x266   : > { %v10454_v59 = vrot.slane %v5546_v6, 3 }
 0x267   : > { %v5250_v13 = vsel %vm1164_vm3, %v5241_v52, %v5249_v49  ;;  %v5544_v38 = vor.u32 %v10452_v41, %v10450_v23  ;;  %8394 = vmatpush3.bf16.msra.mxu1 %v8731_v33  ;;  %8496 = vmatpush3.bf16.msra.mxu0 %v8729_v62  ;;  %v8736_v33 = vld [vmem:[%s11322_s7 + $0x1e8] sm:$0xff]  }
 0x268   : > { %5458 = vst [vmem:[#allocation5 + $0x168] sm:$0xff] %v5250_v13  ;;  %v4672_v46 = vld [vmem:[#allocation4 + $0xa0] sm:$0xf8]  ;;  %v4673_v45 = vld [vmem:[#allocation4 + $0xa8] sm:$0xf]  ;;  %7761 = vmatprep.subr.bf16.mxu1 %v8833_v0  ;;  %8497 = vmatprep.subr.bf16.mxu0 %v8732_v4 }
 0x269   : > { %v3856_v24 = vld [vmem:[#allocation4 + $0x90] sm:$0xf8]  ;;  %v3857_v10 = vld [vmem:[#allocation4 + $0x98] sm:$0xf]  ;;  %v4194_v48 = vld [vmem:[#allocation4 + $0xa0] sm:$0xf0] }
 0x26a   : > { %v4670_v44 = vld [vmem:[#allocation4 + $0x90] sm:$0xf8]  ;;  %v4671_v51 = vld [vmem:[#allocation4 + $0x98] sm:$0xf]  ;;  %v4024_v27 = vshrl.u32 %v3856_v24, 16  ;;  %v4027_v63 = vshll.u32 %v3856_v24, 16 }
 0x26b   : > { %v4192_v56 = vld [vmem:[#allocation4 + $0x90] sm:$0xf0]  ;;  %v4193_v60 = vld [vmem:[#allocation4 + $0x98] sm:$0xf]  ;;  %v4032_v50 = vshrl.u32 %v3857_v10, 16  ;;  %v4035_v40 = vshll.u32 %v3857_v10, 16 }
 0x26c   : > { %v4265_v16 = vrot.slane %v4192_v56, 4  ;;  %v4266_v28 = vrot.slane %v4193_v60, 4  ;;  %v4026_v53 = vrot.slane %v4024_v27, 3  ;;  %v4029_v1 = vrot.slane %v4027_v63, 4  ;;  %v4195_v39 = vld [vmem:[#allocation4 + $0xa8] sm:$0xf] }
 0x26d   : > { %v4823_v19 = vshrl.u32 %v4670_v44, 16  ;;  %v4826_v25 = vshll.u32 %v4670_v44, 16  ;;  %v4034_v35 = vrot.slane %v4032_v50, 3  ;;  %v4037_v9 = vrot.slane %v4035_v40, 4  ;;  %v3858_v7 = vld [vmem:[#allocation4 + $0xa0] sm:$0xf8] }
 0x26e   : > { %v4267_v3 = vsel %vm1018_vm4, %v4265_v16, %v4266_v28  ;;  %v4831_v15 = vshrl.u32 %v4671_v51, 16  ;;  %v4030_v22 = vor.u32 %v4029_v1, %v4026_v53  ;;  %v4834_v17 = vshll.u32 %v4671_v51, 16  ;;  %v3859_v5 = vld [vmem:[#allocation4 + $0xa8] sm:$0xf]  ;;  %v4336_v49 = vld [vmem:[#allocation4 + $0x90] sm:$0xf0] }
 0x26f   : > { %7221 = vmatprep.mubr.bf16.mxu1 %v4267_v3  ;;  %v4825_v30 = vrot.slane %v4823_v19, 3  ;;  %v4828_v32 = vrot.slane %v4826_v25, 4  ;;  %v4038_v47 = vor.u32 %v4037_v9, %v4034_v35  ;;  %v4268_v36 = vrot.slane %v4194_v48, 4  ;;  %v4337_v13 = vld [vmem:[#allocation4 + $0x98] sm:$0x1f]  ;;  %v8733_v60 = vld [vmem:[%s11322_s7 + $0x198] sm:$0xff]  }
 0x270   : > { %v4833_v42 = vrot.slane %v4831_v15, 3  ;;  %v4269_v34 = vrot.slane %v4195_v39, 4  ;;  %v4836_v26 = vrot.slane %v4834_v17, 4  ;;  %v4840_v2 = vshrl.u32 %v4672_v46, 16  ;;  %v8734_v28 = vld [vmem:[%s11322_s7 + $0x1e0] sm:$0xff]   ;;  %8498 = vmatpush3.bf16.msra.mxu0 %v8733_v60 }
 0x271   : > { %v4829_v52 = vor.u32 %v4828_v32, %v4825_v30  ;;  %v4843_v14 = vshll.u32 %v4672_v46, 16  ;;  %v4039_v8 = vsel %vm649_vm5, %v4030_v22, %v4038_v47  ;;  %v4848_v20 = vshrl.u32 %v4673_v45, 16  ;;  %v4338_v50 = vld [vmem:[#allocation4 + $0xa0] sm:$0xf0]  ;;  %v8735_v22 = vld [vmem:[%s11322_s7 + $0x1a0] sm:$0xff]   ;;  %8499 = vmatprep.subr.bf16.mxu0 %v8734_v28 }
 0x272   : > { %v4270_v58 = vsel %vm1018_vm4, %v4268_v36, %v4269_v34  ;;  %v4851_v11 = vshll.u32 %v4673_v45, 16  ;;  %7222 = vmatmul.mubr.bf16.gmra.mrb[16].mxu1 %v4039_v8  ;;  %v4837_v55 = vor.u32 %v4836_v26, %v4833_v42  ;;  %v4842_v12 = vrot.slane %v4840_v2, 3  ;;  %v4999_v60 = vld [vmem:[#allocation4 + $0x58] sm:$0xf] }
 0x273   : > { %v4845_v6 = vrot.slane %v4843_v14, 4  ;;  %v4041_v24 = vshrl.u32 %v3858_v7, 16  ;;  %7229 = vmatprep.mubr.bf16.mxu1 %v4270_v58  ;;  %v4850_v10 = vrot.slane %v4848_v20, 3  ;;  %v4044_v51 = vshll.u32 %v3858_v7, 16  ;;  %v4339_v7 = vld [vmem:[#allocation4 + $0xa8] sm:$0x1f] }
 0x274   : > { %v4853_v44 = vrot.slane %v4851_v11, 4  ;;  %v4049_v56 = vshrl.u32 %v3859_v5, 16  ;;  %v4838_v27 = vsel %vm649_vm5, %v4829_v52, %v4837_v55  ;;  %v4052_v16 = vshll.u32 %v3859_v5, 16  ;;  %8500 = vmatpush3.bf16.msra.mxu0 %v8735_v22  ;;  %v8737_v58 = vld [vmem:[%s11322_s7 + $0x1a8] sm:$0xff]   ;;  %v5478_v22 = vld [vmem:[#allocation4 + $0x58] sm:$0xf] }
 0x275   : > { %v4846_v63 = vor.u32 %v4845_v6, %v4842_v12  ;;  %v4043_v46 = vrot.slane %v4041_v24, 3  ;;  %7374 = vmatprep.mubr.bf16.mxu0 %v4838_v27  ;;  %v4046_v48 = vrot.slane %v4044_v51, 4  ;;  %v4504_v53 = vshrl.u32 %v4336_v49, 16  ;;  %8501 = vmatprep.subr.bf16.mxu0 %v8736_v33  ;;  %v8739_v12 = vld [vmem:[%s11322_s7 + $0x1f0] sm:$0xff]   ;;  %v4998_v6 = vld [vmem:[#allocation4 + $0x50] sm:$0xf0] }
 0x276   : > { %v4854_v40 = vor.u32 %v4853_v44, %v4850_v10  ;;  %v4051_v45 = vrot.slane %v4049_v56, 3  ;;  %7375 = vmatmul.mubr.bf16.gmra.mrb[84].mxu0 %v10405_v18  ;;  %v4054_v19 = vrot.slane %v4052_v16, 4  ;;  %v4507_v25 = vshll.u32 %v4336_v49, 16  ;;  %v5144_v24 = vld [vmem:[#allocation4 + $0x60] sm:$0xf0]  ;;  %v8742_v33 = vld [vmem:[%s11322_s7 + $0x1b8] sm:$0xff]  }
 0x277   : > { %v4512_v39 = vshrl.u32 %v4337_v13, 16  ;;  %v4515_v3 = vshll.u32 %v4337_v13, 16  ;;  %v4047_v29 = vor.u32 %v4046_v48, %v4043_v46  ;;  %v4506_v43 = vrot.slane %v4504_v53, 4  ;;  %v5145_v27 = vld [vmem:[#allocation4 + $0x68] sm:$0x1f] }
 0x278   : > { %v4855_v15 = vsel %vm649_vm5, %v4846_v63, %v4854_v40  ;;  %v4055_v18 = vor.u32 %v4054_v19, %v4051_v45  ;;  %v4509_v17 = vrot.slane %v4507_v25, 5  ;;  %v4521_v62 = vshrl.u32 %v4338_v50, 16  ;;  %8502 = vmatpush3.bf16.msra.mxu0 %v8737_v58  ;;  %v8740_v48 = vld [vmem:[%s11322_s7 + $0x1b0] sm:$0xff]   ;;  %v8741_v25 = vld [vmem:[%s11322_s7 + $0x1f8] sm:$0xff]  }
 0x279   : > { %7382 = vmatprep.mubr.bf16.mxu0 %v4855_v15  ;;  %v4514_v31 = vrot.slane %v4512_v39, 4  ;;  %v4517_v34 = vrot.slane %v4515_v3, 5  ;;  %v4524_v13 = vshll.u32 %v4338_v50, 16  ;;  %v4529_v55 = vshrl.u32 %v4339_v7, 16  ;;  %8503 = vmatprep.subr.bf16.mxu0 %v8739_v12 }
 0x27a   : > { %v4056_v26 = vsel %vm649_vm5, %v4047_v29, %v4055_v18  ;;  %v4510_v2 = vor.u32 %v4509_v17, %v4506_v43  ;;  %v4523_v8 = vrot.slane %v4521_v62, 4  ;;  %v4532_v56 = vshll.u32 %v4339_v7, 16  ;;  %v5815_v18 = vld [vmem:[#allocation4 + $0x60] sm:$0xf0] }
 0x27b   : > { %7230 = vmatmul.mubr.bf16.gmra.mrb[20].mxu1 %v4056_v26  ;;  %v4518_v49 = vor.u32 %v4517_v34, %v4514_v31  ;;  %v4526_v16 = vrot.slane %v4524_v13, 5  ;;  %v4531_v28 = vrot.slane %v4529_v55, 4  ;;  %v5551_v45 = vrot.slane %v5549_v21, 4 }
 0x27c   : > { %v8631_v1 = vpop.f32.mrb[20].mxu0  ;;  %v4534_v40 = vrot.slane %v4532_v56, 5  ;;  %v5066_v53 = vrot.slane %v4998_v6, 4  ;;  %v5067_v39 = vrot.slane %v4999_v60, 4  ;;  %v5252_v3 = vshrl.u32 %v5144_v24, 16  ;;  %8504 = vmatpush3.bf16.msra.mxu0 %v8740_v48 }
 0x27d   : > { %v3552_v35 = vadd.f32 %v10376_v54, %v8631_v1  ;;  %v3543_v9 = vpop.f32.mrb[21].mxu0  ;;  %v4519_v51 = vsel %vm1164_vm3, %v4510_v2, %v4518_v49  ;;  %v4527_v19 = vor.u32 %v4526_v16, %v4523_v8  ;;  %v5552_v29 = vor.u32 %v5551_v45, %v10454_v59  ;;  %8505 = vmatprep.subr.bf16.mxu0 %v8741_v25  ;;  %v5146_v6 = vld [vmem:[#allocation4 + $0x70] sm:$0xf0]  ;;  %v10540_v60 = vld [vmem:[#allocation4 + $0x78] sm:$0x1f] }
 0x27e   : > { %v3544_v30 = vadd.f32 %v10376_v54, %v3543_v9  ;;  %v8632_v32 = vpop.f32.mrb[22].mxu0  ;;  %7383 = vmatmul.mubr.bf16.gmra.mrb[88].mxu0 %v4519_v51  ;;  %v4535_v15 = vor.u32 %v4534_v40, %v4531_v28  ;;  %v5255_v43 = vshll.u32 %v5144_v24, 16  ;;  %v5068_v57 = vsel %vm1018_vm4, %v5066_v53, %v5067_v39  ;;  %v10543_v16 = vld [vmem:[#allocation4 + $0x60] sm:$0xf8] }
 0x27f   : > { %v3619_v47 = vmul.f32 %v10384_v37, %v3552_v35  ;;  %v3555_v42 = vadd.f32 %v10376_v54, %v8632_v32  ;;  %v3546_v36 = vpop.f32.mrb[23].mxu0  ;;  %v5477_v35 = vld [vmem:[#allocation4 + $0x50] sm:$0xf8]  ;;  %v5254_v21 = vrot.slane %v5252_v3, 4  ;;  %v5260_v32 = vshrl.u32 %v5145_v27, 16  ;;  %5122 = vst [vmem:[#allocation5 + $0x160] sm:$0xff] %v5068_v57 }
 0x280   : > { %v3617_v5 = vmul.f32 %v10384_v37, %v3544_v30  ;;  %v3547_v52 = vadd.f32 %v10376_v54, %v3546_v36  ;;  %v10527_v31 = vsel %vm1164_vm3, %v4527_v19, %v4535_v15  ;;  %v5553_v59 = vsel %vm649_vm5, %v5544_v38, %v5552_v29  ;;  %8506 = vmatpush3.bf16.msra.mxu0 %v8742_v33 }
 0x281   : > { %v3658_v14 = vadd.f32 %v10397_v61, %v3619_v47  ;;  %v3620_v4 = vmul.f32 %v10384_v37, %v3555_v42  ;;  %v5257_v7 = vrot.slane %v5255_v43, 5  ;;  %v5816_v47 = vld [vmem:[#allocation4 + $0x68] sm:$0xf]  ;;  %5793 = vst [vmem:[#allocation5 + $0xd0] sm:$0xff] %v5553_v59  ;;  %v5262_v36 = vrot.slane %v5260_v32, 4 }
 0x282   : > { %v3656_v20 = vadd.f32 %v10397_v61, %v3617_v5  ;;  %v3618_v11 = vmul.f32 %v10384_v37, %v3547_v52  ;;  %v5263_v34 = vshll.u32 %v5145_v27, 16  ;;  %v5555_v62 = vshrl.u32 %v5477_v35, 16  ;;  %v5000_v5 = vld [vmem:[#allocation4 + $0x60] sm:$0xf0] }
 0x283   : > { %v3690_v10 = vmax.f32 %v3658_v14, 0.0  ;;  %v3659_v44 = vadd.f32 %v10397_v61, %v3620_v4  ;;  %v5258_v52 = vor.u32 %v5257_v7, %v5254_v21  ;;  %v5558_v26 = vshll.u32 %v5477_v35, 16  ;;  %v5001_v4 = vld [vmem:[#allocation4 + $0x68] sm:$0xf] }
 0x284   : > { %v3688_v63 = vmax.f32 %v3656_v20, 0.0  ;;  %v3657_v46 = vadd.f32 %v10397_v61, %v3618_v11  ;;  %v5563_v2 = vshrl.u32 %v5478_v22, 16  ;;  %v5566_v14 = vshll.u32 %v5478_v22, 16 }
 0x285   : > { %v3691_v50 = vmax.f32 %v3659_v44, 0.0  ;;  %v5265_v23 = vrot.slane %v5263_v34, 5  ;;  %v5557_v41 = vrot.slane %v5555_v62, 3  ;;  %v5883_v38 = vrot.slane %v5815_v18, 4 }
 0x286   : > { %v3689_v1 = vmax.f32 %v3657_v46, 0.0  ;;  %v5884_v49 = vrot.slane %v5816_v47, 4  ;;  %v5560_v8 = vrot.slane %v5558_v26, 4  ;;  %v5565_v58 = vrot.slane %v5563_v2, 3 }
 0x287   : > { %v3711_v9 = vpack.c.bf16 %v3691_v50, %v3690_v10  ;;  %v5568_v20 = vrot.slane %v5566_v14, 4  ;;  %v5069_v11 = vrot.slane %v5000_v5, 4  ;;  %v5266_v13 = vor.u32 %v5265_v23, %v5262_v36 }
 0x288   : > { %v3710_v30 = vpack.c.bf16 %v3689_v1, %v3688_v63  ;;  %v5885_v55 = vsel %vm1018_vm4, %v5883_v38, %v5884_v49  ;;  %v5070_v12 = vrot.slane %v5001_v4, 4  ;;  %v5561_v24 = vor.u32 %v5560_v8, %v5557_v41 }
 0x289   : > { %v3784_v17 = vrot.slane %v3711_v9, 4  ;;  %v5569_v10 = vor.u32 %v5568_v20, %v5565_v58  ;;  %5939 = vst [vmem:[#allocation5 + $0x178] sm:$0xff] %v5885_v55  ;;  %v5267_v44 = vsel %vm1164_vm3, %v5258_v52, %v5266_v13  ;;  %v5269_v27 = vshrl.u32 %v5146_v6, 16 }
 0x28a   : > { %v3783_v42 = vrot.slane %v3710_v30, 4  ;;  %v5071_v51 = vsel %vm1018_vm4, %v5069_v11, %v5070_v12  ;;  %5459 = vst [vmem:[#allocation5 + $0x1b8] sm:$0xff] %v5267_v44  ;;  %v5272_v63 = vshll.u32 %v5146_v6, 16  ;;  %v5277_v46 = vshrl.u32 %v10540_v60, 16 }
 0x28b   : > { %3828 = vst [vmem:[#allocation4 + $0xc8] ss:$-4 sps:$4 sm:$0xff] %v3784_v17   ;;  %v5570_v56 = vsel %vm649_vm5, %v5561_v24, %v5569_v10  ;;  %5123 = vst [vmem:[#allocation5 + $0x1b0] sm:$0xff] %v5071_v51  ;;  %v10545_v28 = vrot.slane %v5269_v27, 4  ;;  %v5280_v45 = vshll.u32 %v10540_v60, 16  ;;  %v5572_v25 = vshrl.u32 %v10543_v16, 16 }
 0x28c   : > { %3826 = vst [vmem:[#allocation4 + $0xb8] ss:$-4 sps:$4 sm:$0xff] %v3783_v42   ;;  %5794 = vst [vmem:[#allocation5 + $0x120] sm:$0xff] %v5570_v56  ;;  %v10547_v50 = vrot.slane %v5272_v63, 5  ;;  %v10550_v19 = vrot.slane %v5277_v46, 4 }
 0x28e   : > { %v5275_v15 = vor.u32 %v10547_v50, %v10545_v28 }
 0x292   : > { %v4198_v57 = vld [vmem:[#allocation4 + $0xc0] sm:$0xf0]  ;;  %v4199_v33 = vld [vmem:[#allocation4 + $0xc8] sm:$0xf] }
 0x293   : > { %v3860_v40 = vld [vmem:[#allocation4 + $0xb0] sm:$0xf8]  ;;  %v3861_v48 = vld [vmem:[#allocation4 + $0xb8] sm:$0xf]  ;;  %v4676_v59 = vld [vmem:[#allocation4 + $0xc0] sm:$0xf8] }
 0x294   : > { %v4674_v53 = vld [vmem:[#allocation4 + $0xb0] sm:$0xf8]  ;;  %v4675_v1 = vld [vmem:[#allocation4 + $0xb8] sm:$0xf]  ;;  %v4058_v35 = vshrl.u32 %v3860_v40, 16  ;;  %v4061_v9 = vshll.u32 %v3860_v40, 16 }
 0x295   : > { %v4196_v39 = vld [vmem:[#allocation4 + $0xb0] sm:$0xf0]  ;;  %v4197_v3 = vld [vmem:[#allocation4 + $0xb8] sm:$0xf]  ;;  %v4066_v22 = vshrl.u32 %v3861_v48, 16  ;;  %v4069_v30 = vshll.u32 %v3861_v48, 16 }
 0x296   : > { %v4271_v29 = vrot.slane %v4196_v39, 4  ;;  %v4272_v43 = vrot.slane %v4197_v3, 4  ;;  %v4060_v21 = vrot.slane %v4058_v35, 3  ;;  %v4063_v32 = vrot.slane %v4061_v9, 4  ;;  %v4677_v34 = vld [vmem:[#allocation4 + $0xc8] sm:$0xf] }
 0x297   : > { %v4857_v18 = vshrl.u32 %v4674_v53, 16  ;;  %v4860_v17 = vshll.u32 %v4674_v53, 16  ;;  %v4068_v47 = vrot.slane %v4066_v22, 3  ;;  %v4071_v42 = vrot.slane %v4069_v30, 4  ;;  %v3862_v2 = vld [vmem:[#allocation4 + $0xc0] sm:$0xf8] }
 0x298   : > { %v4273_v7 = vsel %vm1018_vm4, %v4271_v29, %v4272_v43  ;;  %v4865_v36 = vshrl.u32 %v4675_v1, 16  ;;  %v4064_v62 = vor.u32 %v4063_v32, %v4060_v21  ;;  %v4868_v26 = vshll.u32 %v4675_v1, 16  ;;  %v3863_v38 = vld [vmem:[#allocation4 + $0xc8] sm:$0xf]  ;;  %v4340_v6 = vld [vmem:[#allocation4 + $0xb0] sm:$0xf0] }
 0x299   : > { %7237 = vmatprep.mubr.bf16.mxu1 %v4273_v7  ;;  %v4859_v5 = vrot.slane %v4857_v18, 3  ;;  %v4862_v52 = vrot.slane %v4860_v17, 4  ;;  %v4072_v14 = vor.u32 %v4071_v42, %v4068_v47  ;;  %v4274_v23 = vrot.slane %v4198_v57, 4  ;;  %v4341_v56 = vld [vmem:[#allocation4 + $0xb8] sm:$0x1f] }
 0x29a   : > { %v4867_v4 = vrot.slane %v4865_v36, 3  ;;  %v4275_v41 = vrot.slane %v4199_v33, 4  ;;  %v4870_v8 = vrot.slane %v4868_v26, 4  ;;  %v4874_v58 = vshrl.u32 %v4676_v59, 16  ;;  %v4342_v48 = vld [vmem:[#allocation4 + $0xc0] sm:$0xf0] }
 0x29b   : > { %v4863_v49 = vor.u32 %v4862_v52, %v4859_v5  ;;  %v4877_v20 = vshll.u32 %v4676_v59, 16  ;;  %v4073_v11 = vsel %vm649_vm5, %v4064_v62, %v4072_v14  ;;  %v4882_v55 = vshrl.u32 %v4677_v34, 16  ;;  %v4343_v22 = vld [vmem:[#allocation4 + $0xc8] sm:$0x1f] }
 0x29c   : > { %v4276_v13 = vsel %vm1018_vm4, %v4274_v23, %v4275_v41  ;;  %v4885_v12 = vshll.u32 %v4677_v34, 16  ;;  %7238 = vmatmul.mubr.bf16.gmra.mrb[24].mxu1 %v4073_v11  ;;  %v4871_v24 = vor.u32 %v4870_v8, %v4867_v4  ;;  %v4876_v10 = vrot.slane %v4874_v58, 3 }
 0x29d   : > { %v4879_v44 = vrot.slane %v4877_v20, 4  ;;  %v4075_v51 = vshrl.u32 %v3862_v2, 16  ;;  %7245 = vmatprep.mubr.bf16.mxu1 %v4276_v13  ;;  %v4884_v27 = vrot.slane %v4882_v55, 3  ;;  %v4078_v46 = vshll.u32 %v3862_v2, 16 }
 0x29e   : > { %v4887_v63 = vrot.slane %v4885_v12, 4  ;;  %v4083_v40 = vshrl.u32 %v3863_v38, 16  ;;  %v4872_v53 = vsel %vm649_vm5, %v4863_v49, %v4871_v24  ;;  %v4086_v3 = vshll.u32 %v3863_v38, 16 }
 0x29f   : > { %v4880_v1 = vor.u32 %v4879_v44, %v4876_v10  ;;  %v4077_v39 = vrot.slane %v4075_v51, 3  ;;  %7390 = vmatprep.mubr.bf16.mxu0 %v4872_v53  ;;  %v4080_v9 = vrot.slane %v4078_v46, 4  ;;  %v4538_v43 = vshrl.u32 %v4340_v6, 16  ;;  %v5148_v46 = vld [vmem:[#allocation4 + $0x80] sm:$0xf0] }
 0x2a0   : > { %v4888_v35 = vor.u32 %v4887_v63, %v4884_v27  ;;  %v4085_v29 = vrot.slane %v4083_v40, 3  ;;  %7391 = vmatmul.mubr.bf16.gmra.mrb[92].mxu0 %v10527_v31  ;;  %v4088_v30 = vrot.slane %v4086_v3, 4  ;;  %v4541_v57 = vshll.u32 %v4340_v6, 16  ;;  %v5480_v6 = vld [vmem:[#allocation4 + $0x68] sm:$0xf] }
 0x2a1   : > { %v4546_v21 = vshrl.u32 %v4341_v56, 16  ;;  %v4549_v32 = vshll.u32 %v4341_v56, 16  ;;  %v4081_v17 = vor.u32 %v4080_v9, %v4077_v39  ;;  %v4540_v33 = vrot.slane %v4538_v43, 4  ;;  %v5817_v39 = vld [vmem:[#allocation4 + $0x70] sm:$0xf0] }
 0x2a2   : > { %v4889_v18 = vsel %vm649_vm5, %v4880_v1, %v4888_v35  ;;  %v4555_v59 = vshrl.u32 %v4342_v48, 16  ;;  %v4089_v47 = vor.u32 %v4088_v30, %v4085_v29  ;;  %v4543_v42 = vrot.slane %v4541_v57, 5  ;;  %v5002_v9 = vld [vmem:[#allocation4 + $0x70] sm:$0xf0]  ;;  %v5003_v30 = vld [vmem:[#allocation4 + $0x78] sm:$0xf] }
 0x2a3   : > { %7398 = vmatprep.mubr.bf16.mxu0 %v4889_v18  ;;  %v4548_v36 = vrot.slane %v4546_v21, 4  ;;  %v4551_v34 = vrot.slane %v4549_v32, 5  ;;  %v4558_v31 = vshll.u32 %v4342_v48, 16  ;;  %v4563_v26 = vshrl.u32 %v4343_v22, 16  ;;  %v5149_v21 = vld [vmem:[#allocation4 + $0x88] sm:$0x1f] }
 0x2a4   : > { %v4557_v52 = vrot.slane %v4555_v59, 4  ;;  %v4090_v4 = vsel %vm649_vm5, %v4081_v17, %v4089_v47  ;;  %v4544_v23 = vor.u32 %v4543_v42, %v4540_v33  ;;  %v4566_v12 = vshll.u32 %v4343_v22, 16  ;;  %v5481_v59 = vld [vmem:[#allocation4 + $0x70] sm:$0xf8]  ;;  %v5482_v47 = vld [vmem:[#allocation4 + $0x78] sm:$0xf] }
 0x2a5   : > { %v4552_v41 = vor.u32 %v4551_v34, %v4548_v36  ;;  %7246 = vmatmul.mubr.bf16.gmra.mrb[28].mxu1 %v4090_v4  ;;  %v4560_v58 = vrot.slane %v4558_v31, 5  ;;  %v4565_v20 = vrot.slane %v4563_v26, 4  ;;  %v5282_v51 = vrot.slane %v5280_v45, 5 }
 0x2a6   : > { %v4568_v63 = vrot.slane %v4566_v12, 5  ;;  %v5575_v1 = vshll.u32 %v10543_v16, 16  ;;  %v5580_v35 = vshrl.u32 %v5480_v6, 16  ;;  %v5583_v22 = vshll.u32 %v5480_v6, 16 }
 0x2a7   : > { %v4553_v55 = vsel %vm1164_vm3, %v4544_v23, %v4552_v41  ;;  %v4561_v44 = vor.u32 %v4560_v58, %v4557_v52  ;;  %v5283_v53 = vor.u32 %v5282_v51, %v10550_v19  ;;  %v5072_v28 = vrot.slane %v5002_v9, 4 }
 0x2a8   : > { %7399 = vmatmul.mubr.bf16.gmra.mrb[96].mxu0 %v4553_v55  ;;  %v4569_v3 = vor.u32 %v4568_v63, %v4565_v20  ;;  %v5577_v43 = vrot.slane %v5575_v1, 4  ;;  %v5582_v57 = vrot.slane %v5580_v35, 3  ;;  %v5585_v17 = vrot.slane %v5583_v22, 4 }
 0x2a9   : > { %v5073_v50 = vrot.slane %v5003_v30, 4  ;;  %v5297_v41 = vshll.u32 %v5149_v21, 16  ;;  %v5592_v58 = vshll.u32 %v5481_v59, 16  ;;  %v5597_v20 = vshrl.u32 %v5482_v47, 16 }
 0x2aa   : > { %v8635_v7 = vpop.f32.mrb[24].mxu0  ;;  %v10586_v16 = vsel %vm1164_vm3, %v4561_v44, %v4569_v3  ;;  %v5586_v36 = vor.u32 %v5585_v17, %v5582_v57 }
 0x2ab   : > { %v3568_v62 = vadd.f32 %v10376_v54, %v8635_v7  ;;  %v3559_v5 = vpop.f32.mrb[25].mxu0  ;;  %v5074_v31 = vsel %vm1018_vm4, %v5072_v28, %v5073_v50  ;;  %v5299_v12 = vrot.slane %v5297_v41, 5  ;;  %v5599_v44 = vrot.slane %v5597_v20, 3 }
 0x2ac   : > { %v3560_v2 = vadd.f32 %v10376_v54, %v3559_v5  ;;  %v8636_v14 = vpop.f32.mrb[26].mxu0  ;;  %v5819_v5 = vld [vmem:[#allocation4 + $0x80] sm:$0xf0]  ;;  %5124 = vst [vmem:[#allocation5 + $0x200] sm:$0xff] %v5074_v31 }
 0x2ad   : > { %v3623_v38 = vmul.f32 %v10384_v37, %v3568_v62  ;;  %v3571_v49 = vadd.f32 %v10376_v54, %v8636_v14  ;;  %v3562_v8 = vpop.f32.mrb[27].mxu0  ;;  %v5289_v62 = vshll.u32 %v5148_v46, 16  ;;  %v5820_v14 = vld [vmem:[#allocation4 + $0x88] sm:$0xf] }
 0x2ae   : > { %v3621_v11 = vmul.f32 %v10384_v37, %v3560_v2  ;;  %v3563_v13 = vadd.f32 %v10376_v54, %v3562_v8  ;;  %v5574_v54 = vrot.slane %v5572_v25, 3  ;;  %v5284_v25 = vsel %vm1164_vm3, %v5275_v15, %v5283_v53 }
 0x2af   : > { %v3662_v24 = vadd.f32 %v10397_v61, %v3623_v38  ;;  %v3624_v10 = vmul.f32 %v10384_v37, %v3571_v49  ;;  %5460 = vst [vmem:[#allocation5 + $0x208] sm:$0xff] %v5284_v25  ;;  %v5286_v15 = vshrl.u32 %v5148_v46, 16  ;;  %v5294_v2 = vshrl.u32 %v5149_v21, 16  ;;  %v5004_v49 = vld [vmem:[#allocation4 + $0x80] sm:$0xf0] }
 0x2b0   : > { %v3660_v56 = vadd.f32 %v10397_v61, %v3621_v11  ;;  %v3622_v27 = vmul.f32 %v10384_v37, %v3563_v13  ;;  %v5818_v37 = vld [vmem:[#allocation4 + $0x78] sm:$0xf]  ;;  %v5578_v18 = vor.u32 %v5577_v43, %v5574_v54  ;;  %v5291_v23 = vrot.slane %v5289_v62, 5  ;;  %v5005_v13 = vld [vmem:[#allocation4 + $0x88] sm:$0xf] }
 0x2b1   : > { %v3694_v40 = vmax.f32 %v3662_v24, 0.0  ;;  %v3663_v48 = vadd.f32 %v10397_v61, %v3624_v10  ;;  %v5887_v33 = vrot.slane %v5818_v37, 4  ;;  %v5288_v26 = vrot.slane %v5286_v15, 4  ;;  %v8759_v15 = vld [vmem:[%s11319_s4] ss:$0 sm:$0xff] }
 0x2b2   : > { %v3692_v60 = vmax.f32 %v3660_v56, 0.0  ;;  %v3661_v45 = vadd.f32 %v10397_v61, %v3622_v27  ;;  %v5886_v61 = vrot.slane %v5817_v39, 4  ;;  %v5587_v4 = vsel %vm649_vm5, %v5578_v18, %v5586_v36 }
 0x2b3   : > { %v3695_v29 = vmax.f32 %v3663_v48, 0.0  ;;  %v5589_v38 = vshrl.u32 %v5481_v59, 16  ;;  %5795 = vst [vmem:[#allocation5 + $0x170] sm:$0xff] %v5587_v4  ;;  %v5296_v8 = vrot.slane %v5294_v2, 4  ;;  %v5600_v11 = vshll.u32 %v5482_v47, 16 }
 0x2b4   : > { %v3693_v19 = vmax.f32 %v3661_v45, 0.0  ;;  %v5888_v34 = vsel %vm1018_vm4, %v5886_v61, %v5887_v33  ;;  %v5292_v55 = vor.u32 %v5291_v23, %v5288_v26  ;;  %v5889_v24 = vrot.slane %v5819_v5, 4  ;;  %v8760_v4 = vld [vmem:[%s11320_s5] ss:$0 sm:$0xff] }
 0x2b5   : > { %v3713_v32 = vpack.c.bf16 %v3695_v29, %v3694_v40  ;;  %5940 = vst [vmem:[#allocation5 + $0x1c8] sm:$0xff] %v5888_v34  ;;  %v5591_v6 = vrot.slane %v5589_v38, 3  ;;  %v5594_v10 = vrot.slane %v5592_v58, 4  ;;  %v5602_v51 = vrot.slane %v5600_v11, 4 }
 0x2b6   : > { %v3712_v7 = vpack.c.bf16 %v3693_v19, %v3692_v60  ;;  %v5890_v56 = vrot.slane %v5820_v14, 4  ;;  %v5300_v27 = vor.u32 %v5299_v12, %v5296_v8  ;;  %v5075_v63 = vrot.slane %v5004_v49, 4 }
 0x2b7   : > { %v3786_v42 = vrot.slane %v3713_v32, 4  ;;  %v5076_v54 = vrot.slane %v5005_v13, 4  ;;  %v5595_v46 = vor.u32 %v5594_v10, %v5591_v6  ;;  %v5603_v40 = vor.u32 %v5602_v51, %v5599_v44 }
 0x2b8   : > { %v3785_v52 = vrot.slane %v3712_v7, 4  ;;  %v5891_v48 = vsel %vm1018_vm4, %v5889_v24, %v5890_v56  ;;  %v5301_v53 = vsel %vm1164_vm3, %v5292_v55, %v5300_v27  ;;  %v8761_v55 = vld [vmem:[%s11321_s6] ss:$0 sm:$0xff] }
 0x2b9   : > { %3832 = vst [vmem:[#allocation4 + $0xe8] ss:$-4 sps:$4 sm:$0xff] %v3786_v42   ;;  %5941 = vst [vmem:[#allocation5 + $0x218] sm:$0xff] %v5891_v48  ;;  %v5077_v1 = vsel %vm1018_vm4, %v5075_v63, %v5076_v54  ;;  %v5604_v39 = vsel %vm649_vm5, %v5595_v46, %v5603_v40 }
 0x2ba   : > { %3830 = vst [vmem:[#allocation4 + $0xd8] ss:$-4 sps:$4 sm:$0xff] %v3785_v52   ;;  %5461 = vst [vmem:[#allocation5 + $0x258] sm:$0xff] %v5301_v53 }
 0x2bb   : > { %5125 = vst [vmem:[#allocation5 + $0x250] sm:$0xff] %v5077_v1  ;;  %5796 = vst [vmem:[#allocation5 + $0x1c0] sm:$0xff] %v5604_v39 }
 0x2c0   : > { %v4202_v28 = vld [vmem:[#allocation4 + $0xe0] sm:$0xf0]  ;;  %v4203_v14 = vld [vmem:[#allocation4 + $0xe8] sm:$0xf] }
 0x2c1   : > { %v3864_v60 = vld [vmem:[#allocation4 + $0xd0] sm:$0xf8]  ;;  %v3865_v45 = vld [vmem:[#allocation4 + $0xd8] sm:$0xf]  ;;  %v4680_v50 = vld [vmem:[#allocation4 + $0xe0] sm:$0xf8] }
 0x2c2   : > { %v4678_v3 = vld [vmem:[#allocation4 + $0xd0] sm:$0xf8]  ;;  %v4679_v35 = vld [vmem:[#allocation4 + $0xd8] sm:$0xf]  ;;  %v4092_v29 = vshrl.u32 %v3864_v60, 16  ;;  %v4095_v25 = vshll.u32 %v3864_v60, 16 }
 0x2c3   : > { %v4200_v37 = vld [vmem:[#allocation4 + $0xd0] sm:$0xf0]  ;;  %v4201_v9 = vld [vmem:[#allocation4 + $0xd8] sm:$0xf]  ;;  %v4100_v30 = vshrl.u32 %v3865_v45, 16  ;;  %v4103_v19 = vshll.u32 %v3865_v45, 16 }
 0x2c4   : > { %v4277_v43 = vrot.slane %v4200_v37, 4  ;;  %v4278_v22 = vrot.slane %v4201_v9, 4  ;;  %v4094_v57 = vrot.slane %v4092_v29, 3  ;;  %v4097_v61 = vrot.slane %v4095_v25, 4  ;;  %v3866_v44 = vld [vmem:[#allocation4 + $0xe0] sm:$0xf8] }
 0x2c5   : > { %v4891_v21 = vshrl.u32 %v4678_v3, 16  ;;  %v4894_v32 = vshll.u32 %v4678_v3, 16  ;;  %v4102_v33 = vrot.slane %v4100_v30, 3  ;;  %v4105_v59 = vrot.slane %v4103_v19, 4  ;;  %v4681_v51 = vld [vmem:[#allocation4 + $0xe8] sm:$0xf] }
 0x2c6   : > { %v4279_v17 = vsel %vm1018_vm4, %v4277_v43, %v4278_v22  ;;  %v4899_v7 = vshrl.u32 %v4679_v35, 16  ;;  %v4098_v36 = vor.u32 %v4097_v61, %v4094_v57  ;;  %v4902_v2 = vshll.u32 %v4679_v35, 16  ;;  %v3867_v46 = vld [vmem:[#allocation4 + $0xe8] sm:$0xf]  ;;  %v4344_v22 = vld [vmem:[#allocation4 + $0xd0] sm:$0xf0] }
 0x2c7   : > { %7253 = vmatprep.mubr.bf16.mxu1 %v4279_v17  ;;  %v4893_v34 = vrot.slane %v4891_v21, 3  ;;  %v4896_v62 = vrot.slane %v4894_v32, 4  ;;  %v4106_v31 = vor.u32 %v4105_v59, %v4102_v33  ;;  %v4280_v8 = vrot.slane %v4202_v28, 4  ;;  %v4345_v32 = vld [vmem:[#allocation4 + $0xd8] sm:$0x1f] }
 0x2c8   : > { %v4901_v26 = vrot.slane %v4899_v7, 3  ;;  %v4904_v13 = vrot.slane %v4902_v2, 4  ;;  %v4281_v24 = vrot.slane %v4203_v14, 4  ;;  %v4908_v10 = vshrl.u32 %v4680_v50, 16 }
 0x2c9   : > { %v4897_v49 = vor.u32 %v4896_v62, %v4893_v34  ;;  %v4107_v11 = vsel %vm649_vm5, %v4098_v36, %v4106_v31  ;;  %v4911_v54 = vshll.u32 %v4680_v50, 16  ;;  %v4916_v9 = vshrl.u32 %v4681_v51, 16 }
 0x2ca   : > { %7254 = vmatmul.mubr.bf16.gmra.mrb[32].mxu1 %v4107_v11  ;;  %v4905_v63 = vor.u32 %v4904_v13, %v4901_v26  ;;  %v4282_v53 = vsel %vm1018_vm4, %v4280_v8, %v4281_v24  ;;  %v4910_v1 = vrot.slane %v4908_v10, 3  ;;  %v4919_v29 = vshll.u32 %v4681_v51, 16  ;;  %v4346_v13 = vld [vmem:[#allocation4 + $0xe0] sm:$0xf0]  ;;  %v5150_v24 = vld [vmem:[#allocation4 + $0x90] sm:$0xf0] }
 0x2cb   : > { %v8639_v18 = vpop.f32.mrb[28].mxu0  ;;  %7261 = vmatprep.mubr.bf16.mxu1 %v4282_v53  ;;  %v4913_v3 = vrot.slane %v4911_v54, 4  ;;  %v4109_v25 = vshrl.u32 %v3866_v44, 16  ;;  %v4112_v57 = vshll.u32 %v3866_v44, 16  ;;  %v4117_v61 = vshrl.u32 %v3867_v46, 16 }
 0x2cc   : > { %v3584_v47 = vadd.f32 %v8759_v15, %v8639_v18  ;;  %v3575_v42 = vpop.f32.mrb[29].mxu0  ;;  %v4906_v45 = vsel %vm649_vm5, %v4897_v49, %v4905_v63  ;;  %v4918_v17 = vrot.slane %v4916_v9, 3  ;;  %v4921_v33 = vrot.slane %v4919_v29, 4 }
 0x2cd   : > { %v3576_v5 = vadd.f32 %v8759_v15, %v3575_v42  ;;  %v8640_v52 = vpop.f32.mrb[30].mxu0  ;;  %7406 = vmatprep.mubr.bf16.mxu0 %v4906_v45  ;;  %v4914_v19 = vor.u32 %v4913_v3, %v4910_v1  ;;  %v4111_v59 = vrot.slane %v4109_v25, 3  ;;  %v4114_v50 = vrot.slane %v4112_v57, 4 }
 0x2ce   : > { %v3627_v23 = vmul.f32 %v8760_v4, %v3584_v47  ;;  %v3587_v41 = vadd.f32 %v8759_v15, %v8640_v52  ;;  %v3578_v38 = vpop.f32.mrb[31].mxu0  ;;  %7407 = vmatmul.mubr.bf16.gmra.mrb[100].mxu0 %v10586_v16  ;;  %v4120_v47 = vshll.u32 %v3867_v46, 16  ;;  %v4922_v36 = vor.u32 %v4921_v33, %v4918_v17 }
 0x2cf   : > { %v3625_v58 = vmul.f32 %v8760_v4, %v3576_v5  ;;  %v3579_v20 = vadd.f32 %v8759_v15, %v3578_v38  ;;  %v4119_v15 = vrot.slane %v4117_v61, 3  ;;  %v4572_v34 = vshrl.u32 %v4344_v22, 16 }
 0x2d0   : > { %v3666_v12 = vadd.f32 %v8761_v55, %v3627_v23  ;;  %v3628_v6 = vmul.f32 %v8760_v4, %v3587_v41  ;;  %v4575_v62 = vshll.u32 %v4344_v22, 16  ;;  %v4115_v16 = vor.u32 %v4114_v50, %v4111_v59 }
 0x2d1   : > { %v3664_v56 = vadd.f32 %v8761_v55, %v3625_v58  ;;  %v3626_v27 = vmul.f32 %v8760_v4, %v3579_v20  ;;  %v4122_v52 = vrot.slane %v4120_v47, 4  ;;  %v4580_v31 = vshrl.u32 %v4345_v32, 16 }
 0x2d2   : > { %v3698_v40 = vmax.f32 %v3666_v12, 0.0  ;;  %v3667_v48 = vadd.f32 %v8761_v55, %v3628_v6  ;;  %v4923_v26 = vsel %vm649_vm5, %v4914_v19, %v4922_v36  ;;  %v4574_v2 = vrot.slane %v4572_v34, 4 }
 0x2d3   : > { %v3696_v39 = vmax.f32 %v3664_v56, 0.0  ;;  %v3665_v60 = vadd.f32 %v8761_v55, %v3626_v27  ;;  %v8171_v35 = vpop.f32.mrb[32].mxu0  ;;  %v4577_v14 = vrot.slane %v4575_v62, 5  ;;  %v4583_v4 = vshll.u32 %v4345_v32, 16  ;;  %7414 = vmatprep.mubr.bf16.mxu0 %v4923_v26  ;;  %v10613_v56 = vld [vmem:[#allocation4 + $0x98] sm:$0x1f] }
 0x2d4   : > { %v3699_v37 = vmax.f32 %v3667_v48, 0.0  ;;  %v8172_v43 = vpop.f32.mrb[33].mxu0  ;;  %v4123_v23 = vor.u32 %v4122_v52, %v4119_v15  ;;  %v4582_v41 = vrot.slane %v4580_v31, 4  ;;  %v4347_v27 = vld [vmem:[#allocation4 + $0xe8] sm:$0x1f]  ;;  %v4589_v54 = vshrl.u32 %v4346_v13, 16 }
 0x2d5   : > { %v3697_v30 = vmax.f32 %v3665_v60, 0.0  ;;  %v8174_v21 = vpop.f32.mrb[34].mxu0  ;;  %v8173_v38 = vadd.f32 %v8172_v43, %v8171_v35  ;;  %v4578_v58 = vor.u32 %v4577_v14, %v4574_v2  ;;  %v4585_v20 = vrot.slane %v4583_v4, 5 }
 0x2d6   : > { %v3715_v18 = vpack.c.bf16 %v3699_v37, %v3698_v40  ;;  %v8175_v7 = vpop.f32.mrb[35].mxu0  ;;  %v4124_v55 = vsel %vm649_vm5, %v4115_v16, %v4123_v23  ;;  %v4592_v46 = vshll.u32 %v4346_v13, 16  ;;  %v5303_v40 = vshrl.u32 %v5150_v24, 16 }
 0x2d7   : > { %v3714_v28 = vpack.c.bf16 %v3697_v30, %v3696_v39  ;;  %v8176_v49 = vadd.f32 %v8175_v7, %v8174_v21  ;;  %7262 = vmatmul.mubr.bf16.gmra.mrb[36].mxu1 %v4124_v55  ;;  %v4586_v10 = vor.u32 %v4585_v20, %v4582_v41  ;;  %v5306_v48 = vshll.u32 %v5150_v24, 16  ;;  %v10620_v39 = vld [vmem:[%s11323_s8] ss:$0 sm:$0xff] }
 0x2d8   : > { %v3788_v42 = vrot.slane %v3715_v18, 4  ;;  %v4597_v53 = vshrl.u32 %v4347_v27, 16  ;;  %v5311_v1 = vshrl.u32 %v10613_v56, 16  ;;  %v10622_v60 = vrot.slane %v4589_v54, 4 }
 0x2d9   : > { %v3787_v5 = vrot.slane %v3714_v28, 4  ;;  %v4587_v63 = vsel %vm1164_vm3, %v4578_v58, %v4586_v10  ;;  %v10624_v45 = vrot.slane %v4592_v46, 5  ;;  %v10626_v35 = vrot.slane %v5303_v40, 4 }
 0x2da   : > { %3836 = vst [vmem:[#allocation4 + $0x108] ss:$-4 sps:$4 sm:$0xff] %v3788_v42   ;;  %7415 = vmatmul.mubr.bf16.gmra.mrb[104].mxu0 %v4587_v63  ;;  %v10629_v29 = vadd.f32 %v8173_v38, %v10620_v39  ;;  %v4600_v25 = vshll.u32 %v4347_v27, 16  ;;  %v10631_v43 = vrot.slane %v5306_v48, 5  ;;  %v10634_v30 = vadd.f32 %v8176_v49, %v10620_v39 }
 0x2db   : > { %3834 = vst [vmem:[#allocation4 + $0xf8] ss:$-4 sps:$4 sm:$0xff] %v3787_v5   ;;  %v8177_v8 = vpop.f32.mrb[36].mxu0  ;;  %v4599_v61 = vrot.slane %v4597_v53, 4  ;;  %v10639_v21 = vrot.slane %v5311_v1, 4  ;;  %v4595_v28 = vor.u32 %v10624_v45, %v10622_v60 }
 0x2dc   : > { %v8178_v11 = vpop.f32.mrb[37].mxu0  ;;  %v4602_v13 = vrot.slane %v4600_v25, 5  ;;  %v8762_v25 = vld [vmem:[#allocation5 + $0x28] sm:$0xff] }
 0x2dd   : > { %v8179_v12 = vadd.f32 %v8178_v11, %v8177_v8  ;;  %v8180_v6 = vpop.f32.mrb[38].mxu0 }
 0x2de   : > { %v8181_v44 = vpop.f32.mrb[39].mxu0  ;;  %v4603_v48 = vor.u32 %v4602_v13, %v4599_v61  ;;  %v5483_v61 = vld [vmem:[#allocation4 + $0x80] sm:$0xf8]  ;;  %v5822_v13 = vld [vmem:[#allocation4 + $0x98] sm:$0xf] }
 0x2df   : > { %v10611_v51 = vadd.f32 %v8181_v44, %v8180_v6  ;;  %v10637_v19 = vadd.f32 %v8179_v12, %v10620_v39 }
 0x2e1   : > { %v4684_v32 = vld [vmem:[#allocation4 + $0x100] sm:$0xf8]  ;;  %v4685_v31 = vld [vmem:[#allocation4 + $0x108] sm:$0xf]  ;;  %v10646_v46 = vadd.f32 %v10611_v51, %v10620_v39 }
 0x2e2   : > { %v3868_v3 = vld [vmem:[#allocation4 + $0xf0] sm:$0xf8]  ;;  %v3869_v37 = vld [vmem:[#allocation4 + $0xf8] sm:$0xf]  ;;  %v4942_v55 = vshrl.u32 %v4684_v32, 16  ;;  %v4945_v44 = vshll.u32 %v4684_v32, 16 }
 0x2e3   : > { %v4682_v9 = vld [vmem:[#allocation4 + $0xf0] sm:$0xf8]  ;;  %v4683_v22 = vld [vmem:[#allocation4 + $0xf8] sm:$0xf]  ;;  %v8183_v33 = vpop.f32.mrb[40].mxu0  ;;  %v4126_v59 = vshrl.u32 %v3868_v3, 16 }
 0x2e4   : > { %v4204_v57 = vld [vmem:[#allocation4 + $0xf0] sm:$0xf0]  ;;  %v4205_v18 = vld [vmem:[#allocation4 + $0xf8] sm:$0xf]  ;;  %v4129_v7 = vshll.u32 %v3868_v3, 16  ;;  %v4134_v15 = vshrl.u32 %v3869_v37, 16 }
 0x2e5   : > { %v4283_v17 = vrot.slane %v4204_v57, 4  ;;  %v4284_v50 = vrot.slane %v4205_v18, 4  ;;  %v4137_v47 = vshll.u32 %v3869_v37, 16  ;;  %v4925_v42 = vshrl.u32 %v4682_v9, 16  ;;  %v8184_v36 = vpop.f32.mrb[41].mxu0 }
 0x2e6   : > { %v4128_v34 = vrot.slane %v4126_v59, 3  ;;  %v4131_v62 = vrot.slane %v4129_v7, 4  ;;  %v4928_v5 = vshll.u32 %v4682_v9, 16  ;;  %v4933_v16 = vshrl.u32 %v4683_v22, 16  ;;  %v8186_v52 = vpop.f32.mrb[42].mxu0 }
 0x2e7   : > { %v4285_v26 = vsel %vm1018_vm4, %v4283_v17, %v4284_v50  ;;  %v4136_v2 = vrot.slane %v4134_v15, 3  ;;  %v4139_v14 = vrot.slane %v4137_v47, 4  ;;  %v4927_v4 = vrot.slane %v4925_v42, 3  ;;  %v8187_v23 = vpop.f32.mrb[43].mxu0  ;;  %v4348_v6 = vld [vmem:[#allocation4 + $0xf0] sm:$0xf0] }
 0x2e8   : > { %7269 = vmatprep.mubr.bf16.mxu1 %v4285_v26  ;;  %v4132_v41 = vor.u32 %v4131_v62, %v4128_v34  ;;  %v4930_v38 = vrot.slane %v4928_v5, 4  ;;  %v4935_v49 = vrot.slane %v4933_v16, 3  ;;  %v4936_v8 = vshll.u32 %v4683_v22, 16  ;;  %v4349_v54 = vld [vmem:[#allocation4 + $0xf8] sm:$0x1f] }
 0x2e9   : > { %v4140_v20 = vor.u32 %v4139_v14, %v4136_v2  ;;  %v8185_v11 = vadd.f32 %v8184_v36, %v8183_v33  ;;  %v4950_v27 = vshrl.u32 %v4685_v31, 16  ;;  %v4944_v53 = vrot.slane %v4942_v55, 3  ;;  %v5484_v5 = vld [vmem:[#allocation4 + $0x88] sm:$0xf]  ;;  %v8738_v16 = vld [vmem:[%s11322_s7 + $0x200] sm:$0xff]  }
 0x2ea   : > { %v4931_v24 = vor.u32 %v4930_v38, %v4927_v4  ;;  %v4938_v10 = vrot.slane %v4936_v8, 4  ;;  %v4947_v45 = vrot.slane %v4945_v44, 4  ;;  %v4953_v37 = vshll.u32 %v4685_v31, 16  ;;  %v10659_v4 = vld [vmem:[#allocation4 + $0xa0] sm:$0xf0] }
 0x2eb   : > { %v8189_v58 = vpop.f32.mrb[44].mxu0  ;;  %v4141_v40 = vsel %vm649_vm5, %v4132_v41, %v4140_v20  ;;  %v4952_v3 = vrot.slane %v4950_v27, 3  ;;  %v4604_v9 = vsel %vm1164_vm3, %v4595_v28, %v4603_v48  ;;  %v8188_v22 = vadd.f32 %v8187_v23, %v8186_v52  ;;  %v5006_v55 = vld [vmem:[#allocation4 + $0x90] sm:$0xf0]  ;;  %v5007_v44 = vld [vmem:[#allocation4 + $0x98] sm:$0xf] }
 0x2ec   : > { %v8190_v12 = vpop.f32.mrb[45].mxu0  ;;  %7270 = vmatmul.mubr.bf16.gmra.mrb[40].mxu1 %v4141_v40  ;;  %v4939_v60 = vor.u32 %v4938_v10, %v4935_v49  ;;  %v4606_v57 = vshrl.u32 %v4348_v6, 16  ;;  %v4609_v32 = vshll.u32 %v4348_v6, 16  ;;  %v4948_v18 = vor.u32 %v4947_v45, %v4944_v53  ;;  %v5821_v49 = vld [vmem:[#allocation4 + $0x90] sm:$0xf0]  ;;  %v8743_v40 = vld [vmem:[%s11322_s7 + $0x208] sm:$0xff]  }
 0x2ed   : > { %v8192_v63 = vpop.f32.mrb[46].mxu0  ;;  %7471 = vmatprep.mubr.bf16.mxu1 %v8762_v25  ;;  %v4955_v17 = vrot.slane %v4953_v37, 4  ;;  %v4614_v33 = vshrl.u32 %v4349_v54, 16  ;;  %v4617_v50 = vshll.u32 %v4349_v54, 16  ;;  %v5309_v47 = vor.u32 %v10631_v43, %v10626_v35  ;;  %v10673_v27 = vld [vmem:[#allocation4 + $0xa8] sm:$0x1f] }
 0x2ee   : > { %v8193_v1 = vpop.f32.mrb[47].mxu0  ;;  %v4940_v51 = vsel %vm649_vm5, %v4931_v24, %v4939_v60  ;;  %v4608_v59 = vrot.slane %v4606_v57, 4  ;;  %v4611_v7 = vrot.slane %v4609_v32, 5  ;;  %v8191_v36 = vadd.f32 %v8190_v12, %v8189_v58  ;;  %v8764_v54 = vld [vmem:[#allocation5 + $0x78] sm:$0xff] }
 0x2ef   : > { %7422 = vmatprep.mubr.bf16.mxu0 %v4940_v51  ;;  %v4956_v28 = vor.u32 %v4955_v17, %v4952_v3  ;;  %v4616_v42 = vrot.slane %v4614_v33, 4  ;;  %v8194_v34 = vadd.f32 %v8193_v1, %v8192_v63  ;;  %v4619_v31 = vrot.slane %v4617_v50, 5  ;;  %v5485_v17 = vld [vmem:[#allocation4 + $0x90] sm:$0xf8] }
 0x2f0   : > { %7423 = vmatmul.mubr.bf16.gmra.mrb[108].mxu0 %v4604_v9  ;;  %v4612_v52 = vor.u32 %v4611_v7, %v4608_v59  ;;  %v5314_v14 = vshll.u32 %v10613_v56, 16  ;;  %v10662_v35 = vadd.f32 %v8185_v11, %v10620_v39  ;;  %v10666_v23 = vadd.f32 %v8188_v22, %v10620_v39  ;;  %v8763_v11 = vld [vmem:[#allocation5 + $0x20] sm:$0xff] }
 0x2f1   : > { %v4957_v43 = vsel %vm649_vm5, %v4948_v18, %v4956_v28  ;;  %v5606_v38 = vshrl.u32 %v5483_v61, 16  ;;  %v4620_v8 = vor.u32 %v4619_v31, %v4616_v42  ;;  %v10669_v58 = vadd.f32 %v8191_v36, %v10620_v39 }
 0x2f2   : > { %7430 = vmatprep.mubr.bf16.mxu0 %v4957_v43  ;;  %v5316_v56 = vrot.slane %v5314_v14, 5  ;;  %v5609_v6 = vshll.u32 %v5483_v61, 16  ;;  %v5614_v24 = vshrl.u32 %v5484_v5, 16  ;;  %v5617_v10 = vshll.u32 %v5484_v5, 16 }
 0x2f3   : > { %v8195_v15 = vpop.f32.mrb[48].mxu0  ;;  %v5608_v12 = vrot.slane %v5606_v38, 3  ;;  %v4621_v63 = vsel %vm1164_vm3, %v4612_v52, %v4620_v8  ;;  %v10680_v48 = vadd.f32 %v8194_v34, %v10620_v39  ;;  %v5892_v1 = vrot.slane %v5821_v49, 4  ;;  %v8201_v60 = vpop.f32.mrb[0].mxu1  ;;  %v5823_v8 = vld [vmem:[#allocation4 + $0xa0] sm:$0xf0] }
 0x2f4   : > { %v8196_v62 = vpop.f32.mrb[49].mxu0  ;;  %7472 = vmatmul.mubr.bf16.vlgmr.msra.gmra.mrb[44].mxu1 %v8763_v11  ;;  %v5317_v53 = vor.u32 %v5316_v56, %v10639_v21  ;;  %v5611_v45 = vrot.slane %v5609_v6, 4  ;;  %v5616_v3 = vrot.slane %v5614_v24, 3  ;;  %v5619_v37 = vrot.slane %v5617_v10, 4  ;;  %v8202_v22 = vpop.f32.mrb[1].mxu1 }
 0x2f5   : > { %v10656_v26 = vadd.f32 %v8196_v62, %v8195_v15  ;;  %v8198_v2 = vpop.f32.mrb[50].mxu0  ;;  %7762 = vmatpush1.bf16.msra.mxu1 %v8738_v16  ;;  %7479 = vmatprep.mubr.bf16.mxu1 %v8764_v54  ;;  %v5893_v9 = vrot.slane %v5822_v13, 4  ;;  %v5078_v32 = vrot.slane %v5006_v55, 4  ;;  %v5079_v51 = vrot.slane %v5007_v44, 4  ;;  %v8204_v61 = vpop.f32.mrb[2].mxu1  ;;  %v8765_v15 = vld [vmem:[#allocation5 + $0x38] sm:$0xff] }
 0x2f6   : > { %v8199_v41 = vpop.f32.mrb[51].mxu0  ;;  %7763 = vmatprep.subr.bf16.mxu1 %v8833_v0  ;;  %v10685_v57 = vsel %vm1164_vm3, %v5309_v47, %v5317_v53  ;;  %v5320_v18 = vshrl.u32 %v10659_v4, 16  ;;  %v10688_v33 = vadd.f32 %v8202_v22, %v8201_v60  ;;  %v5612_v59 = vor.u32 %v5611_v45, %v5608_v12  ;;  %v8744_v47 = vld [vmem:[%s11322_s7 + $0x210] sm:$0xff]   ;;  %v8205_v36 = vpop.f32.mrb[3].mxu1  ;;  %v5486_v16 = vld [vmem:[#allocation4 + $0x98] sm:$0xf] }
 0x2f7   : > { %v10671_v20 = vadd.f32 %v8199_v41, %v8198_v2  ;;  %v5620_v7 = vor.u32 %v5619_v37, %v5616_v3  ;;  %v10691_v50 = vsel %vm1018_vm4, %v5892_v1, %v5893_v9  ;;  %v10697_v34 = vsel %vm1018_vm4, %v5078_v32, %v5079_v51  ;;  %v10715_v56 = vld [vmem:[#allocation4 + $0xb0] sm:$0xf0]  ;;  %v5008_v24 = vld [vmem:[#allocation4 + $0xa0] sm:$0xf0] }
 0x2f8   : > { %7431 = vmatmul.mubr.bf16.gmra.mrb[112].mxu0 %v4621_v63  ;;  %v5322_v62 = vrot.slane %v5320_v18, 4  ;;  %v5323_v5 = vshll.u32 %v10659_v4, 16  ;;  %v10702_v52 = vadd.f32 %v10656_v26, %v10620_v39  ;;  %v10705_v2 = vadd.f32 %v8205_v36, %v8204_v61  ;;  %v5824_v26 = vld [vmem:[#allocation4 + $0xa8] sm:$0xf]  ;;  %v8766_v13 = vld [vmem:[#allocation5 + $0x70] sm:$0xff]  ;;  %v8746_v36 = vld [vmem:[%s11322_s7 + $0x220] sm:$0xff]  }
 0x2f9   : > { %7632 = vmatprep.mubr.bf16.mxu0 %v8765_v15  ;;  %7764 = vmatpush1.bf16.msra.mxu1 %v8743_v40  ;;  %v10708_v14 = vsel %vm649_vm5, %v5612_v59, %v5620_v7  ;;  %v5328_v43 = vshrl.u32 %v10673_v27, 16  ;;  %v5331_v49 = vshll.u32 %v10673_v27, 16  ;;  %v10719_v55 = vadd.f32 %v10671_v20, %v10620_v39  ;;  %v8745_v44 = vld [vmem:[%s11322_s7 + $0x218] sm:$0xff]   ;;  %v5009_v40 = vld [vmem:[#allocation4 + $0xa8] sm:$0xf] }
 0x2fa   : > { %7765 = vmatprep.subr.bf16.mxu1 %v8833_v0  ;;  %v5325_v4 = vrot.slane %v5323_v5, 5  ;;  %v5623_v12 = vshrl.u32 %v5485_v17, 16  ;;  %v5626_v6 = vshll.u32 %v5485_v17, 16  ;;  %v5631_v54 = vshrl.u32 %v5486_v16, 16  ;;  %v8768_v32 = vld [vmem:[#allocation5 + $0x30] sm:$0xff]  ;;  %v8769_v15 = vld [vmem:[#allocation5 + $0x88] sm:$0xff] }
 0x2fb   : > { %v8283_v25 = vpop.f32.mrb[52].mxu0  ;;  %v5330_v11 = vrot.slane %v5328_v43, 4  ;;  %v5333_v63 = vrot.slane %v5331_v49, 5  ;;  %v8207_v20 = vpop.f32.mrb[4].mxu1  ;;  %v5634_v60 = vshll.u32 %v5486_v16, 16  ;;  %v5895_v45 = vrot.slane %v5823_v8, 4 }
 0x2fc   : > { %v8284_v21 = vpop.f32.mrb[53].mxu0  ;;  %7480 = vmatmul.mubr.bf16.gmra.mrb[48].mxu1 %v8766_v13  ;;  %v5326_v27 = vor.u32 %v5325_v4, %v5322_v62  ;;  %v5625_v53 = vrot.slane %v5623_v12, 3  ;;  %v5628_v1 = vrot.slane %v5626_v6, 4  ;;  %v8208_v37 = vpop.f32.mrb[5].mxu1  ;;  %v5081_v22 = vrot.slane %v5008_v24, 4  ;;  %v8770_v24 = vld [vmem:[#allocation5 + $0xc0] sm:$0xff] }
 0x2fd   : > { %v8285_v28 = vadd.f32 %v8284_v21, %v8283_v25  ;;  %v8286_v42 = vpop.f32.mrb[54].mxu0  ;;  %7766 = vmatpush1.bf16.msra.mxu1 %v8744_v47  ;;  %v5334_v9 = vor.u32 %v5333_v63, %v5330_v11  ;;  %v5896_v25 = vrot.slane %v5824_v26, 4  ;;  %v10728_v18 = vadd.f32 %v8208_v37, %v8207_v20  ;;  %v8210_v17 = vpop.f32.mrb[6].mxu1  ;;  %v5155_v7 = vld [vmem:[#allocation4 + $0xb8] sm:$0x1f] }
 0x2fe   : > { %v8287_v31 = vpop.f32.mrb[55].mxu0  ;;  %7767 = vmatprep.subr.bf16.mxu1 %v8833_v0  ;;  %v5629_v21 = vor.u32 %v5628_v1, %v5625_v53  ;;  %v5636_v61 = vrot.slane %v5634_v60, 4  ;;  %v5082_v59 = vrot.slane %v5009_v40, 4  ;;  %v5337_v16 = vshrl.u32 %v10715_v56, 16  ;;  %v5488_v26 = vld [vmem:[#allocation4 + $0xa8] sm:$0xf] }
 0x2ff   : > { %v10712_v41 = vadd.f32 %v8285_v28, %v10629_v29  ;;  %v8288_v38 = vadd.f32 %v8287_v31, %v8286_v42  ;;  %v8767_v29 = vld [vmem:[#allocation5 + $0xc8] sm:$0xff]  ;;  %v8211_v42 = vpop.f32.mrb[7].mxu1  ;;  %v10734_v62 = vsel %vm1164_vm3, %v5326_v27, %v5334_v9  ;;  %v10737_v5 = vsel %vm1018_vm4, %v5895_v45, %v5896_v25  ;;  %v5487_v31 = vld [vmem:[#allocation4 + $0xa0] sm:$0xf8]  ;;  %v5825_v63 = vld [vmem:[#allocation4 + $0xb0] sm:$0xf0] }
 0x300   : > { %7487 = vmatprep.mubr.bf16.mxu1 %v8767_v29  ;;  %7633 = vmatmul.mubr.bf16.vlgmr.msra.gmra.mrb[116].mxu0 %v8768_v32  ;;  %v10744_v4 = vadd.f32 %v8211_v42, %v8210_v17  ;;  %v10748_v8 = vsel %vm1018_vm4, %v5081_v22, %v5082_v59  ;;  %v5339_v12 = vrot.slane %v5337_v16, 4  ;;  %v5340_v6 = vshll.u32 %v10715_v56, 16  ;;  %v8771_v40 = vld [vmem:[#allocation5 + $0x118] sm:$0xff]  ;;  %v8747_v56 = vld [vmem:[%s11322_s7 + $0x228] sm:$0xff]   ;;  %v5010_v1 = vld [vmem:[#allocation4 + $0xb0] sm:$0xf0] }
 0x301   : > { %v10722_v10 = vadd.f32 %v8288_v38, %v10634_v30  ;;  %v5633_v30 = vrot.slane %v5631_v54, 3  ;;  %7640 = vmatprep.mubr.bf16.mxu0 %v8769_v15  ;;  %7768 = vmatpush1.bf16.msra.mxu1 %v8745_v44  ;;  %v10742_v38 = vadd.f32 %v10688_v33, %v10620_v39  ;;  %v10756_v33 = vadd.f32 %v10705_v2, %v10620_v39  ;;  %v5826_v54 = vld [vmem:[#allocation4 + $0xb8] sm:$0xf]  ;;  %v8772_v17 = vld [vmem:[#allocation5 + $0x80] sm:$0xff] }
 0x302   : > { %7769 = vmatprep.subr.bf16.mxu1 %v8833_v0  ;;  %v5345_v44 = vshrl.u32 %v5155_v7, 16  ;;  %v5348_v27 = vshll.u32 %v5155_v7, 16  ;;  %v5342_v20 = vrot.slane %v5340_v6, 5  ;;  %v5640_v2 = vshrl.u32 %v5487_v31, 16  ;;  %v5011_v9 = vld [vmem:[#allocation4 + $0xb8] sm:$0xf] }
 0x303   : > { %v8289_v3 = vpop.f32.mrb[56].mxu0  ;;  %v5637_v49 = vor.u32 %v5636_v61, %v5633_v30  ;;  %v5643_v53 = vshll.u32 %v5487_v31, 16  ;;  %v5651_v37 = vshll.u32 %v5488_v26, 16  ;;  %v5156_v30 = vld [vmem:[#allocation4 + $0xc0] sm:$0xf0]  ;;  %v5899_v15 = vrot.slane %v5826_v54, 4 }
 0x304   : > { %v8290_v51 = vpop.f32.mrb[57].mxu0  ;;  %7488 = vmatmul.mubr.bf16.gmra.mrb[52].mxu1 %v8770_v24  ;;  %v5347_v60 = vrot.slane %v5345_v44, 4  ;;  %v5350_v45 = vrot.slane %v5348_v27, 5  ;;  %v5642_v22 = vrot.slane %v5640_v2, 3  ;;  %v5084_v31 = vrot.slane %v5010_v1, 4  ;;  %v8774_v2 = vld [vmem:[#allocation5 + $0x110] sm:$0xff] }
 0x305   : > { %v8291_v47 = vadd.f32 %v8290_v51, %v8289_v3  ;;  %v8292_v28 = vpop.f32.mrb[58].mxu0  ;;  %v10759_v29 = vsel %vm649_vm5, %v5629_v21, %v5637_v49  ;;  %7495 = vmatprep.mubr.bf16.mxu1 %v8771_v40  ;;  %7770 = vmatpush1.bf16.msra.mxu1 %v8746_v36  ;;  %v5648_v3 = vshrl.u32 %v5488_v26, 16  ;;  %v5645_v32 = vrot.slane %v5643_v53, 4  ;;  %v8748_v49 = vld [vmem:[%s11322_s7 + $0x230] sm:$0xff]   ;;  %v5489_v26 = vld [vmem:[#allocation4 + $0xb0] sm:$0xf8] }
 0x306   : > { %v8293_v43 = vpop.f32.mrb[59].mxu0  ;;  %7771 = vmatprep.subr.bf16.mxu1 %v8833_v0  ;;  %v5898_v51 = vrot.slane %v5825_v63, 4  ;;  %v5351_v61 = vor.u32 %v5350_v45, %v5347_v60  ;;  %v5653_v7 = vrot.slane %v5651_v37, 4  ;;  %v5354_v44 = vshrl.u32 %v5156_v30, 16  ;;  %v5490_v27 = vld [vmem:[#allocation4 + $0xb8] sm:$0xf] }
 0x307   : > { %v10751_v13 = vadd.f32 %v8291_v47, %v10637_v19  ;;  %v8294_v11 = vadd.f32 %v8293_v43, %v8292_v28  ;;  %v5650_v59 = vrot.slane %v5648_v3, 3  ;;  %v5157_v47 = vld [vmem:[#allocation4 + $0xc8] sm:$0x1f]  ;;  %v8773_v28 = vld [vmem:[#allocation5 + $0xd8] sm:$0xff]  ;;  %v5646_v16 = vor.u32 %v5645_v32, %v5642_v22  ;;  %v8749_v22 = vld [vmem:[%s11322_s7 + $0x238] sm:$0xff]  }
 0x308   : > { %7641 = vmatmul.mubr.bf16.gmra.mrb[120].mxu0 %v8772_v17  ;;  %v5085_v43 = vrot.slane %v5011_v9, 4  ;;  %v10775_v24 = vsel %vm1018_vm4, %v5898_v51, %v5899_v15  ;;  %v5356_v1 = vrot.slane %v5354_v44, 4  ;;  %v5362_v60 = vshrl.u32 %v5157_v47, 16  ;;  %v5828_v3 = vld [vmem:[#allocation4 + $0xc8] sm:$0xf] }
 0x309   : > { %v10762_v19 = vadd.f32 %v8294_v11, %v10646_v46  ;;  %v5343_v46 = vor.u32 %v5342_v20, %v5339_v12  ;;  %7648 = vmatprep.mubr.bf16.mxu0 %v8773_v28  ;;  %7772 = vmatpush1.bf16.msra.mxu1 %v8747_v56  ;;  %v5654_v6 = vor.u32 %v5653_v7, %v5650_v59  ;;  %v5357_v56 = vshll.u32 %v5156_v30, 16  ;;  %v5827_v20 = vld [vmem:[#allocation4 + $0xc0] sm:$0xf0]  ;;  %v8775_v37 = vld [vmem:[#allocation5 + $0x168] sm:$0xff]  ;;  %v5158_v59 = vld [vmem:[#allocation4 + $0xd0] sm:$0xf0] }
 0x30a   : > { %7773 = vmatprep.subr.bf16.mxu1 %v8833_v0  ;;  %v10782_v40 = vsel %vm1018_vm4, %v5084_v31, %v5085_v43  ;;  %v5365_v45 = vshll.u32 %v5157_v47, 16  ;;  %v5012_v30 = vld [vmem:[#allocation4 + $0xc0] sm:$0xf0]  ;;  %v5364_v32 = vrot.slane %v5362_v60, 4  ;;  %v5665_v17 = vshrl.u32 %v5490_v27, 16 }
 0x30b   : > { %11325 = vst [vmem:[#allocation6_spill] sm:$0xff] %v10762_v19  ;;  %v8295_v25 = vpop.f32.mrb[60].mxu0  ;;  %v10772_v12 = vsel %vm1164_vm3, %v5343_v46, %v5351_v61  ;;  %v10785_v53 = vsel %vm649_vm5, %v5646_v16, %v5654_v6  ;;  %v5359_v9 = vrot.slane %v5357_v56, 5  ;;  %v5660_v46 = vshll.u32 %v5489_v26, 16  ;;  %v5013_v61 = vld [vmem:[#allocation4 + $0xc8] sm:$0xf] }
 0x30c   : > { %v8296_v21 = vpop.f32.mrb[61].mxu0  ;;  %7496 = vmatmul.mubr.bf16.gmra.mrb[56].mxu1 %v8774_v2  ;;  %v5367_v51 = vrot.slane %v5365_v45, 5  ;;  %v5901_v28 = vrot.slane %v5827_v20, 4  ;;  %v5667_v31 = vrot.slane %v5665_v17, 3  ;;  %v5088_v56 = vrot.slane %v5013_v61, 4 }
 0x30d   : > { %v8297_v42 = vadd.f32 %v8296_v21, %v8295_v25  ;;  %v8298_v36 = vpop.f32.mrb[62].mxu0  ;;  %7503 = vmatprep.mubr.bf16.mxu1 %v8775_v37  ;;  %v5657_v25 = vshrl.u32 %v5489_v26, 16  ;;  %7774 = vmatpush1.bf16.msra.mxu1 %v8748_v49  ;;  %v5668_v21 = vshll.u32 %v5490_v27, 16  ;;  %v5662_v47 = vrot.slane %v5660_v46, 4  ;;  %v5159_v26 = vld [vmem:[#allocation4 + $0xd8] sm:$0x1f] }
 0x30e   : > { %v8299_v11 = vpop.f32.mrb[63].mxu0  ;;  %7775 = vmatprep.subr.bf16.mxu1 %v8833_v0  ;;  %v5368_v16 = vor.u32 %v5367_v51, %v5364_v32  ;;  %v5902_v49 = vrot.slane %v5828_v3, 4  ;;  %v5491_v2 = vld [vmem:[#allocation4 + $0xc0] sm:$0xf8]  ;;  %v5371_v37 = vshrl.u32 %v5158_v59, 16  ;;  %v5382_v61 = vshll.u32 %v5159_v26, 16 }
 0x30f   : > { %v10779_v63 = vadd.f32 %v8297_v42, %v10662_v35  ;;  %v8300_v54 = vadd.f32 %v8299_v11, %v8298_v36  ;;  %v5659_v15 = vrot.slane %v5657_v25, 3  ;;  %v8776_v42 = vld [vmem:[#allocation5 + $0xd0] sm:$0xff]  ;;  %v5670_v43 = vrot.slane %v5668_v21, 4  ;;  %v8777_v11 = vld [vmem:[#allocation5 + $0x128] sm:$0xff]  ;;  %v8778_v32 = vld [vmem:[#allocation5 + $0x160] sm:$0xff] }
 0x310   : > { %7649 = vmatmul.mubr.bf16.gmra.mrb[124].mxu0 %v8776_v42  ;;  %v10798_v45 = vsel %vm1018_vm4, %v5901_v28, %v5902_v49  ;;  %v5492_v3 = vld [vmem:[#allocation4 + $0xc8] sm:$0xf]  ;;  %v5373_v17 = vrot.slane %v5371_v37, 4  ;;  %v5379_v21 = vshrl.u32 %v5159_v26, 16  ;;  %v5014_v28 = vld [vmem:[#allocation4 + $0xd0] sm:$0xf0] }
 0x311   : > { %11326 = vst [vmem:[#allocation7_spill] sm:$0xff] %v10779_v63  ;;  %v10788_v35 = vadd.f32 %v8300_v54, %v10666_v23  ;;  %v5360_v23 = vor.u32 %v5359_v9, %v5356_v1  ;;  %7656 = vmatprep.mubr.bf16.mxu0 %v8777_v11  ;;  %v5663_v27 = vor.u32 %v5662_v47, %v5659_v15  ;;  %v5087_v54 = vrot.slane %v5012_v30, 4  ;;  %v8781_v37 = vld [vmem:[#allocation5 + $0x178] sm:$0xff] }
 0x312   : > { %7776 = vmatpush1.bf16.msra.mxu1 %v8749_v22  ;;  %v5671_v60 = vor.u32 %v5670_v43, %v5667_v31  ;;  %v5374_v30 = vshll.u32 %v5158_v59, 16  ;;  %v5829_v22 = vld [vmem:[#allocation4 + $0xd0] sm:$0xf0]  ;;  %v5674_v15 = vshrl.u32 %v5491_v2, 16  ;;  %v5677_v47 = vshll.u32 %v5491_v2, 16 }
 0x313   : > { %11327 = vst [vmem:[#allocation8_spill] sm:$0xff] %v10788_v35  ;;  %v8301_v7 = vpop.f32.mrb[64].mxu0  ;;  %v10795_v20 = vsel %vm1164_vm3, %v5360_v23, %v5368_v16  ;;  %7777 = vmatprep.subr.bf16.mxu1 %v8833_v0  ;;  %v10805_v46 = vsel %vm1018_vm4, %v5087_v54, %v5088_v56  ;;  %v8779_v0 = vld [vmem:[#allocation5 + $0x1b8] sm:$0xff]  ;;  %v5381_v59 = vrot.slane %v5379_v21, 4  ;;  %v5384_v42 = vrot.slane %v5382_v61, 5 }
 0x314   : > { %v8302_v36 = vpop.f32.mrb[65].mxu0  ;;  %7504 = vmatmul.mubr.bf16.gmra.mrb[60].mxu1 %v8778_v32  ;;  %v10808_v51 = vsel %vm649_vm5, %v5663_v27, %v5671_v60  ;;  %v5376_v23 = vrot.slane %v5374_v30, 5  ;;  %v5685_v16 = vshll.u32 %v5492_v3, 16  ;;  %v5015_v31 = vld [vmem:[#allocation4 + $0xd8] sm:$0xf]  ;;  %v5679_v26 = vrot.slane %v5677_v47, 4 }
 0x315   : > { %v8303_v6 = vadd.f32 %v8302_v36, %v8301_v7  ;;  %v8304_v44 = vpop.f32.mrb[66].mxu0  ;;  %v5830_v7 = vld [vmem:[#allocation4 + $0xd8] sm:$0xf]  ;;  %7511 = vmatprep.mubr.bf16.mxu1 %v8779_v0  ;;  %v5682_v36 = vshrl.u32 %v5492_v3, 16  ;;  %v5160_v43 = vld [vmem:[#allocation4 + $0xe0] sm:$0xf0] }
 0x316   : > { %v8305_v1 = vpop.f32.mrb[67].mxu0  ;;  %v5377_v11 = vor.u32 %v5376_v23, %v5373_v17  ;;  %v8780_v27 = vld [vmem:[#allocation5 + $0x120] sm:$0xff]  ;;  %v5905_v60 = vrot.slane %v5830_v7, 4  ;;  %v5161_v2 = vld [vmem:[#allocation4 + $0xe8] sm:$0x1f]  ;;  %v5090_v32 = vrot.slane %v5014_v28, 4 }
 0x317   : > { %v10802_v9 = vadd.f32 %v8303_v6, %v10669_v58  ;;  %v8306_v25 = vadd.f32 %v8305_v1, %v8304_v44  ;;  %v5676_v6 = vrot.slane %v5674_v15, 3  ;;  %v5904_v44 = vrot.slane %v5829_v22, 4  ;;  %v5493_v61 = vld [vmem:[#allocation4 + $0xd0] sm:$0xf8]  ;;  %v5494_v47 = vld [vmem:[#allocation4 + $0xd8] sm:$0xf] }
 0x318   : > { %7657 = vmatmul.mubr.bf16.gmra.mrb[128].mxu0 %v8780_v27  ;;  %v5684_v56 = vrot.slane %v5682_v36, 3  ;;  %v5687_v1 = vrot.slane %v5685_v16, 4  ;;  %v5091_v21 = vrot.slane %v5015_v31, 4  ;;  %v5388_v15 = vshrl.u32 %v5160_v43, 16  ;;  %v8782_v36 = vld [vmem:[#allocation5 + $0x1b0] sm:$0xff] }
 0x319   : > { %11328 = vst [vmem:[#allocation9_spill] sm:$0xff] %v10802_v9  ;;  %v10811_v58 = vadd.f32 %v8306_v25, %v10680_v48  ;;  %v5385_v48 = vor.u32 %v5384_v42, %v5381_v59  ;;  %7664 = vmatprep.mubr.bf16.mxu0 %v8781_v37  ;;  %v5680_v3 = vor.u32 %v5679_v26, %v5676_v6  ;;  %v5391_v28 = vshll.u32 %v5160_v43, 16  ;;  %v5831_v26 = vld [vmem:[#allocation4 + $0xe0] sm:$0xf0]  ;;  %v5832_v43 = vld [vmem:[#allocation4 + $0xe8] sm:$0xf] }
 0x31a   : > { %v5688_v22 = vor.u32 %v5687_v1, %v5684_v56  ;;  %v10817_v23 = vsel %vm1018_vm4, %v5904_v44, %v5905_v60  ;;  %v10823_v42 = vsel %vm1018_vm4, %v5090_v32, %v5091_v21  ;;  %v5399_v6 = vshll.u32 %v5161_v2, 16  ;;  %v8783_v44 = vld [vmem:[#allocation5 + $0x208] sm:$0xff]  ;;  %v5019_v9 = vld [vmem:[#allocation4 + $0xf8] sm:$0xf] }
 0x31b   : > { %11329 = vst [vmem:[#allocation10_spill] sm:$0xff] %v10811_v58  ;;  %v8307_v49 = vpop.f32.mrb[68].mxu0  ;;  %v10814_v0 = vsel %vm1164_vm3, %v5377_v11, %v5385_v48  ;;  %v5396_v11 = vshrl.u32 %v5161_v2, 16  ;;  %v5691_v48 = vshrl.u32 %v5493_v61, 16  ;;  %v5694_v56 = vshll.u32 %v5493_v61, 16 }
 0x31c   : > { %v8308_v54 = vpop.f32.mrb[69].mxu0  ;;  %7512 = vmatmul.mubr.bf16.gmra.mrb[64].mxu1 %v8782_v36  ;;  %v8213_v16 = vpop.f32.mrb[8].mxu1  ;;  %v10826_v31 = vsel %vm649_vm5, %v5680_v3, %v5688_v22  ;;  %v5016_v3 = vld [vmem:[#allocation4 + $0xe0] sm:$0xf0]  ;;  %v10835_v61 = vadd.f32 %v10728_v18, %v10620_v39 }
 0x31d   : > { %v8309_v25 = vadd.f32 %v8308_v54, %v8307_v49  ;;  %v8310_v30 = vpop.f32.mrb[70].mxu0  ;;  %v5390_v49 = vrot.slane %v5388_v15, 4  ;;  %7519 = vmatprep.mubr.bf16.mxu1 %v8783_v44  ;;  %v8214_v27 = vpop.f32.mrb[9].mxu1  ;;  %v5393_v54 = vrot.slane %v5391_v28, 5  ;;  %v5398_v37 = vrot.slane %v5396_v11, 4 }
 0x31e   : > { %v8311_v17 = vpop.f32.mrb[71].mxu0  ;;  %v10831_v1 = vadd.f32 %v8214_v27, %v8213_v16  ;;  %v8216_v60 = vpop.f32.mrb[10].mxu1  ;;  %v5696_v22 = vrot.slane %v5694_v56, 4  ;;  %v5702_v15 = vshll.u32 %v5494_v47, 16  ;;  %v5163_v44 = vld [vmem:[#allocation4 + $0xf8] sm:$0x1f] }
 0x31f   : > { %v10820_v7 = vadd.f32 %v8309_v25, %v10702_v52  ;;  %v8312_v59 = vadd.f32 %v8311_v17, %v8310_v30  ;;  %v5401_v25 = vrot.slane %v5399_v6, 5  ;;  %v5699_v30 = vshrl.u32 %v5494_v47, 16  ;;  %v8217_v2 = vpop.f32.mrb[11].mxu1  ;;  %v5017_v6 = vld [vmem:[#allocation4 + $0xe8] sm:$0xf] }
 0x320   : > { %v5394_v21 = vor.u32 %v5393_v54, %v5390_v49  ;;  %v5693_v17 = vrot.slane %v5691_v48, 3  ;;  %v10837_v36 = vadd.f32 %v8217_v2, %v8216_v60  ;;  %v8785_v27 = vld [vmem:[#allocation5 + $0x1c8] sm:$0xff]  ;;  %v5704_v47 = vrot.slane %v5702_v15, 4 }
 0x321   : > { %11330 = vst [vmem:[#allocation11_spill] sm:$0xff] %v10820_v7  ;;  %v10829_v52 = vadd.f32 %v8312_v59, %v10719_v55  ;;  %v5162_v55 = vld [vmem:[#allocation4 + $0xf0] sm:$0xf0]  ;;  %v5402_v16 = vor.u32 %v5401_v25, %v5398_v37  ;;  %v5701_v11 = vrot.slane %v5699_v30, 3  ;;  %v5907_v56 = vrot.slane %v5831_v26, 4 }
 0x322   : > { %v8784_v59 = vld [vmem:[#allocation5 + $0x170] sm:$0xff]  ;;  %v5697_v48 = vor.u32 %v5696_v22, %v5693_v17  ;;  %v5908_v60 = vrot.slane %v5832_v43, 4  ;;  %v5093_v37 = vrot.slane %v5016_v3, 4  ;;  %v5495_v25 = vld [vmem:[#allocation4 + $0xe0] sm:$0xf8]  ;;  %v5408_v15 = vshll.u32 %v5162_v55, 16 }
 0x323   : > { %11331 = vst [vmem:[#allocation12_spill] sm:$0xff] %v10829_v52  ;;  %v8313_v32 = vpop.f32.mrb[72].mxu0  ;;  %7665 = vmatmul.mubr.bf16.gmra.mrb[132].mxu0 %v8784_v59  ;;  %v10841_v59 = vadd.f32 %v10744_v4, %v10620_v39  ;;  %v10844_v52 = vsel %vm1164_vm3, %v5394_v21, %v5402_v16  ;;  %v5496_v17 = vld [vmem:[#allocation4 + $0xe8] sm:$0xf]  ;;  %v8786_v22 = vld [vmem:[#allocation5 + $0x200] sm:$0xff]  ;;  %v5405_v4 = vshrl.u32 %v5162_v55, 16 }
 0x324   : > { %v8314_v28 = vpop.f32.mrb[73].mxu0  ;;  %7672 = vmatprep.mubr.bf16.mxu0 %v8785_v27  ;;  %7520 = vmatmul.mubr.bf16.gmra.mrb[68].mxu1 %v8786_v22  ;;  %v10850_v26 = vsel %vm1018_vm4, %v5907_v56, %v5908_v60  ;;  %v5413_v27 = vshrl.u32 %v5163_v44, 16  ;;  %v8787_v21 = vld [vmem:[#allocation5 + $0x258] sm:$0xff]  ;;  %v5410_v56 = vrot.slane %v5408_v15, 5  ;;  %v5719_v7 = vshll.u32 %v5496_v17, 16 }
 0x325   : > { %v8315_v49 = vadd.f32 %v8314_v28, %v8313_v32  ;;  %v8316_v54 = vpop.f32.mrb[74].mxu0  ;;  %v5705_v32 = vor.u32 %v5704_v47, %v5701_v11  ;;  %v5094_v28 = vrot.slane %v5017_v6, 4  ;;  %7527 = vmatprep.mubr.bf16.mxu1 %v8787_v21  ;;  %v8219_v3 = vpop.f32.mrb[12].mxu1  ;;  %v5416_v11 = vshll.u32 %v5163_v44, 16  ;;  %v5833_v6 = vld [vmem:[#allocation4 + $0xf0] sm:$0xf0] }
 0x326   : > { %v8317_v18 = vpop.f32.mrb[75].mxu0  ;;  %v5407_v47 = vrot.slane %v5405_v4, 4  ;;  %v5415_v55 = vrot.slane %v5413_v27, 4  ;;  %v5711_v21 = vshll.u32 %v5495_v25, 16  ;;  %v5910_v58 = vrot.slane %v5833_v6, 4  ;;  %v8789_v4 = vld [vmem:[#allocation5 + $0x218] sm:$0xff] }
 0x327   : > { %v10847_v30 = vadd.f32 %v8315_v49, %v10742_v38  ;;  %v8318_v2 = vadd.f32 %v8317_v18, %v8316_v54  ;;  %v10856_v38 = vsel %vm649_vm5, %v5697_v48, %v5705_v32  ;;  %v10859_v16 = vsel %vm1018_vm4, %v5093_v37, %v5094_v28  ;;  %v5834_v49 = vld [vmem:[#allocation4 + $0xf8] sm:$0xf]  ;;  %v8220_v54 = vpop.f32.mrb[13].mxu1  ;;  %v5164_v48 = vld [vmem:[#allocation4 + $0x100] sm:$0xf0] }
 0x328   : > { %v5708_v18 = vshrl.u32 %v5495_v25, 16  ;;  %v10861_v22 = vadd.f32 %v8220_v54, %v8219_v3  ;;  %v8788_v32 = vld [vmem:[#allocation5 + $0x1c0] sm:$0xff]  ;;  %v5411_v44 = vor.u32 %v5410_v56, %v5407_v47  ;;  %v10865_v15 = vadd.f32 %v10831_v1, %v10620_v39  ;;  %v5018_v54 = vld [vmem:[#allocation4 + $0xf0] sm:$0xf0] }
 0x329   : > { %11332 = vst [vmem:[#allocation13_spill] sm:$0xff] %v10847_v30  ;;  %v10853_v43 = vadd.f32 %v8318_v2, %v10756_v33  ;;  %v8222_v33 = vpop.f32.mrb[14].mxu1  ;;  %v5418_v2 = vrot.slane %v5416_v11, 5  ;;  %v5713_v35 = vrot.slane %v5711_v21, 4  ;;  %v5721_v47 = vrot.slane %v5719_v7, 4 }
 0x32a   : > { %v8223_v28 = vpop.f32.mrb[15].mxu1  ;;  %v5710_v30 = vrot.slane %v5708_v18, 3  ;;  %v5911_v56 = vrot.slane %v5834_v49, 4  ;;  %v5497_v6 = vld [vmem:[#allocation4 + $0xf0] sm:$0xf8]  ;;  %v7211_v18 = vadd.f32 %v10837_v36, %v10620_v39  ;;  %v5422_v36 = vshrl.u32 %v5164_v48, 16 }
 0x32b   : > { %11333 = vst [vmem:[#allocation14_spill] sm:$0xff] %v10853_v43  ;;  %v8319_v60 = vpop.f32.mrb[76].mxu0  ;;  %v5716_v43 = vshrl.u32 %v5496_v17, 16  ;;  %7673 = vmatmul.mubr.bf16.gmra.mrb[136].mxu0 %v8788_v32  ;;  %v10867_v11 = vadd.f32 %v8223_v28, %v8222_v33  ;;  %v5419_v25 = vor.u32 %v5418_v2, %v5415_v55  ;;  %v5165_v17 = vld [vmem:[#allocation4 + $0x108] sm:$0x1f]  ;;  %v8790_v2 = vld [vmem:[#allocation5 + $0x250] sm:$0xff] }
 0x32c   : > { %v8320_v37 = vpop.f32.mrb[77].mxu0  ;;  %7680 = vmatprep.mubr.bf16.mxu0 %v8789_v4  ;;  %v5498_v55 = vld [vmem:[#allocation4 + $0xf8] sm:$0xf]  ;;  %7528 = vmatmul.mubr.bf16.gmra.mrb[72].mxu1 %v8790_v2  ;;  %v10878_v7 = vsel %vm1018_vm4, %v5910_v58, %v5911_v56  ;;  %v5425_v49 = vshll.u32 %v5164_v48, 16  ;;  %v5835_v28 = vld [vmem:[#allocation4 + $0x100] sm:$0xf0] }
 0x32d   : > { %v8321_v27 = vadd.f32 %v8320_v37, %v8319_v60  ;;  %v8322_v3 = vpop.f32.mrb[78].mxu0  ;;  %v5718_v63 = vrot.slane %v5716_v43, 3  ;;  %v10875_v33 = vsel %vm1164_vm3, %v5411_v44, %v5419_v25  ;;  %v5714_v37 = vor.u32 %v5713_v35, %v5710_v30  ;;  %7535 = vmatprep.mubr.bf16.mxu1 %v10685_v57  ;;  %v5499_v48 = vld [vmem:[#allocation4 + $0x100] sm:$0xf8] }
 0x32e   : > { %v8323_v32 = vpop.f32.mrb[79].mxu0  ;;  %v5096_v43 = vrot.slane %v5018_v54, 4  ;;  %v5430_v4 = vshrl.u32 %v5165_v17, 16  ;;  %v5725_v35 = vshrl.u32 %v5497_v6, 16  ;;  %v5427_v30 = vrot.slane %v5425_v49, 5 }
 0x32f   : > { %v10872_v1 = vadd.f32 %v8321_v27, %v10835_v61  ;;  %v8324_v60 = vadd.f32 %v8323_v32, %v8322_v3  ;;  %v5722_v21 = vor.u32 %v5721_v47, %v5718_v63  ;;  %v5097_v61 = vrot.slane %v5019_v9, 4  ;;  %v8750_v63 = vld [vmem:[%s11322_s7 + $0x240] ss:$0 sps:$4 sm:$0x33]   ;;  %v5836_v3 = vld [vmem:[#allocation4 + $0x108] sm:$0xf] }
 0x330   : > { %v5433_v27 = vshll.u32 %v5165_v17, 16  ;;  %v5728_v9 = vshll.u32 %v5497_v6, 16  ;;  %v5432_v54 = vrot.slane %v5430_v4, 4  ;;  %v5727_v47 = vrot.slane %v5725_v35, 3 }
 0x331   : > { %11334 = vst [vmem:[#allocation15_spill] sm:$0xff] %v10872_v1  ;;  %v10882_v39 = vadd.f32 %v8324_v60, %v10841_v59  ;;  %v10885_v44 = vsel %vm649_vm5, %v5714_v37, %v5722_v21  ;;  %v10891_v57 = vsel %vm1018_vm4, %v5096_v43, %v5097_v61  ;;  %v5424_v59 = vrot.slane %v5422_v36, 4  ;;  %v5020_v43 = vld [vmem:[#allocation4 + $0x100] sm:$0xf0]  ;;  %v5021_v1 = vld [vmem:[#allocation4 + $0x108] sm:$0xf] }
 0x332   : > { %v5435_v32 = vrot.slane %v5433_v27, 5  ;;  %v5733_v56 = vshrl.u32 %v5498_v55, 16  ;;  %v5730_v37 = vrot.slane %v5728_v9, 4  ;;  %v5736_v21 = vshll.u32 %v5498_v55, 16 }
 0x333   : > { %11335 = vst [vmem:[#allocation16_spill] sm:$0xff] %v10882_v39  ;;  %v8325_v58 = vpop.f32.mrb[80].mxu0  ;;  %7681 = vmatmul.mubr.bf16.gmra.mrb[140].mxu0 %v10708_v14  ;;  %v5428_v2 = vor.u32 %v5427_v30, %v5424_v59  ;;  %v5913_v49 = vrot.slane %v5835_v28, 4  ;;  %v5914_v39 = vrot.slane %v5836_v3, 4  ;;  %v5500_v14 = vld [vmem:[#allocation4 + $0x108] sm:$0xf] }
 0x334   : > { %v8326_v25 = vpop.f32.mrb[81].mxu0  ;;  %7688 = vmatprep.mubr.bf16.mxu0 %v10691_v50  ;;  %v5436_v36 = vor.u32 %v5435_v32, %v5432_v54  ;;  %v5735_v6 = vrot.slane %v5733_v56, 3  ;;  %v5731_v35 = vor.u32 %v5730_v37, %v5727_v47  ;;  %v5738_v19 = vrot.slane %v5736_v21, 4  ;;  %7536 = vmatmul.mubr.bf16.gmra.mrb[76].mxu1 %v10697_v34  ;;  %v5837_v59 = vld [vmem:[#allocation4 + $0x110] sm:$0xf0]  ;;  %v8792_v56 = vld [vmem:[%s9037_s16 + $0x8] sm:$0xff] }
 0x335   : > { %v8327_v17 = vadd.f32 %v8326_v25, %v8325_v58  ;;  %v8328_v60 = vpop.f32.mrb[82].mxu0  ;;  %v10903_v55 = vsel %vm1018_vm4, %v5913_v49, %v5914_v39  ;;  %v7115_v28 = vsel %vm3425_vm15, %v8750_v63, 0  ;;  %v5099_v58 = vrot.slane %v5020_v43, 4  ;;  %7543 = vmatprep.mubr.bf16.mxu1 %v10734_v62  ;;  %v5838_v3 = vld [vmem:[#allocation4 + $0x118] sm:$0xf] }
 0x336   : > { %v8329_v61 = vpop.f32.mrb[83].mxu0  ;;  %v10900_v50 = vsel %vm1164_vm3, %v5428_v2, %v5436_v36  ;;  %v5739_v30 = vor.u32 %v5738_v19, %v5735_v6  ;;  %7778 = vmatpush1.bf16.msra.mxu1 %v7115_v28  ;;  %v5100_v9 = vrot.slane %v5021_v1, 4  ;;  %v5742_v34 = vshrl.u32 %v5499_v48, 16  ;;  %v5501_v25 = vld [vmem:[#allocation4 + $0x110] sm:$0xf8]  ;;  %v8791_v39 = vld [vmem:[%s9037_s16] sm:$0xff] }
 0x337   : > { %v10896_v4 = vadd.f32 %v8327_v17, %v10865_v15  ;;  %v8330_v27 = vadd.f32 %v8329_v61, %v8328_v60  ;;  %v5745_v54 = vshll.u32 %v5499_v48, 16  ;;  %v5750_v32 = vshrl.u32 %v5500_v14, 16  ;;  %v5502_v60 = vld [vmem:[#allocation4 + $0x118] sm:$0xf]  ;;  %v5953_v2 = vld [vmem:[#allocation4 + $0x30] sm:$0xf0] }
 0x338   : > { %v5753_v47 = vshll.u32 %v5500_v14, 16  ;;  %v6287_v17 = vpack.c.bf16 %v8792_v56, %v8791_v39  ;;  %v10912_v63 = vsel %vm649_vm5, %v5731_v35, %v5739_v30  ;;  %v10915_v62 = vsel %vm1018_vm4, %v5099_v58, %v5100_v9  ;;  %v5954_v43 = vld [vmem:[#allocation4 + $0x38] sm:$0x1f]  ;;  %v8794_v28 = vld [vmem:[%s9037_s16 + $0x18] sm:$0xff] }
 0x339   : > { %v10907_v15 = vadd.f32 %v8330_v27, %v7211_v18  ;;  %v5744_v18 = vrot.slane %v5742_v34, 3  ;;  %v5916_v19 = vrot.slane %v5837_v59, 4  ;;  %v5747_v1 = vrot.slane %v5745_v54, 4  ;;  %v5955_v59 = vld [vmem:[#allocation4 + $0x40] sm:$0xf0] }
 0x33a   : > { %v5752_v48 = vrot.slane %v5750_v32, 3  ;;  %v5755_v37 = vrot.slane %v5753_v47, 4  ;;  %6303 = vst.msk [vmem:[#allocation5 + $0x48] sm:$0xff] %vm492_vm0, %v6287_v17  ;;  %v5917_v21 = vrot.slane %v5838_v3, 4  ;;  %v5759_v61 = vshrl.u32 %v5501_v25, 16 }
 0x33b   : > { %7689 = vmatmul.mubr.bf16.gmra.mrb[144].mxu0 %v10759_v29  ;;  %v5762_v36 = vshll.u32 %v5501_v25, 16  ;;  %v5767_v6 = vshrl.u32 %v5502_v60, 16  ;;  %v5770_v49 = vshll.u32 %v5502_v60, 16  ;;  %v5748_v14 = vor.u32 %v5747_v1, %v5744_v18  ;;  %v8793_v29 = vld [vmem:[%s9037_s16 + $0x10] sm:$0xff]  ;;  %v8795_v60 = vld [vmem:[%s9037_s16 + $0x20] sm:$0xff]  ;;  %v8796_v18 = vld [vmem:[%s9037_s16 + $0x28] sm:$0xff] }
 0x33c   : > { %7696 = vmatprep.mubr.bf16.mxu0 %v10737_v5  ;;  %v5756_v27 = vor.u32 %v5755_v37, %v5752_v48  ;;  %v10921_v35 = vsel %vm1018_vm4, %v5916_v19, %v5917_v21  ;;  %v6288_v58 = vpack.c.bf16 %v8794_v28, %v8793_v29  ;;  %v5761_v30 = vrot.slane %v5759_v61, 3  ;;  %v5956_v5 = vld [vmem:[#allocation4 + $0x48] sm:$0x1f]  ;;  %7544 = vmatmul.mubr.bf16.gmra.mrb[80].mxu1 %v10748_v8  ;;  %v5957_v1 = vld [vmem:[#allocation4 + $0x50] sm:$0xf0] }
 0x33d   : > { %v5764_v9 = vrot.slane %v5762_v36, 4  ;;  %v5769_v34 = vrot.slane %v5767_v6, 3  ;;  %v5772_v3 = vrot.slane %v5770_v49, 4  ;;  %v6001_v54 = vshrl.u32 %v5953_v2, 16  ;;  %7551 = vmatprep.mubr.bf16.mxu1 %v10772_v12  ;;  %v5958_v61 = vld [vmem:[#allocation4 + $0x58] sm:$0x1f] }
 0x33e   : > { %v10927_v25 = vsel %vm649_vm5, %v5748_v14, %v5756_v27  ;;  %6304 = vst.msk [vmem:[#allocation5 + $0x98] sm:$0xff] %vm492_vm0, %v6288_v58  ;;  %v6004_v32 = vshll.u32 %v5953_v2, 16  ;;  %v6009_v47 = vshrl.u32 %v5954_v43, 16  ;;  %v6012_v17 = vshll.u32 %v5954_v43, 16  ;;  %v8797_v27 = vld [vmem:[%s9037_s16 + $0x30] sm:$0xff]  ;;  %v8798_v29 = vld [vmem:[%s9037_s16 + $0x38] sm:$0xff] }
 0x33f   : > { %v5765_v39 = vor.u32 %v5764_v9, %v5761_v30  ;;  %v5773_v56 = vor.u32 %v5772_v3, %v5769_v34  ;;  %v6289_v19 = vpack.c.bf16 %v8796_v18, %v8795_v60  ;;  %v6003_v8 = vrot.slane %v6001_v54, 4  ;;  %v5959_v58 = vld [vmem:[#allocation4 + $0x60] sm:$0xf0]  ;;  %v5960_v54 = vld [vmem:[#allocation4 + $0x68] sm:$0x1f] }
 0x340   : > { %v6006_v48 = vrot.slane %v6004_v32, 5  ;;  %v6011_v37 = vrot.slane %v6009_v47, 4  ;;  %v6018_v21 = vshrl.u32 %v5955_v59, 16  ;;  %v6014_v2 = vrot.slane %v6012_v17, 5  ;;  %v8799_v17 = vld [vmem:[%s9037_s16 + $0x40] sm:$0xff]  ;;  %v8800_v60 = vld [vmem:[%s9037_s16 + $0x48] sm:$0xff] }
 0x341   : > { %v10934_v36 = vsel %vm649_vm5, %v5765_v39, %v5773_v56  ;;  %6305 = vst.msk [vmem:[#allocation5 + $0xe8] sm:$0xff] %vm492_vm0, %v6289_v19  ;;  %v6021_v12 = vshll.u32 %v5955_v59, 16  ;;  %v6026_v6 = vshrl.u32 %v5956_v5, 16  ;;  %v6029_v14 = vshll.u32 %v5956_v5, 16 }
 0x342   : > { %v6007_v43 = vor.u32 %v6006_v48, %v6003_v8  ;;  %v6020_v49 = vrot.slane %v6018_v21, 4  ;;  %v6290_v28 = vpack.c.bf16 %v8798_v29, %v8797_v27  ;;  %v6015_v30 = vor.u32 %v6014_v2, %v6011_v37  ;;  %v5963_v29 = vld [vmem:[#allocation4 + $0x80] sm:$0xf0] }
 0x343   : > { %7697 = vmatmul.mubr.bf16.gmra.mrb[148].mxu0 %v10785_v53  ;;  %v6023_v9 = vrot.slane %v6021_v12, 5  ;;  %v6028_v34 = vrot.slane %v6026_v6, 4  ;;  %v6035_v3 = vshrl.u32 %v5957_v1, 16  ;;  %v6031_v59 = vrot.slane %v6029_v14, 5  ;;  %v8802_v14 = vld [vmem:[%s9037_s16 + $0x58] sm:$0xff] }
 0x344   : > { %7704 = vmatprep.mubr.bf16.mxu0 %v10775_v24  ;;  %6306 = vst.msk [vmem:[#allocation5 + $0x138] sm:$0xff] %vm492_vm0, %v6290_v28  ;;  %v6038_v53 = vshll.u32 %v5957_v1, 16  ;;  %v6043_v32 = vshrl.u32 %v5958_v61, 16  ;;  %v6046_v47 = vshll.u32 %v5958_v61, 16  ;;  %v10943_v5 = vsel %vm1164_vm3, %v6007_v43, %v6015_v30  ;;  %v5961_v24 = vld [vmem:[#allocation4 + $0x70] sm:$0xf0]  ;;  %7552 = vmatmul.mubr.bf16.gmra.mrb[84].mxu1 %v10782_v40 }
 0x345   : > { %v6024_v39 = vor.u32 %v6023_v9, %v6020_v49  ;;  %v6037_v56 = vrot.slane %v6035_v3, 4  ;;  %v6291_v18 = vpack.c.bf16 %v8800_v60, %v8799_v17  ;;  %v6032_v19 = vor.u32 %v6031_v59, %v6028_v34  ;;  %v5962_v1 = vld [vmem:[#allocation4 + $0x78] sm:$0x1f]  ;;  %7559 = vmatprep.mubr.bf16.mxu1 %v10795_v20  ;;  %v8801_v40 = vld [vmem:[%s9037_s16 + $0x50] sm:$0xff]  ;;  %v8804_v17 = vld [vmem:[%s9037_s16 + $0x68] sm:$0xff] }
 0x346   : > { %v6040_v8 = vrot.slane %v6038_v53, 5  ;;  %v6045_v48 = vrot.slane %v6043_v32, 4  ;;  %v6048_v37 = vrot.slane %v6046_v47, 5  ;;  %v6052_v21 = vshrl.u32 %v5959_v58, 16  ;;  %v5964_v59 = vld [vmem:[#allocation4 + $0x88] sm:$0x1f] }
 0x347   : > { %6307 = vst.msk [vmem:[#allocation5 + $0x188] sm:$0xff] %vm492_vm0, %v6291_v18  ;;  %v6055_v61 = vshll.u32 %v5959_v58, 16  ;;  %v6060_v2 = vshrl.u32 %v5960_v54, 16  ;;  %v6063_v12 = vshll.u32 %v5960_v54, 16  ;;  %v10951_v6 = vsel %vm1164_vm3, %v6024_v39, %v6032_v19  ;;  %v8225_v53 = vpop.f32.mrb[16].mxu1 }
 0x348   : > { %v6041_v43 = vor.u32 %v6040_v8, %v6037_v56  ;;  %v6049_v49 = vor.u32 %v6048_v37, %v6045_v48  ;;  %v6292_v27 = vpack.c.bf16 %v8802_v14, %v8801_v40  ;;  %v6054_v28 = vrot.slane %v6052_v21, 4  ;;  %v8803_v56 = vld [vmem:[%s9037_s16 + $0x60] sm:$0xff]  ;;  %v8226_v18 = vpop.f32.mrb[17].mxu1  ;;  %v5965_v37 = vld [vmem:[#allocation4 + $0x90] sm:$0xf0] }
 0x349   : > { %v6057_v30 = vrot.slane %v6055_v61, 5  ;;  %v6062_v20 = vrot.slane %v6060_v2, 4  ;;  %v6065_v9 = vrot.slane %v6063_v12, 5  ;;  %v6069_v34 = vshrl.u32 %v5961_v24, 16  ;;  %v5966_v14 = vld [vmem:[#allocation4 + $0x98] sm:$0x1f] }
 0x34a   : > { %v10957_v58 = vsel %vm1164_vm3, %v6041_v43, %v6049_v49  ;;  %6308 = vst.msk [vmem:[#allocation5 + $0x1d8] sm:$0xff] %vm492_vm0, %v6292_v27  ;;  %v6072_v3 = vshll.u32 %v5961_v24, 16  ;;  %v6077_v54 = vshrl.u32 %v5962_v1, 16  ;;  %v6080_v39 = vshll.u32 %v5962_v1, 16  ;;  %v8228_v24 = vpop.f32.mrb[18].mxu1 }
 0x34b   : > { %7705 = vmatmul.mubr.bf16.gmra.mrb[152].mxu0 %v10808_v51  ;;  %v6058_v32 = vor.u32 %v6057_v30, %v6054_v28  ;;  %v6066_v47 = vor.u32 %v6065_v9, %v6062_v20  ;;  %v6293_v60 = vpack.c.bf16 %v8804_v17, %v8803_v56  ;;  %v6071_v51 = vrot.slane %v6069_v34, 4  ;;  %v8229_v1 = vpop.f32.mrb[19].mxu1  ;;  %v10973_v27 = vld [vmem:[%s11323_s8] ss:$0 sm:$0xff] }
 0x34c   : > { %7712 = vmatprep.mubr.bf16.mxu0 %v10798_v45  ;;  %v6074_v19 = vrot.slane %v6072_v3, 5  ;;  %v6079_v8 = vrot.slane %v6077_v54, 4  ;;  %v6086_v48 = vshrl.u32 %v5963_v29, 16  ;;  %v10963_v21 = vadd.f32 %v8226_v18, %v8225_v53  ;;  %7560 = vmatmul.mubr.bf16.gmra.mrb[88].mxu1 %v10805_v46  ;;  %v8806_v54 = vld [vmem:[%s9037_s16 + $0x70] sm:$0xff] }
 0x34d   : > { %v10966_v61 = vsel %vm1164_vm3, %v6058_v32, %v6066_v47  ;;  %v6082_v45 = vrot.slane %v6080_v39, 5  ;;  %6309 = vst.msk [vmem:[#allocation5 + $0x228] sm:$0xff] %vm492_vm0, %v6293_v60  ;;  %v6089_v2 = vshll.u32 %v5963_v29, 16  ;;  %v6094_v49 = vshrl.u32 %v5964_v59, 16  ;;  %7567 = vmatprep.mubr.bf16.mxu1 %v10814_v0  ;;  %v8331_v29 = vpop.f32.mrb[84].mxu0 }
 0x34e   : > { %v6075_v12 = vor.u32 %v6074_v19, %v6071_v51  ;;  %v6088_v43 = vrot.slane %v6086_v48, 4  ;;  %v6097_v40 = vshll.u32 %v5964_v59, 16  ;;  %v7216_v28 = vadd.f32 %v10973_v27, %v10861_v22  ;;  %v8332_v9 = vpop.f32.mrb[85].mxu0  ;;  %v8807_v59 = vld [vmem:[%s9037_s16 + $0x78] sm:$0xff]  ;;  %v5967_v47 = vld [vmem:[#allocation4 + $0xa0] sm:$0xf0] }
 0x34f   : > { %v10978_v46 = vadd.f32 %v8229_v1, %v8228_v24  ;;  %v6083_v30 = vor.u32 %v6082_v45, %v6079_v8  ;;  %v6091_v20 = vrot.slane %v6089_v2, 5  ;;  %v6096_v34 = vrot.slane %v6094_v49, 4  ;;  %v8334_v22 = vpop.f32.mrb[86].mxu0  ;;  %v5968_v60 = vld [vmem:[#allocation4 + $0xa8] sm:$0x1f]  ;;  %v8808_v2 = vld [vmem:[%s9037_s16 + $0x80] sm:$0xff] }
 0x350   : > { %v6099_v3 = vrot.slane %v6097_v40, 5  ;;  %v6294_v53 = vpack.c.bf16 %v8807_v59, %v8806_v54  ;;  %v6103_v32 = vshrl.u32 %v5965_v37, 16  ;;  %v7219_v39 = vadd.f32 %v10973_v27, %v10867_v11  ;;  %v8335_v18 = vpop.f32.mrb[87].mxu0  ;;  %v8809_v1 = vld [vmem:[%s9037_s16 + $0x88] sm:$0xff] }
 0x351   : > { %v8333_v56 = vadd.f32 %v8332_v9, %v8331_v29  ;;  %v10985_v0 = vsel %vm1164_vm3, %v6075_v12, %v6083_v30  ;;  %v6092_v17 = vor.u32 %v6091_v20, %v6088_v43  ;;  %v6106_v8 = vshll.u32 %v5965_v37, 16  ;;  %v8231_v43 = vpop.f32.mrb[20].mxu1  ;;  %v5969_v30 = vld [vmem:[#allocation4 + $0xb0] sm:$0xf0] }
 0x352   : > { %v6100_v51 = vor.u32 %v6099_v3, %v6096_v34  ;;  %6310 = vst.msk [vmem:[#allocation5 + $0x278] sm:$0xff] %vm492_vm0, %v6294_v53  ;;  %v6105_v19 = vrot.slane %v6103_v32, 4  ;;  %v6111_v48 = vshrl.u32 %v5966_v14, 16  ;;  %v8336_v24 = vadd.f32 %v8335_v18, %v8334_v22  ;;  %v8232_v37 = vpop.f32.mrb[21].mxu1  ;;  %v5970_v53 = vld [vmem:[#allocation4 + $0xb8] sm:$0x1f] }
 0x353   : > { %7713 = vmatmul.mubr.bf16.gmra.mrb[156].mxu0 %v10826_v31  ;;  %v10990_v11 = vadd.f32 %v8333_v56, %v7216_v28  ;;  %v6114_v45 = vshll.u32 %v5966_v14, 16  ;;  %v6295_v12 = vpack.c.bf16 %v8809_v1, %v8808_v2  ;;  %v6108_v31 = vrot.slane %v6106_v8, 5  ;;  %v8234_v34 = vpop.f32.mrb[22].mxu1  ;;  %v8337_v32 = vpop.f32.mrb[88].mxu0  ;;  %v8810_v18 = vld [vmem:[%s9037_s16 + $0x90] sm:$0xff] }
 0x354   : > { %7720 = vmatprep.mubr.bf16.mxu0 %v10817_v23  ;;  %v10995_v49 = vsel %vm1164_vm3, %v6092_v17, %v6100_v51  ;;  %v6113_v40 = vrot.slane %v6111_v48, 4  ;;  %v6120_v29 = vshrl.u32 %v5967_v47, 16  ;;  %v10997_v20 = vadd.f32 %v8336_v24, %v7219_v39  ;;  %7568 = vmatmul.mubr.bf16.gmra.mrb[92].mxu1 %v10823_v42  ;;  %v8235_v39 = vpop.f32.mrb[23].mxu1  ;;  %v8338_v8 = vpop.f32.mrb[89].mxu0 }
 0x355   : > { %v6116_v9 = vrot.slane %v6114_v45, 5  ;;  %6311 = vst.msk [vmem:[#allocation5 + $0x2c8] sm:$0xff] %vm492_vm0, %v6295_v12  ;;  %v6123_v23 = vshll.u32 %v5967_v47, 16  ;;  %v6128_v14 = vshrl.u32 %v5968_v60, 16  ;;  %v11001_v28 = vadd.f32 %v8232_v37, %v8231_v43  ;;  %7575 = vmatprep.mubr.bf16.mxu1 %v10844_v52  ;;  %v8811_v47 = vld [vmem:[%s9037_s16 + $0x98] sm:$0xff]  ;;  %v8340_v2 = vpop.f32.mrb[90].mxu0 }
 0x356   : > { %v6109_v3 = vor.u32 %v6108_v31, %v6105_v19  ;;  %v6122_v54 = vrot.slane %v6120_v29, 4  ;;  %v6131_v59 = vshll.u32 %v5968_v60, 16  ;;  %v6296_v51 = vpack.c.bf16 %v8811_v47, %v8810_v18  ;;  %v5971_v60 = vld [vmem:[#allocation4 + $0xc0] sm:$0xf0]  ;;  %v8341_v43 = vpop.f32.mrb[91].mxu0 }
 0x357   : > { %v6117_v56 = vor.u32 %v6116_v9, %v6113_v40  ;;  %v6125_v22 = vrot.slane %v6123_v23, 5  ;;  %v6130_v17 = vrot.slane %v6128_v14, 4  ;;  %v7224_v42 = vadd.f32 %v10973_v27, %v10963_v21  ;;  %v5972_v37 = vld [vmem:[#allocation4 + $0xc8] sm:$0x1f] }
 0x358   : > { %v11008_v48 = vadd.f32 %v8235_v39, %v8234_v34  ;;  %v6133_v19 = vrot.slane %v6131_v59, 5  ;;  %v6137_v24 = vshrl.u32 %v5969_v30, 16  ;;  %v8339_v45 = vadd.f32 %v8338_v8, %v8337_v32  ;;  %6312 = vst.msk [vmem:[#allocation5 + $0x318] sm:$0xff] %vm492_vm0, %v6296_v51  ;;  %v5974_v39 = vld [vmem:[#allocation4 + $0xd8] sm:$0x1f]  ;;  %v8814_v51 = vld [vmem:[%s9037_s16 + $0xb0] sm:$0xff] }
 0x359   : > { %v11011_v52 = vsel %vm1164_vm3, %v6109_v3, %v6117_v56  ;;  %v6126_v1 = vor.u32 %v6125_v22, %v6122_v54  ;;  %v6140_v12 = vshll.u32 %v5969_v30, 16  ;;  %v7227_v21 = vadd.f32 %v10973_v27, %v10978_v46  ;;  %v5973_v30 = vld [vmem:[#allocation4 + $0xd0] sm:$0xf0]  ;;  %v8812_v46 = vld [vmem:[%s9037_s16 + $0xa0] sm:$0xff]  ;;  %v8813_v54 = vld [vmem:[%s9037_s16 + $0xa8] sm:$0xff] }
 0x35a   : > { %v6134_v31 = vor.u32 %v6133_v19, %v6130_v17  ;;  %v6139_v40 = vrot.slane %v6137_v24, 4  ;;  %v6145_v29 = vshrl.u32 %v5970_v53, 16  ;;  %v11018_v9 = vadd.f32 %v8339_v45, %v7224_v42  ;;  %v8815_v42 = vld [vmem:[%s9037_s16 + $0xb8] sm:$0xff]  ;;  %v5975_v19 = vld [vmem:[#allocation4 + $0xe0] sm:$0xf0] }
 0x35b   : > { %7721 = vmatmul.mubr.bf16.gmra.mrb[160].mxu0 %v10856_v38  ;;  %v8342_v23 = vadd.f32 %v8341_v43, %v8340_v2  ;;  %v6142_v14 = vrot.slane %v6140_v12, 5  ;;  %v6148_v34 = vshll.u32 %v5970_v53, 16  ;;  %v6297_v59 = vpack.c.bf16 %v8813_v54, %v8812_v46  ;;  %v5976_v12 = vld [vmem:[#allocation4 + $0xe8] sm:$0x1f]  ;;  %v5978_v54 = vld [vmem:[#allocation4 + $0xf8] sm:$0x1f] }
 0x35c   : > { %7728 = vmatprep.mubr.bf16.mxu0 %v10850_v26  ;;  %v11021_v3 = vsel %vm1164_vm3, %v6126_v1, %v6134_v31  ;;  %v6147_v38 = vrot.slane %v6145_v29, 4  ;;  %v6154_v32 = vshrl.u32 %v5971_v60, 16  ;;  %v6157_v17 = vshll.u32 %v5971_v60, 16  ;;  %7576 = vmatmul.mubr.bf16.gmra.mrb[96].mxu1 %v10859_v16 }
 0x35d   : > { %v11025_v56 = vadd.f32 %v8342_v23, %v7227_v21  ;;  %v6143_v26 = vor.u32 %v6142_v14, %v6139_v40  ;;  %v6150_v22 = vrot.slane %v6148_v34, 5  ;;  %6313 = vst.msk [vmem:[#allocation5 + $0x368] sm:$0xff] %vm492_vm0, %v6297_v59  ;;  %v6162_v18 = vshrl.u32 %v5972_v37, 16  ;;  %7583 = vmatprep.mubr.bf16.mxu1 %v10875_v33  ;;  %v5977_v33 = vld [vmem:[#allocation4 + $0xf0] sm:$0xf0] }
 0x35e   : > { %v6156_v53 = vrot.slane %v6154_v32, 4  ;;  %v6165_v47 = vshll.u32 %v5972_v37, 16  ;;  %v6298_v8 = vpack.c.bf16 %v8815_v42, %v8814_v51  ;;  %v6159_v45 = vrot.slane %v6157_v17, 5 }
 0x35f   : > { %v6151_v24 = vor.u32 %v6150_v22, %v6147_v38  ;;  %v6171_v2 = vshrl.u32 %v5973_v30, 16  ;;  %v6174_v1 = vshll.u32 %v5973_v30, 16  ;;  %v6164_v60 = vrot.slane %v6162_v18, 4  ;;  %v8816_v30 = vld [vmem:[%s9037_s16 + $0xc0] sm:$0xff]  ;;  %v8817_v38 = vld [vmem:[%s9037_s16 + $0xc8] sm:$0xff]  ;;  %v8819_v18 = vld [vmem:[%s9037_s16 + $0xd8] sm:$0xff] }
 0x360   : > { %v6167_v16 = vrot.slane %v6165_v47, 5  ;;  %6314 = vst.msk [vmem:[#allocation5 + $0x3b8] sm:$0xff] %vm492_vm0, %v6298_v8  ;;  %v6179_v21 = vshrl.u32 %v5974_v39, 16  ;;  %v6182_v43 = vshll.u32 %v5974_v39, 16  ;;  %v6160_v40 = vor.u32 %v6159_v45, %v6156_v53  ;;  %v8818_v53 = vld [vmem:[%s9037_s16 + $0xd0] sm:$0xff] }
 0x361   : > { %v11034_v31 = vsel %vm1164_vm3, %v6143_v26, %v6151_v24  ;;  %v6173_v29 = vrot.slane %v6171_v2, 4  ;;  %v6176_v37 = vrot.slane %v6174_v1, 5  ;;  %v6299_v46 = vpack.c.bf16 %v8817_v38, %v8816_v30  ;;  %v5979_v45 = vld [vmem:[#allocation4 + $0x100] sm:$0xf0] }
 0x362   : > { %v6168_v23 = vor.u32 %v6167_v16, %v6164_v60  ;;  %v6181_v14 = vrot.slane %v6179_v21, 4  ;;  %v6184_v34 = vrot.slane %v6182_v43, 5  ;;  %v6188_v32 = vshrl.u32 %v5975_v19, 16 }
 0x363   : > { %7729 = vmatmul.mubr.bf16.gmra.mrb[164].mxu0 %v10885_v44  ;;  %v6177_v59 = vor.u32 %v6176_v37, %v6173_v29  ;;  %v6191_v39 = vshll.u32 %v5975_v19, 16  ;;  %v6196_v26 = vshrl.u32 %v5976_v12, 16  ;;  %6315 = vst.msk [vmem:[#allocation5 + $0x408] sm:$0xff] %vm492_vm0, %v6299_v46  ;;  %v6199_v44 = vshll.u32 %v5976_v12, 16  ;;  %v5980_v12 = vld [vmem:[#allocation4 + $0x108] sm:$0x1f] }
 0x364   : > { %7736 = vmatprep.mubr.bf16.mxu0 %v10878_v7  ;;  %v11041_v22 = vsel %vm1164_vm3, %v6160_v40, %v6168_v23  ;;  %v6185_v17 = vor.u32 %v6184_v34, %v6181_v14  ;;  %v6300_v47 = vpack.c.bf16 %v8819_v18, %v8818_v53  ;;  %v6190_v51 = vrot.slane %v6188_v32, 4  ;;  %7584 = vmatmul.mubr.bf16.gmra.mrb[100].mxu1 %v10891_v57  ;;  %v8820_v57 = vld [vmem:[%s9037_s16 + $0xe0] sm:$0xff]  ;;  %v8821_v23 = vld [vmem:[%s9037_s16 + $0xe8] sm:$0xff] }
 0x365   : > { %v6193_v42 = vrot.slane %v6191_v39, 5  ;;  %v6198_v8 = vrot.slane %v6196_v26, 4  ;;  %v6205_v24 = vshrl.u32 %v5977_v33, 16  ;;  %v6201_v19 = vrot.slane %v6199_v44, 5  ;;  %7591 = vmatprep.mubr.bf16.mxu1 %v10900_v50  ;;  %v6328_v39 = vld [vmem:[#allocation5 + $0x48] sm:$0xff] }
 0x366   : > { %v11048_v7 = vsel %vm1164_vm3, %v6177_v59, %v6185_v17  ;;  %6316 = vst.msk [vmem:[#allocation5 + $0x458] sm:$0xff] %vm492_vm0, %v6300_v47  ;;  %v6208_v2 = vshll.u32 %v5977_v33, 16  ;;  %v6213_v1 = vshrl.u32 %v5978_v54, 16  ;;  %v6216_v21 = vshll.u32 %v5978_v54, 16  ;;  %v8823_v47 = vld [vmem:[%s9037_s16 + $0xf8] sm:$0xff] }
 0x367   : > { %v6194_v60 = vor.u32 %v6193_v42, %v6190_v51  ;;  %v6207_v16 = vrot.slane %v6205_v24, 4  ;;  %v6202_v43 = vor.u32 %v6201_v19, %v6198_v8  ;;  %v6301_v14 = vpack.c.bf16 %v8821_v23, %v8820_v57  ;;  %v5981_v42 = vld [vmem:[#allocation4 + $0x110] sm:$0xf0]  ;;  %v5982_v8 = vld [vmem:[#allocation4 + $0x118] sm:$0x1f] }
 0x368   : > { %v6210_v40 = vrot.slane %v6208_v2, 5  ;;  %v6215_v29 = vrot.slane %v6213_v1, 4  ;;  %v6218_v37 = vrot.slane %v6216_v21, 5  ;;  %v6222_v34 = vshrl.u32 %v5979_v45, 16 }
 0x369   : > { %v6225_v30 = vshll.u32 %v5979_v45, 16  ;;  %v11056_v33 = vsel %vm1164_vm3, %v6194_v60, %v6202_v43  ;;  %v6230_v46 = vshrl.u32 %v5980_v12, 16  ;;  %v6233_v50 = vshll.u32 %v5980_v12, 16  ;;  %6317 = vst.msk [vmem:[#allocation5 + $0x4a8] sm:$0xff] %vm492_vm0, %v6301_v14  ;;  %v8824_v43 = vld [vmem:[#allocation5 + $0x40] sm:$0xff] }
 0x36a   : > { %v6211_v38 = vor.u32 %v6210_v40, %v6207_v16  ;;  %v6219_v54 = vor.u32 %v6218_v37, %v6215_v29  ;;  %v6224_v59 = vrot.slane %v6222_v34, 4  ;;  %v6239_v24 = vshrl.u32 %v5981_v42, 16 }
 0x36b   : > { %7737 = vmatmul.mubr.bf16.gmra.mrb[168].mxu0 %v10912_v63  ;;  %v6227_v32 = vrot.slane %v6225_v30, 5  ;;  %v6232_v26 = vrot.slane %v6230_v46, 4  ;;  %v6235_v17 = vrot.slane %v6233_v50, 5  ;;  %v6242_v45 = vshll.u32 %v5981_v42, 16 }
 0x36c   : > { %7744 = vmatprep.mubr.bf16.mxu0 %v10903_v55  ;;  %v11061_v63 = vsel %vm1164_vm3, %v6211_v38, %v6219_v54  ;;  %7592 = vmatmul.mubr.bf16.gmra.mrb[104].mxu1 %v10915_v62  ;;  %v8822_v55 = vld [vmem:[%s9037_s16 + $0xf0] sm:$0xff]  ;;  %v6247_v19 = vshrl.u32 %v5982_v8, 16  ;;  %v6250_v2 = vshll.u32 %v5982_v8, 16  ;;  %v6338_v62 = vld [vmem:[#allocation5 + $0x98] sm:$0xff]  ;;  %v6241_v1 = vrot.slane %v6239_v24, 4 }
 0x36d   : > { %v6228_v44 = vor.u32 %v6227_v32, %v6224_v59  ;;  %v6236_v53 = vor.u32 %v6235_v17, %v6232_v26  ;;  %8116 = vmatprep.mubr.msk.bf16.mxu1 %vm492_vm0, %v6328_v39  ;;  %v6302_v51 = vpack.c.bf16 %v8823_v47, %v8822_v55  ;;  %v6244_v12 = vrot.slane %v6242_v45, 5  ;;  %v6348_v59 = vld [vmem:[#allocation5 + $0xe8] sm:$0xff] }
 0x36e   : > { %v6249_v60 = vrot.slane %v6247_v19, 4  ;;  %v6252_v16 = vrot.slane %v6250_v2, 5  ;;  %v7232_v38 = vadd.f32 %v10973_v27, %v11001_v28  ;;  %v7235_v32 = vadd.f32 %v10973_v27, %v11008_v48  ;;  %v6358_v19 = vld [vmem:[#allocation5 + $0x138] sm:$0xff] }
 0x36f   : > { %v11066_v18 = vsel %vm1164_vm3, %v6228_v44, %v6236_v53  ;;  %6318 = vst.msk [vmem:[#allocation5 + $0x4f8] sm:$0xff] %vm492_vm0, %v6302_v51  ;;  %v8237_v21 = vpop.f32.mrb[24].mxu1  ;;  %v6245_v29 = vor.u32 %v6244_v12, %v6241_v1  ;;  %v6368_v12 = vld [vmem:[#allocation5 + $0x188] sm:$0xff] }
 0x370   : > { %v8238_v40 = vpop.f32.mrb[25].mxu1  ;;  %v6253_v37 = vor.u32 %v6252_v16, %v6249_v60  ;;  %v6378_v60 = vld [vmem:[#allocation5 + $0x1d8] sm:$0xff]  ;;  %v6388_v16 = vld [vmem:[#allocation5 + $0x228] sm:$0xff] }
 0x371   : > { %v8240_v57 = vpop.f32.mrb[26].mxu1 }
 0x372   : > { %v8241_v23 = vpop.f32.mrb[27].mxu1 }
 0x373   : > { %7745 = vmatmul.mubr.bf16.gmra.mrb[172].mxu0 %v10927_v25  ;;  %v8239_v25 = vadd.f32 %v8238_v40, %v8237_v21  ;;  %v8343_v14 = vpop.f32.mrb[92].mxu0  ;;  %v8242_v34 = vadd.f32 %v8241_v23, %v8240_v57 }
 0x374   : > { %7752 = vmatprep.mubr.bf16.mxu0 %v10921_v35  ;;  %7794 = vmatmul.mubr.bf16.vlgmr.msra.gmra.mrb[108].mxu1 %v8824_v43  ;;  %v11075_v35 = vsel %vm1164_vm3, %v6245_v29, %v6253_v37  ;;  %v8344_v30 = vpop.f32.mrb[93].mxu0  ;;  %v6398_v37 = vld [vmem:[#allocation5 + $0x278] sm:$0xff] }
 0x375   : > { %8117 = vmatprep.mubr.msk.bf16.mxu1 %vm492_vm0, %v6338_v62  ;;  %v8345_v46 = vadd.f32 %v8344_v30, %v8343_v14  ;;  %v8346_v50 = vpop.f32.mrb[94].mxu0  ;;  %v7240_v8 = vadd.f32 %v10973_v27, %v8239_v25 }
 0x376   : > { %v8347_v54 = vpop.f32.mrb[95].mxu0 }
 0x377   : > { %v11082_v39 = vadd.f32 %v8345_v46, %v7232_v38  ;;  %v8348_v26 = vadd.f32 %v8347_v54, %v8346_v50  ;;  %v6408_v50 = vld [vmem:[#allocation5 + $0x2c8] sm:$0xff] }
 0x378   : > { %v8243_v17 = vpop.f32.mrb[28].mxu1 }
 0x379   : > { %v11085_v44 = vadd.f32 %v8348_v26, %v7235_v32 }
 0x37b   : > { %7753 = vmatmul.mubr.bf16.gmra.mrb[176].mxu0 %v10934_v36  ;;  %v8244_v36 = vpop.f32.mrb[29].mxu1  ;;  %v8349_v55 = vpop.f32.mrb[96].mxu0 }
 0x37c   : > { %7802 = vmatmul.mubr.bf16.gmra.mrb[112].mxu1 %v10943_v5  ;;  %v8245_v53 = vadd.f32 %v8244_v36, %v8243_v17  ;;  %v8246_v28 = vpop.f32.mrb[30].mxu1  ;;  %v8350_v51 = vpop.f32.mrb[97].mxu0  ;;  %v7243_v5 = vadd.f32 %v10973_v27, %v8242_v34 }
 0x37d   : > { %8118 = vmatprep.mubr.msk.bf16.mxu1 %vm492_vm0, %v6348_v59  ;;  %v8247_v47 = vpop.f32.mrb[31].mxu1  ;;  %v8351_v48 = vadd.f32 %v8350_v51, %v8349_v55  ;;  %v8352_v24 = vpop.f32.mrb[98].mxu0  ;;  %v6418_v51 = vld [vmem:[#allocation5 + $0x318] sm:$0xff] }
 0x37e   : > { %v8248_v42 = vadd.f32 %v8247_v47, %v8246_v28  ;;  %v8353_v45 = vpop.f32.mrb[99].mxu0 }
 0x37f   : > { %v11090_v2 = vadd.f32 %v8351_v48, %v7240_v8  ;;  %v8354_v62 = vadd.f32 %v8353_v45, %v8352_v24  ;;  %v6428_v45 = vld [vmem:[#allocation5 + $0x368] sm:$0xff] }
 0x380   : > { %v7251_v34 = vadd.f32 %v10973_v27, %v8248_v42 }
 0x381   : > { %v11093_v1 = vadd.f32 %v8354_v62, %v7243_v5 }
 0x384   : > { %7810 = vmatmul.mubr.bf16.gmra.mrb[116].mxu1 %v10951_v6 }
 0x385   : > { %8119 = vmatprep.mubr.msk.bf16.mxu1 %vm492_vm0, %v6358_v19 }
 0x38c   : > { %7818 = vmatmul.mubr.bf16.gmra.mrb[120].mxu1 %v10957_v58 }
 0x38d   : > { %8120 = vmatprep.mubr.msk.bf16.mxu1 %vm492_vm0, %v6368_v12 }
 0x394   : > { %7826 = vmatmul.mubr.bf16.gmra.mrb[124].mxu1 %v10966_v61  ;;  %v7248_v61 = vadd.f32 %v10973_v27, %v8245_v53 }
 0x395   : > { %8121 = vmatprep.mubr.msk.bf16.mxu1 %vm492_vm0, %v6378_v60 }
 0x39c   : > { %7834 = vmatmul.mubr.bf16.gmra.mrb[128].mxu1 %v10985_v0 }
 0x39d   : > { %8122 = vmatprep.mubr.msk.bf16.mxu1 %vm492_vm0, %v6388_v16  ;;  %v8249_v6 = vpop.f32.mrb[32].mxu1  ;;  %v6438_v16 = vld [vmem:[#allocation5 + $0x3b8] sm:$0xff] }
 0x39e   : > { %v8250_v21 = vpop.f32.mrb[33].mxu1 }
 0x39f   : > { %v8251_v43 = vadd.f32 %v8250_v21, %v8249_v6  ;;  %v8252_v40 = vpop.f32.mrb[34].mxu1 }
 0x3a0   : > { %v8253_v29 = vpop.f32.mrb[35].mxu1 }
 0x3a1   : > { %v8254_v25 = vadd.f32 %v8253_v29, %v8252_v40  ;;  %v8355_v58 = vpop.f32.mrb[100].mxu0  ;;  %v7256_v28 = vadd.f32 %v10973_v27, %v8251_v43 }
 0x3a2   : > { %v8356_v57 = vpop.f32.mrb[101].mxu0 }
 0x3a3   : > { %v8357_v23 = vadd.f32 %v8356_v57, %v8355_v58  ;;  %v8358_v14 = vpop.f32.mrb[102].mxu0  ;;  %v7259_v8 = vadd.f32 %v10973_v27, %v8254_v25 }
 0x3a4   : > { %7842 = vmatmul.mubr.bf16.gmra.mrb[132].mxu1 %v10995_v49  ;;  %v8359_v0 = vpop.f32.mrb[103].mxu0 }
 0x3a5   : > { %8123 = vmatprep.mubr.msk.bf16.mxu1 %vm492_vm0, %v6398_v37  ;;  %v11106_v30 = vadd.f32 %v8357_v23, %v7248_v61  ;;  %v8360_v38 = vadd.f32 %v8359_v0, %v8358_v14 }
 0x3a7   : > { %v11108_v46 = vadd.f32 %v8360_v38, %v7251_v34 }
 0x3aa   : > { %v8255_v54 = vpop.f32.mrb[36].mxu1 }
 0x3ab   : > { %v8256_v49 = vpop.f32.mrb[37].mxu1 }
 0x3ac   : > { %7850 = vmatmul.mubr.bf16.gmra.mrb[136].mxu1 %v11011_v52  ;;  %v8257_v59 = vadd.f32 %v8256_v49, %v8255_v54  ;;  %v8258_v32 = vpop.f32.mrb[38].mxu1 }
 0x3ad   : > { %8124 = vmatprep.mubr.msk.bf16.mxu1 %vm492_vm0, %v6408_v50  ;;  %v8361_v26 = vpop.f32.mrb[104].mxu0  ;;  %v8259_v17 = vpop.f32.mrb[39].mxu1 }
 0x3ae   : > { %v8362_v36 = vpop.f32.mrb[105].mxu0  ;;  %v8260_v53 = vadd.f32 %v8259_v17, %v8258_v32 }
 0x3af   : > { %v8363_v55 = vadd.f32 %v8362_v36, %v8361_v26  ;;  %v8364_v47 = vpop.f32.mrb[106].mxu0 }
 0x3b0   : > { %v8365_v42 = vpop.f32.mrb[107].mxu0  ;;  %v7267_v37 = vadd.f32 %v10973_v27, %v8260_v53 }
 0x3b1   : > { %v11114_v48 = vadd.f32 %v8363_v55, %v7256_v28  ;;  %v8366_v52 = vadd.f32 %v8365_v42, %v8364_v47 }
 0x3b3   : > { %v11118_v24 = vadd.f32 %v8366_v52, %v7259_v8  ;;  %v6458_v52 = vld [vmem:[#allocation5 + $0x458] sm:$0xff] }
 0x3b4   : > { %7858 = vmatmul.mubr.bf16.gmra.mrb[140].mxu1 %v11021_v3  ;;  %v7264_v3 = vadd.f32 %v10973_v27, %v8257_v59 }
 0x3b5   : > { %8125 = vmatprep.mubr.msk.bf16.mxu1 %vm492_vm0, %v6418_v51 }
 0x3bc   : > { %7866 = vmatmul.mubr.bf16.gmra.mrb[144].mxu1 %v11034_v31 }
 0x3bd   : > { %8126 = vmatprep.mubr.msk.bf16.mxu1 %vm492_vm0, %v6428_v45 }
 0x3bf   : > { %v8261_v19 = vpop.f32.mrb[40].mxu1 }
 0x3c0   : > { %v8262_v5 = vpop.f32.mrb[41].mxu1 }
 0x3c1   : > { %v8263_v62 = vadd.f32 %v8262_v5, %v8261_v19  ;;  %v8264_v12 = vpop.f32.mrb[42].mxu1 }
 0x3c2   : > { %v8265_v60 = vpop.f32.mrb[43].mxu1 }
 0x3c3   : > { %v8367_v6 = vpop.f32.mrb[108].mxu0  ;;  %v8266_v21 = vadd.f32 %v8265_v60, %v8264_v12  ;;  %v7272_v59 = vadd.f32 %v10973_v27, %v8263_v62 }
 0x3c4   : > { %v8368_v43 = vpop.f32.mrb[109].mxu0  ;;  %7874 = vmatmul.mubr.bf16.gmra.mrb[148].mxu1 %v11041_v22  ;;  %v6448_v22 = vld [vmem:[#allocation5 + $0x408] sm:$0xff] }
 0x3c5   : > { %v8369_v40 = vadd.f32 %v8368_v43, %v8367_v6  ;;  %v8370_v29 = vpop.f32.mrb[110].mxu0  ;;  %8127 = vmatprep.mubr.msk.bf16.mxu1 %vm492_vm0, %v6438_v16  ;;  %v7275_v53 = vadd.f32 %v10973_v27, %v8266_v21  ;;  %v11336_v27 = vld [vmem:[#allocation6_spill] sm:$0xff] }
 0x3c6   : > { %v8371_v31 = vpop.f32.mrb[111].mxu0 }
 0x3c7   : > { %v11126_v25 = vadd.f32 %v8369_v40, %v7264_v3  ;;  %v8372_v58 = vadd.f32 %v8371_v31, %v8370_v29  ;;  %v8395_v57 = vpop.f32.mrb[44].mxu1 }
 0x3c8   : > { %v8396_v61 = vpop.f32.mrb[45].mxu1 }
 0x3c9   : > { %v11128_v23 = vadd.f32 %v8372_v58, %v7267_v37  ;;  %v8397_v14 = vadd.f32 %v8396_v61, %v8395_v57  ;;  %v8398_v0 = vpop.f32.mrb[46].mxu1  ;;  %v6468_v37 = vld [vmem:[#allocation5 + $0x4a8] sm:$0xff] }
 0x3ca   : > { %v8399_v34 = vpop.f32.mrb[47].mxu1  ;;  %v11337_v58 = vld [vmem:[#allocation7_spill] sm:$0xff] }
 0x3cb   : > { %v8373_v38 = vpop.f32.mrb[112].mxu0  ;;  %v7474_v50 = vadd.f32 %v8397_v14, %v10712_v41  ;;  %v8400_v54 = vadd.f32 %v8399_v34, %v8398_v0  ;;  %v11338_v34 = vld [vmem:[#allocation8_spill] sm:$0xff] }
 0x3cc   : > { %v8374_v49 = vpop.f32.mrb[113].mxu0  ;;  %7882 = vmatmul.mubr.bf16.gmra.mrb[152].mxu1 %v11048_v7 }
 0x3cd   : > { %v8375_v32 = vadd.f32 %v8374_v49, %v8373_v38  ;;  %v8376_v26 = vpop.f32.mrb[114].mxu0  ;;  %v7477_v17 = vadd.f32 %v8400_v54, %v10722_v10  ;;  %8128 = vmatprep.mubr.msk.bf16.mxu1 %vm492_vm0, %v6448_v22 }
 0x3ce   : > { %v8377_v36 = vpop.f32.mrb[115].mxu0 }
 0x3cf   : > { %v11136_v28 = vadd.f32 %v8375_v32, %v7272_v59  ;;  %v8378_v55 = vadd.f32 %v8377_v36, %v8376_v26  ;;  %v8401_v47 = vpop.f32.mrb[48].mxu1 }
 0x3d0   : > { %v8402_v41 = vpop.f32.mrb[49].mxu1 }
 0x3d1   : > { %v11138_v51 = vadd.f32 %v8378_v55, %v7275_v53  ;;  %v8403_v42 = vadd.f32 %v8402_v41, %v8401_v47  ;;  %v8404_v7 = vpop.f32.mrb[50].mxu1  ;;  %v6478_v55 = vld [vmem:[#allocation5 + $0x4f8] sm:$0xff] }
 0x3d2   : > { %v8405_v8 = vpop.f32.mrb[51].mxu1  ;;  %v11339_v47 = vld [vmem:[#allocation9_spill] sm:$0xff] }
 0x3d3   : > { %v7482_v45 = vadd.f32 %v8403_v42, %v10751_v13  ;;  %v8507_v19 = vpop.f32.mrb[116].mxu0  ;;  %v8406_v10 = vadd.f32 %v8405_v8, %v8404_v7 }
 0x3d4   : > { %v8508_v5 = vpop.f32.mrb[117].mxu0  ;;  %7890 = vmatmul.mubr.bf16.gmra.mrb[156].mxu1 %v11056_v33 }
 0x3d5   : > { %v8509_v62 = vadd.f32 %v8508_v5, %v8507_v19  ;;  %v7485_v12 = vadd.f32 %v8406_v10, %v11336_v27  ;;  %v8510_v60 = vpop.f32.mrb[118].mxu0  ;;  %8129 = vmatprep.mubr.msk.bf16.mxu1 %vm492_vm0, %v6458_v52  ;;  %v11340_v52 = vld [vmem:[#allocation10_spill] sm:$0xff] }
 0x3d6   : > { %v8511_v16 = vpop.f32.mrb[119].mxu0 }
 0x3d7   : > { %v8512_v6 = vadd.f32 %v8511_v16, %v8510_v60  ;;  %v8407_v21 = vpop.f32.mrb[52].mxu1  ;;  %v11144_v43 = vadd.f32 %v8509_v62, %v7474_v50 }
 0x3d8   : > { %v8408_v3 = vpop.f32.mrb[53].mxu1 }
 0x3d9   : > { %v8409_v40 = vadd.f32 %v8408_v3, %v8407_v21  ;;  %v8410_v29 = vpop.f32.mrb[54].mxu1  ;;  %v11146_v13 = vadd.f32 %v8512_v6, %v7477_v17  ;;  %v11341_v3 = vld [vmem:[#allocation11_spill] sm:$0xff] }
 0x3da   : > { %v8411_v31 = vpop.f32.mrb[55].mxu1 }
 0x3db   : > { %v7490_v33 = vadd.f32 %v8409_v40, %v11337_v58  ;;  %v8513_v57 = vpop.f32.mrb[120].mxu0  ;;  %v8412_v61 = vadd.f32 %v8411_v31, %v8410_v29  ;;  %v11342_v58 = vld [vmem:[#allocation12_spill] sm:$0xff] }
 0x3dc   : > { %v8514_v14 = vpop.f32.mrb[121].mxu0  ;;  %7898 = vmatmul.mubr.bf16.gmra.mrb[160].mxu1 %v11061_v63 }
 0x3dd   : > { %v8515_v0 = vadd.f32 %v8514_v14, %v8513_v57  ;;  %v7493_v22 = vadd.f32 %v8412_v61, %v11338_v34  ;;  %v8516_v38 = vpop.f32.mrb[122].mxu0  ;;  %8130 = vmatprep.mubr.msk.bf16.mxu1 %vm492_vm0, %v6468_v37 }
 0x3de   : > { %v8517_v50 = vpop.f32.mrb[123].mxu0 }
 0x3df   : > { %v8518_v54 = vadd.f32 %v8517_v50, %v8516_v38  ;;  %v8413_v49 = vpop.f32.mrb[56].mxu1  ;;  %v11152_v59 = vadd.f32 %v8515_v0, %v7482_v45 }
 0x3e0   : > { %v8414_v32 = vpop.f32.mrb[57].mxu1 }
 0x3e1   : > { %v8415_v26 = vadd.f32 %v8414_v32, %v8413_v49  ;;  %v8416_v17 = vpop.f32.mrb[58].mxu1  ;;  %v11154_v36 = vadd.f32 %v8518_v54, %v7485_v12  ;;  %v11343_v32 = vld [vmem:[#allocation13_spill] sm:$0xff] }
 0x3e2   : > { %v8417_v53 = vpop.f32.mrb[59].mxu1 }
 0x3e3   : > { %v7498_v63 = vadd.f32 %v8415_v26, %v11339_v47  ;;  %v8519_v41 = vpop.f32.mrb[124].mxu0  ;;  %v8418_v42 = vadd.f32 %v8417_v53, %v8416_v17  ;;  %v11344_v47 = vld [vmem:[#allocation14_spill] sm:$0xff] }
 0x3e4   : > { %v8520_v7 = vpop.f32.mrb[125].mxu0  ;;  %7906 = vmatmul.mubr.bf16.gmra.mrb[164].mxu1 %v11066_v18 }
 0x3e5   : > { %v8521_v8 = vadd.f32 %v8520_v7, %v8519_v41  ;;  %v7501_v19 = vadd.f32 %v8418_v42, %v11340_v52  ;;  %v8522_v10 = vpop.f32.mrb[126].mxu0  ;;  %8131 = vmatprep.mubr.msk.bf16.mxu1 %vm492_vm0, %v6478_v55 }
 0x3e6   : > { %v8523_v45 = vpop.f32.mrb[127].mxu0 }
 0x3e7   : > { %v8524_v5 = vadd.f32 %v8523_v45, %v8522_v10  ;;  %v8419_v62 = vpop.f32.mrb[60].mxu1  ;;  %v11160_v27 = vadd.f32 %v8521_v8, %v7490_v33 }
 0x3e8   : > { %v8420_v12 = vpop.f32.mrb[61].mxu1 }
 0x3e9   : > { %v8421_v60 = vadd.f32 %v8420_v12, %v8419_v62  ;;  %v8422_v16 = vpop.f32.mrb[62].mxu1  ;;  %v11162_v6 = vadd.f32 %v8524_v5, %v7493_v22  ;;  %v11345_v12 = vld [vmem:[#allocation15_spill] sm:$0xff] }
 0x3ea   : > { %v8423_v21 = vpop.f32.mrb[63].mxu1 }
 0x3eb   : > { %v7506_v40 = vadd.f32 %v8421_v60, %v11341_v3  ;;  %v8525_v18 = vpop.f32.mrb[128].mxu0  ;;  %v8424_v29 = vadd.f32 %v8423_v21, %v8422_v16 }
 0x3ec   : > { %v8526_v31 = vpop.f32.mrb[129].mxu0  ;;  %7914 = vmatmul.mubr.bf16.gmra.mrb[168].mxu1 %v11075_v35 }
 0x3ed   : > { %v8527_v37 = vadd.f32 %v8526_v31, %v8525_v18  ;;  %v7509_v57 = vadd.f32 %v8424_v29, %v11342_v58  ;;  %v8528_v61 = vpop.f32.mrb[130].mxu0  ;;  %v11346_v29 = vld [vmem:[#allocation16_spill] sm:$0xff] }
 0x3ee   : > { %v8529_v14 = vpop.f32.mrb[131].mxu0 }
 0x3ef   : > { %v8530_v33 = vadd.f32 %v8529_v14, %v8528_v61  ;;  %v8425_v0 = vpop.f32.mrb[64].mxu1  ;;  %v11167_v34 = vadd.f32 %v8527_v37, %v7498_v63 }
 0x3f0   : > { %v8426_v38 = vpop.f32.mrb[65].mxu1 }
 0x3f1   : > { %v8427_v22 = vadd.f32 %v8426_v38, %v8425_v0  ;;  %v8428_v50 = vpop.f32.mrb[66].mxu1  ;;  %v11169_v54 = vadd.f32 %v8530_v33, %v7501_v19 }
 0x3f2   : > { %v8429_v49 = vpop.f32.mrb[67].mxu1 }
 0x3f3   : > { %v7514_v26 = vadd.f32 %v8427_v22, %v11343_v32  ;;  %v8430_v53 = vadd.f32 %v8429_v49, %v8428_v50 }
 0x3f5   : > { %v7517_v41 = vadd.f32 %v8430_v53, %v11344_v47 }
 0x3f6   : > { %v8531_v17 = vpop.f32.mrb[132].mxu0 }
 0x3f7   : > { %v8532_v35 = vpop.f32.mrb[133].mxu0  ;;  %v8431_v52 = vpop.f32.mrb[68].mxu1 }
 0x3f8   : > { %v8533_v55 = vadd.f32 %v8532_v35, %v8531_v17  ;;  %v8534_v42 = vpop.f32.mrb[134].mxu0  ;;  %v8432_v10 = vpop.f32.mrb[69].mxu1 }
 0x3f9   : > { %v8535_v7 = vpop.f32.mrb[135].mxu0  ;;  %v8433_v45 = vadd.f32 %v8432_v10, %v8431_v52  ;;  %v8434_v5 = vpop.f32.mrb[70].mxu1 }
 0x3fa   : > { %v8536_v8 = vadd.f32 %v8535_v7, %v8534_v42  ;;  %v11173_v63 = vadd.f32 %v8533_v55, %v7506_v40  ;;  %v8435_v62 = vpop.f32.mrb[71].mxu1 }
 0x3fb   : > { %v7522_v60 = vadd.f32 %v8433_v45, %v11345_v12  ;;  %v8436_v21 = vadd.f32 %v8435_v62, %v8434_v5 }
 0x3fc   : > { %v11175_v19 = vadd.f32 %v8536_v8, %v7509_v57 }
 0x3fd   : > { %v7525_v31 = vadd.f32 %v8436_v21, %v11346_v29 }
 0x3fe   : > { %v8537_v16 = vpop.f32.mrb[136].mxu0 }
 0x3ff   : > { %v8538_v3 = vpop.f32.mrb[137].mxu0  ;;  %v8437_v14 = vpop.f32.mrb[72].mxu1 }
 0x400   : > { %v8539_v18 = vadd.f32 %v8538_v3, %v8537_v16  ;;  %v8540_v37 = vpop.f32.mrb[138].mxu0  ;;  %v8438_v33 = vpop.f32.mrb[73].mxu1 }
 0x401   : > { %v8541_v58 = vpop.f32.mrb[139].mxu0  ;;  %v8439_v0 = vadd.f32 %v8438_v33, %v8437_v14  ;;  %v8440_v38 = vpop.f32.mrb[74].mxu1 }
 0x402   : > { %v8542_v61 = vadd.f32 %v8541_v58, %v8540_v37  ;;  %v11179_v40 = vadd.f32 %v8539_v18, %v7514_v26  ;;  %v8441_v22 = vpop.f32.mrb[75].mxu1 }
 0x403   : > { %v7530_v50 = vadd.f32 %v8439_v0, %v10896_v4  ;;  %v8442_v32 = vadd.f32 %v8441_v22, %v8440_v38 }
 0x404   : > { %v11181_v57 = vadd.f32 %v8542_v61, %v7517_v41 }
 0x405   : > { %v7533_v35 = vadd.f32 %v8442_v32, %v10907_v15 }
 0x406   : > { %v8543_v49 = vpop.f32.mrb[140].mxu0 }
 0x407   : > { %v8544_v17 = vpop.f32.mrb[141].mxu0  ;;  %v8443_v7 = vpop.f32.mrb[76].mxu1 }
 0x408   : > { %v8545_v53 = vadd.f32 %v8544_v17, %v8543_v49  ;;  %v8546_v55 = vpop.f32.mrb[142].mxu0  ;;  %v8444_v8 = vpop.f32.mrb[77].mxu1 }
 0x409   : > { %v8547_v47 = vpop.f32.mrb[143].mxu0  ;;  %v8445_v52 = vadd.f32 %v8444_v8, %v8443_v7  ;;  %v8446_v10 = vpop.f32.mrb[78].mxu1 }
 0x40a   : > { %v8548_v42 = vadd.f32 %v8547_v47, %v8546_v55  ;;  %v11185_v26 = vadd.f32 %v8545_v53, %v7522_v60  ;;  %v8447_v45 = vpop.f32.mrb[79].mxu1 }
 0x40b   : > { %v7538_v4 = vadd.f32 %v8445_v52, %v10990_v11  ;;  %v8448_v62 = vadd.f32 %v8447_v45, %v8446_v10 }
 0x40c   : > { %v11187_v41 = vadd.f32 %v8548_v42, %v7525_v31 }
 0x40d   : > { %v7541_v15 = vadd.f32 %v8448_v62, %v10997_v20 }
 0x40e   : > { %v8549_v5 = vpop.f32.mrb[144].mxu0 }
 0x40f   : > { %v8550_v12 = vpop.f32.mrb[145].mxu0  ;;  %v8449_v29 = vpop.f32.mrb[80].mxu1 }
 0x410   : > { %v8551_v16 = vadd.f32 %v8550_v12, %v8549_v5  ;;  %v8552_v21 = vpop.f32.mrb[146].mxu0  ;;  %v8450_v37 = vpop.f32.mrb[81].mxu1 }
 0x411   : > { %v8553_v3 = vpop.f32.mrb[147].mxu0  ;;  %v8451_v58 = vadd.f32 %v8450_v37, %v8449_v29  ;;  %v8452_v61 = vpop.f32.mrb[82].mxu1 }
 0x412   : > { %v8554_v18 = vadd.f32 %v8553_v3, %v8552_v21  ;;  %v11191_v60 = vadd.f32 %v8551_v16, %v7530_v50  ;;  %v8453_v14 = vpop.f32.mrb[83].mxu1 }
 0x413   : > { %v7546_v11 = vadd.f32 %v8451_v58, %v11018_v9  ;;  %v8454_v0 = vadd.f32 %v8453_v14, %v8452_v61 }
 0x414   : > { %v11193_v31 = vadd.f32 %v8554_v18, %v7533_v35 }
 0x415   : > { %v7549_v20 = vadd.f32 %v8454_v0, %v11025_v56 }
 0x416   : > { %v8555_v33 = vpop.f32.mrb[148].mxu0 }
 0x417   : > { %v8556_v38 = vpop.f32.mrb[149].mxu0  ;;  %v8455_v53 = vpop.f32.mrb[84].mxu1 }
 0x418   : > { %v8557_v22 = vadd.f32 %v8556_v38, %v8555_v33  ;;  %v8558_v49 = vpop.f32.mrb[150].mxu0  ;;  %v8456_v55 = vpop.f32.mrb[85].mxu1 }
 0x419   : > { %v8559_v32 = vpop.f32.mrb[151].mxu0  ;;  %v8457_v47 = vadd.f32 %v8456_v55, %v8455_v53  ;;  %v8458_v42 = vpop.f32.mrb[86].mxu1 }
 0x41a   : > { %v8560_v17 = vadd.f32 %v8559_v32, %v8558_v49  ;;  %v11197_v50 = vadd.f32 %v8557_v22, %v7538_v4  ;;  %v8459_v7 = vpop.f32.mrb[87].mxu1 }
 0x41b   : > { %v7554_v9 = vadd.f32 %v8457_v47, %v11082_v39  ;;  %v8460_v52 = vadd.f32 %v8459_v7, %v8458_v42 }
 0x41c   : > { %v11199_v35 = vadd.f32 %v8560_v17, %v7541_v15 }
 0x41d   : > { %v7557_v56 = vadd.f32 %v8460_v52, %v11085_v44 }
 0x41e   : > { %v8561_v8 = vpop.f32.mrb[152].mxu0 }
 0x41f   : > { %v8562_v10 = vpop.f32.mrb[153].mxu0  ;;  %v8461_v16 = vpop.f32.mrb[88].mxu1 }
 0x420   : > { %v8563_v45 = vadd.f32 %v8562_v10, %v8561_v8  ;;  %v8564_v5 = vpop.f32.mrb[154].mxu0  ;;  %v8462_v21 = vpop.f32.mrb[89].mxu1 }
 0x421   : > { %v8565_v62 = vpop.f32.mrb[155].mxu0  ;;  %v8463_v3 = vadd.f32 %v8462_v21, %v8461_v16  ;;  %v8464_v18 = vpop.f32.mrb[90].mxu1 }
 0x422   : > { %v8566_v12 = vadd.f32 %v8565_v62, %v8564_v5  ;;  %v11203_v4 = vadd.f32 %v8563_v45, %v7546_v11  ;;  %v8465_v29 = vpop.f32.mrb[91].mxu1 }
 0x423   : > { %v7562_v39 = vadd.f32 %v8463_v3, %v11090_v2  ;;  %v8466_v58 = vadd.f32 %v8465_v29, %v8464_v18 }
 0x424   : > { %v11205_v15 = vadd.f32 %v8566_v12, %v7549_v20 }
 0x425   : > { %v7565_v44 = vadd.f32 %v8466_v58, %v11093_v1 }
 0x426   : > { %v8567_v37 = vpop.f32.mrb[156].mxu0 }
 0x427   : > { %v8568_v61 = vpop.f32.mrb[157].mxu0  ;;  %v8467_v22 = vpop.f32.mrb[92].mxu1 }
 0x428   : > { %v8569_v14 = vadd.f32 %v8568_v61, %v8567_v37  ;;  %v8570_v33 = vpop.f32.mrb[158].mxu0  ;;  %v8468_v49 = vpop.f32.mrb[93].mxu1 }
 0x429   : > { %v8571_v0 = vpop.f32.mrb[159].mxu0  ;;  %v8469_v32 = vadd.f32 %v8468_v49, %v8467_v22  ;;  %v8470_v17 = vpop.f32.mrb[94].mxu1 }
 0x42a   : > { %v8572_v38 = vadd.f32 %v8571_v0, %v8570_v33  ;;  %v11209_v11 = vadd.f32 %v8569_v14, %v7554_v9  ;;  %v8471_v53 = vpop.f32.mrb[95].mxu1 }
 0x42b   : > { %v7570_v2 = vadd.f32 %v8469_v32, %v11106_v30  ;;  %v8472_v47 = vadd.f32 %v8471_v53, %v8470_v17 }
 0x42c   : > { %v11211_v20 = vadd.f32 %v8572_v38, %v7557_v56 }
 0x42d   : > { %v7573_v1 = vadd.f32 %v8472_v47, %v11108_v46 }
 0x42e   : > { %v8573_v55 = vpop.f32.mrb[160].mxu0 }
 0x42f   : > { %v8574_v42 = vpop.f32.mrb[161].mxu0  ;;  %v8473_v45 = vpop.f32.mrb[96].mxu1 }
 0x430   : > { %v8575_v7 = vadd.f32 %v8574_v42, %v8573_v55  ;;  %v8576_v8 = vpop.f32.mrb[162].mxu0  ;;  %v8474_v5 = vpop.f32.mrb[97].mxu1 }
 0x431   : > { %v8577_v52 = vpop.f32.mrb[163].mxu0  ;;  %v8475_v62 = vadd.f32 %v8474_v5, %v8473_v45  ;;  %v8476_v12 = vpop.f32.mrb[98].mxu1 }
 0x432   : > { %v8578_v10 = vadd.f32 %v8577_v52, %v8576_v8  ;;  %v11215_v9 = vadd.f32 %v8575_v7, %v7562_v39  ;;  %v8477_v16 = vpop.f32.mrb[99].mxu1 }
 0x433   : > { %v7578_v30 = vadd.f32 %v8475_v62, %v11114_v48  ;;  %v8478_v3 = vadd.f32 %v8477_v16, %v8476_v12 }
 0x434   : > { %v11217_v56 = vadd.f32 %v8578_v10, %v7565_v44 }
 0x435   : > { %v7581_v46 = vadd.f32 %v8478_v3, %v11118_v24 }
 0x436   : > { %v8579_v21 = vpop.f32.mrb[164].mxu0 }
 0x437   : > { %v8580_v18 = vpop.f32.mrb[165].mxu0  ;;  %v8479_v14 = vpop.f32.mrb[100].mxu1 }
 0x438   : > { %v8581_v29 = vadd.f32 %v8580_v18, %v8579_v21  ;;  %v8582_v37 = vpop.f32.mrb[166].mxu0  ;;  %v8480_v33 = vpop.f32.mrb[101].mxu1 }
 0x439   : > { %v8583_v58 = vpop.f32.mrb[167].mxu0  ;;  %v8481_v0 = vadd.f32 %v8480_v33, %v8479_v14  ;;  %v8482_v38 = vpop.f32.mrb[102].mxu1 }
 0x43a   : > { %v8584_v61 = vadd.f32 %v8583_v58, %v8582_v37  ;;  %v11221_v39 = vadd.f32 %v8581_v29, %v7570_v2  ;;  %v8483_v22 = vpop.f32.mrb[103].mxu1 }
 0x43b   : > { %v7586_v48 = vadd.f32 %v8481_v0, %v11126_v25  ;;  %v8484_v32 = vadd.f32 %v8483_v22, %v8482_v38 }
 0x43c   : > { %v11223_v44 = vadd.f32 %v8584_v61, %v7573_v1 }
 0x43d   : > { %v7589_v24 = vadd.f32 %v8484_v32, %v11128_v23 }
 0x43e   : > { %v8585_v49 = vpop.f32.mrb[168].mxu0 }
 0x43f   : > { %v8586_v17 = vpop.f32.mrb[169].mxu0  ;;  %v8485_v7 = vpop.f32.mrb[104].mxu1 }
 0x440   : > { %v8587_v53 = vadd.f32 %v8586_v17, %v8585_v49  ;;  %v8588_v55 = vpop.f32.mrb[170].mxu0  ;;  %v8486_v8 = vpop.f32.mrb[105].mxu1 }
 0x441   : > { %v8589_v47 = vpop.f32.mrb[171].mxu0  ;;  %v8487_v52 = vadd.f32 %v8486_v8, %v8485_v7  ;;  %v8488_v1 = vpop.f32.mrb[106].mxu1 }
 0x442   : > { %v8590_v42 = vadd.f32 %v8589_v47, %v8588_v55  ;;  %v11227_v2 = vadd.f32 %v8587_v53, %v7578_v30  ;;  %v8489_v45 = vpop.f32.mrb[107].mxu1 }
 0x443   : > { %v7594_v25 = vadd.f32 %v8487_v52, %v11136_v28  ;;  %v8490_v62 = vadd.f32 %v8489_v45, %v8488_v1 }
 0x444   : > { %v11229_v10 = vadd.f32 %v8590_v42, %v7581_v46 }
 0x445   : > { %v7597_v23 = vadd.f32 %v8490_v62, %v11138_v51 }
 0x446   : > { %v8591_v5 = vpop.f32.mrb[172].mxu0 }
 0x447   : > { %v8592_v12 = vpop.f32.mrb[173].mxu0  ;;  %v7795_v30 = vpop.f32.mrb[108].mxu1 }
 0x448   : > { %v8593_v16 = vadd.f32 %v8592_v12, %v8591_v5  ;;  %v8594_v21 = vpop.f32.mrb[174].mxu0  ;;  %v7796_v28 = vadd.f32 %v7795_v30, %v11144_v43  ;;  %v7797_v46 = vpop.f32.mrb[109].mxu1 }
 0x449   : > { %v8595_v3 = vpop.f32.mrb[175].mxu0  ;;  %v7798_v37 = vpop.f32.mrb[110].mxu1 }
 0x44a   : > { %v8596_v18 = vadd.f32 %v8595_v3, %v8594_v21  ;;  %v11240_v29 = vadd.f32 %v8593_v16, %v7586_v48  ;;  %7922 = vst [vmem:[%s11238_s14] sm:$0xff] %v7796_v28  ;;  %v7799_v51 = vadd.f32 %v7798_v37, %v11146_v13  ;;  %v7800_v61 = vpop.f32.mrb[111].mxu1 }
 0x44c   : > { %v11243_v58 = vadd.f32 %v8596_v18, %v7589_v24  ;;  %7923 = vst [vmem:[%s11238_s14 + $0x8] sm:$0xff] %v7799_v51 }
 0x44e   : > { %v8597_v14 = vpop.f32.mrb[176].mxu0 }
 0x44f   : > { %v8598_v33 = vpop.f32.mrb[177].mxu0  ;;  %v7803_v49 = vpop.f32.mrb[112].mxu1 }
 0x450   : > { %v8599_v0 = vadd.f32 %v8598_v33, %v8597_v14  ;;  %v8600_v38 = vpop.f32.mrb[178].mxu0  ;;  %v7804_v32 = vadd.f32 %v7803_v49, %v11152_v59  ;;  %v7805_v17 = vpop.f32.mrb[113].mxu1 }
 0x451   : > { %v8601_v22 = vpop.f32.mrb[179].mxu0  ;;  %v7806_v53 = vpop.f32.mrb[114].mxu1 }
 0x452   : > { %v8602_v48 = vadd.f32 %v8601_v22, %v8600_v38  ;;  %v11248_v43 = vadd.f32 %v8599_v0, %v7594_v25  ;;  %7924 = vst [vmem:[%s11238_s14 + $0x10] sm:$0xff] %v7804_v32  ;;  %v7807_v13 = vadd.f32 %v7806_v53, %v11154_v36  ;;  %v7808_v55 = vpop.f32.mrb[115].mxu1 }
 0x454   : > { %v11251_v24 = vadd.f32 %v8602_v48, %v7597_v23  ;;  %7925 = vst [vmem:[%s11238_s14 + $0x18] sm:$0xff] %v7807_v13 }
 0x457   : > { %v7811_v47 = vpop.f32.mrb[116].mxu1 }
 0x458   : > { %v7812_v42 = vadd.f32 %v7811_v47, %v11160_v27  ;;  %v7813_v7 = vpop.f32.mrb[117].mxu1 }
 0x459   : > { %v7814_v8 = vpop.f32.mrb[118].mxu1 }
 0x45a   : > { %7926 = vst [vmem:[%s11238_s14 + $0x20] sm:$0xff] %v7812_v42  ;;  %v7815_v59 = vadd.f32 %v7814_v8, %v11162_v6  ;;  %v7816_v52 = vpop.f32.mrb[119].mxu1 }
 0x45c   : > { %7927 = vst [vmem:[%s11238_s14 + $0x28] sm:$0xff] %v7815_v59 }
 0x45f   : > { %v7819_v1 = vpop.f32.mrb[120].mxu1 }
 0x460   : > { %v7820_v45 = vadd.f32 %v7819_v1, %v11167_v34  ;;  %v7821_v25 = vpop.f32.mrb[121].mxu1 }
 0x461   : > { %v7822_v36 = vpop.f32.mrb[122].mxu1 }
 0x462   : > { %7928 = vst [vmem:[%s11238_s14 + $0x30] sm:$0xff] %v7820_v45  ;;  %v7823_v5 = vadd.f32 %v7822_v36, %v11169_v54  ;;  %v7824_v62 = vpop.f32.mrb[123].mxu1 }
 0x464   : > { %7929 = vst [vmem:[%s11238_s14 + $0x38] sm:$0xff] %v7823_v5 }
 0x467   : > { %v7827_v27 = vpop.f32.mrb[124].mxu1 }
 0x468   : > { %v7828_v12 = vadd.f32 %v7827_v27, %v11173_v63  ;;  %v7829_v16 = vpop.f32.mrb[125].mxu1 }
 0x469   : > { %v7830_v6 = vpop.f32.mrb[126].mxu1 }
 0x46a   : > { %7930 = vst [vmem:[%s11238_s14 + $0x40] sm:$0xff] %v7828_v12  ;;  %v7831_v23 = vadd.f32 %v7830_v6, %v11175_v19  ;;  %v7832_v21 = vpop.f32.mrb[127].mxu1 }
 0x46c   : > { %7931 = vst [vmem:[%s11238_s14 + $0x48] sm:$0xff] %v7831_v23 }
 0x46f   : > { %v7835_v34 = vpop.f32.mrb[128].mxu1 }
 0x470   : > { %v7836_v3 = vadd.f32 %v7835_v34, %v11179_v40  ;;  %v7837_v18 = vpop.f32.mrb[129].mxu1 }
 0x471   : > { %v7838_v54 = vpop.f32.mrb[130].mxu1 }
 0x472   : > { %7932 = vst [vmem:[%s11238_s14 + $0x50] sm:$0xff] %v7836_v3  ;;  %v7839_v30 = vadd.f32 %v7838_v54, %v11181_v57  ;;  %v7840_v28 = vpop.f32.mrb[131].mxu1 }
 0x474   : > { %7933 = vst [vmem:[%s11238_s14 + $0x58] sm:$0xff] %v7839_v30 }
 0x477   : > { %v7843_v63 = vpop.f32.mrb[132].mxu1 }
 0x478   : > { %v7844_v46 = vadd.f32 %v7843_v63, %v11185_v26  ;;  %v7845_v37 = vpop.f32.mrb[133].mxu1 }
 0x479   : > { %v7846_v19 = vpop.f32.mrb[134].mxu1 }
 0x47a   : > { %7934 = vst [vmem:[%s11238_s14 + $0x60] sm:$0xff] %v7844_v46  ;;  %v7847_v51 = vadd.f32 %v7846_v19, %v11187_v41  ;;  %v7848_v61 = vpop.f32.mrb[135].mxu1 }
 0x47c   : > { %7935 = vst [vmem:[%s11238_s14 + $0x68] sm:$0xff] %v7847_v51 }
 0x47f   : > { %v7851_v40 = vpop.f32.mrb[136].mxu1 }
 0x480   : > { %v7852_v14 = vadd.f32 %v7851_v40, %v11191_v60  ;;  %v7853_v33 = vpop.f32.mrb[137].mxu1 }
 0x481   : > { %v7854_v57 = vpop.f32.mrb[138].mxu1 }
 0x482   : > { %7936 = vst [vmem:[%s11238_s14 + $0x70] sm:$0xff] %v7852_v14  ;;  %v7855_v0 = vadd.f32 %v7854_v57, %v11193_v31  ;;  %v7856_v38 = vpop.f32.mrb[139].mxu1 }
 0x484   : > { %7937 = vst [vmem:[%s11238_s14 + $0x78] sm:$0xff] %v7855_v0 }
 0x487   : > { %v7859_v26 = vpop.f32.mrb[140].mxu1 }
 0x488   : > { %v7860_v22 = vadd.f32 %v7859_v26, %v11197_v50  ;;  %v7861_v48 = vpop.f32.mrb[141].mxu1 }
 0x489   : > { %v7862_v41 = vpop.f32.mrb[142].mxu1 }
 0x48a   : > { %7938 = vst [vmem:[%s11238_s14 + $0x80] sm:$0xff] %v7860_v22  ;;  %v7863_v49 = vadd.f32 %v7862_v41, %v11199_v35  ;;  %v7864_v32 = vpop.f32.mrb[143].mxu1 }
 0x48c   : > { %7939 = vst [vmem:[%s11238_s14 + $0x88] sm:$0xff] %v7863_v49 }
 0x48f   : > { %v7867_v60 = vpop.f32.mrb[144].mxu1 }
 0x490   : > { %v7868_v17 = vadd.f32 %v7867_v60, %v11203_v4  ;;  %v7869_v53 = vpop.f32.mrb[145].mxu1 }
 0x491   : > { %v7870_v31 = vpop.f32.mrb[146].mxu1 }
 0x492   : > { %7940 = vst [vmem:[%s11238_s14 + $0x90] sm:$0xff] %v7868_v17  ;;  %v7871_v13 = vadd.f32 %v7870_v31, %v11205_v15  ;;  %v7872_v55 = vpop.f32.mrb[147].mxu1 }
 0x494   : > { %7941 = vst [vmem:[%s11238_s14 + $0x98] sm:$0xff] %v7871_v13 }
 0x497   : > { %v7875_v50 = vpop.f32.mrb[148].mxu1 }
 0x498   : > { %v7876_v47 = vadd.f32 %v7875_v50, %v11209_v11  ;;  %v7877_v42 = vpop.f32.mrb[149].mxu1 }
 0x499   : > { %v7878_v35 = vpop.f32.mrb[150].mxu1 }
 0x49a   : > { %7942 = vst [vmem:[%s11238_s14 + $0xa0] sm:$0xff] %v7876_v47  ;;  %v7879_v7 = vadd.f32 %v7878_v35, %v11211_v20  ;;  %v7880_v8 = vpop.f32.mrb[151].mxu1 }
 0x49c   : > { %7943 = vst [vmem:[%s11238_s14 + $0xa8] sm:$0xff] %v7879_v7 }
 0x49f   : > { %v7883_v4 = vpop.f32.mrb[152].mxu1 }
 0x4a0   : > { %v7884_v59 = vadd.f32 %v7883_v4, %v11215_v9  ;;  %v7885_v52 = vpop.f32.mrb[153].mxu1 }
 0x4a1   : > { %v7886_v15 = vpop.f32.mrb[154].mxu1 }
 0x4a2   : > { %7944 = vst [vmem:[%s11238_s14 + $0xb0] sm:$0xff] %v7884_v59  ;;  %v7887_v1 = vadd.f32 %v7886_v15, %v11217_v56  ;;  %v7888_v45 = vpop.f32.mrb[155].mxu1 }
 0x4a4   : > { %7945 = vst [vmem:[%s11238_s14 + $0xb8] sm:$0xff] %v7887_v1 }
 0x4a7   : > { %v7891_v11 = vpop.f32.mrb[156].mxu1 }
 0x4a8   : > { %v7892_v25 = vadd.f32 %v7891_v11, %v11221_v39  ;;  %v7893_v36 = vpop.f32.mrb[157].mxu1 }
 0x4a9   : > { %v7894_v20 = vpop.f32.mrb[158].mxu1 }
 0x4aa   : > { %7946 = vst [vmem:[%s11238_s14 + $0xc0] sm:$0xff] %v7892_v25  ;;  %v7895_v5 = vadd.f32 %v7894_v20, %v11223_v44  ;;  %v7896_v62 = vpop.f32.mrb[159].mxu1 }
 0x4ac   : > { %7947 = vst [vmem:[%s11238_s14 + $0xc8] sm:$0xff] %v7895_v5 }
 0x4af   : > { %v7899_v9 = vpop.f32.mrb[160].mxu1 }
 0x4b0   : > { %v7900_v27 = vadd.f32 %v7899_v9, %v11227_v2  ;;  %v7901_v12 = vpop.f32.mrb[161].mxu1 }
 0x4b1   : > { %v7902_v56 = vpop.f32.mrb[162].mxu1 }
 0x4b2   : > { %7948 = vst [vmem:[%s11238_s14 + $0xd0] sm:$0xff] %v7900_v27  ;;  %v7903_v16 = vadd.f32 %v7902_v56, %v11229_v10  ;;  %v7904_v6 = vpop.f32.mrb[163].mxu1 }
 0x4b4   : > { %7949 = vst [vmem:[%s11238_s14 + $0xd8] sm:$0xff] %v7903_v16 }
 0x4b7   : > { %v7907_v39 = vpop.f32.mrb[164].mxu1 }
 0x4b8   : > { %v7908_v23 = vadd.f32 %v7907_v39, %v11240_v29  ;;  %v7909_v21 = vpop.f32.mrb[165].mxu1 }
 0x4b9   : > { %v7910_v44 = vpop.f32.mrb[166].mxu1 }
 0x4ba   : > { %7950 = vst [vmem:[%s11238_s14 + $0xe0] sm:$0xff] %v7908_v23  ;;  %v7911_v34 = vadd.f32 %v7910_v44, %v11243_v58  ;;  %v7912_v3 = vpop.f32.mrb[167].mxu1 }
 0x4bc   : > { %7951 = vst [vmem:[%s11238_s14 + $0xe8] sm:$0xff] %v7911_v34 }
 0x4bf   : > { %v7915_v2 = vpop.f32.mrb[168].mxu1 }
 0x4c0   : > { %v7916_v18 = vadd.f32 %v7915_v2, %v11248_v43  ;;  %v7917_v54 = vpop.f32.mrb[169].mxu1 }
 0x4c1   : > { %v7918_v30 = vpop.f32.mrb[170].mxu1 }
 0x4c2   : > { %7952 = vst [vmem:[%s11238_s14 + $0xf0] sm:$0xff] %v7916_v18  ;;  %v7919_v10 = vadd.f32 %v7918_v30, %v11251_v24  ;;  %v7920_v28 = vpop.f32.mrb[171].mxu1 }
 0x4c4   : > { %7953 = vst [vmem:[%s11238_s14 + $0xf8] sm:$0xff] %v7919_v10 }
 0x4c5 PF: > { %s19_s30 = sadd.s32 1, %s8831_s30  }
 0x4c6   : > { %p16_p4 = scmp.ge.s32.totalorder %s19_s30, 4  }
 0x4c8   :  { %18 = sbr.rel (!%p16_p4) target bundleno = 1 (0x1), region = 92 }

</bundles_post_ra>
